<compile_context>
chip_gen: v6e
topology: v6e:2x2x1
jax: 0.10.0
libtpu: 0.0.40
codegen_flags: <defaults>
</compile_context>

<pallas_src>
import jax
import jax.numpy as jnp
from jax.experimental import pallas as pl
from jax.experimental.pallas import tpu as pltpu


# ------------------------- in-kernel building blocks ----------------------- #

def _bn_lrelu(y, gamma, beta, *, eps=1e-5, slope=0.2):
    """Batch-stat BatchNorm (two-pass, biased var) + LeakyReLU on an (M, C) slab."""
    m = y.shape[0]
    mean = jnp.sum(y, axis=0, keepdims=True) * (1.0 / m)
    yc = y - mean
    var = jnp.sum(yc * yc, axis=0, keepdims=True) * (1.0 / m)
    var = jnp.maximum(var, 0.0)                       # guard tiny negative values
    z = yc * (jax.lax.rsqrt(var + eps) * gamma) + beta
    return jnp.where(z >= 0.0, z, slope * z)


def _conv3x3(pad_ref, w_ref, b_ref):
    """3x3 conv (pad already applied) as ONE bf16 MXU matmul.

    pad_ref: (N, Ho+2, Wo+2, Cin) f32 VMEM ref, zero border, interior filled.
    w_ref:   (9*Cin, Cout) bf16.   b_ref: (1, Cout) f32.
    Returns (N*Ho*Wo, Cout) f32.
    """
    N, Hp, Wp, Cin = pad_ref.shape
    Ho, Wo = Hp - 2, Wp - 2
    M = N * Ho * Wo
    taps = []
    for kh in range(3):                                # static unroll
        for kw in range(3):
            t = pad_ref[:, kh:kh + Ho, kw:kw + Wo, :]  # ref slice, no concat-pad
            taps.append(t.reshape(M, Cin).astype(jnp.bfloat16))
    patches = jnp.concatenate(taps, axis=-1)           # (M, 9*Cin) bf16 lane concat
    return jnp.dot(patches, w_ref[...],
                   preferred_element_type=jnp.float32) + b_ref[...]


def _maxpool2x2(h, buf_ref):
    """2x2/2 max-pool. H via free leading-dim split; W via 2 stride-2 ref loads.

    h:       (N, H, W, C) f32 value.
    buf_ref: (N, H//2, W, C) f32 VMEM staging scratch.
    Returns  (N, H//2, W//2, C) f32.
    """
    N, H, W, C = h.shape
    Ho, Wo = H // 2, W // 2
    xh = jnp.max(h.reshape(N, Ho, 2, W, C), axis=2)    # leading-dim split: free
    buf_ref[...] = xh
    a = buf_ref[:, :, pl.ds(0, Wo, stride=2), :]       # even columns
    b = buf_ref[:, :, pl.ds(1, Wo, stride=2), :]       # odd columns
    return jnp.maximum(a, b)


# ------------------------------- fused kernel ------------------------------ #

def _vgg_kernel(p1_ref,
                w11_ref, b11_ref, g11_ref, be11_ref,
                w12_ref, b12_ref, g12_ref, be12_ref,
                w21_ref, b21_ref, g21_ref, be21_ref,
                w22_ref, b22_ref, g22_ref, be22_ref,
                w3_ref, b3_ref,
                o_ref,
                pad1_ref, pad2a_ref, pad2b_ref, pool1_ref, pool2_ref):
    N, H1p, W1p, _ = pad1_ref.shape
    H1, W1 = H1p - 2, W1p - 2                          # 16, 16
    H2, W2 = H1 // 2, W1 // 2                          # 8, 8

    # Zero the padded-activation scratches once; interiors are overwritten
    # below, only the 1-pixel borders must stay zero (conv padding=1).
    pad1_ref[...] = jnp.zeros(pad1_ref.shape, pad1_ref.dtype)
    pad2a_ref[...] = jnp.zeros(pad2a_ref.shape, pad2a_ref.dtype)
    pad2b_ref[...] = jnp.zeros(pad2b_ref.shape, pad2b_ref.dtype)

    # --- conv1_1 (3x3, pad 1): im2col hoisted to the wrapper -> one matmul.
    y = jnp.dot(p1_ref[...], w11_ref[...],
                preferred_element_type=jnp.float32) + b11_ref[...]
    y = _bn_lrelu(y, g11_ref[...], be11_ref[...])
    pad1_ref[:, 1:1 + H1, 1:1 + W1, :] = y.reshape(N, H1, W1, y.shape[-1])

    # --- conv1_2 (3x3, pad 1) from the padded scratch.
    y = _conv3x3(pad1_ref, w12_ref, b12_ref)
    y = _bn_lrelu(y, g12_ref[...], be12_ref[...])
    h = y.reshape(N, H1, W1, y.shape[-1])

    # --- maxpool 2x2 -> interior of block-2 padded scratch.
    p = _maxpool2x2(h, pool1_ref)                      # (N, 8, 8, 64)
    pad2a_ref[:, 1:1 + H2, 1:1 + W2, :] = p

    # --- conv2_1 (3x3, pad 1)
    y = _conv3x3(pad2a_ref, w21_ref, b21_ref)
    y = _bn_lrelu(y, g21_ref[...], be21_ref[...])
    pad2b_ref[:, 1:1 + H2, 1:1 + W2, :] = y.reshape(N, H2, W2, y.shape[-1])

    # --- conv2_2 (3x3, pad 1)
    y = _conv3x3(pad2b_ref, w22_ref, b22_ref)
    y = _bn_lrelu(y, g22_ref[...], be22_ref[...])
    h = y.reshape(N, H2, W2, y.shape[-1])

    # --- maxpool 2x2
    p = _maxpool2x2(h, pool2_ref)                      # (N, 4, 4, 128)

    # --- head: conv 4x4 (pad 0) + tanh, output left as a small masked store
    #     (per review: <0.2% of work, not worth a lane-dense repack).
    H3, W3, C3 = p.shape[1], p.shape[2], p.shape[3]
    Ho, Wo = H3 - 3, W3 - 3
    M3 = N * Ho * Wo
    taps = []
    for kh in range(4):
        for kw in range(4):
            t = p[:, kh:kh + Ho, kw:kw + Wo, :]
            taps.append(t.reshape(M3, C3).astype(jnp.bfloat16))
    patches = jnp.concatenate(taps, axis=-1)           # (M3, 16*128) bf16
    y = jnp.dot(patches, w3_ref[...],
                preferred_element_type=jnp.float32) + b3_ref[...]
    o_ref[...] = jnp.tanh(y)


# ------------------------------ model wiring -------------------------------- #

def init_params(key, channel, dim):
    ks = jax.random.split(key, 9)

    def conv_p(k, K, cin, cout):
        kw, kb = jax.random.split(k)
        w = 0.1 * jax.random.normal(kw, (K, K, cin, cout), jnp.float32)
        b = 0.05 * jax.random.normal(kb, (cout,), jnp.float32)
        return w, b

    def bn_p(k, c):
        kg, kb = jax.random.split(k)
        g = 1.0 + 0.1 * jax.random.normal(kg, (c,), jnp.float32)
        b = 0.1 * jax.random.normal(kb, (c,), jnp.float32)
        return g, b

    return {
        "c1_1": conv_p(ks[0], 3, channel, 64), "bn1_1": bn_p(ks[1], 64),
        "c1_2": conv_p(ks[2], 3, 64, 64),      "bn1_2": bn_p(ks[3], 64),
        "c2_1": conv_p(ks[4], 3, 64, 128),     "bn2_1": bn_p(ks[5], 128),
        "c2_2": conv_p(ks[6], 3, 128, 128),    "bn2_2": bn_p(ks[7], 128),
        "c3":   conv_p(ks[8], 4, 128, dim),
    }


def vgg_forward(params, x_nchw):
    """x_nchw: (N, channel, H, W) f32.  Returns (N, dim, H//4-3, W//4-3) (NCHW)."""
    x = jnp.transpose(x_nchw, (0, 2, 3, 1)).astype(jnp.float32)   # -> NHWC
    N, H, W, Cin = x.shape

    # Layer-1 im2col hoisted to XLA: with Cin=4 the 9-tap lane concat is pure
    # relayout for ~1% of the FLOPs, so build the bf16 patch matrix here.
    xp = jnp.pad(x, ((0, 0), (1, 1), (1, 1), (0, 0)))
    taps = [xp[:, kh:kh + H, kw:kw + W, :] for kh in range(3) for kw in range(3)]
    p1 = jnp.concatenate(taps, axis=-1).reshape(N * H * W, 9 * Cin)
    p1 = p1.astype(jnp.bfloat16)

    def prep_conv(p):
        w, b = p
        K, _, ci, co = w.shape
        # (K,K,Cin,Cout) -> (K*K*Cin, Cout); row order (kh, kw, cin) matches the
        # in-kernel tap concatenation.  bf16 operands, f32 accumulation.
        return (w.reshape(K * K * ci, co).astype(jnp.bfloat16),
                b.reshape(1, co).astype(jnp.float32))

    def prep_bn(p):
        g, b = p
        return (g.reshape(1, -1).astype(jnp.float32),
                b.reshape(1, -1).astype(jnp.float32))

    w11, b11 = prep_conv(params["c1_1"]); g11, be11 = prep_bn(params["bn1_1"])
    w12, b12 = prep_conv(params["c1_2"]); g12, be12 = prep_bn(params["bn1_2"])
    w21, b21 = prep_conv(params["c2_1"]); g21, be21 = prep_bn(params["bn2_1"])
    w22, b22 = prep_conv(params["c2_2"]); g22, be22 = prep_bn(params["bn2_2"])
    w3, b3 = prep_conv(params["c3"])

    dim = w3.shape[-1]
    Ho3, Wo3 = H // 4 - 3, W // 4 - 3
    M3 = N * Ho3 * Wo3

    operands = (p1,
                w11, b11, g11, be11, w12, b12, g12, be12,
                w21, b21, g21, be21, w22, b22, g22, be22,
                w3, b3)

    # Advisory scheduling hint for XLA around the fused custom call.
    m1, m2 = N * H * W, N * (H // 2) * (W // 2)
    flops = 2 * (m1 * w11.shape[0] * w11.shape[1] +
                 m1 * w12.shape[0] * w12.shape[1] +
                 m2 * w21.shape[0] * w21.shape[1] +
                 m2 * w22.shape[0] * w22.shape[1] +
                 M3 * w3.shape[0] * w3.shape[1])
    bytes_accessed = sum(int(a.size) * a.dtype.itemsize for a in operands) + M3 * dim * 4
    cost = pl.CostEstimate(flops=flops, transcendentals=M3 * dim,
                           bytes_accessed=bytes_accessed)

    vmem = pl.BlockSpec(memory_space=pltpu.MemorySpace.VMEM)

    out2d = pl.pallas_call(
        _vgg_kernel,
        out_shape=jax.ShapeDtypeStruct((M3, dim), jnp.float32),
        in_specs=[vmem] * len(operands),
        out_specs=vmem,
        scratch_shapes=[
            pltpu.VMEM((N, H + 2, W + 2, 64), jnp.float32),             # pad1
            pltpu.VMEM((N, H // 2 + 2, W // 2 + 2, 64), jnp.float32),   # pad2a
            pltpu.VMEM((N, H // 2 + 2, W // 2 + 2, 128), jnp.float32),  # pad2b
            pltpu.VMEM((N, H // 2, W, 64), jnp.float32),                # pool1 staging
            pltpu.VMEM((N, H // 4, W // 2, 128), jnp.float32),          # pool2 staging
        ],
        cost_estimate=cost,
    )(*operands)

    out = out2d.reshape(N, Ho3, Wo3, dim)
    return jnp.transpose(out, (0, 3, 1, 2))                             # -> NCHW


# ---------------------- pure-JAX reference (same precision) ----------------- #

def _ref_forward(params, x_nchw):
    """Independent reference: XLA convs with bf16 operands / f32 accumulation,
    training-mode BN (biased var, eps=1e-5), LeakyReLU(0.2), 2x2 maxpool, tanh."""
    x = jnp.transpose(x_nchw, (0, 2, 3, 1)).astype(jnp.float32)

    def conv(h, p, pad):
        w, b = p
        y = jax.lax.conv_general_dilated(
            h.astype(jnp.bfloat16), w.astype(jnp.bfloat16),
            window_strides=(1, 1), padding=((pad, pad), (pad, pad)),
            dimension_numbers=("NHWC", "HWIO", "NHWC"),
            preferred_element_type=jnp.float32)
        return y + b.reshape(1, 1, 1, -1)

    def bn_lrelu(h, p):
        g, be = p
        mean = jnp.mean(h, axis=(0, 1, 2), keepdims=True)
        var = jnp.mean((h - mean) ** 2, axis=(0, 1, 2), keepdims=True)
        z = (h - mean) * jax.lax.rsqrt(var + 1e-5) * g.reshape(1, 1, 1, -1) \
            + be.reshape(1, 1, 1, -1)
        return jnp.where(z >= 0.0, z, 0.2 * z)

    def pool(h):
        return jax.lax.reduce_window(h, -jnp.inf, jax.lax.max,
                                     (1, 2, 2, 1), (1, 2, 2, 1), "VALID")

    h = bn_lrelu(conv(x, params["c1_1"], 1), params["bn1_1"])
    h = bn_lrelu(conv(h, params["c1_2"], 1), params["bn1_2"])
    h = pool(h)
    h = bn_lrelu(conv(h, params["c2_1"], 1), params["bn2_1"])
    h = bn_lrelu(conv(h, params["c2_2"], 1), params["bn2_2"])
    h = pool(h)
    h = jnp.tanh(conv(h, params["c3"], 0))
    return jnp.transpose(h, (0, 3, 1, 2))


if __name__ == "__main__":
    key = jax.random.PRNGKey(0)
    kx, kp = jax.random.split(key)
    channel, dim = 4, 32
    x = jax.random.normal(kx, (2, channel, 16, 16), jnp.float32)  # NCHW like PyTorch
    params = init_params(kp, channel, dim)

    out = jax.jit(vgg_forward)(params, x)
    out = jax.block_until_ready(out)

    assert out.shape == (2, dim, 1, 1), out.shape
    assert bool(jnp.all(jnp.isfinite(out)))
    assert bool(jnp.all(jnp.abs(out) <= 1.0 + 1e-6))   # tanh range

    ref = jax.block_until_ready(jax.jit(_ref_forward)(params, x))
    err = float(jnp.max(jnp.abs(out - ref)))
    assert err < 3e-2, f"max |kernel - reference| = {err}"

    print("KERNEL_OK")
</pallas_src>

<mosaic_0001>
module attributes {stable_mosaic.version = 11 : i64} {
  func.func @_vgg_kernel(%arg0: memref<512x36xbf16, #tpu.memory_space<vmem>>, %arg1: memref<36x64xbf16, #tpu.memory_space<vmem>>, %arg2: memref<1x64xf32, #tpu.memory_space<vmem>>, %arg3: memref<1x64xf32, #tpu.memory_space<vmem>>, %arg4: memref<1x64xf32, #tpu.memory_space<vmem>>, %arg5: memref<576x64xbf16, #tpu.memory_space<vmem>>, %arg6: memref<1x64xf32, #tpu.memory_space<vmem>>, %arg7: memref<1x64xf32, #tpu.memory_space<vmem>>, %arg8: memref<1x64xf32, #tpu.memory_space<vmem>>, %arg9: memref<576x128xbf16, #tpu.memory_space<vmem>>, %arg10: memref<1x128xf32, #tpu.memory_space<vmem>>, %arg11: memref<1x128xf32, #tpu.memory_space<vmem>>, %arg12: memref<1x128xf32, #tpu.memory_space<vmem>>, %arg13: memref<1152x128xbf16, #tpu.memory_space<vmem>>, %arg14: memref<1x128xf32, #tpu.memory_space<vmem>>, %arg15: memref<1x128xf32, #tpu.memory_space<vmem>>, %arg16: memref<1x128xf32, #tpu.memory_space<vmem>>, %arg17: memref<2048x32xbf16, #tpu.memory_space<vmem>>, %arg18: memref<1x32xf32, #tpu.memory_space<vmem>>, %arg19: memref<2x32xf32, #tpu.memory_space<vmem>>, %arg20: memref<2x18x18x64xf32, #tpu.memory_space<vmem>>, %arg21: memref<2x10x10x64xf32, #tpu.memory_space<vmem>>, %arg22: memref<2x10x10x128xf32, #tpu.memory_space<vmem>>, %arg23: memref<2x8x16x64xf32, #tpu.memory_space<vmem>>, %arg24: memref<2x4x8x128xf32, #tpu.memory_space<vmem>>) attributes {dimension_semantics = [], scalar_prefetch = 0 : i64, scratch_operands = 5 : i64, tpu.core_type = #tpu.core_type<tc>} {
    %cst = arith.constant 0.000000e+00 : f32
    %0 = vector.broadcast %cst : f32 to vector<2x18x18x64xf32>
    %c0 = arith.constant 0 : index
    %c0_0 = arith.constant 0 : index
    %c0_1 = arith.constant 0 : index
    %c0_2 = arith.constant 0 : index
    %1 = vector.load %arg20[%c0, %c0_0, %c0_1, %c0_2] : memref<2x18x18x64xf32, #tpu.memory_space<vmem>>, vector<2x18x18x64xf32>
    tpu.vector_store %arg20[%c0, %c0_0, %c0_1, %c0_2], %0 {strides = array<i32>} : memref<2x18x18x64xf32, #tpu.memory_space<vmem>>, vector<2x18x18x64xf32>,
    %cst_3 = arith.constant 0.000000e+00 : f32
    %2 = vector.broadcast %cst_3 : f32 to vector<2x10x10x64xf32>
    %c0_4 = arith.constant 0 : index
    %c0_5 = arith.constant 0 : index
    %c0_6 = arith.constant 0 : index
    %c0_7 = arith.constant 0 : index
    %3 = vector.load %arg21[%c0_4, %c0_5, %c0_6, %c0_7] : memref<2x10x10x64xf32, #tpu.memory_space<vmem>>, vector<2x10x10x64xf32>
    tpu.vector_store %arg21[%c0_4, %c0_5, %c0_6, %c0_7], %2 {strides = array<i32>} : memref<2x10x10x64xf32, #tpu.memory_space<vmem>>, vector<2x10x10x64xf32>,
    %cst_8 = arith.constant 0.000000e+00 : f32
    %4 = vector.broadcast %cst_8 : f32 to vector<2x10x10x128xf32>
    %c0_9 = arith.constant 0 : index
    %c0_10 = arith.constant 0 : index
    %c0_11 = arith.constant 0 : index
    %c0_12 = arith.constant 0 : index
    %5 = vector.load %arg22[%c0_9, %c0_10, %c0_11, %c0_12] : memref<2x10x10x128xf32, #tpu.memory_space<vmem>>, vector<2x10x10x128xf32>
    tpu.vector_store %arg22[%c0_9, %c0_10, %c0_11, %c0_12], %4 {strides = array<i32>} : memref<2x10x10x128xf32, #tpu.memory_space<vmem>>, vector<2x10x10x128xf32>,
    %c0_13 = arith.constant 0 : index
    %c0_14 = arith.constant 0 : index
    %6 = vector.load %arg0[%c0_13, %c0_14] : memref<512x36xbf16, #tpu.memory_space<vmem>>, vector<512x36xbf16>
    %c0_15 = arith.constant 0 : index
    %c0_16 = arith.constant 0 : index
    %7 = vector.load %arg1[%c0_15, %c0_16] : memref<36x64xbf16, #tpu.memory_space<vmem>>, vector<36x64xbf16>
    %cst_17 = arith.constant dense<0.000000e+00> : vector<512x64xf32>
    %8 = tpu.matmul %6, %7, %cst_17 {dimension_numbers = #tpu.dot_dimension_numbers<[1], [0], [0], [1], [0, 0, 1, 1], [], []>} : vector<512x36xbf16>, vector<36x64xbf16>, vector<512x64xf32> -> vector<512x64xf32>
    %c0_18 = arith.constant 0 : index
    %c0_19 = arith.constant 0 : index
    %9 = vector.load %arg2[%c0_18, %c0_19] : memref<1x64xf32, #tpu.memory_space<vmem>>, vector<1x64xf32>
    %10 = vector.broadcast %9 : vector<1x64xf32> to vector<512x64xf32>
    %11 = arith.addf %8, %10 : vector<512x64xf32>
    %c0_20 = arith.constant 0 : index
    %c0_21 = arith.constant 0 : index
    %12 = vector.load %arg3[%c0_20, %c0_21] : memref<1x64xf32, #tpu.memory_space<vmem>>, vector<1x64xf32>
    %c0_22 = arith.constant 0 : index
    %c0_23 = arith.constant 0 : index
    %13 = vector.load %arg4[%c0_22, %c0_23] : memref<1x64xf32, #tpu.memory_space<vmem>>, vector<1x64xf32>
    %cst_24 = arith.constant dense<0.000000e+00> : vector<64xf32>
    %14 = vector.multi_reduction <add>, %11, %cst_24 [0] : vector<512x64xf32> to vector<64xf32>
    %15 = vector.shape_cast %14 : vector<64xf32> to vector<1x64xf32>
    %cst_25 = arith.constant 0.001953125 : f32
    %16 = vector.broadcast %cst_25 : f32 to vector<1x64xf32>
    %17 = arith.mulf %15, %16 : vector<1x64xf32>
    %18 = vector.broadcast %17 : vector<1x64xf32> to vector<512x64xf32>
    %19 = arith.subf %11, %18 : vector<512x64xf32>
    %20 = arith.mulf %19, %19 : vector<512x64xf32>
    %cst_26 = arith.constant dense<0.000000e+00> : vector<64xf32>
    %21 = vector.multi_reduction <add>, %20, %cst_26 [0] : vector<512x64xf32> to vector<64xf32>
    %22 = vector.shape_cast %21 : vector<64xf32> to vector<1x64xf32>
    %cst_27 = arith.constant 0.001953125 : f32
    %23 = vector.broadcast %cst_27 : f32 to vector<1x64xf32>
    %24 = arith.mulf %22, %23 : vector<1x64xf32>
    %cst_28 = arith.constant 0.000000e+00 : f32
    %25 = vector.broadcast %cst_28 : f32 to vector<1x64xf32>
    %26 = arith.maximumf %24, %25 : vector<1x64xf32>
    %cst_29 = arith.constant 9.99999974E-6 : f32
    %27 = vector.broadcast %cst_29 : f32 to vector<1x64xf32>
    %28 = arith.addf %26, %27 : vector<1x64xf32>
    %29 = math.rsqrt %28 : vector<1x64xf32>
    %30 = arith.mulf %29, %12 : vector<1x64xf32>
    %31 = vector.broadcast %30 : vector<1x64xf32> to vector<512x64xf32>
    %32 = arith.mulf %19, %31 : vector<512x64xf32>
    %33 = vector.broadcast %13 : vector<1x64xf32> to vector<512x64xf32>
    %34 = arith.addf %32, %33 : vector<512x64xf32>
    %cst_30 = arith.constant 0.000000e+00 : f32
    %35 = vector.broadcast %cst_30 : f32 to vector<512x64xf32>
    %36 = arith.cmpf oge, %34, %35 : vector<512x64xf32>
    %cst_31 = arith.constant 2.000000e-01 : f32
    %37 = vector.broadcast %cst_31 : f32 to vector<512x64xf32>
    %38 = arith.mulf %37, %34 : vector<512x64xf32>
    %39 = arith.select %36, %34, %38 : vector<512x64xi1>, vector<512x64xf32>
    %40 = vector.shape_cast %39 : vector<512x64xf32> to vector<2x16x16x64xf32>
    %c0_32 = arith.constant 0 : index
    %c1 = arith.constant 1 : index
    %c1_33 = arith.constant 1 : index
    %c0_34 = arith.constant 0 : index
    %41 = vector.load %arg20[%c0_32, %c1, %c1_33, %c0_34] : memref<2x18x18x64xf32, #tpu.memory_space<vmem>>, vector<2x16x16x64xf32>
    tpu.vector_store %arg20[%c0_32, %c1, %c1_33, %c0_34], %40 {strides = array<i32>} : memref<2x18x18x64xf32, #tpu.memory_space<vmem>>, vector<2x16x16x64xf32>,
    %c0_35 = arith.constant 0 : index
    %c0_36 = arith.constant 0 : index
    %c0_37 = arith.constant 0 : index
    %c0_38 = arith.constant 0 : index
    %42 = vector.load %arg20[%c0_35, %c0_36, %c0_37, %c0_38] : memref<2x18x18x64xf32, #tpu.memory_space<vmem>>, vector<2x16x16x64xf32>
    %43 = vector.shape_cast %42 : vector<2x16x16x64xf32> to vector<512x64xf32>
    %44 = arith.truncf %43 : vector<512x64xf32> to vector<512x64xbf16>
    %c0_39 = arith.constant 0 : index
    %c0_40 = arith.constant 0 : index
    %c1_41 = arith.constant 1 : index
    %c0_42 = arith.constant 0 : index
    %45 = vector.load %arg20[%c0_39, %c0_40, %c1_41, %c0_42] : memref<2x18x18x64xf32, #tpu.memory_space<vmem>>, vector<2x16x16x64xf32>
    %46 = vector.shape_cast %45 : vector<2x16x16x64xf32> to vector<512x64xf32>
    %47 = arith.truncf %46 : vector<512x64xf32> to vector<512x64xbf16>
    %c0_43 = arith.constant 0 : index
    %c0_44 = arith.constant 0 : index
    %c2 = arith.constant 2 : index
    %c0_45 = arith.constant 0 : index
    %48 = vector.load %arg20[%c0_43, %c0_44, %c2, %c0_45] : memref<2x18x18x64xf32, #tpu.memory_space<vmem>>, vector<2x16x16x64xf32>
    %49 = vector.shape_cast %48 : vector<2x16x16x64xf32> to vector<512x64xf32>
    %50 = arith.truncf %49 : vector<512x64xf32> to vector<512x64xbf16>
    %c0_46 = arith.constant 0 : index
    %c1_47 = arith.constant 1 : index
    %c0_48 = arith.constant 0 : index
    %c0_49 = arith.constant 0 : index
    %51 = vector.load %arg20[%c0_46, %c1_47, %c0_48, %c0_49] : memref<2x18x18x64xf32, #tpu.memory_space<vmem>>, vector<2x16x16x64xf32>
    %52 = vector.shape_cast %51 : vector<2x16x16x64xf32> to vector<512x64xf32>
    %53 = arith.truncf %52 : vector<512x64xf32> to vector<512x64xbf16>
    %c0_50 = arith.constant 0 : index
    %c1_51 = arith.constant 1 : index
    %c1_52 = arith.constant 1 : index
    %c0_53 = arith.constant 0 : index
    %54 = vector.load %arg20[%c0_50, %c1_51, %c1_52, %c0_53] : memref<2x18x18x64xf32, #tpu.memory_space<vmem>>, vector<2x16x16x64xf32>
    %55 = vector.shape_cast %54 : vector<2x16x16x64xf32> to vector<512x64xf32>
    %56 = arith.truncf %55 : vector<512x64xf32> to vector<512x64xbf16>
    %c0_54 = arith.constant 0 : index
    %c1_55 = arith.constant 1 : index
    %c2_56 = arith.constant 2 : index
    %c0_57 = arith.constant 0 : index
    %57 = vector.load %arg20[%c0_54, %c1_55, %c2_56, %c0_57] : memref<2x18x18x64xf32, #tpu.memory_space<vmem>>, vector<2x16x16x64xf32>
    %58 = vector.shape_cast %57 : vector<2x16x16x64xf32> to vector<512x64xf32>
    %59 = arith.truncf %58 : vector<512x64xf32> to vector<512x64xbf16>
    %c0_58 = arith.constant 0 : index
    %c2_59 = arith.constant 2 : index
    %c0_60 = arith.constant 0 : index
    %c0_61 = arith.constant 0 : index
    %60 = vector.load %arg20[%c0_58, %c2_59, %c0_60, %c0_61] : memref<2x18x18x64xf32, #tpu.memory_space<vmem>>, vector<2x16x16x64xf32>
    %61 = vector.shape_cast %60 : vector<2x16x16x64xf32> to vector<512x64xf32>
    %62 = arith.truncf %61 : vector<512x64xf32> to vector<512x64xbf16>
    %c0_62 = arith.constant 0 : index
    %c2_63 = arith.constant 2 : index
    %c1_64 = arith.constant 1 : index
    %c0_65 = arith.constant 0 : index
    %63 = vector.load %arg20[%c0_62, %c2_63, %c1_64, %c0_65] : memref<2x18x18x64xf32, #tpu.memory_space<vmem>>, vector<2x16x16x64xf32>
    %64 = vector.shape_cast %63 : vector<2x16x16x64xf32> to vector<512x64xf32>
    %65 = arith.truncf %64 : vector<512x64xf32> to vector<512x64xbf16>
    %c0_66 = arith.constant 0 : index
    %c2_67 = arith.constant 2 : index
    %c2_68 = arith.constant 2 : index
    %c0_69 = arith.constant 0 : index
    %66 = vector.load %arg20[%c0_66, %c2_67, %c2_68, %c0_69] : memref<2x18x18x64xf32, #tpu.memory_space<vmem>>, vector<2x16x16x64xf32>
    %67 = vector.shape_cast %66 : vector<2x16x16x64xf32> to vector<512x64xf32>
    %68 = arith.truncf %67 : vector<512x64xf32> to vector<512x64xbf16>
    %69 = tpu.concatenate %44, %47, %50, %53, %56, %59, %62, %65, %68 in 1 : vector<512x64xbf16>, vector<512x64xbf16>, vector<512x64xbf16>, vector<512x64xbf16>, vector<512x64xbf16>, vector<512x64xbf16>, vector<512x64xbf16>, vector<512x64xbf16>, vector<512x64xbf16> -> vector<512x576xbf16>
    %c0_70 = arith.constant 0 : index
    %c0_71 = arith.constant 0 : index
    %70 = vector.load %arg5[%c0_70, %c0_71] : memref<576x64xbf16, #tpu.memory_space<vmem>>, vector<576x64xbf16>
    %cst_72 = arith.constant dense<0.000000e+00> : vector<512x64xf32>
    %71 = tpu.matmul %69, %70, %cst_72 {dimension_numbers = #tpu.dot_dimension_numbers<[1], [0], [0], [1], [0, 0, 1, 1], [], []>} : vector<512x576xbf16>, vector<576x64xbf16>, vector<512x64xf32> -> vector<512x64xf32>
    %c0_73 = arith.constant 0 : index
    %c0_74 = arith.constant 0 : index
    %72 = vector.load %arg6[%c0_73, %c0_74] : memref<1x64xf32, #tpu.memory_space<vmem>>, vector<1x64xf32>
    %73 = vector.broadcast %72 : vector<1x64xf32> to vector<512x64xf32>
    %74 = arith.addf %71, %73 : vector<512x64xf32>
    %c0_75 = arith.constant 0 : index
    %c0_76 = arith.constant 0 : index
    %75 = vector.load %arg7[%c0_75, %c0_76] : memref<1x64xf32, #tpu.memory_space<vmem>>, vector<1x64xf32>
    %c0_77 = arith.constant 0 : index
    %c0_78 = arith.constant 0 : index
    %76 = vector.load %arg8[%c0_77, %c0_78] : memref<1x64xf32, #tpu.memory_space<vmem>>, vector<1x64xf32>
    %cst_79 = arith.constant dense<0.000000e+00> : vector<64xf32>
    %77 = vector.multi_reduction <add>, %74, %cst_79 [0] : vector<512x64xf32> to vector<64xf32>
    %78 = vector.shape_cast %77 : vector<64xf32> to vector<1x64xf32>
    %cst_80 = arith.constant 0.001953125 : f32
    %79 = vector.broadcast %cst_80 : f32 to vector<1x64xf32>
    %80 = arith.mulf %78, %79 : vector<1x64xf32>
    %81 = vector.broadcast %80 : vector<1x64xf32> to vector<512x64xf32>
    %82 = arith.subf %74, %81 : vector<512x64xf32>
    %83 = arith.mulf %82, %82 : vector<512x64xf32>
    %cst_81 = arith.constant dense<0.000000e+00> : vector<64xf32>
    %84 = vector.multi_reduction <add>, %83, %cst_81 [0] : vector<512x64xf32> to vector<64xf32>
    %85 = vector.shape_cast %84 : vector<64xf32> to vector<1x64xf32>
    %cst_82 = arith.constant 0.001953125 : f32
    %86 = vector.broadcast %cst_82 : f32 to vector<1x64xf32>
    %87 = arith.mulf %85, %86 : vector<1x64xf32>
    %cst_83 = arith.constant 0.000000e+00 : f32
    %88 = vector.broadcast %cst_83 : f32 to vector<1x64xf32>
    %89 = arith.maximumf %87, %88 : vector<1x64xf32>
    %cst_84 = arith.constant 9.99999974E-6 : f32
    %90 = vector.broadcast %cst_84 : f32 to vector<1x64xf32>
    %91 = arith.addf %89, %90 : vector<1x64xf32>
    %92 = math.rsqrt %91 : vector<1x64xf32>
    %93 = arith.mulf %92, %75 : vector<1x64xf32>
    %94 = vector.broadcast %93 : vector<1x64xf32> to vector<512x64xf32>
    %95 = arith.mulf %82, %94 : vector<512x64xf32>
    %96 = vector.broadcast %76 : vector<1x64xf32> to vector<512x64xf32>
    %97 = arith.addf %95, %96 : vector<512x64xf32>
    %cst_85 = arith.constant 0.000000e+00 : f32
    %98 = vector.broadcast %cst_85 : f32 to vector<512x64xf32>
    %99 = arith.cmpf oge, %97, %98 : vector<512x64xf32>
    %cst_86 = arith.constant 2.000000e-01 : f32
    %100 = vector.broadcast %cst_86 : f32 to vector<512x64xf32>
    %101 = arith.mulf %100, %97 : vector<512x64xf32>
    %102 = arith.select %99, %97, %101 : vector<512x64xi1>, vector<512x64xf32>
    %103 = vector.shape_cast %102 : vector<512x64xf32> to vector<2x16x16x64xf32>
    %104 = vector.shape_cast %103 : vector<2x16x16x64xf32> to vector<2x8x2x16x64xf32>
    %cst_87 = arith.constant dense<0xFF800000> : vector<2x8x16x64xf32>
    %105 = vector.multi_reduction <maximumf>, %104, %cst_87 [2] : vector<2x8x2x16x64xf32> to vector<2x8x16x64xf32>
    %c0_88 = arith.constant 0 : index
    %c0_89 = arith.constant 0 : index
    %c0_90 = arith.constant 0 : index
    %c0_91 = arith.constant 0 : index
    %106 = vector.load %arg23[%c0_88, %c0_89, %c0_90, %c0_91] : memref<2x8x16x64xf32, #tpu.memory_space<vmem>>, vector<2x8x16x64xf32>
    tpu.vector_store %arg23[%c0_88, %c0_89, %c0_90, %c0_91], %105 {strides = array<i32>} : memref<2x8x16x64xf32, #tpu.memory_space<vmem>>, vector<2x8x16x64xf32>,
    %c0_92 = arith.constant 0 : index
    %c0_93 = arith.constant 0 : index
    %c0_94 = arith.constant 0 : index
    %c0_95 = arith.constant 0 : index
    %107 = tpu.strided_load %arg23[%c0_92, %c0_93, %c0_94, %c0_95] {strides = array<i32: 1, 1, 2, 1>} : memref<2x8x16x64xf32, #tpu.memory_space<vmem>>, vector<2x8x8x64xf32>
    %c0_96 = arith.constant 0 : index
    %c0_97 = arith.constant 0 : index
    %c1_98 = arith.constant 1 : index
    %c0_99 = arith.constant 0 : index
    %108 = tpu.strided_load %arg23[%c0_96, %c0_97, %c1_98, %c0_99] {strides = array<i32: 1, 1, 2, 1>} : memref<2x8x16x64xf32, #tpu.memory_space<vmem>>, vector<2x8x8x64xf32>
    %109 = arith.maximumf %107, %108 : vector<2x8x8x64xf32>
    %c0_100 = arith.constant 0 : index
    %c1_101 = arith.constant 1 : index
    %c1_102 = arith.constant 1 : index
    %c0_103 = arith.constant 0 : index
    %110 = vector.load %arg21[%c0_100, %c1_101, %c1_102, %c0_103] : memref<2x10x10x64xf32, #tpu.memory_space<vmem>>, vector<2x8x8x64xf32>
    tpu.vector_store %arg21[%c0_100, %c1_101, %c1_102, %c0_103], %109 {strides = array<i32>} : memref<2x10x10x64xf32, #tpu.memory_space<vmem>>, vector<2x8x8x64xf32>,
    %c0_104 = arith.constant 0 : index
    %c0_105 = arith.constant 0 : index
    %c0_106 = arith.constant 0 : index
    %c0_107 = arith.constant 0 : index
    %111 = vector.load %arg21[%c0_104, %c0_105, %c0_106, %c0_107] : memref<2x10x10x64xf32, #tpu.memory_space<vmem>>, vector<2x8x8x64xf32>
    %112 = vector.shape_cast %111 : vector<2x8x8x64xf32> to vector<128x64xf32>
    %113 = arith.truncf %112 : vector<128x64xf32> to vector<128x64xbf16>
    %c0_108 = arith.constant 0 : index
    %c0_109 = arith.constant 0 : index
    %c1_110 = arith.constant 1 : index
    %c0_111 = arith.constant 0 : index
    %114 = vector.load %arg21[%c0_108, %c0_109, %c1_110, %c0_111] : memref<2x10x10x64xf32, #tpu.memory_space<vmem>>, vector<2x8x8x64xf32>
    %115 = vector.shape_cast %114 : vector<2x8x8x64xf32> to vector<128x64xf32>
    %116 = arith.truncf %115 : vector<128x64xf32> to vector<128x64xbf16>
    %c0_112 = arith.constant 0 : index
    %c0_113 = arith.constant 0 : index
    %c2_114 = arith.constant 2 : index
    %c0_115 = arith.constant 0 : index
    %117 = vector.load %arg21[%c0_112, %c0_113, %c2_114, %c0_115] : memref<2x10x10x64xf32, #tpu.memory_space<vmem>>, vector<2x8x8x64xf32>
    %118 = vector.shape_cast %117 : vector<2x8x8x64xf32> to vector<128x64xf32>
    %119 = arith.truncf %118 : vector<128x64xf32> to vector<128x64xbf16>
    %c0_116 = arith.constant 0 : index
    %c1_117 = arith.constant 1 : index
    %c0_118 = arith.constant 0 : index
    %c0_119 = arith.constant 0 : index
    %120 = vector.load %arg21[%c0_116, %c1_117, %c0_118, %c0_119] : memref<2x10x10x64xf32, #tpu.memory_space<vmem>>, vector<2x8x8x64xf32>
    %121 = vector.shape_cast %120 : vector<2x8x8x64xf32> to vector<128x64xf32>
    %122 = arith.truncf %121 : vector<128x64xf32> to vector<128x64xbf16>
    %c0_120 = arith.constant 0 : index
    %c1_121 = arith.constant 1 : index
    %c1_122 = arith.constant 1 : index
    %c0_123 = arith.constant 0 : index
    %123 = vector.load %arg21[%c0_120, %c1_121, %c1_122, %c0_123] : memref<2x10x10x64xf32, #tpu.memory_space<vmem>>, vector<2x8x8x64xf32>
    %124 = vector.shape_cast %123 : vector<2x8x8x64xf32> to vector<128x64xf32>
    %125 = arith.truncf %124 : vector<128x64xf32> to vector<128x64xbf16>
    %c0_124 = arith.constant 0 : index
    %c1_125 = arith.constant 1 : index
    %c2_126 = arith.constant 2 : index
    %c0_127 = arith.constant 0 : index
    %126 = vector.load %arg21[%c0_124, %c1_125, %c2_126, %c0_127] : memref<2x10x10x64xf32, #tpu.memory_space<vmem>>, vector<2x8x8x64xf32>
    %127 = vector.shape_cast %126 : vector<2x8x8x64xf32> to vector<128x64xf32>
    %128 = arith.truncf %127 : vector<128x64xf32> to vector<128x64xbf16>
    %c0_128 = arith.constant 0 : index
    %c2_129 = arith.constant 2 : index
    %c0_130 = arith.constant 0 : index
    %c0_131 = arith.constant 0 : index
    %129 = vector.load %arg21[%c0_128, %c2_129, %c0_130, %c0_131] : memref<2x10x10x64xf32, #tpu.memory_space<vmem>>, vector<2x8x8x64xf32>
    %130 = vector.shape_cast %129 : vector<2x8x8x64xf32> to vector<128x64xf32>
    %131 = arith.truncf %130 : vector<128x64xf32> to vector<128x64xbf16>
    %c0_132 = arith.constant 0 : index
    %c2_133 = arith.constant 2 : index
    %c1_134 = arith.constant 1 : index
    %c0_135 = arith.constant 0 : index
    %132 = vector.load %arg21[%c0_132, %c2_133, %c1_134, %c0_135] : memref<2x10x10x64xf32, #tpu.memory_space<vmem>>, vector<2x8x8x64xf32>
    %133 = vector.shape_cast %132 : vector<2x8x8x64xf32> to vector<128x64xf32>
    %134 = arith.truncf %133 : vector<128x64xf32> to vector<128x64xbf16>
    %c0_136 = arith.constant 0 : index
    %c2_137 = arith.constant 2 : index
    %c2_138 = arith.constant 2 : index
    %c0_139 = arith.constant 0 : index
    %135 = vector.load %arg21[%c0_136, %c2_137, %c2_138, %c0_139] : memref<2x10x10x64xf32, #tpu.memory_space<vmem>>, vector<2x8x8x64xf32>
    %136 = vector.shape_cast %135 : vector<2x8x8x64xf32> to vector<128x64xf32>
    %137 = arith.truncf %136 : vector<128x64xf32> to vector<128x64xbf16>
    %138 = tpu.concatenate %113, %116, %119, %122, %125, %128, %131, %134, %137 in 1 : vector<128x64xbf16>, vector<128x64xbf16>, vector<128x64xbf16>, vector<128x64xbf16>, vector<128x64xbf16>, vector<128x64xbf16>, vector<128x64xbf16>, vector<128x64xbf16>, vector<128x64xbf16> -> vector<128x576xbf16>
    %c0_140 = arith.constant 0 : index
    %c0_141 = arith.constant 0 : index
    %139 = vector.load %arg9[%c0_140, %c0_141] : memref<576x128xbf16, #tpu.memory_space<vmem>>, vector<576x128xbf16>
    %cst_142 = arith.constant dense<0.000000e+00> : vector<128x128xf32>
    %140 = tpu.matmul %138, %139, %cst_142 {dimension_numbers = #tpu.dot_dimension_numbers<[1], [0], [0], [1], [0, 0, 1, 1], [], []>} : vector<128x576xbf16>, vector<576x128xbf16>, vector<128x128xf32> -> vector<128x128xf32>
    %c0_143 = arith.constant 0 : index
    %c0_144 = arith.constant 0 : index
    %141 = vector.load %arg10[%c0_143, %c0_144] : memref<1x128xf32, #tpu.memory_space<vmem>>, vector<1x128xf32>
    %142 = vector.broadcast %141 : vector<1x128xf32> to vector<128x128xf32>
    %143 = arith.addf %140, %142 : vector<128x128xf32>
    %c0_145 = arith.constant 0 : index
    %c0_146 = arith.constant 0 : index
    %144 = vector.load %arg11[%c0_145, %c0_146] : memref<1x128xf32, #tpu.memory_space<vmem>>, vector<1x128xf32>
    %c0_147 = arith.constant 0 : index
    %c0_148 = arith.constant 0 : index
    %145 = vector.load %arg12[%c0_147, %c0_148] : memref<1x128xf32, #tpu.memory_space<vmem>>, vector<1x128xf32>
    %cst_149 = arith.constant dense<0.000000e+00> : vector<128xf32>
    %146 = vector.multi_reduction <add>, %143, %cst_149 [0] : vector<128x128xf32> to vector<128xf32>
    %147 = vector.shape_cast %146 : vector<128xf32> to vector<1x128xf32>
    %cst_150 = arith.constant 7.812500e-03 : f32
    %148 = vector.broadcast %cst_150 : f32 to vector<1x128xf32>
    %149 = arith.mulf %147, %148 : vector<1x128xf32>
    %150 = vector.broadcast %149 : vector<1x128xf32> to vector<128x128xf32>
    %151 = arith.subf %143, %150 : vector<128x128xf32>
    %152 = arith.mulf %151, %151 : vector<128x128xf32>
    %cst_151 = arith.constant dense<0.000000e+00> : vector<128xf32>
    %153 = vector.multi_reduction <add>, %152, %cst_151 [0] : vector<128x128xf32> to vector<128xf32>
    %154 = vector.shape_cast %153 : vector<128xf32> to vector<1x128xf32>
    %cst_152 = arith.constant 7.812500e-03 : f32
    %155 = vector.broadcast %cst_152 : f32 to vector<1x128xf32>
    %156 = arith.mulf %154, %155 : vector<1x128xf32>
    %cst_153 = arith.constant 0.000000e+00 : f32
    %157 = vector.broadcast %cst_153 : f32 to vector<1x128xf32>
    %158 = arith.maximumf %156, %157 : vector<1x128xf32>
    %cst_154 = arith.constant 9.99999974E-6 : f32
    %159 = vector.broadcast %cst_154 : f32 to vector<1x128xf32>
    %160 = arith.addf %158, %159 : vector<1x128xf32>
    %161 = math.rsqrt %160 : vector<1x128xf32>
    %162 = arith.mulf %161, %144 : vector<1x128xf32>
    %163 = vector.broadcast %162 : vector<1x128xf32> to vector<128x128xf32>
    %164 = arith.mulf %151, %163 : vector<128x128xf32>
    %165 = vector.broadcast %145 : vector<1x128xf32> to vector<128x128xf32>
    %166 = arith.addf %164, %165 : vector<128x128xf32>
    %cst_155 = arith.constant 0.000000e+00 : f32
    %167 = vector.broadcast %cst_155 : f32 to vector<128x128xf32>
    %168 = arith.cmpf oge, %166, %167 : vector<128x128xf32>
    %cst_156 = arith.constant 2.000000e-01 : f32
    %169 = vector.broadcast %cst_156 : f32 to vector<128x128xf32>
    %170 = arith.mulf %169, %166 : vector<128x128xf32>
    %171 = arith.select %168, %166, %170 : vector<128x128xi1>, vector<128x128xf32>
    %172 = vector.shape_cast %171 : vector<128x128xf32> to vector<2x8x8x128xf32>
    %c0_157 = arith.constant 0 : index
    %c1_158 = arith.constant 1 : index
    %c1_159 = arith.constant 1 : index
    %c0_160 = arith.constant 0 : index
    %173 = vector.load %arg22[%c0_157, %c1_158, %c1_159, %c0_160] : memref<2x10x10x128xf32, #tpu.memory_space<vmem>>, vector<2x8x8x128xf32>
    tpu.vector_store %arg22[%c0_157, %c1_158, %c1_159, %c0_160], %172 {strides = array<i32>} : memref<2x10x10x128xf32, #tpu.memory_space<vmem>>, vector<2x8x8x128xf32>,
    %c0_161 = arith.constant 0 : index
    %c0_162 = arith.constant 0 : index
    %c0_163 = arith.constant 0 : index
    %c0_164 = arith.constant 0 : index
    %174 = vector.load %arg22[%c0_161, %c0_162, %c0_163, %c0_164] : memref<2x10x10x128xf32, #tpu.memory_space<vmem>>, vector<2x8x8x128xf32>
    %175 = vector.shape_cast %174 : vector<2x8x8x128xf32> to vector<128x128xf32>
    %176 = arith.truncf %175 : vector<128x128xf32> to vector<128x128xbf16>
    %c0_165 = arith.constant 0 : index
    %c0_166 = arith.constant 0 : index
    %c1_167 = arith.constant 1 : index
    %c0_168 = arith.constant 0 : index
    %177 = vector.load %arg22[%c0_165, %c0_166, %c1_167, %c0_168] : memref<2x10x10x128xf32, #tpu.memory_space<vmem>>, vector<2x8x8x128xf32>
    %178 = vector.shape_cast %177 : vector<2x8x8x128xf32> to vector<128x128xf32>
    %179 = arith.truncf %178 : vector<128x128xf32> to vector<128x128xbf16>
    %c0_169 = arith.constant 0 : index
    %c0_170 = arith.constant 0 : index
    %c2_171 = arith.constant 2 : index
    %c0_172 = arith.constant 0 : index
    %180 = vector.load %arg22[%c0_169, %c0_170, %c2_171, %c0_172] : memref<2x10x10x128xf32, #tpu.memory_space<vmem>>, vector<2x8x8x128xf32>
    %181 = vector.shape_cast %180 : vector<2x8x8x128xf32> to vector<128x128xf32>
    %182 = arith.truncf %181 : vector<128x128xf32> to vector<128x128xbf16>
    %c0_173 = arith.constant 0 : index
    %c1_174 = arith.constant 1 : index
    %c0_175 = arith.constant 0 : index
    %c0_176 = arith.constant 0 : index
    %183 = vector.load %arg22[%c0_173, %c1_174, %c0_175, %c0_176] : memref<2x10x10x128xf32, #tpu.memory_space<vmem>>, vector<2x8x8x128xf32>
    %184 = vector.shape_cast %183 : vector<2x8x8x128xf32> to vector<128x128xf32>
    %185 = arith.truncf %184 : vector<128x128xf32> to vector<128x128xbf16>
    %c0_177 = arith.constant 0 : index
    %c1_178 = arith.constant 1 : index
    %c1_179 = arith.constant 1 : index
    %c0_180 = arith.constant 0 : index
    %186 = vector.load %arg22[%c0_177, %c1_178, %c1_179, %c0_180] : memref<2x10x10x128xf32, #tpu.memory_space<vmem>>, vector<2x8x8x128xf32>
    %187 = vector.shape_cast %186 : vector<2x8x8x128xf32> to vector<128x128xf32>
    %188 = arith.truncf %187 : vector<128x128xf32> to vector<128x128xbf16>
    %c0_181 = arith.constant 0 : index
    %c1_182 = arith.constant 1 : index
    %c2_183 = arith.constant 2 : index
    %c0_184 = arith.constant 0 : index
    %189 = vector.load %arg22[%c0_181, %c1_182, %c2_183, %c0_184] : memref<2x10x10x128xf32, #tpu.memory_space<vmem>>, vector<2x8x8x128xf32>
    %190 = vector.shape_cast %189 : vector<2x8x8x128xf32> to vector<128x128xf32>
    %191 = arith.truncf %190 : vector<128x128xf32> to vector<128x128xbf16>
    %c0_185 = arith.constant 0 : index
    %c2_186 = arith.constant 2 : index
    %c0_187 = arith.constant 0 : index
    %c0_188 = arith.constant 0 : index
    %192 = vector.load %arg22[%c0_185, %c2_186, %c0_187, %c0_188] : memref<2x10x10x128xf32, #tpu.memory_space<vmem>>, vector<2x8x8x128xf32>
    %193 = vector.shape_cast %192 : vector<2x8x8x128xf32> to vector<128x128xf32>
    %194 = arith.truncf %193 : vector<128x128xf32> to vector<128x128xbf16>
    %c0_189 = arith.constant 0 : index
    %c2_190 = arith.constant 2 : index
    %c1_191 = arith.constant 1 : index
    %c0_192 = arith.constant 0 : index
    %195 = vector.load %arg22[%c0_189, %c2_190, %c1_191, %c0_192] : memref<2x10x10x128xf32, #tpu.memory_space<vmem>>, vector<2x8x8x128xf32>
    %196 = vector.shape_cast %195 : vector<2x8x8x128xf32> to vector<128x128xf32>
    %197 = arith.truncf %196 : vector<128x128xf32> to vector<128x128xbf16>
    %c0_193 = arith.constant 0 : index
    %c2_194 = arith.constant 2 : index
    %c2_195 = arith.constant 2 : index
    %c0_196 = arith.constant 0 : index
    %198 = vector.load %arg22[%c0_193, %c2_194, %c2_195, %c0_196] : memref<2x10x10x128xf32, #tpu.memory_space<vmem>>, vector<2x8x8x128xf32>
    %199 = vector.shape_cast %198 : vector<2x8x8x128xf32> to vector<128x128xf32>
    %200 = arith.truncf %199 : vector<128x128xf32> to vector<128x128xbf16>
    %201 = tpu.concatenate %176, %179, %182, %185, %188, %191, %194, %197, %200 in 1 : vector<128x128xbf16>, vector<128x128xbf16>, vector<128x128xbf16>, vector<128x128xbf16>, vector<128x128xbf16>, vector<128x128xbf16>, vector<128x128xbf16>, vector<128x128xbf16>, vector<128x128xbf16> -> vector<128x1152xbf16>
    %c0_197 = arith.constant 0 : index
    %c0_198 = arith.constant 0 : index
    %202 = vector.load %arg13[%c0_197, %c0_198] : memref<1152x128xbf16, #tpu.memory_space<vmem>>, vector<1152x128xbf16>
    %cst_199 = arith.constant dense<0.000000e+00> : vector<128x128xf32>
    %203 = tpu.matmul %201, %202, %cst_199 {dimension_numbers = #tpu.dot_dimension_numbers<[1], [0], [0], [1], [0, 0, 1, 1], [], []>} : vector<128x1152xbf16>, vector<1152x128xbf16>, vector<128x128xf32> -> vector<128x128xf32>
    %c0_200 = arith.constant 0 : index
    %c0_201 = arith.constant 0 : index
    %204 = vector.load %arg14[%c0_200, %c0_201] : memref<1x128xf32, #tpu.memory_space<vmem>>, vector<1x128xf32>
    %205 = vector.broadcast %204 : vector<1x128xf32> to vector<128x128xf32>
    %206 = arith.addf %203, %205 : vector<128x128xf32>
    %c0_202 = arith.constant 0 : index
    %c0_203 = arith.constant 0 : index
    %207 = vector.load %arg15[%c0_202, %c0_203] : memref<1x128xf32, #tpu.memory_space<vmem>>, vector<1x128xf32>
    %c0_204 = arith.constant 0 : index
    %c0_205 = arith.constant 0 : index
    %208 = vector.load %arg16[%c0_204, %c0_205] : memref<1x128xf32, #tpu.memory_space<vmem>>, vector<1x128xf32>
    %cst_206 = arith.constant dense<0.000000e+00> : vector<128xf32>
    %209 = vector.multi_reduction <add>, %206, %cst_206 [0] : vector<128x128xf32> to vector<128xf32>
    %210 = vector.shape_cast %209 : vector<128xf32> to vector<1x128xf32>
    %cst_207 = arith.constant 7.812500e-03 : f32
    %211 = vector.broadcast %cst_207 : f32 to vector<1x128xf32>
    %212 = arith.mulf %210, %211 : vector<1x128xf32>
    %213 = vector.broadcast %212 : vector<1x128xf32> to vector<128x128xf32>
    %214 = arith.subf %206, %213 : vector<128x128xf32>
    %215 = arith.mulf %214, %214 : vector<128x128xf32>
    %cst_208 = arith.constant dense<0.000000e+00> : vector<128xf32>
    %216 = vector.multi_reduction <add>, %215, %cst_208 [0] : vector<128x128xf32> to vector<128xf32>
    %217 = vector.shape_cast %216 : vector<128xf32> to vector<1x128xf32>
    %cst_209 = arith.constant 7.812500e-03 : f32
    %218 = vector.broadcast %cst_209 : f32 to vector<1x128xf32>
    %219 = arith.mulf %217, %218 : vector<1x128xf32>
    %cst_210 = arith.constant 0.000000e+00 : f32
    %220 = vector.broadcast %cst_210 : f32 to vector<1x128xf32>
    %221 = arith.maximumf %219, %220 : vector<1x128xf32>
    %cst_211 = arith.constant 9.99999974E-6 : f32
    %222 = vector.broadcast %cst_211 : f32 to vector<1x128xf32>
    %223 = arith.addf %221, %222 : vector<1x128xf32>
    %224 = math.rsqrt %223 : vector<1x128xf32>
    %225 = arith.mulf %224, %207 : vector<1x128xf32>
    %226 = vector.broadcast %225 : vector<1x128xf32> to vector<128x128xf32>
    %227 = arith.mulf %214, %226 : vector<128x128xf32>
    %228 = vector.broadcast %208 : vector<1x128xf32> to vector<128x128xf32>
    %229 = arith.addf %227, %228 : vector<128x128xf32>
    %cst_212 = arith.constant 0.000000e+00 : f32
    %230 = vector.broadcast %cst_212 : f32 to vector<128x128xf32>
    %231 = arith.cmpf oge, %229, %230 : vector<128x128xf32>
    %cst_213 = arith.constant 2.000000e-01 : f32
    %232 = vector.broadcast %cst_213 : f32 to vector<128x128xf32>
    %233 = arith.mulf %232, %229 : vector<128x128xf32>
    %234 = arith.select %231, %229, %233 : vector<128x128xi1>, vector<128x128xf32>
    %235 = vector.shape_cast %234 : vector<128x128xf32> to vector<2x8x8x128xf32>
    %236 = vector.shape_cast %235 : vector<2x8x8x128xf32> to vector<2x4x2x8x128xf32>
    %cst_214 = arith.constant dense<0xFF800000> : vector<2x4x8x128xf32>
    %237 = vector.multi_reduction <maximumf>, %236, %cst_214 [2] : vector<2x4x2x8x128xf32> to vector<2x4x8x128xf32>
    %c0_215 = arith.constant 0 : index
    %c0_216 = arith.constant 0 : index
    %c0_217 = arith.constant 0 : index
    %c0_218 = arith.constant 0 : index
    %238 = vector.load %arg24[%c0_215, %c0_216, %c0_217, %c0_218] : memref<2x4x8x128xf32, #tpu.memory_space<vmem>>, vector<2x4x8x128xf32>
    tpu.vector_store %arg24[%c0_215, %c0_216, %c0_217, %c0_218], %237 {strides = array<i32>} : memref<2x4x8x128xf32, #tpu.memory_space<vmem>>, vector<2x4x8x128xf32>,
    %c0_219 = arith.constant 0 : index
    %c0_220 = arith.constant 0 : index
    %c0_221 = arith.constant 0 : index
    %c0_222 = arith.constant 0 : index
    %239 = tpu.strided_load %arg24[%c0_219, %c0_220, %c0_221, %c0_222] {strides = array<i32: 1, 1, 2, 1>} : memref<2x4x8x128xf32, #tpu.memory_space<vmem>>, vector<2x4x4x128xf32>
    %c0_223 = arith.constant 0 : index
    %c0_224 = arith.constant 0 : index
    %c1_225 = arith.constant 1 : index
    %c0_226 = arith.constant 0 : index
    %240 = tpu.strided_load %arg24[%c0_223, %c0_224, %c1_225, %c0_226] {strides = array<i32: 1, 1, 2, 1>} : memref<2x4x8x128xf32, #tpu.memory_space<vmem>>, vector<2x4x4x128xf32>
    %241 = arith.maximumf %239, %240 : vector<2x4x4x128xf32>
    %242 = vector.extract_strided_slice %241 {offsets = [0, 0, 0, 0], sizes = [2, 1, 1, 128], strides = [1, 1, 1, 1]} : vector<2x4x4x128xf32> to vector<2x1x1x128xf32>
    %243 = vector.shape_cast %242 : vector<2x1x1x128xf32> to vector<2x128xf32>
    %244 = arith.truncf %243 : vector<2x128xf32> to vector<2x128xbf16>
    %245 = vector.extract_strided_slice %241 {offsets = [0, 0, 1, 0], sizes = [2, 1, 1, 128], strides = [1, 1, 1, 1]} : vector<2x4x4x128xf32> to vector<2x1x1x128xf32>
    %246 = vector.shape_cast %245 : vector<2x1x1x128xf32> to vector<2x128xf32>
    %247 = arith.truncf %246 : vector<2x128xf32> to vector<2x128xbf16>
    %248 = vector.extract_strided_slice %241 {offsets = [0, 0, 2, 0], sizes = [2, 1, 1, 128], strides = [1, 1, 1, 1]} : vector<2x4x4x128xf32> to vector<2x1x1x128xf32>
    %249 = vector.shape_cast %248 : vector<2x1x1x128xf32> to vector<2x128xf32>
    %250 = arith.truncf %249 : vector<2x128xf32> to vector<2x128xbf16>
    %251 = vector.extract_strided_slice %241 {offsets = [0, 0, 3, 0], sizes = [2, 1, 1, 128], strides = [1, 1, 1, 1]} : vector<2x4x4x128xf32> to vector<2x1x1x128xf32>
    %252 = vector.shape_cast %251 : vector<2x1x1x128xf32> to vector<2x128xf32>
    %253 = arith.truncf %252 : vector<2x128xf32> to vector<2x128xbf16>
    %254 = vector.extract_strided_slice %241 {offsets = [0, 1, 0, 0], sizes = [2, 1, 1, 128], strides = [1, 1, 1, 1]} : vector<2x4x4x128xf32> to vector<2x1x1x128xf32>
    %255 = vector.shape_cast %254 : vector<2x1x1x128xf32> to vector<2x128xf32>
    %256 = arith.truncf %255 : vector<2x128xf32> to vector<2x128xbf16>
    %257 = vector.extract_strided_slice %241 {offsets = [0, 1, 1, 0], sizes = [2, 1, 1, 128], strides = [1, 1, 1, 1]} : vector<2x4x4x128xf32> to vector<2x1x1x128xf32>
    %258 = vector.shape_cast %257 : vector<2x1x1x128xf32> to vector<2x128xf32>
    %259 = arith.truncf %258 : vector<2x128xf32> to vector<2x128xbf16>
    %260 = vector.extract_strided_slice %241 {offsets = [0, 1, 2, 0], sizes = [2, 1, 1, 128], strides = [1, 1, 1, 1]} : vector<2x4x4x128xf32> to vector<2x1x1x128xf32>
    %261 = vector.shape_cast %260 : vector<2x1x1x128xf32> to vector<2x128xf32>
    %262 = arith.truncf %261 : vector<2x128xf32> to vector<2x128xbf16>
    %263 = vector.extract_strided_slice %241 {offsets = [0, 1, 3, 0], sizes = [2, 1, 1, 128], strides = [1, 1, 1, 1]} : vector<2x4x4x128xf32> to vector<2x1x1x128xf32>
    %264 = vector.shape_cast %263 : vector<2x1x1x128xf32> to vector<2x128xf32>
    %265 = arith.truncf %264 : vector<2x128xf32> to vector<2x128xbf16>
    %266 = vector.extract_strided_slice %241 {offsets = [0, 2, 0, 0], sizes = [2, 1, 1, 128], strides = [1, 1, 1, 1]} : vector<2x4x4x128xf32> to vector<2x1x1x128xf32>
    %267 = vector.shape_cast %266 : vector<2x1x1x128xf32> to vector<2x128xf32>
    %268 = arith.truncf %267 : vector<2x128xf32> to vector<2x128xbf16>
    %269 = vector.extract_strided_slice %241 {offsets = [0, 2, 1, 0], sizes = [2, 1, 1, 128], strides = [1, 1, 1, 1]} : vector<2x4x4x128xf32> to vector<2x1x1x128xf32>
    %270 = vector.shape_cast %269 : vector<2x1x1x128xf32> to vector<2x128xf32>
    %271 = arith.truncf %270 : vector<2x128xf32> to vector<2x128xbf16>
    %272 = vector.extract_strided_slice %241 {offsets = [0, 2, 2, 0], sizes = [2, 1, 1, 128], strides = [1, 1, 1, 1]} : vector<2x4x4x128xf32> to vector<2x1x1x128xf32>
    %273 = vector.shape_cast %272 : vector<2x1x1x128xf32> to vector<2x128xf32>
    %274 = arith.truncf %273 : vector<2x128xf32> to vector<2x128xbf16>
    %275 = vector.extract_strided_slice %241 {offsets = [0, 2, 3, 0], sizes = [2, 1, 1, 128], strides = [1, 1, 1, 1]} : vector<2x4x4x128xf32> to vector<2x1x1x128xf32>
    %276 = vector.shape_cast %275 : vector<2x1x1x128xf32> to vector<2x128xf32>
    %277 = arith.truncf %276 : vector<2x128xf32> to vector<2x128xbf16>
    %278 = vector.extract_strided_slice %241 {offsets = [0, 3, 0, 0], sizes = [2, 1, 1, 128], strides = [1, 1, 1, 1]} : vector<2x4x4x128xf32> to vector<2x1x1x128xf32>
    %279 = vector.shape_cast %278 : vector<2x1x1x128xf32> to vector<2x128xf32>
    %280 = arith.truncf %279 : vector<2x128xf32> to vector<2x128xbf16>
    %281 = vector.extract_strided_slice %241 {offsets = [0, 3, 1, 0], sizes = [2, 1, 1, 128], strides = [1, 1, 1, 1]} : vector<2x4x4x128xf32> to vector<2x1x1x128xf32>
    %282 = vector.shape_cast %281 : vector<2x1x1x128xf32> to vector<2x128xf32>
    %283 = arith.truncf %282 : vector<2x128xf32> to vector<2x128xbf16>
    %284 = vector.extract_strided_slice %241 {offsets = [0, 3, 2, 0], sizes = [2, 1, 1, 128], strides = [1, 1, 1, 1]} : vector<2x4x4x128xf32> to vector<2x1x1x128xf32>
    %285 = vector.shape_cast %284 : vector<2x1x1x128xf32> to vector<2x128xf32>
    %286 = arith.truncf %285 : vector<2x128xf32> to vector<2x128xbf16>
    %287 = vector.extract_strided_slice %241 {offsets = [0, 3, 3, 0], sizes = [2, 1, 1, 128], strides = [1, 1, 1, 1]} : vector<2x4x4x128xf32> to vector<2x1x1x128xf32>
    %288 = vector.shape_cast %287 : vector<2x1x1x128xf32> to vector<2x128xf32>
    %289 = arith.truncf %288 : vector<2x128xf32> to vector<2x128xbf16>
    %290 = tpu.concatenate %244, %247, %250, %253, %256, %259, %262, %265, %268, %271, %274, %277, %280, %283, %286, %289 in 1 : vector<2x128xbf16>, vector<2x128xbf16>, vector<2x128xbf16>, vector<2x128xbf16>, vector<2x128xbf16>, vector<2x128xbf16>, vector<2x128xbf16>, vector<2x128xbf16>, vector<2x128xbf16>, vector<2x128xbf16>, vector<2x128xbf16>, vector<2x128xbf16>, vector<2x128xbf16>, vector<2x128xbf16>, vector<2x128xbf16>, vector<2x128xbf16> -> vector<2x2048xbf16>
    %c0_227 = arith.constant 0 : index
    %c0_228 = arith.constant 0 : index
    %291 = vector.load %arg17[%c0_227, %c0_228] : memref<2048x32xbf16, #tpu.memory_space<vmem>>, vector<2048x32xbf16>
    %cst_229 = arith.constant dense<0.000000e+00> : vector<2x32xf32>
    %292 = tpu.matmul %290, %291, %cst_229 {dimension_numbers = #tpu.dot_dimension_numbers<[1], [0], [0], [1], [0, 0, 1, 1], [], []>} : vector<2x2048xbf16>, vector<2048x32xbf16>, vector<2x32xf32> -> vector<2x32xf32>
    %c0_230 = arith.constant 0 : index
    %c0_231 = arith.constant 0 : index
    %293 = vector.load %arg18[%c0_230, %c0_231] : memref<1x32xf32, #tpu.memory_space<vmem>>, vector<1x32xf32>
    %294 = vector.broadcast %293 : vector<1x32xf32> to vector<2x32xf32>
    %295 = arith.addf %292, %294 : vector<2x32xf32>
    %296 = math.tanh %295 : vector<2x32xf32>
    %c0_232 = arith.constant 0 : index
    %c0_233 = arith.constant 0 : index
    %297 = vector.load %arg19[%c0_232, %c0_233] : memref<2x32xf32, #tpu.memory_space<vmem>>, vector<2x32xf32>
    tpu.vector_store %arg19[%c0_232, %c0_233], %296 {strides = array<i32>} : memref<2x32xf32, #tpu.memory_space<vmem>>, vector<2x32xf32>,
    return
  }
}

</mosaic_0001>

<bundles_post_ra>
// kernel: vgg_forward.1
= control target key start
LH: loop header
LB: loop body
LE: loop exit
PB: predicated region body
PF: predicated region fallthrough
CT: control target
= control target key end

     0   :  { %s18740_s0 = inlined_call_operand.vmem [shape: bf16[512,36], index: 0, kind: input, shape index: {}]   ;;  %s18741_s1 = inlined_call_operand.vmem [shape: bf16[36,64], index: 1, kind: input, shape index: {}]   ;;  %s18742_s2 = inlined_call_operand.vmem [shape: f32[1,64], index: 2, kind: input, shape index: {}]   ;;  %s18743_s3 = inlined_call_operand.vmem [shape: f32[1,64], index: 3, kind: input, shape index: {}]   ;;  %s18744_s4 = inlined_call_operand.vmem [shape: f32[1,64], index: 4, kind: input, shape index: {}]   ;;  %s18745_s5 = inlined_call_operand.vmem [shape: bf16[576,64], index: 5, kind: input, shape index: {}]   ;;  %s18746_s6 = inlined_call_operand.vmem [shape: f32[1,64], index: 6, kind: input, shape index: {}]   ;;  %s18747_s7 = inlined_call_operand.vmem [shape: f32[1,64], index: 7, kind: input, shape index: {}]   ;;  %s18748_s8 = inlined_call_operand.vmem [shape: f32[1,64], index: 8, kind: input, shape index: {}]   ;;  %s18749_s9 = inlined_call_operand.vmem [shape: bf16[576,128], index: 9, kind: input, shape index: {}]   ;;  %s18750_s10 = inlined_call_operand.vmem [shape: f32[1,128], index: 10, kind: input, shape index: {}]   ;;  %s18751_s11 = inlined_call_operand.vmem [shape: f32[1,128], index: 11, kind: input, shape index: {}]   ;;  %s18752_s12 = inlined_call_operand.vmem [shape: f32[1,128], index: 12, kind: input, shape index: {}]   ;;  %s18753_s13 = inlined_call_operand.vmem [shape: bf16[1152,128], index: 13, kind: input, shape index: {}]   ;;  %s18754_s14 = inlined_call_operand.vmem [shape: f32[1,128], index: 14, kind: input, shape index: {}]   ;;  %s18755_s15 = inlined_call_operand.vmem [shape: f32[1,128], index: 15, kind: input, shape index: {}]   ;;  %s18756_s16 = inlined_call_operand.vmem [shape: f32[1,128], index: 16, kind: input, shape index: {}]   ;;  %s18757_s17 = inlined_call_operand.vmem [shape: bf16[2048,32], index: 17, kind: input, shape index: {}]   ;;  %s18758_s18 = inlined_call_operand.vmem [shape: f32[1,32], index: 18, kind: input, shape index: {}]   ;;  %s18759_s19 = inlined_call_operand.hbm [shape: f32[2,32], index: 19, kind: output, shape index: {}]  }
   0x1   :  { %18904 = sst [smem:[#allocation57_spill]] %s18740_s0 }
   0x2   :  { %18905 = sst [smem:[#allocation58_spill]] %s18741_s1 }
   0x3   :  { %18906 = sst [smem:[#allocation59_spill]] %s18742_s2 }
   0x4   :  { %18907 = sst [smem:[#allocation60_spill]] %s18743_s3 }
   0x5   :  { %s18908_s20 = sld [smem:[#allocation58_spill]]  ;;  %vm602_vm0 = vcmask 1041408   ;;  %vm505_vm1 = vcmask 293888   ;;  %vm18886_vm2 = vcmask 523264   ;;  %v11475_v5 = vmov 0.0  }
   0x6   :  { %s18909_s23 = sld [smem:[#allocation57_spill]]  ;;  %72 = vst.msk [vmem:[#allocation2 + $0x30] sm:$0xff] %vm18886_vm2, %v11475_v5  ;;  %73 = vst.msk [vmem:[#allocation2 + $0x38] sm:$0xff] %vm18886_vm2, %v11475_v5  ;;  %vm67_vm3 = vcmask 517120  }
   0x7   :  { %65 = vst.msk [vmem:[#allocation2] sm:$0xff] %vm18886_vm2, %v11475_v5  ;;  %66 = vst.msk [vmem:[#allocation2 + $0x8] sm:$0xff] %vm18886_vm2, %v11475_v5  ;;  %s18910_s21 = sld [smem:[#allocation59_spill]] }
   0x8   :  { %69 = vst.msk [vmem:[#allocation2 + $0x18] sm:$0xff] %vm18886_vm2, %v11475_v5  ;;  %70 = vst.msk [vmem:[#allocation2 + $0x20] sm:$0xff] %vm18886_vm2, %v11475_v5 }
   0x9   :  { %75 = vst.msk [vmem:[#allocation2 + $0x48] sm:$0xff] %vm18886_vm2, %v11475_v5  ;;  %76 = vst.msk [vmem:[#allocation2 + $0x50] sm:$0xff] %vm18886_vm2, %v11475_v5 }
   0xa   :  { %78 = vst.msk [vmem:[#allocation2 + $0x60] sm:$0xff] %vm18886_vm2, %v11475_v5  ;;  %79 = vst.msk [vmem:[#allocation2 + $0x68] sm:$0xff] %vm18886_vm2, %v11475_v5 }
   0xb   :  { %v11134_v0 = vld [vmem:[%s18908_s20 + $0x10] ss:$0 sps:$4 sm:$0x33]   ;;  %v11135_v1 = vld [vmem:[%s18908_s20 + $0x8] sm:$0xff]   ;;  %v11591_v4 = vld [vmem:[%s18908_s20] sm:$0xff]   ;;  %81 = vst.msk [vmem:[#allocation2 + $0x78] sm:$0xff] %vm18886_vm2, %v11475_v5 }
   0xc   :  { %11129 = vmatprep.subr.msk.bf16.mxu0 %vm602_vm0, %v11134_v0  ;;  %v604_v2 = vsel %vm602_vm0, %v11134_v0, 0  ;;  %v11137_v3 = vld [vmem:[%s18909_s23] sm:$0xff]   ;;  %82 = vst.msk [vmem:[#allocation2 + $0x80] sm:$0xff] %vm18886_vm2, %v11475_v5  ;;  %84 = vst.msk [vmem:[#allocation2 + $0x90] sm:$0xff] %vm18886_vm2, %v11475_v5  ;;  %v11138_v6 = vld [vmem:[%s18909_s23 + $0x8] sm:$0xff]  }
   0xd   :  { %10932 = vmatpush3.bf16.msra.mxu0 %v604_v2  ;;  %10937 = vmatprep.mubr.msk.bf16.mxu0 %vm505_vm1, %v11137_v3  ;;  %85 = vst.msk [vmem:[#allocation2 + $0x98] sm:$0xff] %vm18886_vm2, %v11475_v5  ;;  %87 = vst.msk [vmem:[#allocation2 + $0xa8] sm:$0xff] %vm18886_vm2, %v11475_v5  ;;  %v11139_v7 = vld [vmem:[%s18909_s23 + $0x10] sm:$0xff]   ;;  %v11140_v8 = vld [vmem:[%s18909_s23 + $0x18] sm:$0xff]  }
   0xe   :  { %10933 = vmatprep.subr.bf16.mxu0 %v11135_v1  ;;  %88 = vst.msk [vmem:[#allocation2 + $0xb0] sm:$0xff] %vm18886_vm2, %v11475_v5  ;;  %90 = vst.msk [vmem:[#allocation2 + $0xc0] sm:$0xff] %vm18886_vm2, %v11475_v5  ;;  %v11141_v9 = vld [vmem:[%s18909_s23 + $0x20] sm:$0xff]   ;;  %v11142_v10 = vld [vmem:[%s18909_s23 + $0x28] sm:$0xff]  }
   0xf   :  { %91 = vst.msk [vmem:[#allocation2 + $0xc8] sm:$0xff] %vm18886_vm2, %v11475_v5  ;;  %93 = vst.msk [vmem:[#allocation2 + $0xd8] sm:$0xff] %vm18886_vm2, %v11475_v5  ;;  %v11143_v11 = vld [vmem:[%s18909_s23 + $0x30] sm:$0xff]   ;;  %v11144_v12 = vld [vmem:[%s18909_s23 + $0x38] sm:$0xff]  }
  0x10   :  { %94 = vst.msk [vmem:[#allocation2 + $0xe0] sm:$0xff] %vm18886_vm2, %v11475_v5  ;;  %96 = vst.msk [vmem:[#allocation2 + $0xf0] sm:$0xff] %vm18886_vm2, %v11475_v5  ;;  %v11145_v13 = vld [vmem:[%s18909_s23 + $0x40] sm:$0xff]   ;;  %v11146_v14 = vld [vmem:[%s18909_s23 + $0x48] sm:$0xff]  }
  0x11   :  { %10934 = vmatpush3.bf16.msra.mxu0 %v11135_v1  ;;  %97 = vst.msk [vmem:[#allocation2 + $0xf8] sm:$0xff] %vm18886_vm2, %v11475_v5  ;;  %99 = vst.msk [vmem:[#allocation2 + $0x108] sm:$0xff] %vm18886_vm2, %v11475_v5  ;;  %v11147_v15 = vld [vmem:[%s18909_s23 + $0x50] sm:$0xff]   ;;  %v11148_v16 = vld [vmem:[%s18909_s23 + $0x58] sm:$0xff]  }
  0x12   :  { %10935 = vmatprep.subr.bf16.mxu0 %v11591_v4  ;;  %100 = vst.msk [vmem:[#allocation2 + $0x110] sm:$0xff] %vm18886_vm2, %v11475_v5  ;;  %102 = vst.msk [vmem:[#allocation2 + $0x120] sm:$0xff] %vm18886_vm2, %v11475_v5  ;;  %v11149_v17 = vld [vmem:[%s18909_s23 + $0x60] sm:$0xff]   ;;  %v11150_v18 = vld [vmem:[%s18909_s23 + $0x68] sm:$0xff]  }
  0x13   :  { %103 = vst.msk [vmem:[#allocation2 + $0x128] sm:$0xff] %vm18886_vm2, %v11475_v5  ;;  %105 = vst.msk [vmem:[#allocation2 + $0x138] sm:$0xff] %vm18886_vm2, %v11475_v5  ;;  %v11151_v19 = vld [vmem:[%s18909_s23 + $0x70] sm:$0xff]   ;;  %v11152_v20 = vld [vmem:[%s18909_s23 + $0x78] sm:$0xff]  }
  0x14   :  { %106 = vst.msk [vmem:[#allocation2 + $0x140] sm:$0xff] %vm18886_vm2, %v11475_v5  ;;  %108 = vst.msk [vmem:[#allocation2 + $0x150] sm:$0xff] %vm18886_vm2, %v11475_v5  ;;  %v11153_v21 = vld [vmem:[%s18909_s23 + $0x80] sm:$0xff]   ;;  %v11154_v22 = vld [vmem:[%s18909_s23 + $0x88] sm:$0xff]  }
  0x15   :  { %109 = vst.msk [vmem:[#allocation2 + $0x158] sm:$0xff] %vm18886_vm2, %v11475_v5  ;;  %111 = vst.msk [vmem:[#allocation2 + $0x168] sm:$0xff] %vm18886_vm2, %v11475_v5  ;;  %10936 = vmatpush3.bf16.msra.mxu0 %v11591_v4  ;;  %v11155_v23 = vld [vmem:[%s18909_s23 + $0x90] sm:$0xff]   ;;  %v11156_v24 = vld [vmem:[%s18909_s23 + $0x98] sm:$0xff]  }
  0x16   :  { %112 = vst.msk [vmem:[#allocation2 + $0x170] sm:$0xff] %vm18886_vm2, %v11475_v5  ;;  %114 = vst.msk [vmem:[#allocation2 + $0x180] sm:$0xff] %vm18886_vm2, %v11475_v5  ;;  %v11157_v25 = vld [vmem:[%s18909_s23 + $0xa0] sm:$0xff]   ;;  %v11158_v26 = vld [vmem:[%s18909_s23 + $0xa8] sm:$0xff]  }
  0x17   :  { %115 = vst.msk [vmem:[#allocation2 + $0x188] sm:$0xff] %vm18886_vm2, %v11475_v5  ;;  %117 = vst.msk [vmem:[#allocation2 + $0x198] sm:$0xff] %vm18886_vm2, %v11475_v5  ;;  %v11159_v27 = vld [vmem:[%s18909_s23 + $0xb0] sm:$0xff]   ;;  %v11160_v28 = vld [vmem:[%s18909_s23 + $0xb8] sm:$0xff]  }
  0x18   :  { %118 = vst.msk [vmem:[#allocation2 + $0x1a0] sm:$0xff] %vm18886_vm2, %v11475_v5  ;;  %120 = vst.msk [vmem:[#allocation2 + $0x1b0] sm:$0xff] %vm18886_vm2, %v11475_v5  ;;  %10938 = vmatmul.mubr.msk.bf16.vlgmr.msra.gmra.mxu0 %vm505_vm1, %v11138_v6  ;;  %v11161_v29 = vld [vmem:[%s18909_s23 + $0xc0] sm:$0xff]   ;;  %v11162_v30 = vld [vmem:[%s18909_s23 + $0xc8] sm:$0xff]  }
  0x19   :  { %121 = vst.msk [vmem:[#allocation2 + $0x1b8] sm:$0xff] %vm18886_vm2, %v11475_v5  ;;  %123 = vst.msk [vmem:[#allocation2 + $0x1c8] sm:$0xff] %vm18886_vm2, %v11475_v5  ;;  %10941 = vmatprep.mubr.msk.bf16.mxu0 %vm505_vm1, %v11139_v7  ;;  %v11163_v31 = vld [vmem:[%s18909_s23 + $0xd0] sm:$0xff]   ;;  %v11164_v32 = vld [vmem:[%s18909_s23 + $0xd8] sm:$0xff]  }
  0x1a   :  { %124 = vst.msk [vmem:[#allocation2 + $0x1d0] sm:$0xff] %vm18886_vm2, %v11475_v5  ;;  %126 = vst.msk [vmem:[#allocation2 + $0x1e0] sm:$0xff] %vm18886_vm2, %v11475_v5  ;;  %v11165_v33 = vld [vmem:[%s18909_s23 + $0xe0] sm:$0xff]   ;;  %v11166_v34 = vld [vmem:[%s18909_s23 + $0xe8] sm:$0xff]  }
  0x1b   :  { %127 = vst.msk [vmem:[#allocation2 + $0x1e8] sm:$0xff] %vm18886_vm2, %v11475_v5  ;;  %129 = vst.msk [vmem:[#allocation2 + $0x1f8] sm:$0xff] %vm18886_vm2, %v11475_v5  ;;  %v11167_v35 = vld [vmem:[%s18909_s23 + $0xf0] sm:$0xff]   ;;  %v11168_v36 = vld [vmem:[%s18909_s23 + $0xf8] sm:$0xff]  }
  0x1c   :  { %130 = vst.msk [vmem:[#allocation2 + $0x200] sm:$0xff] %vm18886_vm2, %v11475_v5  ;;  %132 = vst.msk [vmem:[#allocation2 + $0x210] sm:$0xff] %vm18886_vm2, %v11475_v5  ;;  %v12059_v39 = vld [vmem:[%s18910_s21] ss:$0 sm:$0xff] }
  0x1d   :  { %133 = vst.msk [vmem:[#allocation2 + $0x218] sm:$0xff] %vm18886_vm2, %v11475_v5  ;;  %135 = vst.msk [vmem:[#allocation2 + $0x228] sm:$0xff] %vm18886_vm2, %v11475_v5 }
  0x1e   :  { %136 = vst.msk [vmem:[#allocation2 + $0x230] sm:$0xff] %vm18886_vm2, %v11475_v5  ;;  %138 = vst.msk [vmem:[#allocation2 + $0x240] sm:$0xff] %vm18886_vm2, %v11475_v5 }
  0x1f   :  { %139 = vst.msk [vmem:[#allocation2 + $0x248] sm:$0xff] %vm18886_vm2, %v11475_v5  ;;  %141 = vst.msk [vmem:[#allocation2 + $0x258] sm:$0xff] %vm18886_vm2, %v11475_v5 }
  0x20   :  { %142 = vst.msk [vmem:[#allocation2 + $0x260] sm:$0xff] %vm18886_vm2, %v11475_v5  ;;  %144 = vst.msk [vmem:[#allocation2 + $0x270] sm:$0xff] %vm18886_vm2, %v11475_v5  ;;  %10942 = vmatmul.mubr.msk.bf16.gmra.mxu0 %vm505_vm1, %v11140_v8 }
  0x21   :  { %145 = vst.msk [vmem:[#allocation2 + $0x278] sm:$0xff] %vm18886_vm2, %v11475_v5  ;;  %147 = vst.msk [vmem:[#allocation2 + $0x288] sm:$0xff] %vm18886_vm2, %v11475_v5  ;;  %10945 = vmatprep.mubr.msk.bf16.mxu0 %vm505_vm1, %v11141_v9 }
  0x22   :  { %148 = vst.msk [vmem:[#allocation2 + $0x290] sm:$0xff] %vm18886_vm2, %v11475_v5  ;;  %150 = vst.msk [vmem:[#allocation2 + $0x2a0] sm:$0xff] %vm18886_vm2, %v11475_v5 }
  0x23   :  { %151 = vst.msk [vmem:[#allocation2 + $0x2a8] sm:$0xff] %vm18886_vm2, %v11475_v5  ;;  %153 = vst.msk [vmem:[#allocation2 + $0x2b8] sm:$0xff] %vm18886_vm2, %v11475_v5 }
  0x24   :  { %154 = vst.msk [vmem:[#allocation2 + $0x2c0] sm:$0xff] %vm18886_vm2, %v11475_v5  ;;  %156 = vst.msk [vmem:[#allocation2 + $0x2d0] sm:$0xff] %vm18886_vm2, %v11475_v5 }
  0x25   :  { %157 = vst.msk [vmem:[#allocation2 + $0x2d8] sm:$0xff] %vm18886_vm2, %v11475_v5  ;;  %159 = vst.msk [vmem:[#allocation2 + $0x2e8] sm:$0xff] %vm18886_vm2, %v11475_v5 }
  0x26   :  { %160 = vst.msk [vmem:[#allocation2 + $0x2f0] sm:$0xff] %vm18886_vm2, %v11475_v5  ;;  %162 = vst.msk [vmem:[#allocation2 + $0x300] sm:$0xff] %vm18886_vm2, %v11475_v5 }
  0x27   :  { %163 = vst.msk [vmem:[#allocation2 + $0x308] sm:$0xff] %vm18886_vm2, %v11475_v5  ;;  %165 = vst.msk [vmem:[#allocation2 + $0x318] sm:$0xff] %vm18886_vm2, %v11475_v5 }
  0x28   :  { %166 = vst.msk [vmem:[#allocation2 + $0x320] sm:$0xff] %vm18886_vm2, %v11475_v5  ;;  %168 = vst.msk [vmem:[#allocation2 + $0x330] sm:$0xff] %vm18886_vm2, %v11475_v5  ;;  %10946 = vmatmul.mubr.msk.bf16.gmra.mxu0 %vm505_vm1, %v11142_v10 }
  0x29   :  { %169 = vst.msk [vmem:[#allocation2 + $0x338] sm:$0xff] %vm18886_vm2, %v11475_v5  ;;  %171 = vst.msk [vmem:[#allocation2 + $0x348] sm:$0xff] %vm18886_vm2, %v11475_v5  ;;  %10949 = vmatprep.mubr.msk.bf16.mxu0 %vm505_vm1, %v11143_v11 }
  0x2a   :  { %172 = vst.msk [vmem:[#allocation2 + $0x350] sm:$0xff] %vm18886_vm2, %v11475_v5  ;;  %174 = vst.msk [vmem:[#allocation3] sm:$0xff] %vm18886_vm2, %v11475_v5 }
  0x2b   :  { %176 = vst.msk [vmem:[#allocation3 + $0x10] sm:$0xff] %vm18886_vm2, %v11475_v5  ;;  %178 = vst.msk [vmem:[#allocation3 + $0x20] sm:$0xff] %vm18886_vm2, %v11475_v5 }
  0x2c   :  { %180 = vst.msk [vmem:[#allocation3 + $0x30] sm:$0xff] %vm18886_vm2, %v11475_v5  ;;  %182 = vst.msk [vmem:[#allocation3 + $0x40] sm:$0xff] %vm18886_vm2, %v11475_v5 }
  0x2d   :  { %184 = vst.msk [vmem:[#allocation3 + $0x50] sm:$0xff] %vm18886_vm2, %v11475_v5  ;;  %186 = vst.msk [vmem:[#allocation3 + $0x60] sm:$0xff] %vm18886_vm2, %v11475_v5 }
  0x2e   :  { %188 = vst.msk [vmem:[#allocation3 + $0x70] sm:$0xff] %vm18886_vm2, %v11475_v5  ;;  %190 = vst.msk [vmem:[#allocation3 + $0x80] sm:$0xff] %vm18886_vm2, %v11475_v5 }
  0x2f   :  { %192 = vst.msk [vmem:[#allocation3 + $0x90] sm:$0xff] %vm18886_vm2, %v11475_v5  ;;  %194 = vst.msk [vmem:[#allocation3 + $0xa0] sm:$0xff] %vm18886_vm2, %v11475_v5 }
  0x30   :  { %196 = vst.msk [vmem:[#allocation3 + $0xb0] sm:$0xff] %vm18886_vm2, %v11475_v5  ;;  %198 = vst.msk [vmem:[#allocation3 + $0xc0] sm:$0xff] %vm18886_vm2, %v11475_v5  ;;  %10950 = vmatmul.mubr.msk.bf16.gmra.mxu0 %vm505_vm1, %v11144_v12 }
  0x31   :  { %200 = vst.msk [vmem:[#allocation3 + $0xd0] sm:$0xff] %vm18886_vm2, %v11475_v5  ;;  %202 = vst.msk [vmem:[#allocation3 + $0xe0] sm:$0xff] %vm18886_vm2, %v11475_v5  ;;  %10953 = vmatprep.mubr.msk.bf16.mxu0 %vm505_vm1, %v11145_v13 }
  0x32   :  { %204 = vst.msk [vmem:[#allocation3 + $0xf0] sm:$0xff] %vm18886_vm2, %v11475_v5  ;;  %206 = vst.msk [vmem:[#allocation3 + $0x100] sm:$0xff] %vm18886_vm2, %v11475_v5 }
  0x33   :  { %208 = vst.msk [vmem:[#allocation3 + $0x110] sm:$0xff] %vm18886_vm2, %v11475_v5  ;;  %210 = vst.msk [vmem:[#allocation3 + $0x120] sm:$0xff] %vm18886_vm2, %v11475_v5 }
  0x34   :  { %212 = vst.msk [vmem:[#allocation3 + $0x130] sm:$0xff] %vm18886_vm2, %v11475_v5  ;;  %214 = vst [vmem:[#allocation4] sm:$0xff] %v11475_v5 }
  0x35   :  { %215 = vst [vmem:[#allocation4 + $0x8] sm:$0x3] %v11475_v5  ;;  %216 = vst [vmem:[#allocation4 + $0x10] sm:$0xff] %v11475_v5 }
  0x36   :  { %217 = vst [vmem:[#allocation4 + $0x18] sm:$0x3] %v11475_v5  ;;  %218 = vst [vmem:[#allocation4 + $0x20] sm:$0xff] %v11475_v5 }
  0x37   :  { %219 = vst [vmem:[#allocation4 + $0x28] sm:$0x3] %v11475_v5  ;;  %220 = vst [vmem:[#allocation4 + $0x30] sm:$0xff] %v11475_v5 }
  0x38   :  { %221 = vst [vmem:[#allocation4 + $0x38] sm:$0x3] %v11475_v5  ;;  %222 = vst [vmem:[#allocation4 + $0x40] sm:$0xff] %v11475_v5  ;;  %10954 = vmatmul.mubr.msk.bf16.gmra.mxu0 %vm505_vm1, %v11146_v14 }
  0x39   :  { %223 = vst [vmem:[#allocation4 + $0x48] sm:$0x3] %v11475_v5  ;;  %224 = vst [vmem:[#allocation4 + $0x50] sm:$0xff] %v11475_v5  ;;  %10957 = vmatprep.mubr.msk.bf16.mxu0 %vm505_vm1, %v11147_v15 }
  0x3a   :  { %225 = vst [vmem:[#allocation4 + $0x58] sm:$0x3] %v11475_v5  ;;  %226 = vst [vmem:[#allocation4 + $0x60] sm:$0xff] %v11475_v5 }
  0x3b   :  { %227 = vst [vmem:[#allocation4 + $0x68] sm:$0x3] %v11475_v5  ;;  %228 = vst [vmem:[#allocation4 + $0x70] sm:$0xff] %v11475_v5 }
  0x3c   :  { %229 = vst [vmem:[#allocation4 + $0x78] sm:$0x3] %v11475_v5  ;;  %230 = vst [vmem:[#allocation4 + $0x80] sm:$0xff] %v11475_v5 }
  0x3d   :  { %231 = vst [vmem:[#allocation4 + $0x88] sm:$0x3] %v11475_v5  ;;  %232 = vst [vmem:[#allocation4 + $0x90] sm:$0xff] %v11475_v5 }
  0x3e   :  { %233 = vst [vmem:[#allocation4 + $0x98] sm:$0x3] %v11475_v5  ;;  %234 = vst [vmem:[#allocation4 + $0xa0] sm:$0xff] %v11475_v5 }
  0x3f   :  { %235 = vst [vmem:[#allocation4 + $0xa8] sm:$0x3] %v11475_v5  ;;  %236 = vst [vmem:[#allocation4 + $0xb0] sm:$0xff] %v11475_v5 }
  0x40   :  { %237 = vst [vmem:[#allocation4 + $0xb8] sm:$0x3] %v11475_v5  ;;  %238 = vst [vmem:[#allocation4 + $0xc0] sm:$0xff] %v11475_v5  ;;  %10958 = vmatmul.mubr.msk.bf16.gmra.mxu0 %vm505_vm1, %v11148_v16 }
  0x41   :  { %239 = vst [vmem:[#allocation4 + $0xc8] sm:$0x3] %v11475_v5  ;;  %240 = vst [vmem:[#allocation4 + $0xd0] sm:$0xff] %v11475_v5  ;;  %10961 = vmatprep.mubr.msk.bf16.mxu0 %vm505_vm1, %v11149_v17 }
  0x42   :  { %241 = vst [vmem:[#allocation4 + $0xd8] sm:$0x3] %v11475_v5  ;;  %242 = vst [vmem:[#allocation4 + $0xe0] sm:$0xff] %v11475_v5 }
  0x43   :  { %243 = vst [vmem:[#allocation4 + $0xe8] sm:$0x3] %v11475_v5  ;;  %244 = vst [vmem:[#allocation4 + $0xf0] sm:$0xff] %v11475_v5 }
  0x44   :  { %245 = vst [vmem:[#allocation4 + $0xf8] sm:$0x3] %v11475_v5  ;;  %246 = vst [vmem:[#allocation4 + $0x100] sm:$0xff] %v11475_v5 }
  0x45   :  { %247 = vst [vmem:[#allocation4 + $0x108] sm:$0x3] %v11475_v5  ;;  %248 = vst [vmem:[#allocation4 + $0x110] sm:$0xff] %v11475_v5 }
  0x46   :  { %249 = vst [vmem:[#allocation4 + $0x118] sm:$0x3] %v11475_v5  ;;  %250 = vst [vmem:[#allocation4 + $0x120] sm:$0xff] %v11475_v5 }
  0x47   :  { %251 = vst [vmem:[#allocation4 + $0x128] sm:$0x3] %v11475_v5  ;;  %252 = vst [vmem:[#allocation4 + $0x130] sm:$0xff] %v11475_v5 }
  0x48   :  { %253 = vst [vmem:[#allocation4 + $0x138] sm:$0x3] %v11475_v5  ;;  %10962 = vmatmul.mubr.msk.bf16.gmra.mxu0 %vm505_vm1, %v11150_v18  ;;  %74 = vst.msk [vmem:[#allocation2 + $0x40] sm:$0x3] %vm67_vm3, %v11475_v5 }
  0x49   :  { %10965 = vmatprep.mubr.msk.bf16.mxu0 %vm505_vm1, %v11151_v19  ;;  %68 = vst.msk [vmem:[#allocation2 + $0x10] sm:$0x3] %vm67_vm3, %v11475_v5  ;;  %71 = vst.msk [vmem:[#allocation2 + $0x28] sm:$0x3] %vm67_vm3, %v11475_v5 }
  0x4a   :  { %77 = vst.msk [vmem:[#allocation2 + $0x58] sm:$0x3] %vm67_vm3, %v11475_v5  ;;  %80 = vst.msk [vmem:[#allocation2 + $0x70] sm:$0x3] %vm67_vm3, %v11475_v5 }
  0x4b   :  { %83 = vst.msk [vmem:[#allocation2 + $0x88] sm:$0x3] %vm67_vm3, %v11475_v5  ;;  %86 = vst.msk [vmem:[#allocation2 + $0xa0] sm:$0x3] %vm67_vm3, %v11475_v5 }
  0x4c   :  { %89 = vst.msk [vmem:[#allocation2 + $0xb8] sm:$0x3] %vm67_vm3, %v11475_v5  ;;  %92 = vst.msk [vmem:[#allocation2 + $0xd0] sm:$0x3] %vm67_vm3, %v11475_v5 }
  0x4d   :  { %95 = vst.msk [vmem:[#allocation2 + $0xe8] sm:$0x3] %vm67_vm3, %v11475_v5  ;;  %98 = vst.msk [vmem:[#allocation2 + $0x100] sm:$0x3] %vm67_vm3, %v11475_v5 }
  0x4e   :  { %101 = vst.msk [vmem:[#allocation2 + $0x118] sm:$0x3] %vm67_vm3, %v11475_v5  ;;  %104 = vst.msk [vmem:[#allocation2 + $0x130] sm:$0x3] %vm67_vm3, %v11475_v5 }
  0x4f   :  { %107 = vst.msk [vmem:[#allocation2 + $0x148] sm:$0x3] %vm67_vm3, %v11475_v5  ;;  %110 = vst.msk [vmem:[#allocation2 + $0x160] sm:$0x3] %vm67_vm3, %v11475_v5 }
  0x50   :  { %10966 = vmatmul.mubr.msk.bf16.gmra.mxu0 %vm505_vm1, %v11152_v20  ;;  %113 = vst.msk [vmem:[#allocation2 + $0x178] sm:$0x3] %vm67_vm3, %v11475_v5  ;;  %116 = vst.msk [vmem:[#allocation2 + $0x190] sm:$0x3] %vm67_vm3, %v11475_v5 }
  0x51   :  { %10969 = vmatprep.mubr.msk.bf16.mxu0 %vm505_vm1, %v11153_v21  ;;  %119 = vst.msk [vmem:[#allocation2 + $0x1a8] sm:$0x3] %vm67_vm3, %v11475_v5  ;;  %122 = vst.msk [vmem:[#allocation2 + $0x1c0] sm:$0x3] %vm67_vm3, %v11475_v5 }
  0x52   :  { %125 = vst.msk [vmem:[#allocation2 + $0x1d8] sm:$0x3] %vm67_vm3, %v11475_v5  ;;  %128 = vst.msk [vmem:[#allocation2 + $0x1f0] sm:$0x3] %vm67_vm3, %v11475_v5 }
  0x53   :  { %131 = vst.msk [vmem:[#allocation2 + $0x208] sm:$0x3] %vm67_vm3, %v11475_v5  ;;  %134 = vst.msk [vmem:[#allocation2 + $0x220] sm:$0x3] %vm67_vm3, %v11475_v5 }
  0x54   :  { %137 = vst.msk [vmem:[#allocation2 + $0x238] sm:$0x3] %vm67_vm3, %v11475_v5  ;;  %140 = vst.msk [vmem:[#allocation2 + $0x250] sm:$0x3] %vm67_vm3, %v11475_v5 }
  0x55   :  { %143 = vst.msk [vmem:[#allocation2 + $0x268] sm:$0x3] %vm67_vm3, %v11475_v5  ;;  %146 = vst.msk [vmem:[#allocation2 + $0x280] sm:$0x3] %vm67_vm3, %v11475_v5 }
  0x56   :  { %149 = vst.msk [vmem:[#allocation2 + $0x298] sm:$0x3] %vm67_vm3, %v11475_v5  ;;  %152 = vst.msk [vmem:[#allocation2 + $0x2b0] sm:$0x3] %vm67_vm3, %v11475_v5 }
  0x57   :  { %155 = vst.msk [vmem:[#allocation2 + $0x2c8] sm:$0x3] %vm67_vm3, %v11475_v5  ;;  %158 = vst.msk [vmem:[#allocation2 + $0x2e0] sm:$0x3] %vm67_vm3, %v11475_v5 }
  0x58   :  { %10970 = vmatmul.mubr.msk.bf16.gmra.mxu0 %vm505_vm1, %v11154_v22  ;;  %161 = vst.msk [vmem:[#allocation2 + $0x2f8] sm:$0x3] %vm67_vm3, %v11475_v5  ;;  %164 = vst.msk [vmem:[#allocation2 + $0x310] sm:$0x3] %vm67_vm3, %v11475_v5 }
  0x59   :  { %10973 = vmatprep.mubr.msk.bf16.mxu0 %vm505_vm1, %v11155_v23  ;;  %167 = vst.msk [vmem:[#allocation2 + $0x328] sm:$0x3] %vm67_vm3, %v11475_v5  ;;  %170 = vst.msk [vmem:[#allocation2 + $0x340] sm:$0x3] %vm67_vm3, %v11475_v5 }
  0x5a   :  { %173 = vst.msk [vmem:[#allocation2 + $0x358] sm:$0x3] %vm67_vm3, %v11475_v5  ;;  %175 = vst.msk [vmem:[#allocation3 + $0x8] sm:$0x3] %vm67_vm3, %v11475_v5 }
  0x5b   :  { %177 = vst.msk [vmem:[#allocation3 + $0x18] sm:$0x3] %vm67_vm3, %v11475_v5  ;;  %179 = vst.msk [vmem:[#allocation3 + $0x28] sm:$0x3] %vm67_vm3, %v11475_v5 }
  0x5c   :  { %181 = vst.msk [vmem:[#allocation3 + $0x38] sm:$0x3] %vm67_vm3, %v11475_v5  ;;  %183 = vst.msk [vmem:[#allocation3 + $0x48] sm:$0x3] %vm67_vm3, %v11475_v5 }
  0x5d   :  { %185 = vst.msk [vmem:[#allocation3 + $0x58] sm:$0x3] %vm67_vm3, %v11475_v5  ;;  %187 = vst.msk [vmem:[#allocation3 + $0x68] sm:$0x3] %vm67_vm3, %v11475_v5 }
  0x5e   :  { %189 = vst.msk [vmem:[#allocation3 + $0x78] sm:$0x3] %vm67_vm3, %v11475_v5  ;;  %191 = vst.msk [vmem:[#allocation3 + $0x88] sm:$0x3] %vm67_vm3, %v11475_v5 }
  0x5f   :  { %193 = vst.msk [vmem:[#allocation3 + $0x98] sm:$0x3] %vm67_vm3, %v11475_v5  ;;  %195 = vst.msk [vmem:[#allocation3 + $0xa8] sm:$0x3] %vm67_vm3, %v11475_v5 }
  0x60   :  { %197 = vst.msk [vmem:[#allocation3 + $0xb8] sm:$0x3] %vm67_vm3, %v11475_v5  ;;  %199 = vst.msk [vmem:[#allocation3 + $0xc8] sm:$0x3] %vm67_vm3, %v11475_v5  ;;  %10974 = vmatmul.mubr.msk.bf16.gmra.mxu0 %vm505_vm1, %v11156_v24 }
  0x61   :  { %201 = vst.msk [vmem:[#allocation3 + $0xd8] sm:$0x3] %vm67_vm3, %v11475_v5  ;;  %203 = vst.msk [vmem:[#allocation3 + $0xe8] sm:$0x3] %vm67_vm3, %v11475_v5  ;;  %10977 = vmatprep.mubr.msk.bf16.mxu0 %vm505_vm1, %v11157_v25 }
  0x62   :  { %205 = vst.msk [vmem:[#allocation3 + $0xf8] sm:$0x3] %vm67_vm3, %v11475_v5  ;;  %207 = vst.msk [vmem:[#allocation3 + $0x108] sm:$0x3] %vm67_vm3, %v11475_v5 }
  0x63   :  { %209 = vst.msk [vmem:[#allocation3 + $0x118] sm:$0x3] %vm67_vm3, %v11475_v5  ;;  %211 = vst.msk [vmem:[#allocation3 + $0x128] sm:$0x3] %vm67_vm3, %v11475_v5 }
  0x64   :  { %213 = vst.msk [vmem:[#allocation3 + $0x138] sm:$0x3] %vm67_vm3, %v11475_v5 }
  0x68   :  { %10978 = vmatmul.mubr.msk.bf16.gmra.mxu0 %vm505_vm1, %v11158_v26 }
  0x69   :  { %10981 = vmatprep.mubr.msk.bf16.mxu0 %vm505_vm1, %v11159_v27 }
  0x70   :  { %10982 = vmatmul.mubr.msk.bf16.gmra.mxu0 %vm505_vm1, %v11160_v28 }
  0x71   :  { %10985 = vmatprep.mubr.msk.bf16.mxu0 %vm505_vm1, %v11161_v29 }
  0x78   :  { %10986 = vmatmul.mubr.msk.bf16.gmra.mxu0 %vm505_vm1, %v11162_v30 }
  0x79   :  { %10989 = vmatprep.mubr.msk.bf16.mxu0 %vm505_vm1, %v11163_v31 }
  0x80   :  { %10990 = vmatmul.mubr.msk.bf16.gmra.mxu0 %vm505_vm1, %v11164_v32 }
  0x81   :  { %10993 = vmatprep.mubr.msk.bf16.mxu0 %vm505_vm1, %v11165_v33 }
  0x88   :  { %10994 = vmatmul.mubr.msk.bf16.gmra.mxu0 %vm505_vm1, %v11166_v34 }
  0x89   :  { %10997 = vmatprep.mubr.msk.bf16.mxu0 %vm505_vm1, %v11167_v35 }
  0x90   :  { %10998 = vmatmul.mubr.msk.bf16.gmra.mxu0 %vm505_vm1, %v11168_v36 }
  0xd8   :  { %v10939_v37 = vpop.f32.mrf.mxu0 }
  0xd9   :  { %v12065_v43 = vadd.f32 %v10939_v37, %v12059_v39 }
  0xda   :  { %v640_v38 = vpop.f32.mrf.mxu0 }
  0xdb   :  { %v12062_v41 = vadd.f32 %v12059_v39, %v640_v38  ;;  %v900_v51 = vsel %vm18886_vm2, %v12065_v43, 0.0 }
  0xdc   :  { %v10940_v40 = vpop.f32.mrf.mxu0 }
  0xdd   :  { %v897_v46 = vsel %vm18886_vm2, %v12062_v41, 0.0  ;;  %v12073_v47 = vadd.f32 %v10940_v40, %v12059_v39 }
  0xde   :  { %v643_v42 = vpop.f32.mrf.mxu0 }
  0xdf   :  { %v12068_v44 = vadd.f32 %v12059_v39, %v643_v42  ;;  %v902_v55 = vsel %vm18886_vm2, %v12073_v47, 0.0 }
  0xe0   :  { %v10943_v45 = vpop.f32.mrf.mxu0 }
  0xe1   :  { %v898_v48 = vsel %vm18886_vm2, %v12068_v44, 0.0 }
  0xe2   :  { %v899_v49 = vadd.f32 %v898_v48, %v897_v46  ;;  %v656_v50 = vpop.f32.mrf.mxu0 }
  0xe3   :  { %v12080_v52 = vadd.f32 %v12059_v39, %v656_v50 }
  0xe4   :  { %v901_v53 = vadd.f32 %v900_v51, %v899_v49  ;;  %v10944_v54 = vpop.f32.mrf.mxu0 }
  0xe5   :  { %24 = vsyncpa [#allocation8], 0  ;;  %v12085_v58 = vadd.f32 %v10943_v45, %v12059_v39  ;;  %v904_v59 = vsel %vm18886_vm2, %v12080_v52, 0.0  ;;  %v12093_v63 = vadd.f32 %v10944_v54, %v12059_v39  ;;  %s18970_s22 = sld [smem:[#allocation60_spill]]  ;;  %s11477_s26 = smov 64  }
  0xe6   :  { %v903_v56 = vadd.f32 %v902_v55, %v901_v53  ;;  %v659_v57 = vpop.f32.mrf.mxu0 }
  0xe7   :  { %v12090_v60 = vadd.f32 %v12059_v39, %v659_v57  ;;  %v908_v3 = vsel %vm18886_vm2, %v12085_v58, 0.0  ;;  %v910_v7 = vsel %vm18886_vm2, %v12093_v63, 0.0 }
  0xe8   :  { %v905_v61 = vadd.f32 %v904_v59, %v903_v56  ;;  %v10947_v62 = vpop.f32.mrf.mxu0 }
  0xe9   :  { %v906_v0 = vsel %vm18886_vm2, %v12090_v60, 0.0  ;;  %v12105_v10 = vadd.f32 %v10947_v62, %v12059_v39 }
  0xea   :  { %v907_v1 = vadd.f32 %v906_v0, %v905_v61  ;;  %v672_v2 = vpop.f32.mrf.mxu0 }
  0xeb   :  { %v12100_v4 = vadd.f32 %v12059_v39, %v672_v2  ;;  %v916_v19 = vsel %vm18886_vm2, %v12105_v10, 0.0 }
  0xec   :  { %v909_v5 = vadd.f32 %v908_v3, %v907_v1  ;;  %v10948_v6 = vpop.f32.mrf.mxu0 }
  0xed   :  { %v912_v11 = vsel %vm18886_vm2, %v12100_v4, 0.0  ;;  %v12113_v15 = vadd.f32 %v10948_v6, %v12059_v39 }
  0xee   :  { %v911_v8 = vadd.f32 %v910_v7, %v909_v5  ;;  %v675_v9 = vpop.f32.mrf.mxu0 }
  0xef   :  { %v12110_v12 = vadd.f32 %v12059_v39, %v675_v9  ;;  %v918_v23 = vsel %vm18886_vm2, %v12113_v15, 0.0 }
  0xf0   :  { %v913_v13 = vadd.f32 %v912_v11, %v911_v8  ;;  %v10951_v14 = vpop.f32.mrf.mxu0 }
  0xf1   :  { %v914_v16 = vsel %vm18886_vm2, %v12110_v12, 0.0  ;;  %v12125_v26 = vadd.f32 %v10951_v14, %v12059_v39 }
  0xf2   :  { %v915_v17 = vadd.f32 %v914_v16, %v913_v13  ;;  %v688_v18 = vpop.f32.mrf.mxu0 }
  0xf3   :  { %v12120_v20 = vadd.f32 %v12059_v39, %v688_v18  ;;  %v924_v35 = vsel %vm18886_vm2, %v12125_v26, 0.0 }
  0xf4   :  { %v917_v21 = vadd.f32 %v916_v19, %v915_v17  ;;  %v10952_v22 = vpop.f32.mrf.mxu0 }
  0xf5   :  { %v920_v27 = vsel %vm18886_vm2, %v12120_v20, 0.0  ;;  %v12133_v31 = vadd.f32 %v10952_v22, %v12059_v39 }
  0xf6   :  { %v919_v24 = vadd.f32 %v918_v23, %v917_v21  ;;  %v691_v25 = vpop.f32.mrf.mxu0 }
  0xf7   :  { %v12130_v28 = vadd.f32 %v12059_v39, %v691_v25  ;;  %v926_v40 = vsel %vm18886_vm2, %v12133_v31, 0.0 }
  0xf8   :  { %v921_v29 = vadd.f32 %v920_v27, %v919_v24  ;;  %v10955_v30 = vpop.f32.mrf.mxu0 }
  0xf9   :  { %v922_v32 = vsel %vm18886_vm2, %v12130_v28, 0.0  ;;  %v12145_v46 = vadd.f32 %v10955_v30, %v12059_v39 }
  0xfa   :  { %v923_v33 = vadd.f32 %v922_v32, %v921_v29  ;;  %v704_v34 = vpop.f32.mrf.mxu0 }
  0xfb   :  { %v12140_v36 = vadd.f32 %v12059_v39, %v704_v34  ;;  %v932_v57 = vsel %vm18886_vm2, %v12145_v46, 0.0 }
  0xfc   :  { %v925_v37 = vadd.f32 %v924_v35, %v923_v33  ;;  %v10956_v38 = vpop.f32.mrf.mxu0 }
  0xfd   :  { %v928_v48 = vsel %vm18886_vm2, %v12140_v36, 0.0  ;;  %v12153_v53 = vadd.f32 %v10956_v38, %v12059_v39 }
  0xfe   :  { %v927_v42 = vadd.f32 %v926_v40, %v925_v37  ;;  %v707_v45 = vpop.f32.mrf.mxu0 }
  0xff   :  { %v12150_v49 = vadd.f32 %v12059_v39, %v707_v45  ;;  %v934_v0 = vsel %vm18886_vm2, %v12153_v53, 0.0 }
 0x100   :  { %v929_v50 = vadd.f32 %v928_v48, %v927_v42  ;;  %v10959_v51 = vpop.f32.mrf.mxu0 }
 0x101   :  { %v930_v54 = vsel %vm18886_vm2, %v12150_v49, 0.0  ;;  %v12165_v3 = vadd.f32 %v10959_v51, %v12059_v39 }
 0x102   :  { %v931_v55 = vadd.f32 %v930_v54, %v929_v50  ;;  %v720_v56 = vpop.f32.mrf.mxu0 }
 0x103   :  { %v12160_v59 = vadd.f32 %v12059_v39, %v720_v56  ;;  %v940_v16 = vsel %vm18886_vm2, %v12165_v3, 0.0 }
 0x104   :  { %v933_v61 = vadd.f32 %v932_v57, %v931_v55  ;;  %v10960_v62 = vpop.f32.mrf.mxu0 }
 0x105   :  { %v936_v5 = vsel %vm18886_vm2, %v12160_v59, 0.0  ;;  %v12173_v9 = vadd.f32 %v10960_v62, %v12059_v39 }
 0x106   :  { %v935_v1 = vadd.f32 %v934_v0, %v933_v61  ;;  %v723_v2 = vpop.f32.mrf.mxu0 }
 0x107   :  { %v12170_v6 = vadd.f32 %v12059_v39, %v723_v2  ;;  %v942_v21 = vsel %vm18886_vm2, %v12173_v9, 0.0 }
 0x108   :  { %v937_v7 = vadd.f32 %v936_v5, %v935_v1  ;;  %v10963_v8 = vpop.f32.mrf.mxu0 }
 0x109   :  { %v938_v11 = vsel %vm18886_vm2, %v12170_v6, 0.0  ;;  %v12185_v24 = vadd.f32 %v10963_v8, %v12059_v39 }
 0x10a   :  { %v939_v13 = vadd.f32 %v938_v11, %v937_v7  ;;  %v736_v14 = vpop.f32.mrf.mxu0 }
 0x10b   :  { %v12180_v17 = vadd.f32 %v12059_v39, %v736_v14  ;;  %v948_v37 = vsel %vm18886_vm2, %v12185_v24, 0.0 }
 0x10c   :  { %v941_v18 = vadd.f32 %v940_v16, %v939_v13  ;;  %v10964_v19 = vpop.f32.mrf.mxu0 }
 0x10d   :  { %v944_v25 = vsel %vm18886_vm2, %v12180_v17, 0.0  ;;  %v12193_v32 = vadd.f32 %v10964_v19, %v12059_v39 }
 0x10e   :  { %v943_v22 = vadd.f32 %v942_v21, %v941_v18  ;;  %v739_v23 = vpop.f32.mrf.mxu0 }
 0x10f   :  { %v12190_v27 = vadd.f32 %v12059_v39, %v739_v23  ;;  %v950_v45 = vsel %vm18886_vm2, %v12193_v32, 0.0 }
 0x110   :  { %v945_v29 = vadd.f32 %v944_v25, %v943_v22  ;;  %v10967_v30 = vpop.f32.mrf.mxu0 }
 0x111   :  { %v946_v33 = vsel %vm18886_vm2, %v12190_v27, 0.0  ;;  %v12205_v51 = vadd.f32 %v10967_v30, %v12059_v39 }
 0x112   :  { %v947_v34 = vadd.f32 %v946_v33, %v945_v29  ;;  %v752_v35 = vpop.f32.mrf.mxu0 }
 0x113   :  { %v12200_v38 = vadd.f32 %v12059_v39, %v752_v35  ;;  %18912 = vst [vmem:[#allocation11_spill] sm:$0xff] %v12205_v51  ;;  %v956_v2 = vsel %vm18886_vm2, %v12205_v51, 0.0 }
 0x114   :  { %v949_v40 = vadd.f32 %v948_v37, %v947_v34  ;;  %v10968_v42 = vpop.f32.mrf.mxu0 }
 0x115   :  { %18911 = vst [vmem:[#allocation10_spill] sm:$0xff] %v12200_v38  ;;  %v952_v54 = vsel %vm18886_vm2, %v12200_v38, 0.0  ;;  %v12213_v61 = vadd.f32 %v10968_v42, %v12059_v39 }
 0x116   :  { %v951_v48 = vadd.f32 %v950_v45, %v949_v40  ;;  %v755_v50 = vpop.f32.mrf.mxu0 }
 0x117   :  { %v12210_v55 = vadd.f32 %v12059_v39, %v755_v50  ;;  %18914 = vst [vmem:[#allocation13_spill] sm:$0xff] %v12213_v61  ;;  %v958_v11 = vsel %vm18886_vm2, %v12213_v61, 0.0 }
 0x118   :  { %v953_v56 = vadd.f32 %v952_v54, %v951_v48  ;;  %v10971_v57 = vpop.f32.mrf.mxu0 }
 0x119   :  { %18913 = vst [vmem:[#allocation12_spill] sm:$0xff] %v12210_v55  ;;  %v954_v62 = vsel %vm18886_vm2, %v12210_v55, 0.0  ;;  %v12225_v16 = vadd.f32 %v10971_v57, %v12059_v39 }
 0x11a   :  { %v955_v0 = vadd.f32 %v954_v62, %v953_v56  ;;  %v768_v1 = vpop.f32.mrf.mxu0 }
 0x11b   :  { %v12220_v5 = vadd.f32 %v12059_v39, %v768_v1  ;;  %18916 = vst [vmem:[#allocation15_spill] sm:$0xff] %v12225_v16  ;;  %v964_v33 = vsel %vm18886_vm2, %v12225_v16, 0.0 }
 0x11c   :  { %v957_v7 = vadd.f32 %v956_v2, %v955_v0  ;;  %v10972_v8 = vpop.f32.mrf.mxu0 }
 0x11d   :  { %18915 = vst [vmem:[#allocation14_spill] sm:$0xff] %v12220_v5  ;;  %v960_v18 = vsel %vm18886_vm2, %v12220_v5, 0.0  ;;  %v12233_v23 = vadd.f32 %v10972_v8, %v12059_v39 }
 0x11e   :  { %v959_v13 = vadd.f32 %v958_v11, %v957_v7  ;;  %v771_v14 = vpop.f32.mrf.mxu0 }
 0x11f   :  { %v12230_v19 = vadd.f32 %v12059_v39, %v771_v14  ;;  %18918 = vst [vmem:[#allocation17_spill] sm:$0xff] %v12233_v23  ;;  %v966_v40 = vsel %vm18886_vm2, %v12233_v23, 0.0 }
 0x120   :  { %v961_v21 = vadd.f32 %v960_v18, %v959_v13  ;;  %v10975_v22 = vpop.f32.mrf.mxu0 }
 0x121   :  { %18917 = vst [vmem:[#allocation16_spill] sm:$0xff] %v12230_v19  ;;  %v962_v25 = vsel %vm18886_vm2, %v12230_v19, 0.0  ;;  %v12245_v48 = vadd.f32 %v10975_v22, %v12059_v39 }
 0x122   :  { %v963_v29 = vadd.f32 %v962_v25, %v961_v21  ;;  %v784_v30 = vpop.f32.mrf.mxu0 }
 0x123   :  { %v12240_v34 = vadd.f32 %v12059_v39, %v784_v30  ;;  %18920 = vst [vmem:[#allocation19_spill] sm:$0xff] %v12245_v48  ;;  %v972_v7 = vsel %vm18886_vm2, %v12245_v48, 0.0 }
 0x124   :  { %v965_v35 = vadd.f32 %v964_v33, %v963_v29  ;;  %v10976_v37 = vpop.f32.mrf.mxu0 }
 0x125   :  { %18919 = vst [vmem:[#allocation18_spill] sm:$0xff] %v12240_v34  ;;  %v968_v50 = vsel %vm18886_vm2, %v12240_v34, 0.0  ;;  %v12253_v62 = vadd.f32 %v10976_v37, %v12059_v39 }
 0x126   :  { %v967_v42 = vadd.f32 %v966_v40, %v965_v35  ;;  %v787_v45 = vpop.f32.mrf.mxu0 }
 0x127   :  { %v12250_v54 = vadd.f32 %v12059_v39, %v787_v45  ;;  %18922 = vst [vmem:[#allocation21_spill] sm:$0xff] %v12253_v62  ;;  %v974_v14 = vsel %vm18886_vm2, %v12253_v62, 0.0 }
 0x128   :  { %v969_v56 = vadd.f32 %v968_v50, %v967_v42  ;;  %v10979_v57 = vpop.f32.mrf.mxu0 }
 0x129   :  { %18921 = vst [vmem:[#allocation20_spill] sm:$0xff] %v12250_v54  ;;  %v970_v0 = vsel %vm18886_vm2, %v12250_v54, 0.0  ;;  %v12265_v22 = vadd.f32 %v10979_v57, %v12059_v39 }
 0x12a   :  { %v971_v1 = vadd.f32 %v970_v0, %v969_v56  ;;  %v800_v2 = vpop.f32.mrf.mxu0 }
 0x12b   :  { %v12260_v8 = vadd.f32 %v12059_v39, %v800_v2  ;;  %18924 = vst [vmem:[#allocation23_spill] sm:$0xff] %v12265_v22  ;;  %v980_v45 = vsel %vm18886_vm2, %v12265_v22, 0.0 }
 0x12c   :  { %v973_v11 = vadd.f32 %v972_v7, %v971_v1  ;;  %v10980_v13 = vpop.f32.mrf.mxu0 }
 0x12d   :  { %18923 = vst [vmem:[#allocation22_spill] sm:$0xff] %v12260_v8  ;;  %v976_v25 = vsel %vm18886_vm2, %v12260_v8, 0.0  ;;  %v12273_v35 = vadd.f32 %v10980_v13, %v12059_v39 }
 0x12e   :  { %v975_v18 = vadd.f32 %v974_v14, %v973_v11  ;;  %v803_v21 = vpop.f32.mrf.mxu0 }
 0x12f   :  { %v12270_v29 = vadd.f32 %v12059_v39, %v803_v21  ;;  %18926 = vst [vmem:[#allocation25_spill] sm:$0xff] %v12273_v35  ;;  %v982_v0 = vsel %vm18886_vm2, %v12273_v35, 0.0 }
 0x130   :  { %v977_v30 = vadd.f32 %v976_v25, %v975_v18  ;;  %v10983_v33 = vpop.f32.mrf.mxu0 }
 0x131   :  { %18925 = vst [vmem:[#allocation24_spill] sm:$0xff] %v12270_v29  ;;  %v978_v37 = vsel %vm18886_vm2, %v12270_v29, 0.0  ;;  %v12285_v7 = vadd.f32 %v10983_v33, %v12059_v39 }
 0x132   :  { %v979_v40 = vadd.f32 %v978_v37, %v977_v30  ;;  %v816_v42 = vpop.f32.mrf.mxu0 }
 0x133   :  { %v12280_v50 = vadd.f32 %v12059_v39, %v816_v42  ;;  %18928 = vst [vmem:[#allocation27_spill] sm:$0xff] %v12285_v7  ;;  %v988_v33 = vsel %vm18886_vm2, %v12285_v7, 0.0 }
 0x134   :  { %v981_v56 = vadd.f32 %v980_v45, %v979_v40  ;;  %v10984_v57 = vpop.f32.mrf.mxu0 }
 0x135   :  { %18927 = vst [vmem:[#allocation26_spill] sm:$0xff] %v12280_v50  ;;  %v984_v11 = vsel %vm18886_vm2, %v12280_v50, 0.0  ;;  %v12293_v21 = vadd.f32 %v10984_v57, %v12059_v39 }
 0x136   :  { %v983_v1 = vadd.f32 %v982_v0, %v981_v56  ;;  %v819_v2 = vpop.f32.mrf.mxu0 }
 0x137   :  { %v12290_v13 = vadd.f32 %v12059_v39, %v819_v2  ;;  %18929 = vst [vmem:[#allocation28_spill] sm:$0xff] %v12293_v21  ;;  %v990_v56 = vsel %vm18886_vm2, %v12293_v21, 0.0 }
 0x138   :  { %v985_v14 = vadd.f32 %v984_v11, %v983_v1  ;;  %v10987_v18 = vpop.f32.mrf.mxu0 }
 0x139   :  { %v986_v25 = vsel %vm18886_vm2, %v12290_v13, 0.0  ;;  %v12305_v57 = vadd.f32 %v10987_v18, %v12059_v39 }
 0x13a   :  { %v987_v30 = vadd.f32 %v986_v25, %v985_v14  ;;  %v832_v37 = vpop.f32.mrf.mxu0 }
 0x13b   :  { %v12300_v40 = vadd.f32 %v12059_v39, %v832_v37  ;;  %v996_v18 = vsel %vm18886_vm2, %v12305_v57, 0.0 }
 0x13c   :  { %v989_v42 = vadd.f32 %v988_v33, %v987_v30  ;;  %v10988_v45 = vpop.f32.mrf.mxu0 }
 0x13d   :  { %v992_v2 = vsel %vm18886_vm2, %v12300_v40, 0.0  ;;  %v12313_v37 = vadd.f32 %v10988_v45, %v12059_v39 }
 0x13e   :  { %v991_v0 = vadd.f32 %v990_v56, %v989_v42  ;;  %v835_v1 = vpop.f32.mrf.mxu0 }
 0x13f   :  { %v12310_v11 = vadd.f32 %v12059_v39, %v835_v1  ;;  %v998_v1 = vsel %vm18886_vm2, %v12313_v37, 0.0 }
 0x140   :  { %v993_v14 = vadd.f32 %v992_v2, %v991_v0  ;;  %v10991_v25 = vpop.f32.mrf.mxu0 }
 0x141   :  { %v994_v30 = vsel %vm18886_vm2, %v12310_v11, 0.0  ;;  %v857_v45 = vadd.f32 %v10991_v25, %v12059_v39 }
 0x142   :  { %v995_v33 = vadd.f32 %v994_v30, %v993_v14  ;;  %v848_v42 = vpop.f32.mrf.mxu0 }
 0x143   :  { %v849_v56 = vadd.f32 %v12059_v39, %v848_v42 }
 0x144   :  { %v997_v21 = vadd.f32 %v996_v18, %v995_v33  ;;  %v10992_v7 = vpop.f32.mrf.mxu0  ;;  %v1004_v18 = vsel %vm18886_vm2, %v857_v45, 0.0 }
 0x145   :  { %v1000_v50 = vsel %vm18886_vm2, %v849_v56, 0.0  ;;  %v860_v22 = vadd.f32 %v10992_v7, %v12059_v39 }
 0x146   :  { %v999_v0 = vadd.f32 %v998_v1, %v997_v21  ;;  %v851_v2 = vpop.f32.mrf.mxu0 }
 0x147   :  { %v852_v35 = vadd.f32 %v12059_v39, %v851_v2  ;;  %v1006_v25 = vsel %vm18886_vm2, %v860_v22, 0.0 }
 0x148   :  { %v1001_v14 = vadd.f32 %v1000_v50, %v999_v0  ;;  %v10995_v30 = vpop.f32.mrf.mxu0 }
 0x149   :  { %v1002_v29 = vsel %vm18886_vm2, %v852_v35, 0.0  ;;  %v873_v2 = vadd.f32 %v10995_v30, %v12059_v39 }
 0x14a   :  { %v1003_v42 = vadd.f32 %v1002_v29, %v1001_v14  ;;  %v864_v33 = vpop.f32.mrf.mxu0 }
 0x14b   :  { %v865_v8 = vadd.f32 %v12059_v39, %v864_v33 }
 0x14c   :  { %v1005_v21 = vadd.f32 %v1004_v18, %v1003_v42  ;;  %v10996_v1 = vpop.f32.mrf.mxu0  ;;  %v1012_v42 = vsel %vm18886_vm2, %v873_v2, 0.0 }
 0x14d   :  { %v1008_v50 = vsel %vm18886_vm2, %v865_v8, 0.0  ;;  %v876_v29 = vadd.f32 %v10996_v1, %v12059_v39 }
 0x14e   :  { %v1007_v62 = vadd.f32 %v1006_v25, %v1005_v21  ;;  %v867_v48 = vpop.f32.mrf.mxu0 }
 0x14f   :  { %v868_v7 = vadd.f32 %v12059_v39, %v867_v48  ;;  %v1014_v30 = vsel %vm18886_vm2, %v876_v29, 0.0 }
 0x150   :  { %v1009_v0 = vadd.f32 %v1008_v50, %v1007_v62  ;;  %v10999_v54 = vpop.f32.mrf.mxu0 }
 0x151   :  { %v1010_v14 = vsel %vm18886_vm2, %v868_v7, 0.0  ;;  %v889_v48 = vadd.f32 %v10999_v54, %v12059_v39 }
 0x152   :  { %v1011_v34 = vadd.f32 %v1010_v14, %v1009_v0  ;;  %v880_v33 = vpop.f32.mrf.mxu0 }
 0x153   :  { %v881_v18 = vadd.f32 %v12059_v39, %v880_v33  ;;  %v1020_v33 = vsel %vm18886_vm2, %v889_v48, 0.0 }
 0x154   :  { %v1013_v21 = vadd.f32 %v1012_v42, %v1011_v34  ;;  %v11000_v25 = vpop.f32.mrf.mxu0 }
 0x155   :  { %v1016_v62 = vsel %vm18886_vm2, %v881_v18, 0.0  ;;  %v892_v0 = vadd.f32 %v11000_v25, %v12059_v39 }
 0x156   :  { %v1015_v23 = vadd.f32 %v1014_v30, %v1013_v21  ;;  %v883_v16 = vpop.f32.mrf.mxu0 }
 0x157   :  { %v884_v1 = vadd.f32 %v12059_v39, %v883_v16  ;;  %v1022_v42 = vsel %vm18886_vm2, %v892_v0, 0.0 }
 0x158   :  { %v1017_v50 = vadd.f32 %v1016_v62, %v1015_v23 }
 0x159   :  { %v1018_v14 = vsel %vm18886_vm2, %v884_v1, 0.0 }
 0x15a   :  { %v1019_v19 = vadd.f32 %v1018_v14, %v1017_v50 }
 0x15c   :  { %v1021_v34 = vadd.f32 %v1020_v33, %v1019_v19 }
 0x15e   :  { %v1023_v5 = vadd.f32 %v1022_v42, %v1021_v34 }
 0x160   :  { %v1024_v21 = vrot.slane %v1023_v5, 4 }
 0x162   :  { %v1025_v30 = vadd.f32 %v1024_v21, %v1023_v5 }
 0x164   :  { %v1026_v61 = vrot.slane %v1025_v30, 2 }
 0x166   :  { %v1027_v54 = vadd.f32 %v1026_v61, %v1025_v30 }
 0x168   :  { %v1028_v51 = vrot.slane %v1027_v54, 1 }
 0x16a   :  { %v1029_v55 = vadd.f32 %v1028_v51, %v1027_v54 }
 0x16c   :  { %v12345_v38 = vmul.f32 0.001953125, %v1029_v55 }
 0x16e   :  { %v12349_v39 = vsub.f32 %v12290_v13, %v12345_v38  ;;  %v12353_v16 = vsub.f32 %v12300_v40, %v12345_v38  ;;  %v12357_v19 = vsub.f32 %v12310_v11, %v12345_v38  ;;  %v12361_v5 = vsub.f32 %v12305_v57, %v12345_v38 }
 0x16f   :  { %v12365_v51 = vsub.f32 %v12313_v37, %v12345_v38  ;;  %v12368_v55 = vsub.f32 %v849_v56, %v12345_v38  ;;  %v12371_v61 = vsub.f32 %v852_v35, %v12345_v38  ;;  %v12374_v23 = vsub.f32 %v857_v45, %v12345_v38 }
 0x170   :  { %v12377_v13 = vsub.f32 %v860_v22, %v12345_v38  ;;  %v12380_v40 = vsub.f32 %v865_v8, %v12345_v38  ;;  %v12383_v57 = vsub.f32 %v868_v7, %v12345_v38  ;;  %v12386_v11 = vsub.f32 %v873_v2, %v12345_v38 }
 0x171   :  { %v12389_v37 = vsub.f32 %v876_v29, %v12345_v38  ;;  %v12392_v35 = vsub.f32 %v881_v18, %v12345_v38  ;;  %v12395_v56 = vsub.f32 %v884_v1, %v12345_v38  ;;  %v12398_v22 = vsub.f32 %v889_v48, %v12345_v38 }
 0x172   :  { %v12401_v8 = vsub.f32 %v892_v0, %v12345_v38  ;;  %v12405_v45 = vsub.f32 %v12062_v41, %v12345_v38  ;;  %v12409_v2 = vsub.f32 %v12068_v44, %v12345_v38  ;;  %v12413_v7 = vsub.f32 %v12065_v43, %v12345_v38 }
 0x173   :  { %18930 = vst [vmem:[#allocation29_spill] sm:$0xff] %v12389_v37  ;;  %18931 = vst [vmem:[#allocation30_spill] sm:$0xff] %v12392_v35  ;;  %v12417_v29 = vsub.f32 %v12073_v47, %v12345_v38  ;;  %v12425_v41 = vsub.f32 %v12080_v52, %v12345_v38  ;;  %v12431_v43 = vsub.f32 %v12090_v60, %v12345_v38 }
 0x174   :  { %18932 = vst [vmem:[#allocation31_spill] sm:$0xff] %v12398_v22  ;;  %18933 = vst [vmem:[#allocation32_spill] sm:$0xff] %v12401_v8  ;;  %v1095_v18 = vmul.f32 %v12405_v45, %v12405_v45  ;;  %v1096_v25 = vmul.f32 %v12409_v2, %v12409_v2  ;;  %v1097_v44 = vmul.f32 %v12413_v7, %v12413_v7 }
 0x175   :  { %18934 = vst [vmem:[#allocation33_spill] sm:$0xff] %v12425_v41  ;;  %18935 = vst [vmem:[#allocation34_spill] sm:$0xff] %v12431_v43  ;;  %v1098_v47 = vmul.f32 %v12417_v29, %v12417_v29  ;;  %v12439_v50 = vsub.f32 %v12085_v58, %v12345_v38  ;;  %v1099_v52 = vmul.f32 %v12425_v41, %v12425_v41 }
 0x176   :  { %v1159_v48 = vsel %vm18886_vm2, %v1095_v18, 0.0  ;;  %v1160_v62 = vsel %vm18886_vm2, %v1096_v25, 0.0  ;;  %v1162_v0 = vsel %vm18886_vm2, %v1097_v44, 0.0  ;;  %v12446_v60 = vsub.f32 %v12093_v63, %v12345_v38 }
 0x177   :  { %v1161_v1 = vadd.f32 %v1160_v62, %v1159_v48  ;;  %18936 = vst [vmem:[#allocation35_spill] sm:$0xff] %v12439_v50  ;;  %v1100_v33 = vmul.f32 %v12431_v43, %v12431_v43  ;;  %v1164_v34 = vsel %vm18886_vm2, %v1098_v47, 0.0  ;;  %v12453_v58 = vsub.f32 %v12100_v4, %v12345_v38 }
 0x178   :  { %18937 = vst [vmem:[#allocation36_spill] sm:$0xff] %v12446_v60  ;;  %v1101_v21 = vmul.f32 %v12439_v50, %v12439_v50  ;;  %v1166_v30 = vsel %vm18886_vm2, %v1099_v52, 0.0  ;;  %v12460_v63 = vsub.f32 %v12110_v12, %v12345_v38  ;;  %v1102_v18 = vmul.f32 %v12446_v60, %v12446_v60  ;;  %v18969_v60 = vld [vmem:[#allocation28_spill] sm:$0xff] }
 0x179   :  { %v1163_v14 = vadd.f32 %v1162_v0, %v1161_v1  ;;  %18938 = vst [vmem:[#allocation37_spill] sm:$0xff] %v12453_v58  ;;  %v1168_v25 = vsel %vm18886_vm2, %v1100_v33, 0.0  ;;  %v12467_v4 = vsub.f32 %v12105_v10, %v12345_v38  ;;  %v1103_v47 = vmul.f32 %v12453_v58, %v12453_v58  ;;  %v18968_v58 = vld [vmem:[#allocation27_spill] sm:$0xff] }
 0x17a   :  { %18939 = vst [vmem:[#allocation38_spill] sm:$0xff] %v12460_v63  ;;  %v1170_v48 = vsel %vm18886_vm2, %v1101_v21, 0.0  ;;  %v12474_v12 = vsub.f32 %v12113_v15, %v12345_v38  ;;  %v1104_v1 = vmul.f32 %v12460_v63, %v12460_v63  ;;  %v1172_v52 = vsel %vm18886_vm2, %v1102_v18, 0.0 }
 0x17b   :  { %v1165_v42 = vadd.f32 %v1164_v34, %v1163_v14  ;;  %18940 = vst [vmem:[#allocation39_spill] sm:$0xff] %v12467_v4  ;;  %v12481_v10 = vsub.f32 %v12120_v20, %v12345_v38  ;;  %v1105_v14 = vmul.f32 %v12467_v4, %v12467_v4  ;;  %v1174_v33 = vsel %vm18886_vm2, %v1103_v47, 0.0 }
 0x17c   :  { %18941 = vst [vmem:[#allocation40_spill] sm:$0xff] %v12474_v12  ;;  %v12488_v15 = vsub.f32 %v12130_v28, %v12345_v38  ;;  %v1176_v21 = vsel %vm18886_vm2, %v1104_v1, 0.0  ;;  %v12495_v20 = vsub.f32 %v12125_v26, %v12345_v38  ;;  %v12502_v28 = vsub.f32 %v12133_v31, %v12345_v38 }
 0x17d   :  { %v1167_v54 = vadd.f32 %v1166_v30, %v1165_v42  ;;  %18942 = vst [vmem:[#allocation41_spill] sm:$0xff] %v12481_v10  ;;  %v1106_v42 = vmul.f32 %v12474_v12, %v12474_v12  ;;  %v1178_v18 = vsel %vm18886_vm2, %v1105_v14, 0.0  ;;  %v12509_v26 = vsub.f32 %v12140_v36, %v12345_v38 }
 0x17e   :  { %18943 = vst [vmem:[#allocation42_spill] sm:$0xff] %v12488_v15  ;;  %18944 = vst [vmem:[#allocation43_spill] sm:$0xff] %v12495_v20  ;;  %v12516_v31 = vsub.f32 %v12150_v49, %v12345_v38  ;;  %v12523_v36 = vsub.f32 %v12145_v46, %v12345_v38  ;;  %v12530_v49 = vsub.f32 %v12153_v53, %v12345_v38 }
 0x17f   :  { %v1169_v44 = vadd.f32 %v1168_v25, %v1167_v54  ;;  %v1107_v54 = vmul.f32 %v12481_v10, %v12481_v10  ;;  %18945 = vst [vmem:[#allocation44_spill] sm:$0xff] %v12502_v28  ;;  %v1180_v47 = vsel %vm18886_vm2, %v1106_v42, 0.0  ;;  %18946 = vst [vmem:[#allocation45_spill] sm:$0xff] %v12509_v26  ;;  %v12537_v46 = vsub.f32 %v12160_v59, %v12345_v38 }
 0x180   :  { %18947 = vst [vmem:[#allocation46_spill] sm:$0xff] %v12516_v31  ;;  %18948 = vst [vmem:[#allocation47_spill] sm:$0xff] %v12523_v36  ;;  %v12544_v53 = vsub.f32 %v12170_v6, %v12345_v38  ;;  %v12551_v59 = vsub.f32 %v12165_v3, %v12345_v38  ;;  %v12558_v6 = vsub.f32 %v12173_v9, %v12345_v38 }
 0x181   :  { %v1171_v62 = vadd.f32 %v1170_v48, %v1169_v44  ;;  %v1108_v44 = vmul.f32 %v12488_v15, %v12488_v15  ;;  %v1182_v1 = vsel %vm18886_vm2, %v1107_v54, 0.0  ;;  %18949 = vst [vmem:[#allocation48_spill] sm:$0xff] %v12530_v49  ;;  %18950 = vst [vmem:[#allocation49_spill] sm:$0xff] %v12537_v46  ;;  %v12565_v3 = vsub.f32 %v12180_v17, %v12345_v38 }
 0x182   :  { %v12572_v9 = vsub.f32 %v12190_v27, %v12345_v38  ;;  %v12579_v17 = vsub.f32 %v12185_v24, %v12345_v38  ;;  %v12586_v27 = vsub.f32 %v12193_v32, %v12345_v38 }
 0x183   :  { %v1173_v0 = vadd.f32 %v1172_v52, %v1171_v62  ;;  %v1109_v62 = vmul.f32 %v12495_v20, %v12495_v20  ;;  %v1184_v14 = vsel %vm18886_vm2, %v1108_v44, 0.0 }
 0x185   :  { %v1175_v34 = vadd.f32 %v1174_v33, %v1173_v0  ;;  %v1110_v0 = vmul.f32 %v12502_v28, %v12502_v28  ;;  %v1186_v42 = vsel %vm18886_vm2, %v1109_v62, 0.0 }
 0x187   :  { %v1177_v30 = vadd.f32 %v1176_v21, %v1175_v34  ;;  %v1111_v34 = vmul.f32 %v12509_v26, %v12509_v26  ;;  %v1188_v54 = vsel %vm18886_vm2, %v1110_v0, 0.0 }
 0x189   :  { %v1179_v25 = vadd.f32 %v1178_v18, %v1177_v30  ;;  %v1112_v30 = vmul.f32 %v12516_v31, %v12516_v31  ;;  %v1190_v44 = vsel %vm18886_vm2, %v1111_v34, 0.0 }
 0x18b   :  { %v1181_v48 = vadd.f32 %v1180_v47, %v1179_v25  ;;  %v1113_v25 = vmul.f32 %v12523_v36, %v12523_v36  ;;  %v1192_v62 = vsel %vm18886_vm2, %v1112_v30, 0.0 }
 0x18d   :  { %v1183_v52 = vadd.f32 %v1182_v1, %v1181_v48  ;;  %v1114_v48 = vmul.f32 %v12530_v49, %v12530_v49  ;;  %v1194_v0 = vsel %vm18886_vm2, %v1113_v25, 0.0 }
 0x18f   :  { %v1185_v33 = vadd.f32 %v1184_v14, %v1183_v52  ;;  %v1115_v52 = vmul.f32 %v12537_v46, %v12537_v46  ;;  %v1196_v34 = vsel %vm18886_vm2, %v1114_v48, 0.0 }
 0x191   :  { %v1187_v21 = vadd.f32 %v1186_v42, %v1185_v33  ;;  %v1116_v33 = vmul.f32 %v12544_v53, %v12544_v53  ;;  %v1198_v30 = vsel %vm18886_vm2, %v1115_v52, 0.0 }
 0x193   :  { %v1189_v18 = vadd.f32 %v1188_v54, %v1187_v21  ;;  %v1117_v21 = vmul.f32 %v12551_v59, %v12551_v59  ;;  %v1200_v25 = vsel %vm18886_vm2, %v1116_v33, 0.0  ;;  %v1121_v33 = vmul.f32 %v12579_v17, %v12579_v17 }
 0x195   :  { %v1191_v47 = vadd.f32 %v1190_v44, %v1189_v18  ;;  %v1118_v18 = vmul.f32 %v12558_v6, %v12558_v6  ;;  %v1202_v48 = vsel %vm18886_vm2, %v1117_v21, 0.0  ;;  %v18952_v21 = vld [vmem:[#allocation12_spill] sm:$0xff] }
 0x196   :  { %v12600_v32 = vsub.f32 %v18952_v21, %v12345_v38 }
 0x197   :  { %v1193_v1 = vadd.f32 %v1192_v62, %v1191_v47  ;;  %v1119_v47 = vmul.f32 %v12565_v3, %v12565_v3  ;;  %v1204_v52 = vsel %vm18886_vm2, %v1118_v18, 0.0 }
 0x199   :  { %v1195_v14 = vadd.f32 %v1194_v0, %v1193_v1  ;;  %v1120_v1 = vmul.f32 %v12572_v9, %v12572_v9 }
 0x19b   :  { %v1197_v42 = vadd.f32 %v1196_v34, %v1195_v14  ;;  %v18951_v14 = vld [vmem:[#allocation10_spill] sm:$0xff]  ;;  %v1206_v34 = vsel %vm18886_vm2, %v1119_v47, 0.0  ;;  %v1210_v47 = vsel %vm18886_vm2, %v1121_v33, 0.0 }
 0x19c   :  { %v12593_v24 = vsub.f32 %v18951_v14, %v12345_v38  ;;  %v1124_v14 = vmul.f32 %v12600_v32, %v12600_v32 }
 0x19d   :  { %v1199_v54 = vadd.f32 %v1198_v30, %v1197_v42  ;;  %v1122_v30 = vmul.f32 %v12586_v27, %v12586_v27 }
 0x19f   :  { %v1201_v44 = vadd.f32 %v1200_v25, %v1199_v54  ;;  %v1208_v54 = vsel %vm18886_vm2, %v1120_v1, 0.0  ;;  %v18953_v25 = vld [vmem:[#allocation11_spill] sm:$0xff]  ;;  %v1212_v1 = vsel %vm18886_vm2, %v1122_v30, 0.0  ;;  %v1216_v30 = vsel %vm18886_vm2, %v1124_v14, 0.0 }
 0x1a1   :  { %v1203_v62 = vadd.f32 %v1202_v48, %v1201_v44  ;;  %v12607_v44 = vsub.f32 %v18953_v25, %v12345_v38  ;;  %v1123_v48 = vmul.f32 %v12593_v24, %v12593_v24  ;;  %v18956_v25 = vld [vmem:[#allocation16_spill] sm:$0xff] }
 0x1a3   :  { %v1205_v0 = vadd.f32 %v1204_v52, %v1203_v62  ;;  %v18954_v52 = vld [vmem:[#allocation13_spill] sm:$0xff]  ;;  %v1214_v33 = vsel %vm18886_vm2, %v1123_v48, 0.0 }
 0x1a5   :  { %v1207_v42 = vadd.f32 %v1206_v34, %v1205_v0  ;;  %v12614_v0 = vsub.f32 %v18954_v52, %v12345_v38 }
 0x1a7   :  { %v1209_v18 = vadd.f32 %v1208_v54, %v1207_v42  ;;  %v18955_v42 = vld [vmem:[#allocation14_spill] sm:$0xff]  ;;  %v1125_v54 = vmul.f32 %v12607_v44, %v12607_v44  ;;  %v1126_v52 = vmul.f32 %v12614_v0, %v12614_v0 }
 0x1a8   :  { %v12621_v21 = vsub.f32 %v18955_v42, %v12345_v38 }
 0x1a9   :  { %v1211_v62 = vadd.f32 %v1210_v47, %v1209_v18  ;;  %v12628_v47 = vsub.f32 %v18956_v25, %v12345_v38  ;;  %v1218_v48 = vsel %vm18886_vm2, %v1125_v54, 0.0  ;;  %v1220_v14 = vsel %vm18886_vm2, %v1126_v52, 0.0 }
 0x1aa   :  { %v1127_v46 = vmul.f32 %v12621_v21, %v12621_v21 }
 0x1ab   :  { %v1213_v34 = vadd.f32 %v1212_v1, %v1211_v62  ;;  %v18957_v1 = vld [vmem:[#allocation15_spill] sm:$0xff]  ;;  %v1128_v49 = vmul.f32 %v12628_v47, %v12628_v47 }
 0x1ac   :  { %v12635_v42 = vsub.f32 %v18957_v1, %v12345_v38  ;;  %v1222_v54 = vsel %vm18886_vm2, %v1127_v46, 0.0 }
 0x1ad   :  { %v1215_v18 = vadd.f32 %v1214_v33, %v1213_v34  ;;  %v18958_v33 = vld [vmem:[#allocation17_spill] sm:$0xff]  ;;  %v1224_v52 = vsel %vm18886_vm2, %v1128_v49, 0.0 }
 0x1ae   :  { %v12642_v25 = vsub.f32 %v18958_v33, %v12345_v38  ;;  %v1129_v36 = vmul.f32 %v12635_v42, %v12635_v42 }
 0x1af   :  { %v1217_v62 = vadd.f32 %v1216_v30, %v1215_v18  ;;  %v18959_v30 = vld [vmem:[#allocation18_spill] sm:$0xff] }
 0x1b0   :  { %v12649_v1 = vsub.f32 %v18959_v30, %v12345_v38  ;;  %v1130_v31 = vmul.f32 %v12642_v25, %v12642_v25  ;;  %v1226_v46 = vsel %vm18886_vm2, %v1129_v36, 0.0 }
 0x1b1   :  { %v1219_v34 = vadd.f32 %v1218_v48, %v1217_v62  ;;  %v18960_v48 = vld [vmem:[#allocation20_spill] sm:$0xff] }
 0x1b2   :  { %v12656_v33 = vsub.f32 %v18960_v48, %v12345_v38  ;;  %v1131_v26 = vmul.f32 %v12649_v1, %v12649_v1  ;;  %v1228_v49 = vsel %vm18886_vm2, %v1130_v31, 0.0 }
 0x1b3   :  { %v1221_v18 = vadd.f32 %v1220_v14, %v1219_v34  ;;  %v18961_v14 = vld [vmem:[#allocation19_spill] sm:$0xff] }
 0x1b4   :  { %v12663_v30 = vsub.f32 %v18961_v14, %v12345_v38  ;;  %v1132_v28 = vmul.f32 %v12656_v33, %v12656_v33  ;;  %v1230_v36 = vsel %vm18886_vm2, %v1131_v26, 0.0 }
 0x1b5   :  { %v1223_v62 = vadd.f32 %v1222_v54, %v1221_v18  ;;  %v18962_v54 = vld [vmem:[#allocation21_spill] sm:$0xff] }
 0x1b6   :  { %v12670_v48 = vsub.f32 %v18962_v54, %v12345_v38  ;;  %v1133_v20 = vmul.f32 %v12663_v30, %v12663_v30  ;;  %v1232_v31 = vsel %vm18886_vm2, %v1132_v28, 0.0 }
 0x1b7   :  { %v1225_v34 = vadd.f32 %v1224_v52, %v1223_v62  ;;  %v18963_v52 = vld [vmem:[#allocation22_spill] sm:$0xff] }
 0x1b8   :  { %v12677_v14 = vsub.f32 %v18963_v52, %v12345_v38  ;;  %v1134_v15 = vmul.f32 %v12670_v48, %v12670_v48  ;;  %v1234_v26 = vsel %vm18886_vm2, %v1133_v20, 0.0 }
 0x1b9   :  { %v1227_v18 = vadd.f32 %v1226_v46, %v1225_v34  ;;  %v18964_v46 = vld [vmem:[#allocation24_spill] sm:$0xff] }
 0x1ba   :  { %v12684_v54 = vsub.f32 %v18964_v46, %v12345_v38  ;;  %v1135_v10 = vmul.f32 %v12677_v14, %v12677_v14  ;;  %v1236_v28 = vsel %vm18886_vm2, %v1134_v15, 0.0  ;;  %v12715_v15 = vsub.f32 %v18968_v58, %v12345_v38 }
 0x1bb   :  { %v1229_v62 = vadd.f32 %v1228_v49, %v1227_v18  ;;  %v18965_v49 = vld [vmem:[#allocation23_spill] sm:$0xff] }
 0x1bc   :  { %v12691_v52 = vsub.f32 %v18965_v49, %v12345_v38  ;;  %v1136_v12 = vmul.f32 %v12684_v54, %v12684_v54  ;;  %v1238_v20 = vsel %vm18886_vm2, %v1135_v10, 0.0  ;;  %v12722_v10 = vsub.f32 %v18969_v60, %v12345_v38 }
 0x1bd   :  { %v1231_v34 = vadd.f32 %v1230_v36, %v1229_v62  ;;  %v18966_v36 = vld [vmem:[#allocation25_spill] sm:$0xff]  ;;  %v1141_v58 = vmul.f32 %v12715_v15, %v12715_v15 }
 0x1be   :  { %v12698_v46 = vsub.f32 %v18966_v36, %v12345_v38  ;;  %v1137_v4 = vmul.f32 %v12691_v52, %v12691_v52  ;;  %v1240_v36 = vsel %vm18886_vm2, %v1136_v12, 0.0 }
 0x1bf   :  { %v1233_v18 = vadd.f32 %v1232_v31, %v1231_v34  ;;  %v18967_v31 = vld [vmem:[#allocation26_spill] sm:$0xff]  ;;  %v1250_v60 = vsel %vm18886_vm2, %v1141_v58, 0.0  ;;  %v1147_v58 = vmul.f32 %v12368_v55, %v12368_v55 }
 0x1c0   :  { %v12705_v49 = vsub.f32 %v18967_v31, %v12345_v38  ;;  %v1143_v38 = vmul.f32 %v12353_v16, %v12353_v16 }
 0x1c1   :  { %v1235_v62 = vadd.f32 %v1234_v26, %v1233_v18  ;;  %v1138_v26 = vmul.f32 %v12698_v46, %v12698_v46 }
 0x1c3   :  { %v1237_v34 = vadd.f32 %v1236_v28, %v1235_v62  ;;  %v1139_v62 = vmul.f32 %v12705_v49, %v12705_v49  ;;  %v1242_v28 = vsel %vm18886_vm2, %v1137_v4, 0.0  ;;  %v1244_v12 = vsel %vm18886_vm2, %v1138_v26, 0.0 }
 0x1c4   :  { %v1142_v4 = vmul.f32 %v12722_v10, %v12722_v10  ;;  %v1144_v26 = vmul.f32 %v12357_v19, %v12357_v19 }
 0x1c5   :  { %v1239_v18 = vadd.f32 %v1238_v20, %v1237_v34  ;;  %v1140_v34 = vmul.f32 %v12349_v39, %v12349_v39 }
 0x1c7   :  { %v1241_v63 = vadd.f32 %v1240_v36, %v1239_v18  ;;  %v1246_v18 = vsel %vm18886_vm2, %v1139_v62, 0.0  ;;  %v1145_v62 = vmul.f32 %v12361_v5, %v12361_v5 }
 0x1c9   :  { %v1243_v31 = vadd.f32 %v1242_v28, %v1241_v63  ;;  %v1248_v63 = vsel %vm18886_vm2, %v1140_v34, 0.0  ;;  %v1146_v34 = vmul.f32 %v12365_v51, %v12365_v51 }
 0x1cb   :  { %v1245_v20 = vadd.f32 %v1244_v12, %v1243_v31  ;;  %v1252_v31 = vsel %vm18886_vm2, %v1142_v4, 0.0  ;;  %v1260_v4 = vsel %vm18886_vm2, %v1146_v34, 0.0  ;;  %v1152_v34 = vmul.f32 %v12383_v57, %v12383_v57 }
 0x1cd   :  { %v1247_v36 = vadd.f32 %v1246_v18, %v1245_v20  ;;  %v1254_v20 = vsel %vm18886_vm2, %v1143_v38, 0.0  ;;  %v1149_v38 = vmul.f32 %v12374_v23, %v12374_v23 }
 0x1cf   :  { %v1249_v28 = vadd.f32 %v1248_v63, %v1247_v36  ;;  %v1256_v36 = vsel %vm18886_vm2, %v1144_v26, 0.0  ;;  %v1150_v26 = vmul.f32 %v12377_v13, %v12377_v13 }
 0x1d1   :  { %v1251_v50 = vadd.f32 %v1250_v60, %v1249_v28  ;;  %v1258_v28 = vsel %vm18886_vm2, %v1145_v62, 0.0  ;;  %v1151_v62 = vmul.f32 %v12380_v40, %v12380_v40 }
 0x1d3   :  { %v1253_v12 = vadd.f32 %v1252_v31, %v1251_v50  ;;  %v1148_v50 = vmul.f32 %v12371_v61, %v12371_v61 }
 0x1d5   :  { %v1255_v18 = vadd.f32 %v1254_v20, %v1253_v12  ;;  %v1262_v12 = vsel %vm18886_vm2, %v1147_v58, 0.0  ;;  %v1153_v58 = vmul.f32 %v12386_v11, %v12386_v11 }
 0x1d7   :  { %v1257_v63 = vadd.f32 %v1256_v36, %v1255_v18  ;;  %v1264_v18 = vsel %vm18886_vm2, %v1148_v50, 0.0  ;;  %v1154_v50 = vmul.f32 %v12389_v37, %v12389_v37 }
 0x1d9   :  { %v1259_v60 = vadd.f32 %v1258_v28, %v1257_v63  ;;  %v1266_v63 = vsel %vm18886_vm2, %v1149_v38, 0.0  ;;  %v1155_v38 = vmul.f32 %v12392_v35, %v12392_v35 }
 0x1db   :  { %v1261_v31 = vadd.f32 %v1260_v4, %v1259_v60  ;;  %v1268_v60 = vsel %vm18886_vm2, %v1150_v26, 0.0  ;;  %v1156_v26 = vmul.f32 %v12395_v56, %v12395_v56 }
 0x1dd   :  { %v1263_v20 = vadd.f32 %v1262_v12, %v1261_v31  ;;  %v1270_v31 = vsel %vm18886_vm2, %v1151_v62, 0.0  ;;  %v1157_v62 = vmul.f32 %v12398_v22, %v12398_v22 }
 0x1df   :  { %v1265_v36 = vadd.f32 %v1264_v18, %v1263_v20  ;;  %v1272_v20 = vsel %vm18886_vm2, %v1152_v34, 0.0  ;;  %v1158_v34 = vmul.f32 %v12401_v8, %v12401_v8  ;;  %v1297_v8 = vlaneseq }
 0x1e1   :  { %v1267_v28 = vadd.f32 %v1266_v63, %v1265_v36  ;;  %v1274_v36 = vsel %vm18886_vm2, %v1153_v58, 0.0  ;;  %v1282_v58 = vsel %vm18886_vm2, %v1157_v62, 0.0  ;;  %v1298_v37 = vshrl.u32 %v1297_v8, 7 }
 0x1e3   :  { %v1269_v4 = vadd.f32 %v1268_v60, %v1267_v28  ;;  %v1276_v28 = vsel %vm18886_vm2, %v1154_v50, 0.0  ;;  %v12786_v62 = vsub.s32 0, %v1298_v37 }
 0x1e5   :  { %v1271_v12 = vadd.f32 %v1270_v31, %v1269_v4  ;;  %v1278_v4 = vsel %vm18886_vm2, %v1155_v38, 0.0  ;;  %18971 = vst [vmem:[#allocation10_spill] sm:$0xff] %v12786_v62 }
 0x1e7   :  { %v1273_v18 = vadd.f32 %v1272_v20, %v1271_v12  ;;  %v1280_v12 = vsel %vm18886_vm2, %v1156_v26, 0.0  ;;  %v895_v26 = vld [vmem:[%s18970_s22] sm:$0x1] }
 0x1e9   :  { %v1275_v63 = vadd.f32 %v1274_v36, %v1273_v18  ;;  %v1284_v36 = vsel %vm18886_vm2, %v1158_v34, 0.0 }
 0x1eb   :  { %v1277_v60 = vadd.f32 %v1276_v28, %v1275_v63 }
 0x1ed   :  { %v1279_v31 = vadd.f32 %v1278_v4, %v1277_v60 }
 0x1ef   :  { %v1281_v20 = vadd.f32 %v1280_v12, %v1279_v31  ;;  %v11170_v12 = vld [vmem:[%s18745_s5 + $0x30] sm:$0xff]  }
 0x1f1   :  { %v1283_v18 = vadd.f32 %v1282_v58, %v1281_v20 }
 0x1f3   :  { %v1285_v43 = vadd.f32 %v1284_v36, %v1283_v18 }
 0x1f5   :  { %v1286_v50 = vrot.slane %v1285_v43, 4 }
 0x1f7   :  { %v1287_v63 = vadd.f32 %v1286_v50, %v1285_v43 }
 0x1f9   :  { %v1288_v28 = vrot.slane %v1287_v63, 2 }
 0x1fb   :  { %v1289_v41 = vadd.f32 %v1288_v28, %v1287_v63 }
 0x1fd   :  { %v1290_v22 = vrot.slane %v1289_v41, 1 }
 0x1ff   :  { %v1291_v35 = vadd.f32 %v1290_v22, %v1289_v41  ;;  %v11169_v22 = vld [vmem:[%s18745_s5 + $0x38] sm:$0xff]   ;;  %v18802_v41 = vmov 0  }
 0x200   :  { %3844 = vmatprep.subr.bf16.mxu1 %v18802_v41  ;;  %4133 = vmatprep.subr.bf16.mxu0 %v18802_v41 }
 0x201   :  { %v1292_v38 = vmul.f32 0.001953125, %v1291_v35  ;;  %v12794_v35 = vld [vmem:[%s18744_s4] ss:$0 sm:$0xff]  ;;  %3845 = vmatpush1.bf16.msra.mxu1 %v11169_v22 }
 0x202   :  { %3846 = vmatprep.subr.bf16.mxu1 %v18802_v41 }
 0x203   :  { %v1293_v60 = vmax.f32 %v1292_v38, 0.0 }
 0x205   :  { %v1294_v4 = vadd.f32 1e-05, %v1293_v60  ;;  %3847 = vmatpush1.bf16.msra.mxu1 %v11170_v12 }
 0x206   :  { %3848 = vmatprep.subr.bf16.mxu1 %v18802_v41 }
 0x207   :  { %11441 = vrsqrt.f32 %v1294_v4 }
 0x214   :  { %v11442_v31 = vpop.eup %11441 }
 0x215   :  { %v1296_v34 = vmul.f32 %v11442_v31, %v895_v26 }
 0x217   :  { %v12789_v43 = vrot.slane %v1296_v34, %v12786_v62  ;;  %v11174_v34 = vld [vmem:[%s18745_s5 + $0x10] sm:$0xff]   ;;  %v19000_v62 = vld [vmem:[#allocation42_spill] sm:$0xff] }
 0x219   :  { %v1362_v8 = vmul.f32 %v12789_v43, %v12395_v56  ;;  %v11171_v56 = vld [vmem:[%s18745_s5 + $0x28] sm:$0xff]   ;;  %v12815_v18 = vmul.f32 %v12789_v43, %v12405_v45  ;;  %v12819_v36 = vmul.f32 %v12789_v43, %v12409_v2  ;;  %v1303_v50 = vmul.f32 %v12789_v43, %v12413_v7 }
 0x21a   :  { %3849 = vmatpush1.bf16.msra.mxu1 %v11171_v56  ;;  %v1304_v63 = vmul.f32 %v12789_v43, %v12417_v29  ;;  %v12827_v28 = vmul.f32 %v12789_v43, %v12544_v53  ;;  %v12832_v45 = vmul.f32 %v12789_v43, %v12551_v59  ;;  %v12836_v2 = vmul.f32 %v12789_v43, %v12558_v6  ;;  %v11172_v53 = vld [vmem:[%s18745_s5 + $0x20] sm:$0xff]  }
 0x21b   :  { %v1432_v37 = vadd.f32 %v12794_v35, %v1362_v8  ;;  %3850 = vmatprep.subr.bf16.mxu1 %v18802_v41  ;;  %v12840_v7 = vmul.f32 %v12789_v43, %v12565_v3  ;;  %v12844_v29 = vmul.f32 %v12789_v43, %v12572_v9  ;;  %v12851_v59 = vmul.f32 %v12789_v43, %v12579_v17 }
 0x21c   :  { %v12855_v6 = vmul.f32 %v12789_v43, %v12586_v27  ;;  %v12859_v3 = vmul.f32 %v12789_v43, %v12593_v24  ;;  %v12863_v9 = vmul.f32 %v12789_v43, %v12600_v32  ;;  %v12867_v38 = vmul.f32 %v12789_v43, %v12607_v44 }
 0x21d   :  { %vm1496_vm4 = vcmp.ge.f32.partialorder %v1432_v37, 0.0  ;;  %v1560_v20 = vmul.f32 0.2, %v1432_v37  ;;  %v12871_v17 = vmul.f32 %v12789_v43, %v12614_v0  ;;  %v12875_v27 = vmul.f32 %v12789_v43, %v12621_v21 }
 0x21e   :  { %v12879_v24 = vmul.f32 %v12789_v43, %v12628_v47  ;;  %3851 = vmatpush1.bf16.msra.mxu1 %v11172_v53  ;;  %v12883_v32 = vmul.f32 %v12789_v43, %v12635_v42  ;;  %v12887_v44 = vmul.f32 %v12789_v43, %v12642_v25  ;;  %v12891_v0 = vmul.f32 %v12789_v43, %v12649_v1  ;;  %v11175_v53 = vld [vmem:[%s18745_s5 + $0x8] sm:$0xff]  }
 0x21f   :  { %v1624_v58 = vsel %vm1496_vm4, %v1432_v37, %v1560_v20  ;;  %v12895_v21 = vmul.f32 %v12789_v43, %v12656_v33  ;;  %3852 = vmatprep.subr.bf16.mxu1 %v18802_v41  ;;  %v12900_v47 = vmul.f32 %v12789_v43, %v12663_v30  ;;  %v12904_v42 = vmul.f32 %v12789_v43, %v12670_v48  ;;  %v11173_v33 = vld [vmem:[%s18745_s5 + $0x18] sm:$0xff]  }
 0x220   :  { %1689 = vst.msk [vmem:[#allocation2 + $0x321] sm:$0xff] %vm18886_vm2, %v1624_v58  ;;  %v12908_v25 = vmul.f32 %v12789_v43, %v12677_v14  ;;  %v12912_v1 = vmul.f32 %v12789_v43, %v12684_v54  ;;  %v12919_v30 = vmul.f32 %v12789_v43, %v12691_v52  ;;  %v12923_v48 = vmul.f32 %v12789_v43, %v12698_v46  ;;  %v18972_v37 = vld [vmem:[#allocation29_spill] sm:$0xff]  ;;  %v18974_v58 = vld [vmem:[#allocation31_spill] sm:$0xff] }
 0x221   :  { %v12927_v14 = vmul.f32 %v12789_v43, %v12705_v49  ;;  %v12931_v54 = vmul.f32 %v12789_v43, %v12349_v39  ;;  %v12935_v60 = vmul.f32 %v12789_v43, %v12715_v15  ;;  %v12939_v52 = vmul.f32 %v12789_v43, %v12722_v10 }
 0x222   :  { %v1373_v4 = vadd.f32 %v12794_v35, %v1303_v50  ;;  %v1374_v46 = vadd.f32 %v12794_v35, %v1304_v63  ;;  %3853 = vmatpush1.bf16.msra.mxu1 %v11173_v33  ;;  %v12945_v49 = vmul.f32 %v12789_v43, %v12353_v16  ;;  %v12949_v39 = vmul.f32 %v12789_v43, %v12357_v19 }
 0x223   :  { %v12953_v15 = vmul.f32 %v12789_v43, %v12361_v5  ;;  %v12957_v10 = vmul.f32 %v12789_v43, %v12365_v51  ;;  %3854 = vmatprep.subr.bf16.mxu1 %v18802_v41  ;;  %v1353_v16 = vmul.f32 %v12789_v43, %v12368_v55  ;;  %v12964_v19 = vmul.f32 %v12789_v43, %v12371_v61 }
 0x224   :  { %vm1437_vm5 = vcmp.ge.f32.partialorder %v1373_v4, 0.0  ;;  %vm1438_vm6 = vcmp.ge.f32.partialorder %v1374_v46, 0.0  ;;  %v1501_v26 = vmul.f32 0.2, %v1373_v4  ;;  %v1502_v31 = vmul.f32 0.2, %v1374_v46 }
 0x225   :  { %v12968_v5 = vmul.f32 %v12789_v43, %v12374_v23  ;;  %v12972_v51 = vmul.f32 %v12789_v43, %v12377_v13  ;;  %v1357_v22 = vmul.f32 %v12789_v43, %v12380_v40  ;;  %v1358_v55 = vmul.f32 %v12789_v43, %v12383_v57  ;;  %v18973_v13 = vld [vmem:[#allocation30_spill] sm:$0xff]  ;;  %v18975_v40 = vld [vmem:[#allocation32_spill] sm:$0xff] }
 0x226   :  { %v1565_v61 = vsel %vm1437_vm5, %v1373_v4, %v1501_v26  ;;  %v1566_v8 = vsel %vm1438_vm6, %v1374_v46, %v1502_v31  ;;  %v1359_v23 = vmul.f32 %v12789_v43, %v12386_v11  ;;  %v1360_v12 = vmul.f32 %v12789_v43, %v18972_v37  ;;  %3855 = vmatpush1.bf16.msra.mxu1 %v11174_v34 }
 0x227   :  { %v1361_v20 = vmul.f32 %v12789_v43, %v18973_v13  ;;  %v1363_v56 = vmul.f32 %v12789_v43, %v18974_v58  ;;  %1630 = vst.msk [vmem:[#allocation2 + $0x31] sm:$0xff] %vm18886_vm2, %v1565_v61  ;;  %1631 = vst.msk [vmem:[#allocation2 + $0x39] sm:$0xff] %vm18886_vm2, %v1566_v8  ;;  %v1364_v57 = vmul.f32 %v12789_v43, %v18975_v40  ;;  %3856 = vmatprep.subr.bf16.mxu1 %v18802_v41  ;;  %v11178_v13 = vld [vmem:[%s18745_s5 + $0x70] sm:$0xff]   ;;  %v11179_v40 = vld [vmem:[%s18745_s5 + $0x68] sm:$0xff]  }
 0x228   :  { %v12995_v11 = vadd.f32 %v12794_v35, %v12815_v18  ;;  %v12999_v50 = vadd.f32 %v12794_v35, %v12819_v36  ;;  %v13003_v63 = vadd.f32 %v12794_v35, %v12827_v28  ;;  %v13011_v33 = vadd.f32 %v12794_v35, %v12832_v45 }
 0x229   :  { %v13015_v18 = vadd.f32 %v12794_v35, %v12836_v2  ;;  %v13019_v36 = vadd.f32 %v12794_v35, %v12840_v7  ;;  %v13023_v28 = vadd.f32 %v12794_v35, %v12844_v29  ;;  %v13027_v4 = vadd.f32 %v12794_v35, %v12851_v59 }
 0x22a   :  { %v13031_v45 = vadd.f32 %v12794_v35, %v12855_v6  ;;  %v13035_v2 = vadd.f32 %v12794_v35, %v12859_v3  ;;  %v13039_v7 = vadd.f32 %v12794_v35, %v12863_v9  ;;  %v13043_v29 = vadd.f32 %v12794_v35, %v12867_v38  ;;  %3857 = vmatpush1.bf16.msra.mxu1 %v11175_v53 }
 0x22b   :  { %v13047_v59 = vadd.f32 %v12794_v35, %v12871_v17  ;;  %v13051_v6 = vadd.f32 %v12794_v35, %v12875_v27  ;;  %v13055_v3 = vadd.f32 %v12794_v35, %v12879_v24  ;;  %v13059_v9 = vadd.f32 %v12794_v35, %v12883_v32  ;;  %3858 = vmatprep.subr.bf16.mxu1 %v18802_v41  ;;  %v11176_v24 = vld [vmem:[%s18745_s5] sm:$0xff]  }
 0x22c   :  { %v13063_v38 = vadd.f32 %v12794_v35, %v12887_v44  ;;  %v13067_v17 = vadd.f32 %v12794_v35, %v12891_v0  ;;  %v13071_v27 = vadd.f32 %v12794_v35, %v12895_v21  ;;  %v13079_v32 = vadd.f32 %v12794_v35, %v12900_v47 }
 0x22d   :  { %v13083_v44 = vadd.f32 %v12794_v35, %v12904_v42  ;;  %v13087_v0 = vadd.f32 %v12794_v35, %v12908_v25  ;;  %v13091_v21 = vadd.f32 %v12794_v35, %v12912_v1  ;;  %v13095_v31 = vadd.f32 %v12794_v35, %v12919_v30 }
 0x22e   :  { %v1982_v46 = vld [vmem:[#allocation2 + $0x30] sm:$0xff]  ;;  %v1983_v26 = vld [vmem:[#allocation2 + $0x38] sm:$0xff]  ;;  %v13099_v47 = vadd.f32 %v12794_v35, %v12923_v48  ;;  %v13103_v42 = vadd.f32 %v12794_v35, %v12927_v14  ;;  %v13107_v25 = vadd.f32 %v12794_v35, %v12931_v54  ;;  %v13111_v34 = vadd.f32 %v12794_v35, %v12935_v60  ;;  %3859 = vmatpush1.bf16.msra.mxu1 %v11176_v24 }
 0x22f   :  { %v2045_v1 = vpack.c.bf16 %v1983_v26, %v1982_v46  ;;  %v13115_v30 = vadd.f32 %v12794_v35, %v12939_v52  ;;  %v13119_v48 = vadd.f32 %v12794_v35, %v12945_v49  ;;  %v13123_v14 = vadd.f32 %v12794_v35, %v12949_v39  ;;  %3860 = vmatprep.subr.bf16.mxu1 %v18802_v41  ;;  %v11177_v49 = vld [vmem:[%s18745_s5 + $0x78] sm:$0xff]   ;;  %v18993_v24 = vld [vmem:[#allocation35_spill] sm:$0xff] }
 0x230   :  { %18976 = vst [vmem:[#allocation12_spill] sm:$0xff] %v13111_v34  ;;  %v13127_v54 = vadd.f32 %v12794_v35, %v12953_v15  ;;  %v13131_v60 = vadd.f32 %v12794_v35, %v12957_v10  ;;  %v13134_v52 = vadd.f32 %v12794_v35, %v1353_v16  ;;  %v13143_v39 = vadd.f32 %v12794_v35, %v12964_v19  ;;  %v18994_v26 = vld [vmem:[#allocation36_spill] sm:$0xff] }
 0x231   :  { %18977 = vst [vmem:[#allocation11_spill] sm:$0xff] %v13123_v14  ;;  %2687 = vrot.lane.b32.xlu1 %v2045_v1, %s11477_s26  ;;  %v13147_v15 = vadd.f32 %v12794_v35, %v12968_v5  ;;  %v13151_v10 = vadd.f32 %v12794_v35, %v12972_v51  ;;  %v13154_v16 = vadd.f32 %v12794_v35, %v1357_v22  ;;  %vm1435_vm7 = vcmp.ge.f32.partialorder %v12995_v11, 0.0 }
 0x232   :  { %18978 = vst [vmem:[#allocation13_spill] sm:$0xff] %v13127_v54  ;;  %18979 = vst [vmem:[#allocation14_spill] sm:$0xff] %v13131_v60  ;;  %v13157_v61 = vadd.f32 %v12794_v35, %v1358_v55  ;;  %v13160_v8 = vadd.f32 %v12794_v35, %v1359_v23  ;;  %v13163_v19 = vadd.f32 %v12794_v35, %v1360_v12  ;;  %vm1436_vm8 = vcmp.ge.f32.partialorder %v12999_v50, 0.0  ;;  %v13179_v23 = vld [vmem:[#allocation2 + $0x1] sm:$0xff]  ;;  %v13181_v12 = vld [vmem:[#allocation2 + $0x9] sm:$0xff] }
 0x233   :  { %18980 = vst [vmem:[#allocation16_spill] sm:$0xff] %v13134_v52  ;;  %18981 = vst [vmem:[#allocation15_spill] sm:$0xff] %v13143_v39  ;;  %v13166_v37 = vadd.f32 %v12794_v35, %v1361_v20  ;;  %v13169_v5 = vadd.f32 %v12794_v35, %v1363_v56  ;;  %v13172_v51 = vadd.f32 %v12794_v35, %v1364_v57  ;;  %3861 = vmatpush2.bf16.msra.mxu1 %v11177_v49  ;;  %v18991_v57 = vld [vmem:[#allocation33_spill] sm:$0xff]  ;;  %v18998_v56 = vld [vmem:[#allocation40_spill] sm:$0xff] }
 0x234   :  { %18982 = vst [vmem:[#allocation17_spill] sm:$0xff] %v13147_v15  ;;  %18983 = vst [vmem:[#allocation18_spill] sm:$0xff] %v13151_v10  ;;  %v1499_v22 = vmul.f32 0.2, %v12995_v11  ;;  %v1500_v55 = vmul.f32 0.2, %v12999_v50  ;;  %3862 = vmatprep.subr.bf16.mxu1 %v18802_v41  ;;  %v1305_v53 = vmul.f32 %v12789_v43, %v18991_v57  ;;  %v1307_v46 = vmul.f32 %v12789_v43, %v18993_v24 }
 0x235   :  { %18984 = vst [vmem:[#allocation20_spill] sm:$0xff] %v13154_v16  ;;  %18985 = vst [vmem:[#allocation19_spill] sm:$0xff] %v13157_v61  ;;  %v1308_v1 = vmul.f32 %v12789_v43, %v18994_v26  ;;  %v18995_v49 = vld [vmem:[#allocation37_spill] sm:$0xff]  ;;  %v1312_v57 = vmul.f32 %v12789_v43, %v18998_v56  ;;  %v1314_v24 = vmul.f32 %v12789_v43, %v19000_v62  ;;  %v19005_v56 = vld [vmem:[#allocation47_spill] sm:$0xff]  ;;  %v19007_v62 = vmov 0  }
 0x236   :  { %18986 = vst [vmem:[#allocation21_spill] sm:$0xff] %v13160_v8  ;;  %18987 = vst [vmem:[#allocation22_spill] sm:$0xff] %v13163_v19  ;;  %v1563_v20 = vsel %vm1435_vm7, %v12995_v11, %v1499_v22  ;;  %v1564_v58 = vsel %vm1436_vm8, %v12999_v50, %v1500_v55  ;;  %v18992_v11 = vld [vmem:[#allocation34_spill] sm:$0xff]  ;;  %v1309_v22 = vmul.f32 %v12789_v43, %v18995_v49 }
 0x237   :  { %18988 = vst [vmem:[#allocation24_spill] sm:$0xff] %v13166_v37  ;;  %18989 = vst [vmem:[#allocation23_spill] sm:$0xff] %v13169_v5  ;;  %3863 = vmatpush2.bf16.msra.mxu1 %v11178_v13  ;;  %v1306_v50 = vmul.f32 %v12789_v43, %v18992_v11  ;;  %v18996_v55 = vld [vmem:[#allocation38_spill] sm:$0xff]  ;;  %v19002_v5 = vld [vmem:[#allocation44_spill] sm:$0xff]  ;;  %v1319_v8 = vmul.f32 %v12789_v43, %v19005_v56  ;;  %v13240_v56 = vadd.f32 %v12794_v35, %v1308_v1 }
 0x238   :  { %18990 = vst [vmem:[#allocation25_spill] sm:$0xff] %v13172_v51  ;;  %1628 = vst.msk [vmem:[#allocation2 + $0x19] sm:$0xff] %vm18886_vm2, %v1563_v20  ;;  %3864 = vmatprep.subr.bf16.mxu1 %v18802_v41  ;;  %v1310_v13 = vmul.f32 %v12789_v43, %v18996_v55  ;;  %v18997_v20 = vld [vmem:[#allocation39_spill] sm:$0xff]  ;;  %v18999_v41 = vld [vmem:[#allocation41_spill] sm:$0xff]  ;;  %v1316_v49 = vmul.f32 %v12789_v43, %v19002_v5 }
 0x239   :  { %1629 = vst.msk [vmem:[#allocation2 + $0x21] sm:$0xff] %vm18886_vm2, %v1564_v58  ;;  %v1311_v58 = vmul.f32 %v12789_v43, %v18997_v20  ;;  %v1313_v11 = vmul.f32 %v12789_v43, %v18999_v41  ;;  %v19001_v51 = vld [vmem:[#allocation43_spill] sm:$0xff]  ;;  %v19003_v55 = vld [vmem:[#allocation45_spill] sm:$0xff]  ;;  %v19004_v20 = vld [vmem:[#allocation46_spill] sm:$0xff]  ;;  %v1376_v16 = vadd.f32 %v12794_v35, %v1306_v50  ;;  %vm1442_vm12 = vcmp.ge.f32.partialorder %v13240_v56, 0.0 }
 0x23a   :  { %v1315_v26 = vmul.f32 %v12789_v43, %v19001_v51  ;;  %v1317_v37 = vmul.f32 %v12789_v43, %v19003_v55  ;;  %v1318_v19 = vmul.f32 %v12789_v43, %v19004_v20  ;;  %v19006_v41 = vld [vmem:[#allocation48_spill] sm:$0xff]  ;;  %v11180_v51 = vld [vmem:[%s18745_s5 + $0x60] sm:$0xff]   ;;  %v1375_v55 = vadd.f32 %v12794_v35, %v1305_v53 }
 0x23b   :  { %3865 = vmatpush2.bf16.msra.mxu1 %v11179_v40  ;;  %v1320_v61 = vmul.f32 %v12789_v43, %v19006_v41  ;;  %v19008_v5 = vld [vmem:[#allocation49_spill] sm:$0xff]  ;;  %v13237_v20 = vadd.f32 %v12794_v35, %v1307_v46  ;;  %v13243_v41 = vadd.f32 %v12794_v35, %v1309_v22  ;;  %v13246_v10 = vadd.f32 %v12794_v35, %v1310_v13 }
 0x23c   :  { %3866 = vmatprep.subr.bf16.mxu1 %v19007_v62  ;;  %v1321_v40 = vmul.f32 %v12789_v43, %v19008_v5  ;;  %v13249_v15 = vadd.f32 %v12794_v35, %v1311_v58  ;;  %v13252_v53 = vadd.f32 %v12794_v35, %v1312_v57  ;;  %v13255_v50 = vadd.f32 %v12794_v35, %v1313_v11  ;;  %v11181_v11 = vld [vmem:[%s18745_s5 + $0x58] sm:$0xff]  }
 0x23d   :  { %v13258_v46 = vadd.f32 %v12794_v35, %v1314_v24  ;;  %v13261_v22 = vadd.f32 %v12794_v35, %v1315_v26  ;;  %v13264_v13 = vadd.f32 %v12794_v35, %v1316_v49  ;;  %v13267_v58 = vadd.f32 %v12794_v35, %v1317_v37 }
 0x23e   :  { %v13270_v57 = vadd.f32 %v12794_v35, %v1318_v19  ;;  %v13277_v24 = vadd.f32 %v12794_v35, %v1319_v8  ;;  %v13280_v26 = vadd.f32 %v12794_v35, %v1320_v61  ;;  %v13283_v49 = vadd.f32 %v12794_v35, %v1321_v40  ;;  %v1792_v8 = vld [vmem:[#allocation2 + $0x31] sm:$0xff] }
 0x23f   :  { %v1980_v43 = vld [vmem:[#allocation2 + $0x18] sm:$0xff]  ;;  %3867 = vmatpush2.bf16.msra.mxu1 %v11180_v51  ;;  %vm1439_vm9 = vcmp.ge.f32.partialorder %v1375_v55, 0.0  ;;  %vm1440_vm10 = vcmp.ge.f32.partialorder %v1376_v16, 0.0  ;;  %vm1441_vm11 = vcmp.ge.f32.partialorder %v13237_v20, 0.0  ;;  %vm1443_vm13 = vcmp.ge.f32.partialorder %v13243_v41, 0.0 }
 0x240   :  { %v1981_v5 = vld [vmem:[#allocation2 + $0x20] sm:$0xff]  ;;  %3868 = vmatprep.subr.bf16.mxu1 %v19007_v62  ;;  %vm1444_vm14 = vcmp.ge.f32.partialorder %v13246_v10, 0.0  ;;  %vm1445_vm15 = vcmp.ge.f32.partialorder %v13249_v15, 0.0  ;;  %vm1446_vm0 = vcmp.ge.f32.partialorder %v13252_v53, 0.0  ;;  %vm1447_vm1 = vcmp.ge.f32.partialorder %v13255_v50, 0.0 }
 0x241   :  { %v2044_v1 = vpack.c.bf16 %v1981_v5, %v1980_v43  ;;  %v1790_v19 = vld [vmem:[#allocation2 + $0x19] sm:$0xff]  ;;  %v1791_v37 = vld [vmem:[#allocation2 + $0x21] sm:$0xff]  ;;  %vm1448_vm3 = vcmp.ge.f32.partialorder %v13258_v46, 0.0  ;;  %v1503_v35 = vmul.f32 0.2, %v1375_v55  ;;  %vm1449_vm4 = vcmp.ge.f32.partialorder %v13261_v22, 0.0 }
 0x242   :  { %v1793_v51 = vld [vmem:[#allocation2 + $0x39] sm:$0xff]  ;;  %v1504_v61 = vmul.f32 0.2, %v1376_v16  ;;  %v1505_v40 = vmul.f32 0.2, %v13237_v20  ;;  %v1853_v43 = vpack.c.bf16 %v1791_v37, %v1790_v19  ;;  %vm1450_vm5 = vcmp.ge.f32.partialorder %v13264_v13, 0.0 }
 0x243   :  { %2685 = vrot.lane.b32.xlu0 %v2044_v1, %s11477_s26  ;;  %3869 = vmatpush2.bf16.msra.mxu1 %v11181_v11  ;;  %v1506_v5 = vmul.f32 0.2, %v13240_v56  ;;  %v1507_v1 = vmul.f32 0.2, %v13243_v41  ;;  %v1508_v39 = vmul.f32 0.2, %v13246_v10  ;;  %v19009_v11 = vpack.c.bf16 %v13181_v12, %v13179_v23 }
 0x244   :  { %3870 = vmatprep.subr.bf16.mxu1 %v19007_v62  ;;  %v13304_v52 = vpack.c.bf16 %v1793_v51, %v1792_v8  ;;  %v1509_v19 = vmul.f32 0.2, %v13249_v15  ;;  %v1510_v37 = vmul.f32 0.2, %v13252_v53  ;;  %v1511_v62 = vmul.f32 0.2, %v13255_v50  ;;  %2591 = vrot.lane.b32.xlu1 %v1853_v43, %s11477_s26 }
 0x245   :  { %v1567_v60 = vsel %vm1439_vm9, %v1375_v55, %v1503_v35  ;;  %vm1451_vm6 = vcmp.ge.f32.partialorder %v13267_v58, 0.0  ;;  %v13314_v54 = vmul.f32 0.2, %v13258_v46  ;;  %v13317_v23 = vmul.f32 0.2, %v13261_v22 }
 0x246   :  { %19010 = vst [vmem:[#allocation26_spill] sm:$0xff] %v13304_v52  ;;  %v13320_v12 = vmul.f32 0.2, %v13264_v13  ;;  %v1568_v8 = vsel %vm1440_vm10, %v1376_v16, %v1504_v61  ;;  %1632 = vst.msk [vmem:[#allocation2 + $0x49] sm:$0xff] %vm18886_vm2, %v1567_v60  ;;  %vm1452_vm7 = vcmp.ge.f32.partialorder %v13270_v57, 0.0  ;;  %v1569_v43 = vsel %vm1441_vm11, %v13237_v20, %v1505_v40 }
 0x247   :  { %2589 = vrot.lane.b32.xlu0 %v19009_v11, %s11477_s26  ;;  %v13326_v51 = vmul.f32 0.2, %v13267_v58  ;;  %v13329_v55 = vmul.f32 0.2, %v13270_v57  ;;  %v13332_v35 = vmul.f32 0.2, %v13277_v24  ;;  %v1570_v11 = vsel %vm1442_vm12, %v13240_v56, %v1506_v5 }
 0x248   :  { %1633 = vst.msk [vmem:[#allocation2 + $0x51] sm:$0xff] %vm18886_vm2, %v1568_v8  ;;  %vm1453_vm8 = vcmp.ge.f32.partialorder %v13277_v24, 0.0  ;;  %v13340_v60 = vmul.f32 0.2, %v13280_v26  ;;  %v13343_v16 = vmul.f32 0.2, %v13283_v49  ;;  %2593 = vrot.lane.b32.xlu1 %v13304_v52, %s11477_s26 }
 0x249   :  { %v13346_v61 = vmul.f32 0.2, %v13003_v63  ;;  %1634 = vst.msk [vmem:[#allocation2 + $0x61] sm:$0xff] %vm18886_vm2, %v1569_v43  ;;  %vm1454_vm9 = vcmp.ge.f32.partialorder %v13280_v26, 0.0  ;;  %v13354_v20 = vmul.f32 0.2, %v13011_v33 }
 0x24a   :  { %v13357_v40 = vmul.f32 0.2, %v13015_v18  ;;  %v13360_v8 = vmul.f32 0.2, %v13019_v36  ;;  %1635 = vst.msk [vmem:[#allocation2 + $0x69] sm:$0xff] %vm18886_vm2, %v1570_v11  ;;  %vm1455_vm10 = vcmp.ge.f32.partialorder %v13283_v49, 0.0 }
 0x24b   :  { %19011 = vst [vmem:[#allocation27_spill] sm:$0xff] %v13346_v61  ;;  %v1571_v61 = vsel %vm1443_vm13, %v13243_v41, %v1507_v1  ;;  %v13370_v56 = vmul.f32 0.2, %v13023_v28  ;;  %v13373_v5 = vmul.f32 0.2, %v13027_v4  ;;  %v1572_v41 = vsel %vm1444_vm14, %v13246_v10, %v1508_v39 }
 0x24c   :  { %v13376_v43 = vmul.f32 0.2, %v13031_v45  ;;  %1636 = vst.msk [vmem:[#allocation2 + $0x79] sm:$0xff] %vm18886_vm2, %v1571_v61  ;;  %v13385_v1 = vmul.f32 0.2, %v13035_v2  ;;  %1637 = vst.msk [vmem:[#allocation2 + $0x81] sm:$0xff] %vm18886_vm2, %v1572_v41 }
 0x24d   :  { %v13388_v11 = vmul.f32 0.2, %v13039_v7  ;;  %v13391_v52 = vmul.f32 0.2, %v13043_v29  ;;  %vm1458_vm13 = vcmp.ge.f32.partialorder %v13015_v18, 0.0  ;;  %vm19040_vm11 = vcmp.ge.f32.partialorder %v13011_v33, 0.0 }
 0x24e   :  { %19012 = vst [vmem:[#allocation28_spill] sm:$0xff] %v13376_v43  ;;  %v1573_v43 = vsel %vm1445_vm15, %v13249_v15, %v1509_v19  ;;  %v13402_v39 = vmul.f32 0.2, %v13047_v59  ;;  %v13405_v10 = vmul.f32 0.2, %v13051_v6  ;;  %v1574_v15 = vsel %vm1446_vm0, %v13252_v53, %v1510_v37 }
 0x24f   :  { %v13408_v61 = vmul.f32 0.2, %v13055_v3  ;;  %1638 = vst.msk [vmem:[#allocation2 + $0x91] sm:$0xff] %vm18886_vm2, %v1573_v43  ;;  %vm1462_vm15 = vcmp.ge.f32.partialorder %v13031_v45, 0.0  ;;  %v13419_v19 = vmul.f32 0.2, %v13059_v9  ;;  %v1575_v53 = vsel %vm1447_vm1, %v13255_v50, %v1511_v62 }
 0x250   :  { %v13422_v41 = vmul.f32 0.2, %v13063_v38  ;;  %1639 = vst.msk [vmem:[#allocation2 + $0x99] sm:$0xff] %vm18886_vm2, %v1574_v15  ;;  %vm1466_vm0 = vcmp.ge.f32.partialorder %v13047_v59, 0.0  ;;  %v13436_v37 = vmul.f32 0.2, %v13071_v27  ;;  %v1576_v62 = vsel %vm1448_vm3, %v13258_v46, %v13314_v54 }
 0x251   :  { %19013 = vst [vmem:[#allocation29_spill] sm:$0xff] %v13408_v61  ;;  %v13425_v61 = vmul.f32 0.2, %v13067_v17  ;;  %v13439_v43 = vmul.f32 0.2, %v13079_v32  ;;  %1640 = vst.msk [vmem:[#allocation2 + $0xa9] sm:$0xff] %vm18886_vm2, %v1575_v53  ;;  %v1577_v54 = vsel %vm1449_vm4, %v13261_v22, %v13317_v23  ;;  %v1578_v22 = vsel %vm1450_vm5, %v13264_v13, %v13320_v12 }
 0x252   :  { %vm1470_vm1 = vcmp.ge.f32.partialorder %v13063_v38, 0.0  ;;  %v13454_v50 = vmul.f32 0.2, %v13087_v0  ;;  %v13457_v15 = vmul.f32 0.2, %v13091_v21  ;;  %1641 = vst.msk [vmem:[#allocation2 + $0xb1] sm:$0xff] %vm18886_vm2, %v1576_v62  ;;  %v1579_v13 = vsel %vm1451_vm6, %v13267_v58, %v13326_v51 }
 0x253   :  { %19014 = vst [vmem:[#allocation30_spill] sm:$0xff] %v13425_v61  ;;  %v13442_v61 = vmul.f32 0.2, %v13083_v44  ;;  %vm1474_vm3 = vcmp.ge.f32.partialorder %v13083_v44, 0.0  ;;  %v13472_v46 = vmul.f32 0.2, %v13099_v47  ;;  %v1580_v58 = vsel %vm1452_vm7, %v13270_v57, %v13329_v55 }
 0x254   :  { %v13475_v53 = vmul.f32 0.2, %v13103_v42  ;;  %1642 = vst.msk [vmem:[#allocation2 + $0xc1] sm:$0xff] %vm18886_vm2, %v1577_v54  ;;  %vm1478_vm4 = vcmp.ge.f32.partialorder %v13099_v47, 0.0  ;;  %v13490_v23 = vmul.f32 0.2, %v13111_v34  ;;  %v1581_v57 = vsel %vm1453_vm8, %v13277_v24, %v13332_v35 }
 0x255   :  { %19015 = vst [vmem:[#allocation31_spill] sm:$0xff] %v13442_v61  ;;  %v13460_v61 = vmul.f32 0.2, %v13095_v31  ;;  %v13493_v62 = vmul.f32 0.2, %v13115_v30  ;;  %1643 = vst.msk [vmem:[#allocation2 + $0xc9] sm:$0xff] %vm18886_vm2, %v1578_v22  ;;  %v1582_v24 = vsel %vm1454_vm9, %v13280_v26, %v13340_v60  ;;  %v1583_v26 = vsel %vm1455_vm10, %v13283_v49, %v13343_v16 }
 0x256   :  { %vm1482_vm5 = vcmp.ge.f32.partialorder %v13115_v30, 0.0  ;;  %v19020_v12 = vld [vmem:[#allocation13_spill] sm:$0xff]  ;;  %v13508_v54 = vmul.f32 0.2, %v13123_v14  ;;  %1644 = vst.msk [vmem:[#allocation2 + $0xd9] sm:$0xff] %vm18886_vm2, %v1579_v13  ;;  %v19024_v51 = vld [vmem:[#allocation16_spill] sm:$0xff]  ;;  %v1586_v49 = vsel %vm1458_vm13, %v13015_v18, %v13357_v40 }
 0x257   :  { %19016 = vst [vmem:[#allocation32_spill] sm:$0xff] %v13460_v61  ;;  %v13478_v61 = vmul.f32 0.2, %v13107_v25  ;;  %19018 = vst [vmem:[#allocation34_spill] sm:$0xff] %v13493_v62  ;;  %v19022_v62 = vld [vmem:[#allocation14_spill] sm:$0xff]  ;;  %v19025_v22 = vld [vmem:[#allocation15_spill] sm:$0xff] }
 0x258   :  { %v13514_v34 = vmul.f32 0.2, %v19022_v62  ;;  %vm1486_vm6 = vcmp.ge.f32.partialorder %v19022_v62, 0.0  ;;  %v19026_v14 = vld [vmem:[#allocation17_spill] sm:$0xff]  ;;  %1645 = vst.msk [vmem:[#allocation2 + $0xe1] sm:$0xff] %vm18886_vm2, %v1580_v58  ;;  %v19029_v55 = vld [vmem:[#allocation18_spill] sm:$0xff] }
 0x259   :  { %19017 = vst [vmem:[#allocation33_spill] sm:$0xff] %v13478_v61  ;;  %v13496_v61 = vmul.f32 0.2, %v13119_v48  ;;  %vm1490_vm7 = vcmp.ge.f32.partialorder %v19029_v55, 0.0  ;;  %v19030_v13 = vld [vmem:[#allocation20_spill] sm:$0xff]  ;;  %v19031_v62 = vld [vmem:[#allocation19_spill] sm:$0xff] }
 0x25a   :  { %19023 = vst [vmem:[#allocation37_spill] sm:$0xff] %v13514_v34  ;;  %v13529_v34 = vmul.f32 0.2, %v19025_v22  ;;  %v13544_v22 = vmul.f32 0.2, %v19029_v55  ;;  %1646 = vst.msk [vmem:[#allocation2 + $0xf1] sm:$0xff] %vm18886_vm2, %v1581_v57 }
 0x25b   :  { %19019 = vst [vmem:[#allocation35_spill] sm:$0xff] %v13496_v61  ;;  %v13511_v61 = vmul.f32 0.2, %v19020_v12  ;;  %v13526_v12 = vmul.f32 0.2, %v19024_v51  ;;  %v19032_v51 = vld [vmem:[#allocation21_spill] sm:$0xff] }
 0x25c   :  { %19027 = vst [vmem:[#allocation38_spill] sm:$0xff] %v13529_v34  ;;  %v19034_v35 = vld [vmem:[#allocation22_spill] sm:$0xff]  ;;  %v19035_v58 = vld [vmem:[#allocation24_spill] sm:$0xff]  ;;  %v19036_v34 = vld [vmem:[#allocation23_spill] sm:$0xff]  ;;  %vm19039_vm9 = vcmp.ge.f32.partialorder %v13003_v63, 0.0  ;;  %vm19041_vm10 = vcmp.ge.f32.partialorder %v13019_v36, 0.0 }
 0x25d   :  { %19021 = vst [vmem:[#allocation36_spill] sm:$0xff] %v13511_v61  ;;  %v13532_v61 = vmul.f32 0.2, %v19026_v14  ;;  %v13547_v14 = vmul.f32 0.2, %v19030_v13  ;;  %vm1494_vm8 = vcmp.ge.f32.partialorder %v19034_v35, 0.0  ;;  %v1587_v16 = vsel %vm19041_vm10, %v13019_v36, %v13360_v8 }
 0x25e   :  { %vm1495_vm12 = vcmp.ge.f32.partialorder %v19035_v58, 0.0  ;;  %vm1497_vm14 = vcmp.ge.f32.partialorder %v19036_v34, 0.0  ;;  %v19037_v55 = vld [vmem:[#allocation25_spill] sm:$0xff]  ;;  %v13562_v13 = vmul.f32 0.2, %v19032_v51  ;;  %1647 = vst.msk [vmem:[#allocation2 + $0xf9] sm:$0xff] %vm18886_vm2, %v1582_v24 }
 0x25f   :  { %19028 = vst [vmem:[#allocation39_spill] sm:$0xff] %v13532_v61  ;;  %v13550_v61 = vmul.f32 0.2, %v19031_v62  ;;  %v13565_v62 = vmul.f32 0.2, %v19034_v35  ;;  %v19038_v51 = vld [vmem:[#allocation27_spill] sm:$0xff] }
 0x260   :  { %v13576_v60 = vmul.f32 0.2, %v19036_v34  ;;  %v13579_v57 = vmul.f32 0.2, %v19037_v55  ;;  %v1584_v35 = vsel %vm19039_vm9, %v13003_v63, %v19038_v51  ;;  %1648 = vst.msk [vmem:[#allocation2 + $0x109] sm:$0xff] %vm18886_vm2, %v1583_v26  ;;  %vm19042_vm9 = vcmp.ge.f32.partialorder %v13023_v28, 0.0 }
 0x261   :  { %19033 = vst [vmem:[#allocation40_spill] sm:$0xff] %v13550_v61  ;;  %v13568_v61 = vmul.f32 0.2, %v19035_v58  ;;  %v1585_v58 = vsel %vm19040_vm11, %v13011_v33, %v13354_v20  ;;  %v1588_v63 = vsel %vm19042_vm9, %v13023_v28, %v13370_v56  ;;  %vm19043_vm11 = vcmp.ge.f32.partialorder %v13027_v4, 0.0  ;;  %1649 = vst.msk [vmem:[#allocation2 + $0x111] sm:$0xff] %vm18886_vm2, %v1584_v35  ;;  %v19044_v18 = vld [vmem:[#allocation28_spill] sm:$0xff] }
 0x262   :  { %v1589_v33 = vsel %vm19043_vm11, %v13027_v4, %v13373_v5  ;;  %1650 = vst.msk [vmem:[#allocation2 + $0x121] sm:$0xff] %vm18886_vm2, %v1585_v58  ;;  %v1590_v20 = vsel %vm1462_vm15, %v13031_v45, %v19044_v18  ;;  %vm19045_vm13 = vcmp.ge.f32.partialorder %v13035_v2, 0.0  ;;  %vm19046_vm10 = vcmp.ge.f32.partialorder %v13039_v7, 0.0  ;;  %1651 = vst.msk [vmem:[#allocation2 + $0x129] sm:$0xff] %vm18886_vm2, %v1586_v49  ;;  %v19059_v8 = vld [vmem:[#allocation32_spill] sm:$0xff]  ;;  %v19082_v24 = vld [vmem:[#allocation17_spill] sm:$0xff] }
 0x263   :  { %v1591_v36 = vsel %vm19045_vm13, %v13035_v2, %v13385_v1  ;;  %v1592_v28 = vsel %vm19046_vm10, %v13039_v7, %v13388_v11  ;;  %vm19047_vm9 = vcmp.ge.f32.partialorder %v13043_v29, 0.0  ;;  %1652 = vst.msk [vmem:[#allocation2 + $0x139] sm:$0xff] %vm18886_vm2, %v1587_v16  ;;  %1653 = vst.msk [vmem:[#allocation2 + $0x141] sm:$0xff] %vm18886_vm2, %v1588_v63  ;;  %v1594_v45 = vsel %vm1466_vm0, %v13047_v59, %v13402_v39  ;;  %v19049_v7 = vld [vmem:[#allocation29_spill] sm:$0xff]  ;;  %v19064_v5 = vld [vmem:[#allocation12_spill] sm:$0xff] }
 0x264   :  { %v1593_v4 = vsel %vm19047_vm9, %v13043_v29, %v13391_v52  ;;  %1654 = vst.msk [vmem:[#allocation2 + $0x151] sm:$0xff] %vm18886_vm2, %v1589_v33  ;;  %vm19048_vm15 = vcmp.ge.f32.partialorder %v13051_v6, 0.0  ;;  %vm19050_vm11 = vcmp.ge.f32.partialorder %v13055_v3, 0.0  ;;  %vm19051_vm13 = vcmp.ge.f32.partialorder %v13059_v9, 0.0  ;;  %1655 = vst.msk [vmem:[#allocation2 + $0x159] sm:$0xff] %vm18886_vm2, %v1590_v20  ;;  %v19067_v11 = vld [vmem:[#allocation35_spill] sm:$0xff] }
 0x265   :  { %v1595_v2 = vsel %vm19048_vm15, %v13051_v6, %v13405_v10  ;;  %v1596_v29 = vsel %vm19050_vm11, %v13055_v3, %v19049_v7  ;;  %v1597_v52 = vsel %vm19051_vm13, %v13059_v9, %v13419_v19  ;;  %1656 = vst.msk [vmem:[#allocation2 + $0x169] sm:$0xff] %vm18886_vm2, %v1591_v36  ;;  %1657 = vst.msk [vmem:[#allocation2 + $0x171] sm:$0xff] %vm18886_vm2, %v1592_v28  ;;  %v19052_v6 = vld [vmem:[#allocation30_spill] sm:$0xff]  ;;  %vm19053_vm0 = vcmp.ge.f32.partialorder %v13067_v17, 0.0  ;;  %v19069_v39 = vld [vmem:[#allocation11_spill] sm:$0xff] }
 0x266   :  { %1658 = vst.msk [vmem:[#allocation2 + $0x181] sm:$0xff] %vm18886_vm2, %v1593_v4  ;;  %v1598_v59 = vsel %vm1470_vm1, %v13063_v38, %v13422_v41  ;;  %v1599_v3 = vsel %vm19053_vm0, %v13067_v17, %v19052_v6  ;;  %vm19054_vm10 = vcmp.ge.f32.partialorder %v13071_v27, 0.0  ;;  %vm19055_vm9 = vcmp.ge.f32.partialorder %v13079_v32, 0.0  ;;  %1659 = vst.msk [vmem:[#allocation2 + $0x189] sm:$0xff] %vm18886_vm2, %v1594_v45  ;;  %v19056_v38 = vld [vmem:[#allocation31_spill] sm:$0xff]  ;;  %v19071_v19 = vld [vmem:[#allocation36_spill] sm:$0xff] }
 0x267   :  { %v1600_v9 = vsel %vm19054_vm10, %v13071_v27, %v13436_v37  ;;  %v1601_v40 = vsel %vm19055_vm9, %v13079_v32, %v13439_v43  ;;  %1660 = vst.msk [vmem:[#allocation2 + $0x1c9] sm:$0xff] %vm18886_vm2, %v1595_v2  ;;  %1661 = vst.msk [vmem:[#allocation2 + $0x1d1] sm:$0xff] %vm18886_vm2, %v1596_v29  ;;  %v1602_v17 = vsel %vm1474_vm3, %v13083_v44, %v19056_v38  ;;  %vm19057_vm1 = vcmp.ge.f32.partialorder %v13087_v0, 0.0  ;;  %v19072_v41 = vld [vmem:[#allocation13_spill] sm:$0xff]  ;;  %v19075_v43 = vld [vmem:[#allocation14_spill] sm:$0xff] }
 0x268   :  { %1662 = vst.msk [vmem:[#allocation2 + $0x1e1] sm:$0xff] %vm18886_vm2, %v1597_v52  ;;  %v1603_v27 = vsel %vm19057_vm1, %v13087_v0, %v13454_v50  ;;  %vm19058_vm15 = vcmp.ge.f32.partialorder %v13091_v21, 0.0  ;;  %vm19060_vm11 = vcmp.ge.f32.partialorder %v13095_v31, 0.0  ;;  %1663 = vst.msk [vmem:[#allocation2 + $0x1e9] sm:$0xff] %vm18886_vm2, %v1598_v59  ;;  %v1606_v44 = vsel %vm1478_vm4, %v13099_v47, %v13472_v46  ;;  %v19066_v47 = vld [vmem:[#allocation34_spill] sm:$0xff]  ;;  %v19081_v51 = vld [vmem:[#allocation39_spill] sm:$0xff] }
 0x269   :  { %v1604_v32 = vsel %vm19058_vm15, %v13091_v21, %v13457_v15  ;;  %v1605_v56 = vsel %vm19060_vm11, %v13095_v31, %v19059_v8  ;;  %1664 = vst.msk [vmem:[#allocation2 + $0x1f9] sm:$0xff] %vm18886_vm2, %v1599_v3  ;;  %1665 = vst.msk [vmem:[#allocation2 + $0x201] sm:$0xff] %vm18886_vm2, %v1600_v9  ;;  %vm19061_vm3 = vcmp.ge.f32.partialorder %v13103_v42, 0.0  ;;  %v19062_v21 = vld [vmem:[#allocation33_spill] sm:$0xff]  ;;  %vm19063_vm13 = vcmp.ge.f32.partialorder %v13107_v25, 0.0  ;;  %v19076_v15 = vld [vmem:[#allocation16_spill] sm:$0xff] }
 0x26a   :  { %1666 = vst.msk [vmem:[#allocation2 + $0x211] sm:$0xff] %vm18886_vm2, %v1601_v40  ;;  %v1607_v0 = vsel %vm19061_vm3, %v13103_v42, %v13475_v53  ;;  %v1608_v31 = vsel %vm19063_vm13, %v13107_v25, %v19062_v21  ;;  %vm19065_vm0 = vcmp.ge.f32.partialorder %v19064_v5, 0.0  ;;  %1667 = vst.msk [vmem:[#allocation2 + $0x219] sm:$0xff] %vm18886_vm2, %v1602_v17  ;;  %v1610_v42 = vsel %vm1482_vm5, %v13115_v30, %v19066_v47  ;;  %v1984_v30 = vld [vmem:[#allocation2 + $0x48] sm:$0xff]  ;;  %v1985_v58 = vld [vmem:[#allocation2 + $0x50] sm:$0xff] }
 0x26b   :  { %v1609_v1 = vsel %vm19065_vm0, %v19064_v5, %v13490_v23  ;;  %1668 = vst.msk [vmem:[#allocation2 + $0x229] sm:$0xff] %vm18886_vm2, %v1603_v27  ;;  %1669 = vst.msk [vmem:[#allocation2 + $0x231] sm:$0xff] %vm18886_vm2, %v1604_v32  ;;  %vm19068_vm4 = vcmp.ge.f32.partialorder %v13119_v48, 0.0  ;;  %vm19070_vm10 = vcmp.ge.f32.partialorder %v19069_v39, 0.0  ;;  %vm19073_vm9 = vcmp.ge.f32.partialorder %v19072_v41, 0.0  ;;  %v19078_v53 = vld [vmem:[#allocation38_spill] sm:$0xff] }
 0x26c   :  { %1670 = vst.msk [vmem:[#allocation2 + $0x241] sm:$0xff] %vm18886_vm2, %v1605_v56  ;;  %v1611_v25 = vsel %vm19068_vm4, %v13119_v48, %v19067_v11  ;;  %v1612_v10 = vsel %vm19070_vm10, %v19069_v39, %v13508_v54  ;;  %v1613_v37 = vsel %vm19073_vm9, %v19072_v41, %v19071_v19  ;;  %1671 = vst.msk [vmem:[#allocation2 + $0x249] sm:$0xff] %vm18886_vm2, %v1606_v44  ;;  %v19074_v48 = vld [vmem:[#allocation37_spill] sm:$0xff]  ;;  %vm19077_vm5 = vcmp.ge.f32.partialorder %v19076_v15, 0.0  ;;  %v19079_v23 = vld [vmem:[#allocation15_spill] sm:$0xff] }
 0x26d   :  { %1672 = vst.msk [vmem:[#allocation2 + $0x259] sm:$0xff] %vm18886_vm2, %v1607_v0  ;;  %1673 = vst.msk [vmem:[#allocation2 + $0x261] sm:$0xff] %vm18886_vm2, %v1608_v31  ;;  %v1614_v50 = vsel %vm1486_vm6, %v19075_v43, %v19074_v48  ;;  %v1615_v46 = vsel %vm19077_vm5, %v19076_v15, %v13526_v12  ;;  %vm19080_vm1 = vcmp.ge.f32.partialorder %v19079_v23, 0.0  ;;  %vm19083_vm15 = vcmp.ge.f32.partialorder %v19082_v24, 0.0  ;;  %v1794_v12 = vld [vmem:[#allocation2 + $0x49] sm:$0xff]  ;;  %v1795_v26 = vld [vmem:[#allocation2 + $0x51] sm:$0xff] }
 0x26e   :  { %1674 = vst.msk [vmem:[#allocation2 + $0x271] sm:$0xff] %vm18886_vm2, %v1609_v1  ;;  %v1616_v54 = vsel %vm19080_vm1, %v19079_v23, %v19078_v53  ;;  %v1617_v35 = vsel %vm19083_vm15, %v19082_v24, %v19081_v51  ;;  %1675 = vst.msk [vmem:[#allocation2 + $0x279] sm:$0xff] %vm18886_vm2, %v1610_v42  ;;  %v19084_v49 = vld [vmem:[#allocation18_spill] sm:$0xff]  ;;  %v19085_v63 = vld [vmem:[#allocation20_spill] sm:$0xff]  ;;  %v19095_v48 = vmov 0  }
 0x26f   :  { %1676 = vst.msk [vmem:[#allocation2 + $0x289] sm:$0xff] %vm18886_vm2, %v1611_v25  ;;  %1677 = vst.msk [vmem:[#allocation2 + $0x291] sm:$0xff] %vm18886_vm2, %v1612_v10  ;;  %v1618_v16 = vsel %vm1490_vm7, %v19084_v49, %v13544_v22  ;;  %vm19086_vm6 = vcmp.ge.f32.partialorder %v19085_v63, 0.0  ;;  %v19087_v18 = vld [vmem:[#allocation40_spill] sm:$0xff]  ;;  %v19088_v20 = vld [vmem:[#allocation19_spill] sm:$0xff]  ;;  %vm19094_vm7 = vcmp.ge.f32.partialorder %v19037_v55, 0.0 }
 0x270   :  { %1678 = vst.msk [vmem:[#allocation2 + $0x2a1] sm:$0xff] %vm18886_vm2, %v1613_v37  ;;  %v1619_v33 = vsel %vm19086_vm6, %v19085_v63, %v13547_v14  ;;  %vm19089_vm11 = vcmp.ge.f32.partialorder %v19088_v20, 0.0  ;;  %v19090_v28 = vld [vmem:[#allocation21_spill] sm:$0xff]  ;;  %1679 = vst.msk [vmem:[#allocation2 + $0x2a9] sm:$0xff] %vm18886_vm2, %v1614_v50  ;;  %v19092_v14 = vld [vmem:[#allocation22_spill] sm:$0xff]  ;;  %v1626_v7 = vsel %vm19094_vm7, %v19037_v55, %v13579_v57 }
 0x271   :  { %v1620_v36 = vsel %vm19089_vm11, %v19088_v20, %v19087_v18  ;;  %vm19091_vm3 = vcmp.ge.f32.partialorder %v19090_v28, 0.0  ;;  %1680 = vst.msk [vmem:[#allocation2 + $0x2b9] sm:$0xff] %vm18886_vm2, %v1615_v46  ;;  %1681 = vst.msk [vmem:[#allocation2 + $0x2c1] sm:$0xff] %vm18886_vm2, %v1616_v54  ;;  %v1622_v22 = vsel %vm1494_vm8, %v19092_v14, %v13565_v62  ;;  %v19093_v45 = vld [vmem:[#allocation24_spill] sm:$0xff]  ;;  %v1986_v62 = vld [vmem:[#allocation2 + $0x60] sm:$0xff] }
 0x272   :  { %v1621_v4 = vsel %vm19091_vm3, %v19090_v28, %v13562_v13  ;;  %1682 = vst.msk [vmem:[#allocation2 + $0x2d1] sm:$0xff] %vm18886_vm2, %v1617_v35  ;;  %v1623_v2 = vsel %vm1495_vm12, %v19093_v45, %v13568_v61  ;;  %v1625_v13 = vsel %vm1497_vm14, %v19036_v34, %v13576_v60  ;;  %1683 = vst.msk [vmem:[#allocation2 + $0x2d9] sm:$0xff] %vm18886_vm2, %v1618_v16  ;;  %v1987_v55 = vld [vmem:[#allocation2 + $0x68] sm:$0xff]  ;;  %v1988_v59 = vld [vmem:[#allocation2 + $0x78] sm:$0xff] }
 0x273   :  { %1684 = vst.msk [vmem:[#allocation2 + $0x2e9] sm:$0xff] %vm18886_vm2, %v1619_v33  ;;  %1685 = vst.msk [vmem:[#allocation2 + $0x2f1] sm:$0xff] %vm18886_vm2, %v1620_v36  ;;  %v13792_v34 = vpack.c.bf16 %v1985_v58, %v1984_v30  ;;  %v13794_v61 = vpack.c.bf16 %v1795_v26, %v1794_v12  ;;  %v1796_v60 = vld [vmem:[#allocation2 + $0x61] sm:$0xff]  ;;  %v1797_v57 = vld [vmem:[#allocation2 + $0x69] sm:$0xff]  ;;  %v13800_v29 = vpack.c.bf16 %v1987_v55, %v1986_v62 }
 0x274   :  { %1686 = vst.msk [vmem:[#allocation2 + $0x301] sm:$0xff] %vm18886_vm2, %v1621_v4  ;;  %1687 = vst.msk [vmem:[#allocation2 + $0x309] sm:$0xff] %vm18886_vm2, %v1622_v22  ;;  %v13802_v52 = vpack.c.bf16 %v1797_v57, %v1796_v60  ;;  %v1989_v6 = vld [vmem:[#allocation2 + $0x80] sm:$0xff]  ;;  %v1990_v17 = vld [vmem:[#allocation2 + $0x90] sm:$0xff] }
 0x275   :  { %1688 = vst.msk [vmem:[#allocation2 + $0x319] sm:$0xff] %vm18886_vm2, %v1623_v2  ;;  %1690 = vst.msk [vmem:[#allocation2 + $0x331] sm:$0xff] %vm18886_vm2, %v1625_v13  ;;  %2689 = vrot.lane.b32.xlu0 %v13792_v34, %s11477_s26  ;;  %2595 = vrot.lane.b32.xlu1 %v13794_v61, %s11477_s26  ;;  %v1798_v3 = vld [vmem:[#allocation2 + $0x79] sm:$0xff]  ;;  %v1799_v9 = vld [vmem:[#allocation2 + $0x81] sm:$0xff]  ;;  %v13808_v40 = vpack.c.bf16 %v1989_v6, %v1988_v59 }
 0x276   :  { %1691 = vst.msk [vmem:[#allocation2 + $0x339] sm:$0xff] %vm18886_vm2, %v1626_v7  ;;  %v13810_v38 = vpack.c.bf16 %v1799_v9, %v1798_v3  ;;  %v1991_v27 = vld [vmem:[#allocation2 + $0x98] sm:$0xff]  ;;  %v1992_v0 = vld [vmem:[#allocation2 + $0xa8] sm:$0xff]  ;;  %v1993_v21 = vld [vmem:[#allocation2 + $0xb0] sm:$0xff] }
 0x277   :  { %v1800_v32 = vld [vmem:[#allocation2 + $0x91] sm:$0xff]  ;;  %v1801_v8 = vld [vmem:[#allocation2 + $0x99] sm:$0xff]  ;;  %v2049_v56 = vpack.c.bf16 %v1991_v27, %v1990_v17  ;;  %v1802_v31 = vld [vmem:[#allocation2 + $0xa9] sm:$0xff]  ;;  %v2050_v1 = vpack.c.bf16 %v1993_v21, %v1992_v0 }
 0x278   :  { %v13816_v44 = vpack.c.bf16 %v1801_v8, %v1800_v32  ;;  %v1803_v5 = vld [vmem:[#allocation2 + $0xb1] sm:$0xff]  ;;  %v1994_v42 = vld [vmem:[#allocation2 + $0xc0] sm:$0xff]  ;;  %v1995_v25 = vld [vmem:[#allocation2 + $0xc8] sm:$0xff] }
 0x279   :  { %2691 = vrot.lane.b32.xlu0 %v13800_v29, %s11477_s26  ;;  %2597 = vrot.lane.b32.xlu1 %v13802_v52, %s11477_s26  ;;  %v13821_v47 = vpack.c.bf16 %v1803_v5, %v1802_v31  ;;  %v11182_v11 = vld [vmem:[%s18745_s5 + $0x50] sm:$0xff]   ;;  %v1804_v39 = vld [vmem:[#allocation2 + $0xc1] sm:$0xff]  ;;  %v2051_v41 = vpack.c.bf16 %v1995_v25, %v1994_v42  ;;  %v1996_v30 = vld [vmem:[#allocation2 + $0xd8] sm:$0xff] }
 0x27a   :  { %v1805_v10 = vld [vmem:[#allocation2 + $0xc9] sm:$0xff]  ;;  %3871 = vmatpush2.bf16.msra.mxu1 %v11182_v11  ;;  %v1997_v43 = vld [vmem:[#allocation2 + $0xe0] sm:$0xff]  ;;  %v11186_v53 = vld [vmem:[%s18745_s5 + $0xb8] sm:$0xff]  }
 0x27b   :  { %v11183_v19 = vld [vmem:[%s18745_s5 + $0x48] sm:$0xff]   ;;  %v13832_v37 = vpack.c.bf16 %v1805_v10, %v1804_v39  ;;  %3872 = vmatprep.subr.bf16.mxu1 %v19095_v48  ;;  %v1806_v50 = vld [vmem:[#allocation2 + $0xd9] sm:$0xff]  ;;  %v2052_v23 = vpack.c.bf16 %v1997_v43, %v1996_v30  ;;  %v1998_v51 = vld [vmem:[#allocation2 + $0xf0] sm:$0xff]  ;;  %4134 = vmatpush1.bf16.msra.mxu0 %v11186_v53 }
 0x27c   :  { %v1807_v15 = vld [vmem:[#allocation2 + $0xe1] sm:$0xff]  ;;  %v1999_v24 = vld [vmem:[#allocation2 + $0xf8] sm:$0xff]  ;;  %v11187_v26 = vld [vmem:[%s18745_s5 + $0xb0] sm:$0xff]   ;;  %4135 = vmatprep.subr.bf16.mxu0 %v19095_v48 }
 0x27d   :  { %2693 = vrot.lane.b32.xlu0 %v13808_v40, %s11477_s26  ;;  %2599 = vrot.lane.b32.xlu1 %v13810_v38, %s11477_s26  ;;  %v11184_v46 = vld [vmem:[%s18745_s5 + $0x40] sm:$0xff]   ;;  %v13844_v54 = vpack.c.bf16 %v1807_v15, %v1806_v50  ;;  %v13850_v35 = vld [vmem:[%s18745_s5 + $0x118] sm:$0xff]   ;;  %v2053_v49 = vpack.c.bf16 %v1999_v24, %v1998_v51  ;;  %v2000_v63 = vld [vmem:[#allocation2 + $0x108] sm:$0xff] }
 0x27e   :  { %3873 = vmatpush2.bf16.msra.mxu1 %v11183_v19  ;;  %v1808_v58 = vld [vmem:[#allocation2 + $0xf1] sm:$0xff]  ;;  %v1809_v12 = vld [vmem:[#allocation2 + $0xf9] sm:$0xff]  ;;  %v1810_v18 = vld [vmem:[#allocation2 + $0x109] sm:$0xff] }
 0x27f   :  { %3874 = vmatprep.subr.bf16.mxu1 %v19095_v48  ;;  %v13859_v16 = vpack.c.bf16 %v1809_v12, %v1808_v58  ;;  %v2001_v33 = vld [vmem:[#allocation2 + $0x110] sm:$0xff]  ;;  %4136 = vmatpush1.bf16.msra.mxu0 %v11187_v26  ;;  %v11188_v36 = vld [vmem:[%s18745_s5 + $0xa8] sm:$0xff]   ;;  %v2002_v14 = vld [vmem:[#allocation2 + $0x120] sm:$0xff] }
 0x280   :  { %v1811_v20 = vld [vmem:[#allocation2 + $0x111] sm:$0xff]  ;;  %4137 = vmatprep.subr.bf16.mxu0 %v19095_v48  ;;  %v2054_v28 = vpack.c.bf16 %v2001_v33, %v2000_v63  ;;  %v2003_v22 = vld [vmem:[#allocation2 + $0x128] sm:$0xff]  ;;  %v11189_v13 = vld [vmem:[%s18745_s5 + $0xa0] sm:$0xff]  }
 0x281   :  { %2695 = vrot.lane.b32.xlu0 %v2049_v56, %s11477_s26  ;;  %2601 = vrot.lane.b32.xlu1 %v13816_v44, %s11477_s26  ;;  %v13869_v4 = vpack.c.bf16 %v1811_v20, %v1810_v18  ;;  %v1812_v45 = vld [vmem:[#allocation2 + $0x121] sm:$0xff]  ;;  %v1813_v2 = vld [vmem:[#allocation2 + $0x129] sm:$0xff]  ;;  %v2055_v7 = vpack.c.bf16 %v2003_v22, %v2002_v14  ;;  %v2004_v55 = vld [vmem:[#allocation2 + $0x138] sm:$0xff] }
 0x282   :  { %3875 = vmatpush2.bf16.msra.mxu1 %v11184_v46  ;;  %v13878_v62 = vpack.c.bf16 %v1813_v2, %v1812_v45  ;;  %v2005_v60 = vld [vmem:[#allocation2 + $0x140] sm:$0xff]  ;;  %v11190_v6 = vld [vmem:[%s18745_s5 + $0x98] sm:$0xff]   ;;  %v2006_v17 = vld [vmem:[#allocation2 + $0x150] sm:$0xff] }
 0x283   :  { %11001 = vmatprep.subr.bf16.mxu1 %v13850_v35  ;;  %4138 = vmatpush1.bf16.msra.mxu0 %v11188_v36  ;;  %v1814_v57 = vld [vmem:[#allocation2 + $0x139] sm:$0xff]  ;;  %v1815_v59 = vld [vmem:[#allocation2 + $0x141] sm:$0xff]  ;;  %v2056_v3 = vpack.c.bf16 %v2005_v60, %v2004_v55  ;;  %v1816_v32 = vld [vmem:[#allocation2 + $0x151] sm:$0xff] }
 0x284   :  { %4139 = vmatprep.subr.bf16.mxu0 %v19095_v48  ;;  %v13887_v9 = vpack.c.bf16 %v1815_v59, %v1814_v57  ;;  %v2007_v27 = vld [vmem:[#allocation2 + $0x158] sm:$0xff]  ;;  %v11191_v56 = vld [vmem:[%s18745_s5 + $0x90] sm:$0xff]   ;;  %v2008_v31 = vld [vmem:[#allocation2 + $0x168] sm:$0xff] }
 0x285   :  { %2697 = vrot.lane.b32.xlu0 %v2050_v1, %s11477_s26  ;;  %2603 = vrot.lane.b32.xlu1 %v13821_v47, %s11477_s26  ;;  %v1817_v8 = vld [vmem:[#allocation2 + $0x159] sm:$0xff]  ;;  %v2057_v0 = vpack.c.bf16 %v2007_v27, %v2006_v17  ;;  %v2009_v5 = vld [vmem:[#allocation2 + $0x170] sm:$0xff]  ;;  %v11192_v11 = vld [vmem:[%s18745_s5 + $0x88] sm:$0xff]  }
 0x286   :  { %v13896_v21 = vpack.c.bf16 %v1817_v8, %v1816_v32  ;;  %v1818_v1 = vld [vmem:[#allocation2 + $0x169] sm:$0xff]  ;;  %v1819_v42 = vld [vmem:[#allocation2 + $0x171] sm:$0xff]  ;;  %v1821_v39 = vld [vmem:[#allocation2 + $0x1b9] sm:$0xff]  ;;  %v2058_v10 = vpack.c.bf16 %v2009_v5, %v2008_v31 }
 0x287   :  { %4140 = vmatpush1.bf16.msra.mxu0 %v11189_v13  ;;  %v1820_v25 = vld [vmem:[#allocation2 + $0x1b1] sm:$0xff]  ;;  %v13905_v19 = vpack.c.bf16 %v1819_v42, %v1818_v1  ;;  %v2011_v30 = vld [vmem:[#allocation2 + $0x188] sm:$0xff]  ;;  %v11193_v43 = vld [vmem:[%s18745_s5 + $0x80] sm:$0xff]  }
 0x288   :  { %4141 = vmatprep.subr.bf16.mxu0 %v19095_v48  ;;  %v1868_v50 = vpack.c.bf16 %v1821_v39, %v1820_v25  ;;  %v2172_v46 = vld [vmem:[#allocation2 + $0x1a] sm:$0xff]  ;;  %v2173_v53 = vld [vmem:[#allocation2 + $0x22] sm:$0xff]  ;;  %v2013_v51 = vld [vmem:[#allocation2 + $0x1d0] sm:$0xff] }
 0x289   :  { %2699 = vrot.lane.b32.xlu0 %v2051_v41, %s11477_s26  ;;  %2605 = vrot.lane.b32.xlu1 %v13832_v37, %s11477_s26  ;;  %v2010_v41 = vld [vmem:[#allocation2 + $0x180] sm:$0xff]  ;;  %v11194_v24 = vld [vmem:[%s18745_s5 + $0xf8] sm:$0xff]   ;;  %v13920_v12 = vpack.c.bf16 %v2173_v53, %v2172_v46  ;;  %v1822_v26 = vld [vmem:[#allocation2 + $0x1c9] sm:$0xff] }
 0x28a   :  { %v2059_v15 = vpack.c.bf16 %v2011_v30, %v2010_v41  ;;  %v11195_v63 = vld [vmem:[%s18745_s5 + $0xf0] sm:$0xff]   ;;  %v2175_v20 = vld [vmem:[#allocation2 + $0x3a] sm:$0xff]  ;;  %v11196_v14 = vld [vmem:[%s18745_s5 + $0xe8] sm:$0xff]  }
 0x28b   :  { %4142 = vmatpush1.bf16.msra.mxu0 %v11190_v6  ;;  %v2174_v18 = vld [vmem:[#allocation2 + $0x32] sm:$0xff]  ;;  %v2014_v36 = vld [vmem:[#allocation2 + $0x1e0] sm:$0xff]  ;;  %v2176_v6 = vld [vmem:[#allocation2 + $0x4a] sm:$0xff] }
 0x28c   :  { %4143 = vmatprep.subr.bf16.mxu0 %v19095_v48  ;;  %v19096_v22 = vld [vmem:[#allocation26_spill] sm:$0xff]  ;;  %v13936_v2 = vpack.c.bf16 %v2175_v20, %v2174_v18  ;;  %v2016_v57 = vld [vmem:[#allocation2 + $0x1f8] sm:$0xff]  ;;  %v1885_v31 = vld [vmem:[#allocation2 + $0xa] sm:$0xff] }
 0x28d   :  { %2701 = vrot.lane.b32.xlu0 %v2052_v23, %s11477_s26  ;;  %2607 = vrot.lane.b32.xlu1 %v13844_v54, %s11477_s26  ;;  %v2012_v23 = vld [vmem:[#allocation2 + $0x1c8] sm:$0xff]  ;;  %v11197_v55 = vld [vmem:[%s18745_s5 + $0xe0] sm:$0xff]   ;;  %v11198_v17 = vld [vmem:[%s18745_s5 + $0xd8] sm:$0xff]  }
 0x28e   :  { %v2060_v58 = vpack.c.bf16 %v2013_v51, %v2012_v23  ;;  %v1824_v13 = vld [vmem:[#allocation2 + $0x1e1] sm:$0xff]  ;;  %v1826_v8 = vld [vmem:[#allocation2 + $0x1f9] sm:$0xff]  ;;  %v2018_v1 = vld [vmem:[#allocation2 + $0x210] sm:$0xff] }
 0x28f   :  { %4144 = vmatpush1.bf16.msra.mxu0 %v11191_v56  ;;  %v2017_v59 = vld [vmem:[#allocation2 + $0x200] sm:$0xff]  ;;  %v2019_v42 = vld [vmem:[#allocation2 + $0x218] sm:$0xff]  ;;  %v2179_v25 = vld [vmem:[#allocation2 + $0x6a] sm:$0xff] }
 0x290   :  { %4145 = vmatprep.subr.bf16.mxu0 %v19095_v48  ;;  %v2062_v27 = vpack.c.bf16 %v2017_v59, %v2016_v57  ;;  %v1827_v56 = vld [vmem:[#allocation2 + $0x201] sm:$0xff]  ;;  %v1829_v46 = vld [vmem:[#allocation2 + $0x219] sm:$0xff]  ;;  %v11202_v20 = vld [vmem:[%s18745_s5 + $0x110] sm:$0xff]  }
 0x291   :  { %2703 = vrot.lane.b32.xlu0 %v2053_v49, %s11477_s26  ;;  %2609 = vrot.lane.b32.xlu1 %v13859_v16, %s11477_s26  ;;  %v1823_v49 = vld [vmem:[#allocation2 + $0x1d1] sm:$0xff]  ;;  %v13964_v5 = vpack.c.bf16 %v1827_v56, %v1826_v8  ;;  %v11200_v39 = vld [vmem:[%s18745_s5 + $0xc8] sm:$0xff]   ;;  %v1692_v41 = vld [vmem:[#allocation2] sm:$0xff] }
 0x292   :  { %v1869_v33 = vpack.c.bf16 %v1823_v49, %v1822_v26  ;;  %v1693_v30 = vld [vmem:[#allocation2 + $0x8] sm:$0xff]  ;;  %v11201_v23 = vld [vmem:[%s18745_s5 + $0xc0] sm:$0xff]   ;;  %v2021_v26 = vld [vmem:[#allocation2 + $0x230] sm:$0xff] }
 0x293   :  { %4146 = vmatpush1.bf16.msra.mxu0 %v11192_v11  ;;  %v2178_v11 = vld [vmem:[#allocation2 + $0x62] sm:$0xff]  ;;  %v1756_v51 = vpack.c.bf16 %v1693_v30, %v1692_v41  ;;  %v2026_v41 = vld [vmem:[#allocation2 + $0x270] sm:$0xff]  ;;  %v2027_v30 = vld [vmem:[#allocation2 + $0x278] sm:$0xff] }
 0x294   :  { %4147 = vmatprep.subr.bf16.mxu0 %v19095_v48  ;;  %v2023_v59 = vld [vmem:[#allocation2 + $0x248] sm:$0xff] }
 0x295   :  { %2705 = vrot.lane.b32.xlu0 %v2054_v28, %s11477_s26  ;;  %2611 = vrot.lane.b32.xlu1 %v13869_v4, %s11477_s26  ;;  %v2015_v28 = vld [vmem:[#allocation2 + $0x1e8] sm:$0xff] }
 0x296   :  { %v2061_v45 = vpack.c.bf16 %v2015_v28, %v2014_v36  ;;  %v1832_v8 = vld [vmem:[#allocation2 + $0x241] sm:$0xff]  ;;  %v1833_v56 = vld [vmem:[#allocation2 + $0x249] sm:$0xff] }
 0x297   :  { %4148 = vmatpush1.bf16.msra.mxu0 %v11193_v43  ;;  %v2063_v43 = vpack.c.bf16 %v2019_v42, %v2018_v1  ;;  %v2185_v1 = vld [vmem:[#allocation2 + $0xb2] sm:$0xff] }
 0x298   :  { %4149 = vmatprep.subr.bf16.mxu0 %v19095_v48 }
 0x299   :  { %2707 = vrot.lane.b32.xlu0 %v2055_v7, %s11477_s26  ;;  %2613 = vrot.lane.b32.xlu1 %v13878_v62, %s11477_s26  ;;  %v1825_v7 = vld [vmem:[#allocation2 + $0x1e9] sm:$0xff] }
 0x29a   :  { %v13945_v60 = vpack.c.bf16 %v1825_v7, %v1824_v13  ;;  %v1831_v13 = vld [vmem:[#allocation2 + $0x231] sm:$0xff]  ;;  %v1695_v7 = vld [vmem:[#allocation2 + $0x20] sm:$0xff] }
 0x29b   :  { %4150 = vmatpush2.bf16.msra.mxu0 %v11194_v24 }
 0x29c   :  { %4151 = vmatprep.subr.bf16.mxu0 %v19095_v48 }
 0x29d   :  { %2709 = vrot.lane.b32.xlu0 %v2056_v3, %s11477_s26  ;;  %2615 = vrot.lane.b32.xlu1 %v13887_v9, %s11477_s26  ;;  %v2177_v3 = vld [vmem:[#allocation2 + $0x52] sm:$0xff] }
 0x29e   :  { %v13955_v32 = vpack.c.bf16 %v2177_v3, %v2176_v6  ;;  %v2182_v6 = vld [vmem:[#allocation2 + $0x92] sm:$0xff] }
 0x29f   :  { %4152 = vmatpush2.bf16.msra.mxu0 %v11195_v63  ;;  %v2180_v63 = vld [vmem:[#allocation2 + $0x7a] sm:$0xff] }
 0x2a0   :  { %4153 = vmatprep.subr.bf16.mxu0 %v19095_v48 }
 0x2a1   :  { %2711 = vrot.lane.b32.xlu0 %v2057_v0, %s11477_s26  ;;  %2617 = vrot.lane.b32.xlu1 %v13896_v21, %s11477_s26  ;;  %v11199_v0 = vld [vmem:[%s18745_s5 + $0xd0] sm:$0xff]  }
 0x2a3   :  { %4154 = vmatpush2.bf16.msra.mxu0 %v11196_v14  ;;  %v2688_v49 = vpop.permute.xlu1 %2687 }
 0x2a4   :  { %4155 = vmatprep.subr.bf16.mxu0 %v19095_v48  ;;  %v3075_v36 = vsel %vm18886_vm2, %v13920_v12, %v2688_v49 }
 0x2a5   :  { %2713 = vrot.lane.b32.xlu0 %v2058_v10, %s11477_s26  ;;  %2619 = vrot.lane.b32.xlu1 %v13905_v19, %s11477_s26 }
 0x2a7   :  { %4156 = vmatpush2.bf16.msra.mxu0 %v11197_v55 }
 0x2a8   :  { %4157 = vmatprep.subr.bf16.mxu0 %v19095_v48 }
 0x2a9   :  { %2715 = vrot.lane.b32.xlu0 %v2059_v15, %s11477_s26  ;;  %2621 = vrot.lane.b32.xlu1 %v1868_v50, %s11477_s26  ;;  %v13974_v50 = vpack.c.bf16 %v2179_v25, %v2178_v11  ;;  %v1828_v15 = vld [vmem:[#allocation2 + $0x211] sm:$0xff]  ;;  %v1834_v25 = vld [vmem:[#allocation2 + $0x259] sm:$0xff] }
 0x2aa   :  { %v13984_v24 = vpack.c.bf16 %v1829_v46, %v1828_v15  ;;  %v2187_v15 = vld [vmem:[#allocation2 + $0xca] sm:$0xff]  ;;  %v2067_v46 = vpack.c.bf16 %v2027_v30, %v2026_v41  ;;  %v2032_v41 = vld [vmem:[#allocation2 + $0x2b8] sm:$0xff]  ;;  %v2033_v30 = vld [vmem:[#allocation2 + $0x2c0] sm:$0xff] }
 0x2ab   :  { %4158 = vmatpush2.bf16.msra.mxu0 %v11198_v17 }
 0x2ac   :  { %4159 = vmatprep.subr.bf16.mxu0 %v19095_v48 }
 0x2ad   :  { %2717 = vrot.lane.b32.xlu0 %v2060_v58, %s11477_s26  ;;  %2781 = vrot.lane.b32.xlu1 %v13920_v12, %s11477_s26  ;;  %v2020_v58 = vld [vmem:[#allocation2 + $0x228] sm:$0xff]  ;;  %v2022_v12 = vld [vmem:[#allocation2 + $0x240] sm:$0xff] }
 0x2ae   :  { %v2064_v28 = vpack.c.bf16 %v2021_v26, %v2020_v58  ;;  %v2065_v17 = vpack.c.bf16 %v2023_v59, %v2022_v12  ;;  %v1696_v58 = vld [vmem:[#allocation2 + $0x30] sm:$0xff] }
 0x2af   :  { %4160 = vmatpush2.bf16.msra.mxu0 %v11199_v0  ;;  %v14014_v0 = vpack.c.bf16 %v1833_v56, %v1832_v8  ;;  %v1838_v12 = vld [vmem:[#allocation2 + $0x289] sm:$0xff]  ;;  %v2191_v8 = vld [vmem:[#allocation2 + $0xfa] sm:$0xff] }
 0x2b0   :  { %4161 = vmatprep.subr.bf16.mxu0 %v19095_v48 }
 0x2b1   :  { %2877 = vrot.lane.b32.xlu0 %v19096_v22, %s11477_s26  ;;  %2623 = vrot.lane.b32.xlu1 %v1869_v33, %s11477_s26  ;;  %v2181_v33 = vld [vmem:[#allocation2 + $0x82] sm:$0xff]  ;;  %v1694_v22 = vld [vmem:[#allocation2 + $0x18] sm:$0xff] }
 0x2b2   :  { %v13996_v14 = vpack.c.bf16 %v2181_v33, %v2180_v63  ;;  %v1757_v57 = vpack.c.bf16 %v1695_v7, %v1694_v22  ;;  %v2028_v33 = vld [vmem:[#allocation2 + $0x288] sm:$0xff] }
 0x2b3   :  { %4162 = vmatpush2.bf16.msra.mxu0 %v11200_v39  ;;  %v1835_v39 = vld [vmem:[#allocation2 + $0x261] sm:$0xff] }
 0x2b4   :  { %4163 = vmatprep.subr.bf16.mxu0 %v19095_v48 }
 0x2b5   :  { %2719 = vrot.lane.b32.xlu0 %v2061_v45, %s11477_s26  ;;  %2783 = vrot.lane.b32.xlu1 %v13936_v2, %s11477_s26  ;;  %v2686_v53 = vpop.permute.xlu0 %2685  ;;  %v1830_v45 = vld [vmem:[#allocation2 + $0x229] sm:$0xff] }
 0x2b6   :  { %v14002_v55 = vpack.c.bf16 %v1831_v13, %v1830_v45 }
 0x2b7   :  { %4164 = vmatpush2.bf16.msra.mxu0 %v11201_v23  ;;  %v11203_v23 = vld [vmem:[%s18745_s5 + $0x108] sm:$0xff]  }
 0x2b9   :  { %2879 = vrot.lane.b32.xlu0 %v13794_v61, %s11477_s26  ;;  %2625 = vrot.lane.b32.xlu1 %v13945_v60, %s11477_s26  ;;  %v1884_v61 = vld [vmem:[#allocation2 + $0x2] sm:$0xff]  ;;  %v2590_v18 = vpop.permute.xlu0 %2589 }
 0x2ba   :  { %v1948_v10 = vpack.c.bf16 %v1885_v31, %v1884_v61  ;;  %v2943_v48 = vsel %vm18886_vm2, %v1756_v51, %v2590_v18  ;;  %v2024_v61 = vld [vmem:[#allocation2 + $0x258] sm:$0xff]  ;;  %v2184_v31 = vld [vmem:[#allocation2 + $0xaa] sm:$0xff] }
 0x2bb   :  { %v14020_v11 = vpack.c.bf16 %v2185_v1, %v2184_v31  ;;  %v1837_v51 = vld [vmem:[#allocation2 + $0x279] sm:$0xff]  ;;  %v2029_v18 = vld [vmem:[#allocation2 + $0x290] sm:$0xff] }
 0x2bc   :  { %v2068_v13 = vpack.c.bf16 %v2029_v18, %v2028_v33  ;;  %v2035_v33 = vld [vmem:[#allocation2 + $0x2d8] sm:$0xff]  ;;  %v2194_v18 = vld [vmem:[#allocation2 + $0x122] sm:$0xff] }
 0x2bd   :  { %2721 = vrot.lane.b32.xlu0 %v2062_v27, %s11477_s26  ;;  %2785 = vrot.lane.b32.xlu1 %v13955_v32, %s11477_s26 }
 0x2c1   :  { %2881 = vrot.lane.b32.xlu0 %v13802_v52, %s11477_s26  ;;  %2627 = vrot.lane.b32.xlu1 %v13964_v5, %s11477_s26  ;;  %v3071_v52 = vsel %vm18886_vm2, %v1948_v10, %v2686_v53  ;;  %v14025_v10 = vpack.c.bf16 %v1835_v39, %v1834_v25  ;;  %v1841_v25 = vld [vmem:[#allocation2 + $0x2a9] sm:$0xff] }
 0x2c2   :  { %3876 = vmatprep.mubr.bf16.mxu1 %v3071_v52  ;;  %v1836_v52 = vld [vmem:[#allocation2 + $0x271] sm:$0xff] }
 0x2c3   :  { %3877 = vmatmul.mubr.bf16.vlgmr.msra.gmra.mxu1 %v2943_v48  ;;  %v14039_v63 = vpack.c.bf16 %v1837_v51, %v1836_v52  ;;  %v2189_v48 = vld [vmem:[#allocation2 + $0xe2] sm:$0xff] }
 0x2c4   :  { %11002 = vmatpush3.bf16.msra.mxu1 %v13850_v35  ;;  %3884 = vmatprep.mubr.bf16.mxu1 %v3075_v36  ;;  %v2183_v35 = vld [vmem:[#allocation2 + $0x9a] sm:$0xff] }
 0x2c5   :  { %2723 = vrot.lane.b32.xlu0 %v2063_v43, %s11477_s26  ;;  %2787 = vrot.lane.b32.xlu1 %v13974_v50, %s11477_s26  ;;  %v14009_v27 = vpack.c.bf16 %v2183_v35, %v2182_v6  ;;  %v2186_v43 = vld [vmem:[#allocation2 + $0xc2] sm:$0xff] }
 0x2c6   :  { %11003 = vmatprep.subr.bf16.mxu1 %v11202_v20  ;;  %v14031_v53 = vpack.c.bf16 %v2187_v15, %v2186_v43  ;;  %v2030_v35 = vld [vmem:[#allocation2 + $0x2a0] sm:$0xff]  ;;  %v2192_v43 = vld [vmem:[#allocation2 + $0x10a] sm:$0xff]  ;;  %v2193_v15 = vld [vmem:[#allocation2 + $0x112] sm:$0xff] }
 0x2c7   :  { %v14087_v52 = vpack.c.bf16 %v2193_v15, %v2192_v43  ;;  %v2038_v15 = vld [vmem:[#allocation2 + $0x300] sm:$0xff] }
 0x2c8   :  { %11004 = vmatpush3.bf16.msra.mxu1 %v11202_v20  ;;  %v2188_v20 = vld [vmem:[#allocation2 + $0xda] sm:$0xff] }
 0x2c9   :  { %2883 = vrot.lane.b32.xlu0 %v13810_v38, %s11477_s26  ;;  %2629 = vrot.lane.b32.xlu1 %v13984_v24, %s11477_s26  ;;  %v2592_v38 = vpop.permute.xlu1 %2591 }
 0x2ca   :  { %v2947_v3 = vsel %vm18886_vm2, %v1757_v57, %v2592_v38  ;;  %11005 = vmatprep.subr.bf16.mxu1 %v11203_v23  ;;  %v14051_v38 = vpack.c.bf16 %v2189_v48, %v2188_v20  ;;  %v1839_v57 = vld [vmem:[#allocation2 + $0x291] sm:$0xff] }
 0x2cb   :  { %3885 = vmatmul.mubr.bf16.gmra.mxu1 %v2947_v3  ;;  %v14058_v6 = vpack.c.bf16 %v1839_v57, %v1838_v12  ;;  %v2031_v3 = vld [vmem:[#allocation2 + $0x2a8] sm:$0xff]  ;;  %v1845_v12 = vld [vmem:[#allocation2 + $0x2d9] sm:$0xff] }
 0x2cc   :  { %11006 = vmatpush3.bf16.msra.mxu1 %v11203_v23  ;;  %v2195_v20 = vld [vmem:[#allocation2 + $0x12a] sm:$0xff] }
 0x2cd   :  { %2725 = vrot.lane.b32.xlu0 %v2064_v28, %s11477_s26  ;;  %2789 = vrot.lane.b32.xlu1 %v13996_v14, %s11477_s26 }
 0x2d1   :  { %2885 = vrot.lane.b32.xlu0 %v13816_v44, %s11477_s26  ;;  %2631 = vrot.lane.b32.xlu1 %v14002_v55, %s11477_s26  ;;  %v2025_v44 = vld [vmem:[#allocation2 + $0x260] sm:$0xff] }
 0x2d2   :  { %v2066_v42 = vpack.c.bf16 %v2025_v44, %v2024_v61 }
 0x2d5   :  { %2727 = vrot.lane.b32.xlu0 %v2065_v17, %s11477_s26  ;;  %2791 = vrot.lane.b32.xlu1 %v14009_v27, %s11477_s26  ;;  %v2190_v17 = vld [vmem:[#allocation2 + $0xf2] sm:$0xff] }
 0x2d6   :  { %v14068_v31 = vpack.c.bf16 %v2191_v8, %v2190_v17 }
 0x2d9   :  { %2887 = vrot.lane.b32.xlu0 %v13821_v47, %s11477_s26  ;;  %2633 = vrot.lane.b32.xlu1 %v14014_v0, %s11477_s26  ;;  %v2594_v47 = vpop.permute.xlu1 %2593 }
 0x2dd   :  { %2729 = vrot.lane.b32.xlu0 %v2066_v42, %s11477_s26  ;;  %2793 = vrot.lane.b32.xlu1 %v14020_v11, %s11477_s26  ;;  %v1840_v42 = vld [vmem:[#allocation2 + $0x2a1] sm:$0xff] }
 0x2de   :  { %v14077_v39 = vpack.c.bf16 %v1841_v25, %v1840_v42  ;;  %v1846_v25 = vld [vmem:[#allocation2 + $0x2e9] sm:$0xff] }
 0x2e1   :  { %2889 = vrot.lane.b32.xlu0 %v13832_v37, %s11477_s26  ;;  %2635 = vrot.lane.b32.xlu1 %v14025_v10, %s11477_s26  ;;  %v1697_v37 = vld [vmem:[#allocation2 + $0x38] sm:$0xff] }
 0x2e2   :  { %v14041_v36 = vpack.c.bf16 %v1697_v37, %v1696_v58  ;;  %v1842_v58 = vld [vmem:[#allocation2 + $0x2b9] sm:$0xff]  ;;  %v1843_v37 = vld [vmem:[#allocation2 + $0x2c1] sm:$0xff] }
 0x2e4   :  { %v2951_v22 = vsel %vm18886_vm2, %v14041_v36, %v2594_v47 }
 0x2e5   :  { %2731 = vrot.lane.b32.xlu0 %v2067_v46, %s11477_s26  ;;  %2795 = vrot.lane.b32.xlu1 %v14031_v53, %s11477_s26  ;;  %v2070_v46 = vpack.c.bf16 %v2033_v30, %v2032_v41 }
 0x2e7   :  { %v2690_v26 = vpop.permute.xlu0 %2689  ;;  %v2596_v49 = vpop.permute.xlu1 %2595 }
 0x2e8   :  { %v3079_v28 = vsel %vm18886_vm2, %v13936_v2, %v2690_v26  ;;  %v2955_v56 = vsel %vm18886_vm2, %v13792_v34, %v2596_v49  ;;  %v14098_v26 = vpack.c.bf16 %v1843_v37, %v1842_v58  ;;  %v2034_v49 = vld [vmem:[#allocation2 + $0x2d0] sm:$0xff] }
 0x2e9   :  { %2891 = vrot.lane.b32.xlu0 %v13844_v54, %s11477_s26  ;;  %2637 = vrot.lane.b32.xlu1 %v14039_v63, %s11477_s26 }
 0x2ea   :  { %3892 = vmatprep.mubr.bf16.mxu1 %v3079_v28  ;;  %v2071_v28 = vpack.c.bf16 %v2035_v33, %v2034_v49 }
 0x2eb   :  { %v2692_v45 = vpop.permute.xlu0 %2691  ;;  %v2598_v7 = vpop.permute.xlu1 %2597  ;;  %3893 = vmatmul.mubr.bf16.gmra.mxu1 %v2951_v22 }
 0x2ec   :  { %v3083_v54 = vsel %vm18886_vm2, %v13955_v32, %v2692_v45  ;;  %v2069_v32 = vpack.c.bf16 %v2031_v3, %v2030_v35  ;;  %v14110_v45 = vpack.c.bf16 %v2195_v20, %v2194_v18  ;;  %v2037_v35 = vld [vmem:[#allocation2 + $0x2f0] sm:$0xff]  ;;  %v2196_v3 = vld [vmem:[#allocation2 + $0x13a] sm:$0xff] }
 0x2ed   :  { %2733 = vrot.lane.b32.xlu0 %v2068_v13, %s11477_s26  ;;  %2797 = vrot.lane.b32.xlu1 %v14051_v38, %s11477_s26  ;;  %v1849_v20 = vld [vmem:[#allocation2 + $0x309] sm:$0xff] }
 0x2ee   :  { %3900 = vmatprep.mubr.bf16.mxu1 %v3083_v54 }
 0x2ef   :  { %v2694_v2 = vpop.permute.xlu0 %2693  ;;  %v2600_v59 = vpop.permute.xlu1 %2599 }
 0x2f0   :  { %v3087_v1 = vsel %vm18886_vm2, %v13974_v50, %v2694_v2  ;;  %v2959_v50 = vsel %vm18886_vm2, %v13800_v29, %v2598_v7  ;;  %v1844_v7 = vld [vmem:[#allocation2 + $0x2d1] sm:$0xff] }
 0x2f1   :  { %2893 = vrot.lane.b32.xlu0 %v13859_v16, %s11477_s26  ;;  %2639 = vrot.lane.b32.xlu1 %v14058_v6, %s11477_s26  ;;  %v14121_v2 = vpack.c.bf16 %v1845_v12, %v1844_v7  ;;  %v2040_v12 = vld [vmem:[#allocation2 + $0x318] sm:$0xff] }
 0x2f3   :  { %v2696_v61 = vpop.permute.xlu0 %2695  ;;  %v14066_v44 = vpop.permute.xlu1 %2601  ;;  %3901 = vmatmul.mubr.bf16.gmra.mxu1 %v2955_v56 }
 0x2f4   :  { %3908 = vmatprep.mubr.bf16.mxu1 %v3087_v1  ;;  %v3091_v51 = vsel %vm18886_vm2, %v13996_v14, %v2696_v61  ;;  %v2963_v14 = vsel %vm18886_vm2, %v13808_v40, %v2600_v59  ;;  %v1704_v40 = vld [vmem:[#allocation2 + $0x90] sm:$0xff]  ;;  %v2036_v59 = vld [vmem:[#allocation2 + $0x2e8] sm:$0xff] }
 0x2f5   :  { %2735 = vrot.lane.b32.xlu0 %v2069_v32, %s11477_s26  ;;  %2799 = vrot.lane.b32.xlu1 %v14068_v31, %s11477_s26  ;;  %v2072_v61 = vpack.c.bf16 %v2037_v35, %v2036_v59 }
 0x2f7   :  { %v2698_v16 = vpop.permute.xlu0 %2697  ;;  %v14075_v34 = vpop.permute.xlu1 %2603 }
 0x2f8   :  { %v3095_v13 = vsel %vm18886_vm2, %v14009_v27, %v2698_v16  ;;  %v2197_v27 = vld [vmem:[#allocation2 + $0x142] sm:$0xff]  ;;  %v1707_v16 = vld [vmem:[#allocation2 + $0xb0] sm:$0xff] }
 0x2f9   :  { %2895 = vrot.lane.b32.xlu0 %v13869_v4, %s11477_s26  ;;  %2641 = vrot.lane.b32.xlu1 %v14077_v39, %s11477_s26  ;;  %v14136_v1 = vpack.c.bf16 %v2197_v27, %v2196_v3 }
 0x2fb   :  { %v2700_v47 = vpop.permute.xlu0 %2699  ;;  %v14085_v23 = vpop.permute.xlu1 %2605  ;;  %3909 = vmatmul.mubr.bf16.gmra.mxu1 %v2959_v50  ;;  %v2039_v50 = vld [vmem:[#allocation2 + $0x308] sm:$0xff] }
 0x2fc   :  { %3916 = vmatprep.mubr.bf16.mxu1 %v3091_v51  ;;  %v3099_v42 = vsel %vm18886_vm2, %v14020_v11, %v2700_v47  ;;  %v2199_v11 = vld [vmem:[#allocation2 + $0x15a] sm:$0xff]  ;;  %v2073_v37 = vpack.c.bf16 %v2039_v50, %v2038_v15 }
 0x2fd   :  { %2737 = vrot.lane.b32.xlu0 %v2070_v46, %s11477_s26  ;;  %2801 = vrot.lane.b32.xlu1 %v14087_v52, %s11477_s26  ;;  %v2198_v46 = vld [vmem:[#allocation2 + $0x152] sm:$0xff]  ;;  %v2077_v15 = vld [vmem:[#allocation2 + $0x21] sm:$0xff] }
 0x2fe   :  { %v14162_v33 = vpack.c.bf16 %v2199_v11, %v2198_v46 }
 0x2ff   :  { %v14094_v4 = vpop.permute.xlu0 %2701  ;;  %v14096_v29 = vpop.permute.xlu1 %2607 }
 0x300   :  { %v3103_v18 = vsel %vm18886_vm2, %v14031_v53, %v14094_v4  ;;  %v2201_v53 = vld [vmem:[#allocation2 + $0x172] sm:$0xff] }
 0x301   :  { %2897 = vrot.lane.b32.xlu0 %v13878_v62, %s11477_s26  ;;  %2643 = vrot.lane.b32.xlu1 %v14098_v26, %s11477_s26  ;;  %v1705_v62 = vld [vmem:[#allocation2 + $0x98] sm:$0xff] }
 0x302   :  { %v14123_v17 = vpack.c.bf16 %v1705_v62, %v1704_v40  ;;  %v2041_v40 = vld [vmem:[#allocation2 + $0x320] sm:$0xff]  ;;  %v2200_v62 = vld [vmem:[#allocation2 + $0x16a] sm:$0xff] }
 0x303   :  { %v14106_v48 = vpop.permute.xlu0 %2703  ;;  %v14108_v22 = vpop.permute.xlu1 %2609  ;;  %3917 = vmatmul.mubr.bf16.gmra.mxu1 %v2963_v14  ;;  %v1709_v14 = vld [vmem:[#allocation2 + $0xc8] sm:$0xff]  ;;  %v2074_v3 = vpack.c.bf16 %v2041_v40, %v2040_v12 }
 0x304   :  { %3924 = vmatprep.mubr.bf16.mxu1 %v3095_v13  ;;  %v2967_v8 = vsel %vm18886_vm2, %v14123_v17, %v14066_v44  ;;  %v1706_v44 = vld [vmem:[#allocation2 + $0xa8] sm:$0xff] }
 0x305   :  { %2739 = vrot.lane.b32.xlu0 %v2071_v28, %s11477_s26  ;;  %2803 = vrot.lane.b32.xlu1 %v14110_v45, %s11477_s26  ;;  %v14149_v47 = vpack.c.bf16 %v1707_v16, %v1706_v44  ;;  %v1711_v44 = vld [vmem:[#allocation2 + $0xe0] sm:$0xff] }
 0x306   :  { %v2076_v16 = vld [vmem:[#allocation2 + $0x19] sm:$0xff] }
 0x307   :  { %v14117_v57 = vpop.permute.xlu0 %2705  ;;  %v14119_v54 = vpop.permute.xlu1 %2611  ;;  %v2971_v51 = vsel %vm18886_vm2, %v14149_v47, %v14075_v34  ;;  %v1708_v34 = vld [vmem:[#allocation2 + $0xc0] sm:$0xff] }
 0x308   :  { %v14176_v4 = vpack.c.bf16 %v1709_v14, %v1708_v34  ;;  %v2395_v34 = vld [vmem:[#allocation2 + $0x199] sm:$0xff]  ;;  %v2396_v14 = vld [vmem:[#allocation2 + $0x1a1] sm:$0xff] }
 0x309   :  { %2899 = vrot.lane.b32.xlu0 %v13887_v9, %s11477_s26  ;;  %2645 = vrot.lane.b32.xlu1 %v14121_v2, %s11477_s26  ;;  %v1847_v9 = vld [vmem:[#allocation2 + $0x2f1] sm:$0xff] }
 0x30a   :  { %v14147_v43 = vpack.c.bf16 %v1847_v9, %v1846_v25  ;;  %v2975_v59 = vsel %vm18886_vm2, %v14176_v4, %v14085_v23  ;;  %v2394_v25 = vld [vmem:[#allocation2 + $0x189] sm:$0xff]  ;;  %v1850_v9 = vld [vmem:[#allocation2 + $0x319] sm:$0xff] }
 0x30b   :  { %v14132_v56 = vpop.permute.xlu0 %2707  ;;  %v14134_v32 = vpop.permute.xlu1 %2613  ;;  %3925 = vmatmul.mubr.bf16.gmra.mxu1 %v2967_v8  ;;  %v14189_v8 = vpack.c.bf16 %v2201_v53, %v2200_v62  ;;  %v1710_v23 = vld [vmem:[#allocation2 + $0xd8] sm:$0xff] }
 0x30c   :  { %3932 = vmatprep.mubr.bf16.mxu1 %v3099_v42  ;;  %v2393_v42 = vld [vmem:[#allocation2 + $0x181] sm:$0xff] }
 0x30d   :  { %2741 = vrot.lane.b32.xlu0 %v2072_v61, %s11477_s26  ;;  %2805 = vrot.lane.b32.xlu1 %v14136_v1, %s11477_s26  ;;  %v1851_v61 = vld [vmem:[#allocation2 + $0x321] sm:$0xff]  ;;  %v2443_v46 = vpack.c.bf16 %v2394_v25, %v2393_v42  ;;  %v2444_v25 = vpack.c.bf16 %v2396_v14, %v2395_v34 }
 0x30f   :  { %v14143_v41 = vpop.permute.xlu0 %2709  ;;  %v14145_v30 = vpop.permute.xlu1 %2615 }
 0x311   :  { %2901 = vrot.lane.b32.xlu0 %v13896_v21, %s11477_s26  ;;  %2647 = vrot.lane.b32.xlu1 %v14147_v43, %s11477_s26  ;;  %v1848_v21 = vld [vmem:[#allocation2 + $0x301] sm:$0xff] }
 0x312   :  { %v14174_v7 = vpack.c.bf16 %v1849_v20, %v1848_v21  ;;  %v2202_v21 = vld [vmem:[#allocation2 + $0x182] sm:$0xff]  ;;  %v2203_v20 = vld [vmem:[#allocation2 + $0x18a] sm:$0xff] }
 0x313   :  { %v14158_v58 = vpop.permute.xlu0 %2711  ;;  %v14160_v49 = vpop.permute.xlu1 %2617  ;;  %3933 = vmatmul.mubr.bf16.gmra.mxu1 %v2971_v51  ;;  %v14199_v51 = vpack.c.bf16 %v1851_v61, %v1850_v9  ;;  %v11204_v61 = vld [vmem:[%s18745_s5 + $0x100] sm:$0xff]   ;;  %v2251_v42 = vpack.c.bf16 %v2203_v20, %v2202_v21  ;;  %v2205_v9 = vld [vmem:[#allocation2 + $0x1d2] sm:$0xff]  ;;  %v2207_v21 = vld [vmem:[#allocation2 + $0x1ea] sm:$0xff] }
 0x314   :  { %3940 = vmatprep.mubr.bf16.mxu1 %v3103_v18  ;;  %v2140_v18 = vpack.c.bf16 %v2077_v15, %v2076_v16  ;;  %11007 = vmatprep.subr.bf16.mxu1 %v11204_v61 }
 0x315   :  { %2743 = vrot.lane.b32.xlu0 %v2073_v37, %s11477_s26  ;;  %2807 = vrot.lane.b32.xlu1 %v14162_v33, %s11477_s26  ;;  %v14201_v37 = vpack.c.bf16 %v1711_v44, %v1710_v23  ;;  %v1712_v23 = vld [vmem:[#allocation2 + $0xf0] sm:$0xff]  ;;  %v1713_v44 = vld [vmem:[#allocation2 + $0xf8] sm:$0xff] }
 0x316   :  { %11008 = vmatpush3.bf16.msra.mxu1 %v11204_v61  ;;  %v2208_v61 = vld [vmem:[#allocation2 + $0x1fa] sm:$0xff] }
 0x317   :  { %v14170_v28 = vpop.permute.xlu0 %2713  ;;  %v14172_v13 = vpop.permute.xlu1 %2619  ;;  %v2979_v12 = vsel %vm18886_vm2, %v14201_v37, %v14096_v29  ;;  %v2204_v29 = vld [vmem:[#allocation2 + $0x1ca] sm:$0xff] }
 0x319   :  { %2903 = vrot.lane.b32.xlu0 %v13905_v19, %s11477_s26  ;;  %2649 = vrot.lane.b32.xlu1 %v14174_v7, %s11477_s26  ;;  %v3107_v19 = vsel %vm18886_vm2, %v14051_v38, %v14106_v48  ;;  %v2042_v38 = vld [vmem:[#allocation2 + $0x330] sm:$0xff]  ;;  %v2043_v48 = vld [vmem:[#allocation2 + $0x338] sm:$0xff] }
 0x31a   :  { %v2075_v53 = vpack.c.bf16 %v2043_v48, %v2042_v38  ;;  %v14226_v38 = vpack.c.bf16 %v1713_v44, %v1712_v23  ;;  %v2274_v23 = vld [vmem:[#allocation2 + $0x68] sm:$0xff] }
 0x31b   :  { %v14185_v35 = vpop.permute.xlu0 %2715  ;;  %v14187_v27 = vpop.permute.xlu1 %2621  ;;  %3941 = vmatmul.mubr.bf16.gmra.mxu1 %v2975_v59 }
 0x31c   :  { %3948 = vmatprep.mubr.bf16.mxu1 %v3107_v19  ;;  %v2983_v34 = vsel %vm18886_vm2, %v14226_v38, %v14108_v22  ;;  %v2209_v22 = vld [vmem:[#allocation2 + $0x202] sm:$0xff] }
 0x31d   :  { %2745 = vrot.lane.b32.xlu0 %v2074_v3, %s11477_s26  ;;  %2809 = vrot.lane.b32.xlu1 %v14189_v8, %s11477_s26  ;;  %v3111_v3 = vsel %vm18886_vm2, %v14068_v31, %v14117_v57  ;;  %v2078_v31 = vld [vmem:[#allocation2 + $0x31] sm:$0xff]  ;;  %v2079_v57 = vld [vmem:[#allocation2 + $0x39] sm:$0xff]  ;;  %v14249_v44 = vpack.c.bf16 %v2209_v22, %v2208_v61  ;;  %v2083_v61 = vld [vmem:[#allocation2 + $0x69] sm:$0xff] }
 0x31e   :  { %v2141_v48 = vpack.c.bf16 %v2079_v57, %v2078_v31  ;;  %v2210_v57 = vld [vmem:[#allocation2 + $0x212] sm:$0xff] }
 0x31f   :  { %v14197_v50 = vpop.permute.xlu0 %2717  ;;  %v2782_v11 = vpop.permute.xlu1 %2781  ;;  %v2275_v22 = vld [vmem:[#allocation2 + $0x78] sm:$0xff] }
 0x320   :  { %v3199_v40 = vsel %vm18886_vm2, %v2140_v18, %v2782_v11  ;;  %v14224_v11 = vpack.c.bf16 %v2205_v9, %v2204_v29  ;;  %v2206_v18 = vld [vmem:[#allocation2 + $0x1e2] sm:$0xff] }
 0x321   :  { %2905 = vrot.lane.b32.xlu0 %v2443_v46, %s11477_s26  ;;  %2651 = vrot.lane.b32.xlu1 %v14199_v51, %s11477_s26  ;;  %v2271_v46 = vld [vmem:[#allocation2 + $0x48] sm:$0xff]  ;;  %v2273_v9 = vld [vmem:[#allocation2 + $0x60] sm:$0xff] }
 0x322   :  { %v2080_v29 = vld [vmem:[#allocation2 + $0x49] sm:$0xff] }
 0x323   :  { %v2878_v62 = vpop.permute.xlu0 %2877  ;;  %v14210_v59 = vpop.permute.xlu1 %2623  ;;  %3949 = vmatmul.mubr.bf16.gmra.mxu1 %v2979_v12 }
 0x324   :  { %v3327_v19 = vsel %vm18886_vm2, %v14041_v36, %v2878_v62  ;;  %3956 = vmatprep.mubr.bf16.mxu1 %v3111_v3  ;;  %v2272_v36 = vld [vmem:[#allocation2 + $0x50] sm:$0xff]  ;;  %v3115_v62 = vsel %vm18886_vm2, %v14087_v52, %v14132_v56  ;;  %v14241_v3 = vpack.c.bf16 %v2207_v21, %v2206_v18 }
 0x325   :  { %2747 = vrot.lane.b32.xlu0 %v2075_v53, %s11477_s26  ;;  %4165 = vmatprep.mubr.bf16.mxu0 %v3327_v19  ;;  %v2334_v20 = vpack.c.bf16 %v2272_v36, %v2271_v46  ;;  %v1714_v19 = vld [vmem:[#allocation2 + $0x108] sm:$0xff]  ;;  %v2335_v46 = vpack.c.bf16 %v2274_v23, %v2273_v9 }
 0x326   :  { %4166 = vmatmul.mubr.bf16.vlgmr.msra.gmra.mxu0 %v3199_v40  ;;  %2811 = vrot.lane.b32.xlu1 %v2251_v42, %s11477_s26  ;;  %v1715_v42 = vld [vmem:[#allocation2 + $0x110] sm:$0xff] }
 0x327   :  { %v14222_v16 = vpop.permute.xlu0 %2719  ;;  %v2784_v15 = vpop.permute.xlu1 %2783  ;;  %v14251_v31 = vpack.c.bf16 %v1715_v42, %v1714_v19  ;;  %v2276_v19 = vld [vmem:[#allocation2 + $0x80] sm:$0xff] }
 0x328   :  { %v3203_v12 = vsel %vm18886_vm2, %v2141_v48, %v2784_v15  ;;  %v2211_v15 = vld [vmem:[#allocation2 + $0x21a] sm:$0xff]  ;;  %v2336_v9 = vpack.c.bf16 %v2276_v19, %v2275_v22 }
 0x329   :  { %2907 = vrot.lane.b32.xlu0 %v2444_v25, %s11477_s26  ;;  %v2081_v25 = vld [vmem:[#allocation2 + $0x51] sm:$0xff]  ;;  %v2987_v36 = vsel %vm18886_vm2, %v14251_v31, %v14119_v54 }
 0x32a   :  { %2813 = vrot.lane.b32.xlu1 %v14224_v11, %s11477_s26  ;;  %v2213_v54 = vld [vmem:[#allocation2 + $0x232] sm:$0xff] }
 0x32b   :  { %v2880_v14 = vpop.permute.xlu0 %2879  ;;  %v14235_v40 = vpop.permute.xlu1 %2625  ;;  %3957 = vmatmul.mubr.bf16.gmra.mxu1 %v2983_v34  ;;  %v14267_v34 = vpack.c.bf16 %v2211_v15, %v2210_v57 }
 0x32c   :  { %v3331_v53 = vsel %vm18886_vm2, %v2334_v20, %v2880_v14  ;;  %3964 = vmatprep.mubr.bf16.mxu1 %v3115_v62  ;;  %v2212_v14 = vld [vmem:[#allocation2 + $0x22a] sm:$0xff] }
 0x32d   :  { %2909 = vrot.lane.b32.xlu0 %v13945_v60, %s11477_s26  ;;  %4173 = vmatprep.mubr.bf16.mxu0 %v3331_v53  ;;  %v2142_v60 = vpack.c.bf16 %v2081_v25, %v2080_v29  ;;  %v1717_v62 = vld [vmem:[#allocation2 + $0x128] sm:$0xff]  ;;  %v14275_v42 = vpack.c.bf16 %v2213_v54, %v2212_v14 }
 0x32e   :  { %4174 = vmatmul.mubr.bf16.gmra.mxu0 %v3203_v12  ;;  %2815 = vrot.lane.b32.xlu1 %v14241_v3, %s11477_s26  ;;  %v1716_v12 = vld [vmem:[#allocation2 + $0x120] sm:$0xff] }
 0x32f   :  { %v14247_v52 = vpop.permute.xlu0 %2721  ;;  %v2786_v56 = vpop.permute.xlu1 %2785  ;;  %v2082_v53 = vld [vmem:[#allocation2 + $0x61] sm:$0xff]  ;;  %v14277_v29 = vpack.c.bf16 %v1717_v62, %v1716_v12  ;;  %v2218_v62 = vld [vmem:[#allocation2 + $0x272] sm:$0xff] }
 0x330   :  { %v3207_v18 = vsel %vm18886_vm2, %v2142_v60, %v2786_v56  ;;  %v2214_v25 = vld [vmem:[#allocation2 + $0x242] sm:$0xff]  ;;  %v2215_v56 = vld [vmem:[#allocation2 + $0x24a] sm:$0xff] }
 0x331   :  { %2911 = vrot.lane.b32.xlu0 %v13964_v5, %s11477_s26  ;;  %v3119_v5 = vsel %vm18886_vm2, %v14110_v45, %v14143_v41  ;;  %v2991_v23 = vsel %vm18886_vm2, %v14277_v29, %v14134_v32  ;;  %v2217_v32 = vld [vmem:[#allocation2 + $0x262] sm:$0xff] }
 0x332   :  { %2817 = vrot.lane.b32.xlu1 %v14249_v44, %s11477_s26  ;;  %v2085_v14 = vld [vmem:[#allocation2 + $0x81] sm:$0xff] }
 0x333   :  { %v2882_v48 = vpop.permute.xlu0 %2881  ;;  %v14261_v21 = vpop.permute.xlu1 %2627  ;;  %3965 = vmatmul.mubr.bf16.gmra.mxu1 %v2987_v36  ;;  %v14293_v36 = vpack.c.bf16 %v2215_v56, %v2214_v25  ;;  %v2220_v56 = vld [vmem:[#allocation2 + $0x28a] sm:$0xff] }
 0x334   :  { %v3335_v20 = vsel %vm18886_vm2, %v2335_v46, %v2882_v48  ;;  %3972 = vmatprep.mubr.bf16.mxu1 %v3119_v5  ;;  %v2216_v48 = vld [vmem:[#allocation2 + $0x25a] sm:$0xff] }
 0x335   :  { %2913 = vrot.lane.b32.xlu0 %v13984_v24, %s11477_s26  ;;  %4181 = vmatprep.mubr.bf16.mxu0 %v3335_v20  ;;  %v2143_v24 = vpack.c.bf16 %v2083_v61, %v2082_v53  ;;  %v1719_v5 = vld [vmem:[#allocation2 + $0x140] sm:$0xff]  ;;  %v14301_v54 = vpack.c.bf16 %v2217_v32, %v2216_v48  ;;  %v2223_v48 = vld [vmem:[#allocation2 + $0x2aa] sm:$0xff] }
 0x336   :  { %4182 = vmatmul.mubr.bf16.gmra.mxu0 %v3207_v18  ;;  %2819 = vrot.lane.b32.xlu1 %v14267_v34, %s11477_s26  ;;  %v1718_v18 = vld [vmem:[#allocation2 + $0x138] sm:$0xff] }
 0x337   :  { %v14273_v45 = vpop.permute.xlu0 %2723  ;;  %v2788_v41 = vpop.permute.xlu1 %2787  ;;  %v2084_v20 = vld [vmem:[#allocation2 + $0x79] sm:$0xff]  ;;  %v14303_v12 = vpack.c.bf16 %v1719_v5, %v1718_v18 }
 0x338   :  { %v3211_v57 = vsel %vm18886_vm2, %v2143_v24, %v2788_v41  ;;  %v2219_v53 = vld [vmem:[#allocation2 + $0x27a] sm:$0xff] }
 0x339   :  { %2915 = vrot.lane.b32.xlu0 %v14002_v55, %s11477_s26  ;;  %v3123_v55 = vsel %vm18886_vm2, %v14136_v1, %v14158_v58  ;;  %v2995_v61 = vsel %vm18886_vm2, %v14303_v12, %v14145_v30  ;;  %v14320_v25 = vpack.c.bf16 %v2219_v53, %v2218_v62  ;;  %v2221_v30 = vld [vmem:[#allocation2 + $0x292] sm:$0xff]  ;;  %v1917_v53 = vld [vmem:[#allocation2 + $0x1ba] sm:$0xff] }
 0x33a   :  { %2821 = vrot.lane.b32.xlu1 %v14275_v42, %s11477_s26  ;;  %v1916_v62 = vld [vmem:[#allocation2 + $0x1b2] sm:$0xff] }
 0x33b   :  { %v2884_v60 = vpop.permute.xlu0 %2883  ;;  %v14287_v15 = vpop.permute.xlu1 %2629  ;;  %3973 = vmatmul.mubr.bf16.gmra.mxu1 %v2991_v23  ;;  %v1721_v23 = vld [vmem:[#allocation2 + $0x158] sm:$0xff] }
 0x33c   :  { %v3339_v46 = vsel %vm18886_vm2, %v2336_v9, %v2884_v60  ;;  %3980 = vmatprep.mubr.bf16.mxu1 %v3123_v55  ;;  %v1720_v9 = vld [vmem:[#allocation2 + $0x150] sm:$0xff] }
 0x33d   :  { %2917 = vrot.lane.b32.xlu0 %v14014_v0, %s11477_s26  ;;  %4189 = vmatprep.mubr.bf16.mxu0 %v3339_v46  ;;  %v2144_v0 = vpack.c.bf16 %v2085_v14, %v2084_v20  ;;  %v2086_v60 = vld [vmem:[#allocation2 + $0x91] sm:$0xff]  ;;  %v14330_v55 = vpack.c.bf16 %v1721_v23, %v1720_v9  ;;  %v2222_v46 = vld [vmem:[#allocation2 + $0x2a2] sm:$0xff]  ;;  %v2227_v9 = vld [vmem:[#allocation2 + $0x2da] sm:$0xff] }
 0x33e   :  { %4190 = vmatmul.mubr.bf16.gmra.mxu0 %v3211_v57  ;;  %2823 = vrot.lane.b32.xlu1 %v14293_v36, %s11477_s26  ;;  %v14328_v57 = vpack.c.bf16 %v2221_v30, %v2220_v56  ;;  %v2226_v56 = vld [vmem:[#allocation2 + $0x2d2] sm:$0xff] }
 0x33f   :  { %v14299_v1 = vpop.permute.xlu0 %2725  ;;  %v2790_v58 = vpop.permute.xlu1 %2789  ;;  %v2999_v32 = vsel %vm18886_vm2, %v14330_v55, %v14160_v49  ;;  %v2225_v49 = vld [vmem:[#allocation2 + $0x2c2] sm:$0xff]  ;;  %v1724_v23 = vld [vmem:[#allocation2 + $0x1b0] sm:$0xff] }
 0x340   :  { %v3215_v22 = vsel %vm18886_vm2, %v2144_v0, %v2790_v58  ;;  %v14347_v58 = vpack.c.bf16 %v2223_v48, %v2222_v46  ;;  %v2224_v0 = vld [vmem:[#allocation2 + $0x2ba] sm:$0xff] }
 0x341   :  { %2919 = vrot.lane.b32.xlu0 %v14025_v10, %s11477_s26  ;;  %v3127_v10 = vsel %vm18886_vm2, %v14162_v33, %v14170_v28  ;;  %v2087_v33 = vld [vmem:[#allocation2 + $0x99] sm:$0xff] }
 0x342   :  { %2825 = vrot.lane.b32.xlu1 %v14301_v54, %s11477_s26 }
 0x343   :  { %v2886_v41 = vpop.permute.xlu0 %2885  ;;  %v14313_v19 = vpop.permute.xlu1 %2631  ;;  %3981 = vmatmul.mubr.bf16.gmra.mxu1 %v2995_v61  ;;  %v1722_v61 = vld [vmem:[#allocation2 + $0x168] sm:$0xff] }
 0x344   :  { %v3343_v24 = vsel %vm18886_vm2, %v14123_v17, %v2886_v41  ;;  %3988 = vmatprep.mubr.bf16.mxu1 %v3127_v10  ;;  %v1723_v41 = vld [vmem:[#allocation2 + $0x170] sm:$0xff]  ;;  %v1964_v10 = vpack.c.bf16 %v1917_v53, %v1916_v62  ;;  %v2230_v53 = vld [vmem:[#allocation2 + $0x302] sm:$0xff] }
 0x345   :  { %2921 = vrot.lane.b32.xlu0 %v14039_v63, %s11477_s26  ;;  %4197 = vmatprep.mubr.bf16.mxu0 %v3343_v24  ;;  %v2145_v63 = vpack.c.bf16 %v2087_v33, %v2086_v60  ;;  %v14355_v24 = vpack.c.bf16 %v2225_v49, %v2224_v0  ;;  %v14357_v30 = vpack.c.bf16 %v1723_v41, %v1722_v61  ;;  %v1725_v60 = vld [vmem:[#allocation2 + $0x1b8] sm:$0xff]  ;;  %v2231_v49 = vld [vmem:[#allocation2 + $0x30a] sm:$0xff] }
 0x346   :  { %4198 = vmatmul.mubr.bf16.gmra.mxu0 %v3215_v22  ;;  %2827 = vrot.lane.b32.xlu1 %v14320_v25, %s11477_s26 }
 0x347   :  { %v14326_v28 = vpop.permute.xlu0 %2727  ;;  %v2792_v17 = vpop.permute.xlu1 %2791  ;;  %v3003_v33 = vsel %vm18886_vm2, %v14357_v30, %v14172_v13  ;;  %v2228_v13 = vld [vmem:[#allocation2 + $0x2ea] sm:$0xff] }
 0x348   :  { %v3219_v5 = vsel %vm18886_vm2, %v2145_v63, %v2792_v17 }
 0x349   :  { %2923 = vrot.lane.b32.xlu0 %v14058_v6, %s11477_s26  ;;  %v3131_v6 = vsel %vm18886_vm2, %v14189_v8, %v14185_v35  ;;  %v2088_v35 = vld [vmem:[#allocation2 + $0xa9] sm:$0xff]  ;;  %v2089_v8 = vld [vmem:[#allocation2 + $0xb1] sm:$0xff] }
 0x34a   :  { %2829 = vrot.lane.b32.xlu1 %v14328_v57, %s11477_s26 }
 0x34b   :  { %v2888_v18 = vpop.permute.xlu0 %2887  ;;  %v14340_v20 = vpop.permute.xlu1 %2633  ;;  %3989 = vmatmul.mubr.bf16.gmra.mxu1 %v2999_v32  ;;  %v14373_v32 = vpack.c.bf16 %v2227_v9, %v2226_v56  ;;  %v1726_v56 = vld [vmem:[#allocation2 + $0x1c8] sm:$0xff]  ;;  %v2092_v9 = vld [vmem:[#allocation2 + $0xd9] sm:$0xff] }
 0x34c   :  { %v3347_v14 = vsel %vm18886_vm2, %v14149_v47, %v2888_v18  ;;  %3996 = vmatprep.mubr.bf16.mxu1 %v3131_v6  ;;  %v1772_v18 = vpack.c.bf16 %v1725_v60, %v1724_v23  ;;  %v2090_v6 = vld [vmem:[#allocation2 + $0xc1] sm:$0xff]  ;;  %v2425_v60 = vld [vmem:[#allocation2 + $0x331] sm:$0xff] }
 0x34d   :  { %2925 = vrot.lane.b32.xlu0 %v14077_v39, %s11477_s26  ;;  %4205 = vmatprep.mubr.bf16.mxu0 %v3347_v14  ;;  %v2146_v39 = vpack.c.bf16 %v2089_v8, %v2088_v35  ;;  %v2091_v14 = vld [vmem:[#allocation2 + $0xc9] sm:$0xff]  ;;  %v3139_v8 = vsel %vm18886_vm2, %v14224_v11, %v14222_v16  ;;  %v2093_v16 = vld [vmem:[#allocation2 + $0xe1] sm:$0xff] }
 0x34e   :  { %4206 = vmatmul.mubr.bf16.gmra.mxu0 %v3219_v5  ;;  %2831 = vrot.lane.b32.xlu1 %v14347_v58, %s11477_s26  ;;  %v2229_v5 = vld [vmem:[#allocation2 + $0x2f2] sm:$0xff]  ;;  %v3007_v62 = vsel %vm18886_vm2, %v1772_v18, %v14187_v27  ;;  %v2427_v18 = vld [vmem:[#allocation2 + $0x349] sm:$0xff] }
 0x34f   :  { %v14353_v47 = vpop.permute.xlu0 %2729  ;;  %v2794_v22 = vpop.permute.xlu1 %2793 }
 0x350   :  { %v3223_v63 = vsel %vm18886_vm2, %v2146_v39, %v2794_v22  ;;  %v2233_v22 = vld [vmem:[#allocation2 + $0x322] sm:$0xff]  ;;  %v1727_v39 = vld [vmem:[#allocation2 + $0x1d0] sm:$0xff] }
 0x351   :  { %2927 = vrot.lane.b32.xlu0 %v14098_v26, %s11477_s26  ;;  %v3135_v26 = vsel %vm18886_vm2, %v1964_v10, %v14197_v50  ;;  %v2232_v10 = vld [vmem:[#allocation2 + $0x31a] sm:$0xff] }
 0x352   :  { %2833 = vrot.lane.b32.xlu1 %v14355_v24, %s11477_s26  ;;  %v14405_v23 = vpack.c.bf16 %v2233_v22, %v2232_v10 }
 0x353   :  { %v2890_v17 = vpop.permute.xlu0 %2889  ;;  %v14367_v46 = vpop.permute.xlu1 %2635  ;;  %3997 = vmatmul.mubr.bf16.gmra.mxu1 %v3003_v33  ;;  %v2426_v33 = vld [vmem:[#allocation2 + $0x339] sm:$0xff] }
 0x354   :  { %v3351_v48 = vsel %vm18886_vm2, %v14176_v4, %v2890_v17  ;;  %4004 = vmatprep.mubr.bf16.mxu1 %v3135_v26  ;;  %v14381_v4 = vpack.c.bf16 %v2229_v5, %v2228_v13  ;;  %v1773_v17 = vpack.c.bf16 %v1727_v39, %v1726_v56  ;;  %v2235_v26 = vld [vmem:[#allocation2 + $0x33a] sm:$0xff]  ;;  %v2428_v13 = vld [vmem:[#allocation2 + $0x351] sm:$0xff]  ;;  %v3147_v39 = vsel %vm18886_vm2, %v14249_v44, %v14273_v45 }
 0x355   :  { %2929 = vrot.lane.b32.xlu0 %v14121_v2, %s11477_s26  ;;  %4213 = vmatprep.mubr.bf16.mxu0 %v3351_v48  ;;  %v2147_v2 = vpack.c.bf16 %v2091_v14, %v2090_v6  ;;  %v14413_v6 = vpack.c.bf16 %v2426_v33, %v2425_v60  ;;  %v2096_v60 = vld [vmem:[#allocation2 + $0x109] sm:$0xff] }
 0x356   :  { %4214 = vmatmul.mubr.bf16.gmra.mxu0 %v3223_v63  ;;  %2835 = vrot.lane.b32.xlu1 %v14373_v32, %s11477_s26  ;;  %v2234_v63 = vld [vmem:[#allocation2 + $0x332] sm:$0xff]  ;;  %v3011_v48 = vsel %vm18886_vm2, %v1773_v17, %v14210_v59  ;;  %v1728_v59 = vld [vmem:[#allocation2 + $0x1e0] sm:$0xff] }
 0x357   :  { %v14379_v50 = vpop.permute.xlu0 %2731  ;;  %v2796_v0 = vpop.permute.xlu1 %2795 }
 0x358   :  { %v3227_v41 = vsel %vm18886_vm2, %v2147_v2, %v2796_v0  ;;  %v2267_v2 = vpack.c.bf16 %v2235_v26, %v2234_v63 }
 0x359   :  { %2931 = vrot.lane.b32.xlu0 %v14147_v43, %s11477_s26  ;;  %v14397_v43 = vpack.c.bf16 %v2231_v49, %v2230_v53  ;;  %v1729_v53 = vld [vmem:[#allocation2 + $0x1e8] sm:$0xff]  ;;  %v2460_v49 = vpack.c.bf16 %v2428_v13, %v2427_v18  ;;  %v1732_v13 = vld [vmem:[#allocation2 + $0x210] sm:$0xff] }
 0x35a   :  { %2837 = vrot.lane.b32.xlu1 %v14381_v4, %s11477_s26 }
 0x35b   :  { %v2892_v61 = vpop.permute.xlu0 %2891  ;;  %v14390_v35 = vpop.permute.xlu1 %2637  ;;  %4005 = vmatmul.mubr.bf16.gmra.mxu1 %v3007_v62 }
 0x35c   :  { %v3355_v27 = vsel %vm18886_vm2, %v14201_v37, %v2892_v61  ;;  %4012 = vmatprep.mubr.bf16.mxu1 %v3139_v8  ;;  %v2094_v61 = vld [vmem:[#allocation2 + $0xf1] sm:$0xff] }
 0x35d   :  { %2933 = vrot.lane.b32.xlu0 %v14174_v7, %s11477_s26  ;;  %4221 = vmatprep.mubr.bf16.mxu0 %v3355_v27  ;;  %v2148_v7 = vpack.c.bf16 %v2093_v16, %v2092_v9  ;;  %v1730_v16 = vld [vmem:[#allocation2 + $0x1f8] sm:$0xff] }
 0x35e   :  { %4222 = vmatmul.mubr.bf16.gmra.mxu0 %v3227_v41  ;;  %2839 = vrot.lane.b32.xlu1 %v14397_v43, %s11477_s26  ;;  %v2095_v41 = vld [vmem:[#allocation2 + $0xf9] sm:$0xff] }
 0x35f   :  { %v14403_v11 = vpop.permute.xlu0 %2733  ;;  %v2798_v37 = vpop.permute.xlu1 %2797 }
 0x360   :  { %v3231_v14 = vsel %vm18886_vm2, %v2148_v7, %v2798_v37  ;;  %v1731_v37 = vld [vmem:[#allocation2 + $0x200] sm:$0xff] }
 0x361   :  { %2935 = vrot.lane.b32.xlu0 %v14199_v51, %s11477_s26  ;;  %v3143_v51 = vsel %vm18886_vm2, %v14241_v3, %v14247_v52  ;;  %v14428_v52 = vpack.c.bf16 %v1729_v53, %v1728_v59  ;;  %v14444_v7 = vpack.c.bf16 %v1731_v37, %v1730_v16  ;;  %v3159_v16 = vsel %vm18886_vm2, %v14293_v36, %v14353_v47 }
 0x362   :  { %2841 = vrot.lane.b32.xlu1 %v14405_v23, %s11477_s26 }
 0x363   :  { %v2894_v5 = vpop.permute.xlu0 %2893  ;;  %v14416_v0 = vpop.permute.xlu1 %2639  ;;  %4013 = vmatmul.mubr.bf16.gmra.mxu1 %v3011_v48  ;;  %v3015_v27 = vsel %vm18886_vm2, %v14428_v52, %v14235_v40  ;;  %v2097_v40 = vld [vmem:[#allocation2 + $0x111] sm:$0xff]  ;;  %v3019_v44 = vsel %vm18886_vm2, %v14444_v7, %v14261_v21  ;;  %v3151_v48 = vsel %vm18886_vm2, %v14267_v34, %v14299_v1  ;;  %v2099_v21 = vld [vmem:[#allocation2 + $0x129] sm:$0xff] }
 0x364   :  { %v3359_v62 = vsel %vm18886_vm2, %v14226_v38, %v2894_v5  ;;  %4020 = vmatprep.mubr.bf16.mxu1 %v3143_v51  ;;  %v2149_v38 = vpack.c.bf16 %v2095_v41, %v2094_v61  ;;  %v2150_v63 = vpack.c.bf16 %v2097_v40, %v2096_v60  ;;  %v1733_v5 = vld [vmem:[#allocation2 + $0x218] sm:$0xff]  ;;  %v1734_v41 = vld [vmem:[#allocation2 + $0x228] sm:$0xff]  ;;  %v1736_v60 = vld [vmem:[#allocation2 + $0x240] sm:$0xff] }
 0x365   :  { %2937 = vrot.lane.b32.xlu0 %v14413_v6, %s11477_s26  ;;  %4229 = vmatprep.mubr.bf16.mxu0 %v3359_v62  ;;  %v1737_v40 = vld [vmem:[#allocation2 + $0x248] sm:$0xff] }
 0x366   :  { %4230 = vmatmul.mubr.bf16.gmra.mxu0 %v3231_v14  ;;  %2843 = vrot.lane.b32.xlu1 %v2267_v2, %s11477_s26  ;;  %v2098_v14 = vld [vmem:[#allocation2 + $0x121] sm:$0xff]  ;;  %v14459_v2 = vpack.c.bf16 %v1733_v5, %v1732_v13  ;;  %v3163_v13 = vsel %vm18886_vm2, %v14301_v54, %v14379_v50 }
 0x367   :  { %v14426_v8 = vpop.permute.xlu0 %2735  ;;  %v2800_v3 = vpop.permute.xlu1 %2799  ;;  %v2151_v59 = vpack.c.bf16 %v2099_v21, %v2098_v14  ;;  %v1738_v21 = vld [vmem:[#allocation2 + $0x258] sm:$0xff] }
 0x368   :  { %v3235_v10 = vsel %vm18886_vm2, %v2149_v38, %v2800_v3  ;;  %v3023_v34 = vsel %vm18886_vm2, %v14459_v2, %v14287_v15  ;;  %v1735_v3 = vld [vmem:[#allocation2 + $0x230] sm:$0xff]  ;;  %v2100_v38 = vld [vmem:[#allocation2 + $0x139] sm:$0xff]  ;;  %v2101_v15 = vld [vmem:[#allocation2 + $0x141] sm:$0xff] }
 0x369   :  { %2939 = vrot.lane.b32.xlu0 %v2460_v49, %s11477_s26  ;;  %v3155_v49 = vsel %vm18886_vm2, %v14275_v42, %v14326_v28 }
 0x36b   :  { %v2896_v22 = vpop.permute.xlu0 %2895  ;;  %v14435_v56 = vpop.permute.xlu1 %2641  ;;  %4021 = vmatmul.mubr.bf16.gmra.mxu1 %v3015_v27 }
 0x36c   :  { %v3363_v9 = vsel %vm18886_vm2, %v14251_v31, %v2896_v22  ;;  %4028 = vmatprep.mubr.bf16.mxu1 %v3147_v39  ;;  %v2152_v39 = vpack.c.bf16 %v2101_v15, %v2100_v38 }
 0x36d   :  { %4237 = vmatprep.mubr.bf16.mxu0 %v3363_v9 }
 0x36e   :  { %4238 = vmatmul.mubr.bf16.gmra.mxu0 %v3235_v10  ;;  %v14474_v10 = vpack.c.bf16 %v1735_v3, %v1734_v41 }
 0x36f   :  { %v14442_v33 = vpop.permute.xlu0 %2737  ;;  %v2802_v17 = vpop.permute.xlu1 %2801 }
 0x370   :  { %v3239_v31 = vsel %vm18886_vm2, %v2150_v63, %v2802_v17  ;;  %v3027_v42 = vsel %vm18886_vm2, %v14474_v10, %v14313_v19  ;;  %v2102_v17 = vld [vmem:[#allocation2 + $0x151] sm:$0xff]  ;;  %v2103_v19 = vld [vmem:[#allocation2 + $0x159] sm:$0xff] }
 0x373   :  { %v2898_v45 = vpop.permute.xlu0 %2897  ;;  %v14450_v26 = vpop.permute.xlu1 %2643  ;;  %4029 = vmatmul.mubr.bf16.gmra.mxu1 %v3019_v44 }
 0x374   :  { %v3367_v18 = vsel %vm18886_vm2, %v14277_v29, %v2898_v45  ;;  %4036 = vmatprep.mubr.bf16.mxu1 %v3151_v48  ;;  %v14489_v45 = vpack.c.bf16 %v1737_v40, %v1736_v60  ;;  %v1741_v60 = vld [vmem:[#allocation2 + $0x278] sm:$0xff]  ;;  %v2106_v40 = vld [vmem:[#allocation2 + $0x181] sm:$0xff] }
 0x375   :  { %4245 = vmatprep.mubr.bf16.mxu0 %v3367_v18 }
 0x376   :  { %4246 = vmatmul.mubr.bf16.gmra.mxu0 %v3239_v31  ;;  %v2153_v31 = vpack.c.bf16 %v2103_v19, %v2102_v17  ;;  %v3031_v36 = vsel %vm18886_vm2, %v14489_v45, %v14340_v20  ;;  %v1739_v20 = vld [vmem:[#allocation2 + $0x260] sm:$0xff]  ;;  %v2107_v17 = vld [vmem:[#allocation2 + $0x189] sm:$0xff] }
 0x377   :  { %v14457_v51 = vpop.permute.xlu0 %2739  ;;  %v2804_v62 = vpop.permute.xlu1 %2803  ;;  %v14508_v41 = vpack.c.bf16 %v1739_v20, %v1738_v21  ;;  %v1742_v20 = vld [vmem:[#allocation2 + $0x288] sm:$0xff] }
 0x378   :  { %v3243_v29 = vsel %vm18886_vm2, %v2151_v59, %v2804_v62  ;;  %v2104_v62 = vld [vmem:[#allocation2 + $0x169] sm:$0xff]  ;;  %v2105_v59 = vld [vmem:[#allocation2 + $0x171] sm:$0xff] }
 0x379   :  { %v2154_v50 = vpack.c.bf16 %v2105_v59, %v2104_v62  ;;  %v3035_v3 = vsel %vm18886_vm2, %v14508_v41, %v14367_v46  ;;  %v2300_v46 = vld [vmem:[#allocation2 + $0x1a0] sm:$0xff]  ;;  %v1743_v62 = vld [vmem:[#allocation2 + $0x290] sm:$0xff] }
 0x37b   :  { %v2900_v1 = vpop.permute.xlu0 %2899  ;;  %v14465_v53 = vpop.permute.xlu1 %2645  ;;  %4037 = vmatmul.mubr.bf16.gmra.mxu1 %v3023_v34 }
 0x37c   :  { %v3371_v61 = vsel %vm18886_vm2, %v14303_v12, %v2900_v1  ;;  %4044 = vmatprep.mubr.bf16.mxu1 %v3155_v49  ;;  %v2297_v49 = vld [vmem:[#allocation2 + $0x180] sm:$0xff] }
 0x37d   :  { %4253 = vmatprep.mubr.bf16.mxu0 %v3371_v61  ;;  %v2298_v61 = vld [vmem:[#allocation2 + $0x188] sm:$0xff] }
 0x37e   :  { %4254 = vmatmul.mubr.bf16.gmra.mxu0 %v3243_v29 }
 0x37f   :  { %v14472_v27 = vpop.permute.xlu0 %2741  ;;  %v2806_v22 = vpop.permute.xlu1 %2805 }
 0x380   :  { %v3247_v28 = vsel %vm18886_vm2, %v2152_v39, %v2806_v22 }
 0x383   :  { %v2902_v12 = vpop.permute.xlu0 %2901  ;;  %v14480_v9 = vpop.permute.xlu1 %2647  ;;  %4045 = vmatmul.mubr.bf16.gmra.mxu1 %v3027_v42  ;;  %v3167_v42 = vsel %vm18886_vm2, %v14320_v25, %v14403_v11  ;;  %v2155_v11 = vpack.c.bf16 %v2107_v17, %v2106_v40  ;;  %v1746_v40 = vld [vmem:[#allocation2 + $0x2b8] sm:$0xff]  ;;  %v1747_v17 = vld [vmem:[#allocation2 + $0x2c0] sm:$0xff] }
 0x384   :  { %v3375_v37 = vsel %vm18886_vm2, %v14330_v55, %v2902_v12  ;;  %4052 = vmatprep.mubr.bf16.mxu1 %v3159_v16  ;;  %v14494_v47 = vpop.f32.mrf.mxu1  ;;  %v1740_v12 = vld [vmem:[#allocation2 + $0x270] sm:$0xff] }
 0x385   :  { %4261 = vmatprep.mubr.bf16.mxu0 %v3375_v37  ;;  %v2299_v37 = vld [vmem:[#allocation2 + $0x198] sm:$0xff] }
 0x386   :  { %4262 = vmatmul.mubr.bf16.gmra.mxu0 %v3247_v28  ;;  %v3880_v14 = vpop.f32.mrf.mxu1 }
 0x387   :  { %v14487_v63 = vpop.permute.xlu0 %2743  ;;  %v2808_v44 = vpop.permute.xlu1 %2807  ;;  %v3171_v14 = vsel %vm18886_vm2, %v14328_v57, %v14426_v8 }
 0x388   :  { %v3251_v55 = vsel %vm18886_vm2, %v2153_v31, %v2808_v44  ;;  %v14504_v34 = vpop.f32.mrf.mxu1 }
 0x38a   :  { %v3883_v54 = vpop.f32.mrf.mxu1 }
 0x38b   :  { %v2904_v48 = vpop.permute.xlu0 %2903  ;;  %v14497_v18 = vpop.permute.xlu1 %2649  ;;  %4053 = vmatmul.mubr.bf16.gmra.mxu1 %v3031_v36  ;;  %v2348_v36 = vpack.c.bf16 %v2300_v46, %v2299_v37  ;;  %v3179_v46 = vsel %vm18886_vm2, %v14355_v24, %v14457_v51 }
 0x38c   :  { %v3379_v5 = vsel %vm18886_vm2, %v14357_v30, %v2904_v48  ;;  %4060 = vmatprep.mubr.bf16.mxu1 %v3163_v13  ;;  %v2347_v30 = vpack.c.bf16 %v2298_v61, %v2297_v49  ;;  %v14513_v38 = vpop.f32.mrf.mxu1  ;;  %v2109_v49 = vld [vmem:[#allocation2 + $0x1d1] sm:$0xff]  ;;  %v14538_v61 = vpack.c.bf16 %v1743_v62, %v1742_v20 }
 0x38d   :  { %4269 = vmatprep.mubr.bf16.mxu0 %v3379_v5  ;;  %v1749_v20 = vld [vmem:[#allocation2 + $0x2d8] sm:$0xff] }
 0x38e   :  { %4270 = vmatmul.mubr.bf16.gmra.mxu0 %v3251_v55  ;;  %v3888_v16 = vpop.f32.mrf.mxu1  ;;  %v14526_v55 = vpack.c.bf16 %v1741_v60, %v1740_v12  ;;  %v3043_v57 = vsel %vm18886_vm2, %v14538_v61, %v14416_v0 }
 0x38f   :  { %v14506_v1 = vpop.permute.xlu0 %2745  ;;  %v2810_v29 = vpop.permute.xlu1 %2809 }
 0x390   :  { %v3255_v15 = vsel %vm18886_vm2, %v2154_v50, %v2810_v29  ;;  %v14522_v19 = vpop.f32.mrf.mxu1  ;;  %v3039_v48 = vsel %vm18886_vm2, %v14526_v55, %v14390_v35  ;;  %v2108_v29 = vld [vmem:[#allocation2 + $0x1c9] sm:$0xff] }
 0x391   :  { %v2156_v8 = vpack.c.bf16 %v2109_v49, %v2108_v29 }
 0x392   :  { %v3891_v25 = vpop.f32.mrf.mxu1 }
 0x393   :  { %v2906_v22 = vpop.permute.xlu0 %2905  ;;  %v14516_v39 = vpop.permute.xlu1 %2651  ;;  %4061 = vmatmul.mubr.bf16.gmra.mxu1 %v3035_v3  ;;  %v2113_v25 = vld [vmem:[#allocation2 + $0x201] sm:$0xff] }
 0x394   :  { %v3383_v28 = vsel %vm18886_vm2, %v2347_v30, %v2906_v22  ;;  %4068 = vmatprep.mubr.bf16.mxu1 %v3167_v42  ;;  %v3175_v30 = vsel %vm18886_vm2, %v14347_v58, %v14442_v33  ;;  %v2110_v42 = vld [vmem:[#allocation2 + $0x1e1] sm:$0xff] }
 0x395   :  { %4277 = vmatprep.mubr.bf16.mxu0 %v3383_v28  ;;  %v2111_v28 = vld [vmem:[#allocation2 + $0x1e9] sm:$0xff] }
 0x396   :  { %4278 = vmatmul.mubr.bf16.gmra.mxu0 %v3255_v15  ;;  %v1744_v15 = vld [vmem:[#allocation2 + $0x2a0] sm:$0xff]  ;;  %v2157_v58 = vpack.c.bf16 %v2111_v28, %v2110_v42 }
 0x397   :  { %v14524_v44 = vpop.permute.xlu0 %2747 }
 0x398   :  { %v2812_v31 = vpop.permute.xlu1 %2811 }
 0x399   :  { %v3259_v13 = vsel %vm18886_vm2, %v2155_v11, %v2812_v31  ;;  %v14564_v11 = vpack.c.bf16 %v1747_v17, %v1746_v40  ;;  %v1753_v40 = vld [vmem:[#allocation2 + $0x308] sm:$0xff] }
 0x39b   :  { %v2908_v5 = vpop.permute.xlu0 %2907  ;;  %4069 = vmatmul.mubr.bf16.gmra.mxu1 %v3039_v48  ;;  %v3051_v24 = vsel %vm18886_vm2, %v14564_v11, %v14450_v26 }
 0x39c   :  { %v3387_v21 = vsel %vm18886_vm2, %v2348_v36, %v2908_v5  ;;  %4076 = vmatprep.mubr.bf16.mxu1 %v3171_v14  ;;  %v2814_v54 = vpop.permute.xlu1 %2813  ;;  %v2112_v36 = vld [vmem:[#allocation2 + $0x1f9] sm:$0xff] }
 0x39d   :  { %4285 = vmatprep.mubr.bf16.mxu0 %v3387_v21  ;;  %v3263_v3 = vsel %vm18886_vm2, %v2156_v8, %v2814_v54  ;;  %v2158_v51 = vpack.c.bf16 %v2113_v25, %v2112_v36  ;;  %v1748_v21 = vld [vmem:[#allocation2 + $0x2d0] sm:$0xff]  ;;  %v2115_v54 = vld [vmem:[#allocation2 + $0x219] sm:$0xff] }
 0x39e   :  { %4286 = vmatmul.mubr.bf16.gmra.mxu0 %v3259_v13  ;;  %v14579_v49 = vpack.c.bf16 %v1749_v20, %v1748_v21  ;;  %v1754_v21 = vld [vmem:[#allocation2 + $0x318] sm:$0xff]  ;;  %v1755_v20 = vld [vmem:[#allocation2 + $0x320] sm:$0xff] }
 0x39f   :  { %v2910_v59 = vpop.permute.xlu0 %2909 }
 0x3a0   :  { %v3391_v35 = vsel %vm18886_vm2, %v14428_v52, %v2910_v59  ;;  %v1745_v52 = vld [vmem:[#allocation2 + $0x2a8] sm:$0xff]  ;;  %v2816_v12 = vpop.permute.xlu1 %2815 }
 0x3a1   :  { %4293 = vmatprep.mubr.bf16.mxu0 %v3391_v35  ;;  %v14549_v0 = vpack.c.bf16 %v1745_v52, %v1744_v15  ;;  %v2114_v35 = vld [vmem:[#allocation2 + $0x211] sm:$0xff] }
 0x3a2   :  { %v2159_v8 = vpack.c.bf16 %v2115_v54, %v2114_v35  ;;  %v1751_v15 = vld [vmem:[#allocation2 + $0x2f0] sm:$0xff]  ;;  %v2462_v54 = vld [vmem:[#allocation2 + $0x3a] sm:$0xff] }
 0x3a3   :  { %v2912_v50 = vpop.permute.xlu0 %2911  ;;  %4077 = vmatmul.mubr.bf16.gmra.mxu1 %v3043_v57  ;;  %v3047_v16 = vsel %vm18886_vm2, %v14549_v0, %v14435_v56  ;;  %v2461_v35 = vld [vmem:[#allocation2 + $0x32] sm:$0xff] }
 0x3a4   :  { %4084 = vmatprep.mubr.bf16.mxu1 %v3175_v30  ;;  %v3395_v22 = vsel %vm18886_vm2, %v14444_v7, %v2912_v50  ;;  %v3267_v7 = vsel %vm18886_vm2, %v2157_v58, %v2816_v12  ;;  %v2818_v13 = vpop.permute.xlu1 %2817  ;;  %v2116_v12 = vld [vmem:[#allocation2 + $0x229] sm:$0xff] }
 0x3a5   :  { %v3271_v62 = vsel %vm18886_vm2, %v2158_v51, %v2818_v13  ;;  %v2119_v13 = vld [vmem:[#allocation2 + $0x249] sm:$0xff] }
 0x3a6   :  { %4294 = vmatmul.mubr.bf16.gmra.mxu0 %v3263_v3  ;;  %v1750_v3 = vld [vmem:[#allocation2 + $0x2e8] sm:$0xff] }
 0x3a7   :  { %4301 = vmatprep.mubr.bf16.mxu0 %v3395_v22  ;;  %v2914_v33 = vpop.permute.xlu0 %2913  ;;  %v14594_v28 = vpack.c.bf16 %v1751_v15, %v1750_v3 }
 0x3a8   :  { %v3399_v31 = vsel %vm18886_vm2, %v14459_v2, %v2914_v33  ;;  %v3183_v2 = vsel %vm18886_vm2, %v14373_v32, %v14472_v27  ;;  %v3055_v32 = vsel %vm18886_vm2, %v14579_v49, %v14465_v53  ;;  %v2820_v27 = vpop.permute.xlu1 %2819 }
 0x3a9   :  { %v3275_v52 = vsel %vm18886_vm2, %v2159_v8, %v2820_v27  ;;  %v2121_v27 = vld [vmem:[#allocation2 + $0x261] sm:$0xff] }
 0x3ab   :  { %v14554_v37 = vpop.f32.mrf.mxu1  ;;  %4085 = vmatmul.mubr.bf16.gmra.mxu1 %v3047_v16  ;;  %v2916_v5 = vpop.permute.xlu0 %2915  ;;  %v2117_v16 = vld [vmem:[#allocation2 + $0x231] sm:$0xff] }
 0x3ac   :  { %4092 = vmatprep.mubr.bf16.mxu1 %v3179_v46  ;;  %v3403_v29 = vsel %vm18886_vm2, %v14474_v10, %v2916_v5  ;;  %v3187_v10 = vsel %vm18886_vm2, %v14381_v4, %v14487_v63  ;;  %v3059_v4 = vsel %vm18886_vm2, %v14594_v28, %v14480_v9  ;;  %v2822_v63 = vpop.permute.xlu1 %2821  ;;  %v2160_v33 = vpack.c.bf16 %v2117_v16, %v2116_v12  ;;  %v2464_v12 = vld [vmem:[#allocation2 + $0x52] sm:$0xff]  ;;  %v2465_v16 = vld [vmem:[#allocation2 + $0x62] sm:$0xff] }
 0x3ad   :  { %v3896_v60 = vpop.f32.mrf.mxu1 }
 0x3ae   :  { %4302 = vmatmul.mubr.bf16.gmra.mxu0 %v3267_v7  ;;  %v1752_v60 = vld [vmem:[#allocation2 + $0x300] sm:$0xff]  ;;  %v3279_v17 = vsel %vm18886_vm2, %v2160_v33, %v2822_v63 }
 0x3af   :  { %4309 = vmatprep.mubr.bf16.mxu0 %v3399_v31  ;;  %v14562_v56 = vpop.f32.mrf.mxu1  ;;  %v2918_v50 = vpop.permute.xlu0 %2917  ;;  %v14609_v25 = vpack.c.bf16 %v1753_v40, %v1752_v60  ;;  %v2123_v63 = vld [vmem:[#allocation2 + $0x279] sm:$0xff] }
 0x3b0   :  { %v3407_v53 = vsel %vm18886_vm2, %v14489_v45, %v2918_v50  ;;  %v3191_v45 = vsel %vm18886_vm2, %v14397_v43, %v14506_v1  ;;  %v2824_v1 = vpop.permute.xlu1 %2823  ;;  %v2525_v50 = vpack.c.bf16 %v2462_v54, %v2461_v35 }
 0x3b1   :  { %v3899_v48 = vpop.f32.mrf.mxu1  ;;  %v3063_v43 = vsel %vm18886_vm2, %v14609_v25, %v14497_v18 }
 0x3b2   :  { %v2118_v48 = vld [vmem:[#allocation2 + $0x241] sm:$0xff] }
 0x3b3   :  { %v14569_v14 = vpop.f32.mrf.mxu1  ;;  %4093 = vmatmul.mubr.bf16.gmra.mxu1 %v3051_v24  ;;  %v2920_v46 = vpop.permute.xlu0 %2919  ;;  %v2161_v51 = vpack.c.bf16 %v2119_v13, %v2118_v48  ;;  %v2467_v13 = vld [vmem:[#allocation2 + $0x7a] sm:$0xff] }
 0x3b4   :  { %4100 = vmatprep.mubr.bf16.mxu1 %v3183_v2  ;;  %v3411_v9 = vsel %vm18886_vm2, %v14508_v41, %v2920_v46  ;;  %v3195_v41 = vsel %vm18886_vm2, %v14405_v23, %v14524_v44  ;;  %v2826_v8 = vpop.permute.xlu1 %2825 }
 0x3b5   :  { %v3904_v59 = vpop.f32.mrf.mxu1 }
 0x3b6   :  { %4310 = vmatmul.mubr.bf16.gmra.mxu0 %v3271_v62  ;;  %v3283_v62 = vsel %vm18886_vm2, %v2161_v51, %v2824_v1  ;;  %v2469_v1 = vld [vmem:[#allocation2 + $0x92] sm:$0xff]  ;;  %v2470_v51 = vld [vmem:[#allocation2 + $0x9a] sm:$0xff] }
 0x3b7   :  { %4317 = vmatprep.mubr.bf16.mxu0 %v3403_v29  ;;  %v14577_v26 = vpop.f32.mrf.mxu1  ;;  %v2922_v5 = vpop.permute.xlu0 %2921 }
 0x3b8   :  { %v3415_v18 = vsel %vm18886_vm2, %v14526_v55, %v2922_v5  ;;  %v2124_v5 = vld [vmem:[#allocation2 + $0x289] sm:$0xff] }
 0x3b9   :  { %v3907_v57 = vpop.f32.mrf.mxu1 }
 0x3ba   :  { %v14624_v57 = vpack.c.bf16 %v1755_v20, %v1754_v21 }
 0x3bb   :  { %v14584_v30 = vpop.f32.mrf.mxu1  ;;  %4101 = vmatmul.mubr.bf16.gmra.mxu1 %v3055_v32  ;;  %v2120_v32 = vld [vmem:[#allocation2 + $0x259] sm:$0xff]  ;;  %v2924_v3 = vpop.permute.xlu0 %2923 }
 0x3bc   :  { %4108 = vmatprep.mubr.bf16.mxu1 %v3187_v10  ;;  %v3067_v44 = vsel %vm18886_vm2, %v14624_v57, %v14516_v39  ;;  %v2162_v10 = vpack.c.bf16 %v2121_v27, %v2120_v32 }
 0x3bd   :  { %v3912_v22 = vpop.f32.mrf.mxu1 }
 0x3be   :  { %4318 = vmatmul.mubr.bf16.gmra.mxu0 %v3275_v52  ;;  %v3287_v55 = vsel %vm18886_vm2, %v2162_v10, %v2826_v8  ;;  %v3419_v22 = vsel %vm18886_vm2, %v14538_v61, %v2924_v3  ;;  %v2472_v10 = vld [vmem:[#allocation2 + $0xb2] sm:$0xff] }
 0x3bf   :  { %4325 = vmatprep.mubr.bf16.mxu0 %v3407_v53  ;;  %v14592_v42 = vpop.f32.mrf.mxu1  ;;  %v2463_v53 = vld [vmem:[#allocation2 + $0x4a] sm:$0xff] }
 0x3c0   :  { %v2526_v46 = vpack.c.bf16 %v2464_v12, %v2463_v53  ;;  %v2126_v53 = vld [vmem:[#allocation2 + $0x2a1] sm:$0xff]  ;;  %v2127_v12 = vld [vmem:[#allocation2 + $0x2a9] sm:$0xff] }
 0x3c1   :  { %v3915_v58 = vpop.f32.mrf.mxu1 }
 0x3c2   :  { %v2466_v58 = vld [vmem:[#allocation2 + $0x6a] sm:$0xff] }
 0x3c3   :  { %v14599_v7 = vpop.f32.mrf.mxu1  ;;  %4109 = vmatmul.mubr.bf16.gmra.mxu1 %v3059_v4  ;;  %v2122_v4 = vld [vmem:[#allocation2 + $0x271] sm:$0xff]  ;;  %v2527_v60 = vpack.c.bf16 %v2466_v58, %v2465_v16 }
 0x3c4   :  { %4116 = vmatprep.mubr.bf16.mxu1 %v3191_v45  ;;  %v2828_v45 = vpop.permute.xlu1 %2827  ;;  %v2163_v40 = vpack.c.bf16 %v2123_v63, %v2122_v4 }
 0x3c5   :  { %v3920_v31 = vpop.f32.mrf.mxu1 }
 0x3c6   :  { %4326 = vmatmul.mubr.bf16.gmra.mxu0 %v3279_v17  ;;  %v2926_v17 = vpop.permute.xlu0 %2925  ;;  %v3291_v61 = vsel %vm18886_vm2, %v2163_v40, %v2828_v45 }
 0x3c7   :  { %4333 = vmatprep.mubr.bf16.mxu0 %v3411_v9  ;;  %v14607_v36 = vpop.f32.mrf.mxu1  ;;  %v3423_v48 = vsel %vm18886_vm2, %v14549_v0, %v2926_v17 }
 0x3c9   :  { %v3923_v24 = vpop.f32.mrf.mxu1 }
 0x3ca   :  { %v2468_v24 = vld [vmem:[#allocation2 + $0x82] sm:$0xff]  ;;  %v2928_v0 = vpop.permute.xlu0 %2927 }
 0x3cb   :  { %v14614_v2 = vpop.f32.mrf.mxu1  ;;  %4117 = vmatmul.mubr.bf16.gmra.mxu1 %v3063_v43  ;;  %v2528_v20 = vpack.c.bf16 %v2468_v24, %v2467_v13  ;;  %v3427_v8 = vsel %vm18886_vm2, %v14564_v11, %v2928_v0  ;;  %v2475_v24 = vld [vmem:[#allocation2 + $0xda] sm:$0xff] }
 0x3cc   :  { %4124 = vmatprep.mubr.bf16.mxu1 %v3195_v41  ;;  %v2125_v41 = vld [vmem:[#allocation2 + $0x291] sm:$0xff] }
 0x3cd   :  { %v3928_v59 = vpop.f32.mrf.mxu1  ;;  %v2164_v35 = vpack.c.bf16 %v2125_v41, %v2124_v5  ;;  %v2477_v41 = vld [vmem:[#allocation2 + $0xf2] sm:$0xff] }
 0x3ce   :  { %4334 = vmatmul.mubr.bf16.gmra.mxu0 %v3283_v62  ;;  %v14649_v62 = vld [vmem:[%s18746_s6] ss:$0 sm:$0xff]  ;;  %v2830_v59 = vpop.permute.xlu1 %2829  ;;  %v2930_v45 = vpop.permute.xlu0 %2929 }
 0x3cf   :  { %4341 = vmatprep.mubr.bf16.mxu0 %v3415_v18  ;;  %v14622_v29 = vpop.f32.mrf.mxu1  ;;  %v2529_v18 = vpack.c.bf16 %v2470_v51, %v2469_v1  ;;  %v3879_v32 = vadd.f32 %v14649_v62, %v14494_v47  ;;  %v3295_v27 = vsel %vm18886_vm2, %v2164_v35, %v2830_v59  ;;  %v3882_v16 = vadd.f32 %v14649_v62, %v14504_v34  ;;  %v2476_v1 = vld [vmem:[#allocation2 + $0xe2] sm:$0xff] }
 0x3d0   :  { %v3431_v13 = vsel %vm18886_vm2, %v14579_v49, %v2930_v45  ;;  %v2129_v59 = vld [vmem:[#allocation2 + $0x2c1] sm:$0xff]  ;;  %v2532_v0 = vpack.c.bf16 %v2476_v1, %v2475_v24  ;;  %v3898_v45 = vadd.f32 %v14649_v62, %v14562_v56 }
 0x3d1   :  { %v3931_v23 = vpop.f32.mrf.mxu1 }
 0x3d2   :  { %v2832_v63 = vpop.permute.xlu1 %2831 }
 0x3d3   :  { %v14629_v15 = vpop.f32.mrf.mxu1  ;;  %4125 = vmatmul.mubr.bf16.gmra.mxu1 %v3067_v44 }
 0x3d4   :  { %11009 = vmatprep.mubr.msk.bf16.mxu1 %vm18886_vm2, %v2525_v50  ;;  %v2471_v50 = vld [vmem:[#allocation2 + $0xaa] sm:$0xff] }
 0x3d5   :  { %v3936_v52 = vpop.f32.mrf.mxu1  ;;  %v2530_v4 = vpack.c.bf16 %v2472_v10, %v2471_v50 }
 0x3d6   :  { %4342 = vmatmul.mubr.bf16.gmra.mxu0 %v3287_v55  ;;  %v2473_v52 = vld [vmem:[#allocation2 + $0xc2] sm:$0xff] }
 0x3d7   :  { %4349 = vmatprep.mubr.bf16.mxu0 %v3419_v22  ;;  %v14635_v39 = vpop.f32.mrf.mxu1  ;;  %v2474_v22 = vld [vmem:[#allocation2 + $0xca] sm:$0xff] }
 0x3d8   :  { %v2531_v11 = vpack.c.bf16 %v2474_v22, %v2473_v52  ;;  %v3895_v52 = vadd.f32 %v14649_v62, %v14554_v37 }
 0x3d9   :  { %v3939_v33 = vpop.f32.mrf.mxu1 }
 0x3db   :  { %v14637_v31 = vpop.f32.mrf.mxu1  ;;  %11010 = vmatmul.mubr.msk.bf16.vlgmr.msra.gmra.mxu1 %vm18886_vm2, %v2526_v46  ;;  %v2165_v46 = vpack.c.bf16 %v2127_v12, %v2126_v53 }
 0x3dc   :  { %11013 = vmatprep.mubr.msk.bf16.mxu1 %vm18886_vm2, %v2527_v60 }
 0x3dd   :  { %v3944_v9 = vpop.f32.mrf.mxu1  ;;  %v3299_v34 = vsel %vm18886_vm2, %v2165_v46, %v2832_v63  ;;  %v2481_v63 = vld [vmem:[#allocation2 + $0x122] sm:$0xff]  ;;  %v2131_v46 = vld [vmem:[#allocation2 + $0x2d9] sm:$0xff] }
 0x3de   :  { %4350 = vmatmul.mubr.bf16.gmra.mxu0 %v3291_v61  ;;  %v3887_v61 = vadd.f32 %v14649_v62, %v14513_v38 }
 0x3df   :  { %4357 = vmatprep.mubr.bf16.mxu0 %v3423_v48  ;;  %v14644_v43 = vpop.f32.mrf.mxu1 }
 0x3e1   :  { %v3947_v21 = vpop.f32.mrf.mxu1 }
 0x3e2   :  { %v2478_v21 = vld [vmem:[#allocation2 + $0xfa] sm:$0xff] }
 0x3e3   :  { %v14651_v54 = vpop.f32.mrf.mxu1  ;;  %11014 = vmatmul.mubr.msk.bf16.gmra.mxu1 %vm18886_vm2, %v2528_v20  ;;  %v2128_v20 = vld [vmem:[#allocation2 + $0x2b9] sm:$0xff]  ;;  %v2533_v49 = vpack.c.bf16 %v2478_v21, %v2477_v41  ;;  %v3903_v21 = vadd.f32 %v14649_v62, %v14569_v14 }
 0x3e4   :  { %11017 = vmatprep.mubr.msk.bf16.mxu1 %vm18886_vm2, %v2529_v18  ;;  %v3890_v18 = vadd.f32 %v14649_v62, %v14522_v19 }
 0x3e5   :  { %v3952_v23 = vpop.f32.mrf.mxu1 }
 0x3e6   :  { %v4167_v44 = vpop.f32.mrf.mxu0  ;;  %4358 = vmatmul.mubr.bf16.gmra.mxu0 %v3295_v27  ;;  %v2166_v23 = vpack.c.bf16 %v2129_v59, %v2128_v20 }
 0x3e7   :  { %v14660_v3 = vadd.f32 %v4167_v44, %v3879_v32  ;;  %4365 = vmatprep.mubr.bf16.mxu0 %v3427_v8  ;;  %v14662_v55 = vpop.f32.mrf.mxu1  ;;  %v2834_v32 = vpop.permute.xlu1 %2833 }
 0x3e8   :  { %v4169_v47 = vpop.f32.mrf.mxu0  ;;  %v2932_v44 = vpop.permute.xlu0 %2931  ;;  %v3303_v19 = vsel %vm18886_vm2, %v2166_v23, %v2834_v32  ;;  %v2132_v23 = vld [vmem:[#allocation2 + $0x2e9] sm:$0xff] }
 0x3e9   :  { %v3955_v58 = vpop.f32.mrf.mxu1  ;;  %v3435_v12 = vsel %vm18886_vm2, %v14594_v28, %v2932_v44  ;;  %v2479_v47 = vld [vmem:[#allocation2 + $0x10a] sm:$0xff] }
 0x3ea   :  { %v4170_v33 = vpop.f32.mrf.mxu0  ;;  %v2133_v44 = vld [vmem:[#allocation2 + $0x2f1] sm:$0xff] }
 0x3eb   :  { %v14666_v60 = vadd.f32 %v4170_v33, %v3882_v16  ;;  %v14668_v40 = vpop.f32.mrf.mxu1  ;;  %11018 = vmatmul.mubr.msk.bf16.gmra.mxu1 %vm18886_vm2, %v2530_v4  ;;  %v2480_v16 = vld [vmem:[#allocation2 + $0x112] sm:$0xff]  ;;  %v2482_v33 = vld [vmem:[#allocation2 + $0x12a] sm:$0xff] }
 0x3ec   :  { %v4172_v17 = vpop.f32.mrf.mxu0  ;;  %11021 = vmatprep.mubr.msk.bf16.mxu1 %vm18886_vm2, %v2531_v11  ;;  %v2130_v11 = vld [vmem:[#allocation2 + $0x2d1] sm:$0xff]  ;;  %v2535_v28 = vpack.c.bf16 %v2482_v33, %v2481_v63 }
 0x3ed   :  { %v3960_v9 = vpop.f32.mrf.mxu1 }
 0x3ee   :  { %v4175_v48 = vpop.f32.mrf.mxu0  ;;  %4366 = vmatmul.mubr.bf16.gmra.mxu0 %v3299_v34  ;;  %v2836_v34 = vpop.permute.xlu1 %2835 }
 0x3ef   :  { %v14677_v51 = vadd.f32 %v4175_v48, %v3887_v61  ;;  %4373 = vmatprep.mubr.bf16.mxu0 %v3431_v13  ;;  %v14679_v5 = vpop.f32.mrf.mxu1  ;;  %v2534_v61 = vpack.c.bf16 %v2480_v16, %v2479_v47  ;;  %v2167_v48 = vpack.c.bf16 %v2131_v46, %v2130_v11  ;;  %v2934_v13 = vpop.permute.xlu0 %2933  ;;  %v3911_v11 = vadd.f32 %v14649_v62, %v14584_v30 }
 0x3f0   :  { %v4177_v38 = vpop.f32.mrf.mxu0 }
 0x3f1   :  { %v3963_v35 = vpop.f32.mrf.mxu1  ;;  %v3307_v56 = vsel %vm18886_vm2, %v2167_v48, %v2836_v34  ;;  %v3439_v38 = vsel %vm18886_vm2, %v14609_v25, %v2934_v13  ;;  %v2490_v48 = vld [vmem:[#allocation2 + $0x18a] sm:$0xff]  ;;  %v2134_v13 = vld [vmem:[#allocation2 + $0x301] sm:$0xff] }
 0x3f2   :  { %v4178_v27 = vpop.f32.mrf.mxu0  ;;  %v2484_v35 = vld [vmem:[#allocation2 + $0x142] sm:$0xff] }
 0x3f3   :  { %v14683_v8 = vadd.f32 %v4178_v27, %v3890_v18  ;;  %v14685_v50 = vpop.f32.mrf.mxu1  ;;  %11022 = vmatmul.mubr.msk.bf16.gmra.mxu1 %vm18886_vm2, %v2532_v0  ;;  %v2483_v18 = vld [vmem:[#allocation2 + $0x13a] sm:$0xff]  ;;  %v2485_v27 = vld [vmem:[#allocation2 + $0x152] sm:$0xff]  ;;  %v2936_v47 = vpop.permute.xlu0 %2935 }
 0x3f4   :  { %v4180_v10 = vpop.f32.mrf.mxu0  ;;  %11025 = vmatprep.mubr.msk.bf16.mxu1 %vm18886_vm2, %v2533_v49  ;;  %v2486_v49 = vld [vmem:[#allocation2 + $0x15a] sm:$0xff] }
 0x3f5   :  { %v3968_v22 = vpop.f32.mrf.mxu1  ;;  %v3906_v10 = vadd.f32 %v14649_v62, %v14577_v26  ;;  %v2537_v25 = vpack.c.bf16 %v2486_v49, %v2485_v27 }
 0x3f6   :  { %v4183_v53 = vpop.f32.mrf.mxu0  ;;  %4374 = vmatmul.mubr.bf16.gmra.mxu0 %v3303_v19  ;;  %v2536_v19 = vpack.c.bf16 %v2484_v35, %v2483_v18  ;;  %v2838_v22 = vpop.permute.xlu1 %2837 }
 0x3f7   :  { %v14694_v58 = vadd.f32 %v4183_v53, %v3895_v52  ;;  %4381 = vmatprep.mubr.bf16.mxu0 %v3435_v12  ;;  %v14696_v4 = vpop.f32.mrf.mxu1  ;;  %v2168_v12 = vpack.c.bf16 %v2133_v44, %v2132_v23  ;;  %v2938_v49 = vpop.permute.xlu0 %2937 }
 0x3f8   :  { %v4185_v37 = vpop.f32.mrf.mxu0 }
 0x3f9   :  { %v3971_v17 = vpop.f32.mrf.mxu1  ;;  %v3311_v26 = vsel %vm18886_vm2, %v2168_v12, %v2838_v22  ;;  %v2332_v12 = vld [vmem:[#allocation2 + $0x350] sm:$0xff] }
 0x3fa   :  { %v4186_v9 = vpop.f32.mrf.mxu0  ;;  %v2487_v17 = vld [vmem:[#allocation2 + $0x16a] sm:$0xff] }
 0x3fb   :  { %v14700_v24 = vadd.f32 %v4186_v9, %v3898_v45  ;;  %v14702_v1 = vpop.f32.mrf.mxu1  ;;  %11026 = vmatmul.mubr.msk.bf16.gmra.mxu1 %vm18886_vm2, %v2534_v61  ;;  %v3443_v45 = vsel %vm18886_vm2, %v14624_v57, %v2936_v47  ;;  %v2488_v61 = vld [vmem:[#allocation2 + $0x172] sm:$0xff]  ;;  %v2840_v57 = vpop.permute.xlu1 %2839 }
 0x3fc   :  { %v4188_v41 = vpop.f32.mrf.mxu0  ;;  %11029 = vmatprep.mubr.msk.bf16.mxu1 %vm18886_vm2, %v2535_v28  ;;  %v2489_v28 = vld [vmem:[#allocation2 + $0x182] sm:$0xff] }
 0x3fd   :  { %v3976_v20 = vpop.f32.mrf.mxu1  ;;  %v2135_v41 = vld [vmem:[#allocation2 + $0x309] sm:$0xff]  ;;  %v2539_v35 = vpack.c.bf16 %v2490_v48, %v2489_v28  ;;  %v3922_v48 = vadd.f32 %v14649_v62, %v14607_v36  ;;  %v3927_v36 = vadd.f32 %v14649_v62, %v14614_v2 }
 0x3fe   :  { %v4191_v59 = vpop.f32.mrf.mxu0  ;;  %4382 = vmatmul.mubr.bf16.gmra.mxu0 %v3307_v56  ;;  %v2329_v56 = vld [vmem:[#allocation2 + $0x330] sm:$0xff]  ;;  %v2330_v20 = vld [vmem:[#allocation2 + $0x338] sm:$0xff]  ;;  %v2169_v27 = vpack.c.bf16 %v2135_v41, %v2134_v13  ;;  %v2940_v13 = vpop.permute.xlu0 %2939 }
 0x3ff   :  { %v14711_v0 = vadd.f32 %v4191_v59, %v3903_v21  ;;  %4389 = vmatprep.mubr.bf16.mxu0 %v3439_v38  ;;  %v14713_v32 = vpop.f32.mrf.mxu1  ;;  %v3914_v21 = vadd.f32 %v14649_v62, %v14592_v42  ;;  %v2538_v38 = vpack.c.bf16 %v2488_v61, %v2487_v17  ;;  %v2491_v42 = vld [vmem:[#allocation2 + $0x19a] sm:$0xff] }
 0x400   :  { %v4193_v14 = vpop.f32.mrf.mxu0  ;;  %v3315_v22 = vsel %vm18886_vm2, %v2169_v27, %v2840_v57  ;;  %v2136_v17 = vld [vmem:[#allocation2 + $0x319] sm:$0xff]  ;;  %v2137_v61 = vld [vmem:[#allocation2 + $0x321] sm:$0xff] }
 0x401   :  { %v3979_v52 = vpop.f32.mrf.mxu1 }
 0x402   :  { %v4194_v53 = vpop.f32.mrf.mxu0  ;;  %v2492_v52 = vld [vmem:[#allocation2 + $0x1a2] sm:$0xff] }
 0x403   :  { %v14717_v16 = vadd.f32 %v4194_v53, %v3906_v10  ;;  %v14719_v63 = vpop.f32.mrf.mxu1  ;;  %11030 = vmatmul.mubr.msk.bf16.gmra.mxu1 %vm18886_vm2, %v2536_v19  ;;  %v2363_v10 = vpack.c.bf16 %v2330_v20, %v2329_v56  ;;  %v3919_v19 = vadd.f32 %v14649_v62, %v14599_v7  ;;  %v2170_v20 = vpack.c.bf16 %v2137_v61, %v2136_v17 }
 0x404   :  { %v4196_v33 = vpop.f32.mrf.mxu0  ;;  %11033 = vmatprep.mubr.msk.bf16.mxu1 %vm18886_vm2, %v2537_v25  ;;  %v2331_v25 = vld [vmem:[#allocation2 + $0x348] sm:$0xff] }
 0x405   :  { %v3984_v46 = vpop.f32.mrf.mxu1  ;;  %v3447_v33 = vsel %vm18886_vm2, %v2363_v10, %v2938_v49  ;;  %v2364_v28 = vpack.c.bf16 %v2332_v12, %v2331_v25  ;;  %v2496_v10 = vld [vmem:[#allocation2 + $0x202] sm:$0xff]  ;;  %v3930_v25 = vadd.f32 %v14649_v62, %v14622_v29  ;;  %v3935_v29 = vadd.f32 %v14649_v62, %v14629_v15 }
 0x406   :  { %v4199_v37 = vpop.f32.mrf.mxu0  ;;  %4390 = vmatmul.mubr.bf16.gmra.mxu0 %v3311_v26  ;;  %v2540_v46 = vpack.c.bf16 %v2492_v52, %v2491_v42 }
 0x407   :  { %v14728_v34 = vadd.f32 %v4199_v37, %v3911_v11  ;;  %4397 = vmatprep.mubr.bf16.mxu0 %v3443_v45  ;;  %v14730_v9 = vpop.f32.mrf.mxu1  ;;  %v2493_v37 = vld [vmem:[#allocation2 + $0x1e2] sm:$0xff]  ;;  %v2494_v45 = vld [vmem:[#allocation2 + $0x1ea] sm:$0xff] }
 0x408   :  { %v4201_v30 = vpop.f32.mrf.mxu0  ;;  %v2541_v56 = vpack.c.bf16 %v2494_v45, %v2493_v37 }
 0x409   :  { %v3987_v59 = vpop.f32.mrf.mxu1  ;;  %v2842_v30 = vpop.permute.xlu1 %2841 }
 0x40a   :  { %v4202_v18 = vpop.f32.mrf.mxu0 }
 0x40b   :  { %v14734_v23 = vadd.f32 %v4202_v18, %v3914_v21  ;;  %v14736_v44 = vpop.f32.mrf.mxu1  ;;  %11034 = vmatmul.mubr.msk.bf16.gmra.mxu1 %vm18886_vm2, %v2538_v38  ;;  %v3451_v18 = vsel %vm18886_vm2, %v2364_v28, %v2940_v13  ;;  %v2500_v13 = vld [vmem:[#allocation2 + $0x232] sm:$0xff] }
 0x40c   :  { %v4204_v14 = vpop.f32.mrf.mxu0  ;;  %11037 = vmatprep.mubr.msk.bf16.mxu1 %vm18886_vm2, %v2539_v35  ;;  %v3319_v35 = vsel %vm18886_vm2, %v2170_v20, %v2842_v30 }
 0x40d   :  { %v3992_v53 = vpop.f32.mrf.mxu1  ;;  %v2495_v14 = vld [vmem:[#allocation2 + $0x1fa] sm:$0xff] }
 0x40e   :  { %v4207_v47 = vpop.f32.mrf.mxu0  ;;  %4398 = vmatmul.mubr.bf16.gmra.mxu0 %v3315_v22  ;;  %v2498_v22 = vld [vmem:[#allocation2 + $0x21a] sm:$0xff]  ;;  %v2542_v2 = vpack.c.bf16 %v2496_v10, %v2495_v14  ;;  %v3943_v14 = vadd.f32 %v14649_v62, %v14637_v31 }
 0x40f   :  { %v14744_v11 = vadd.f32 %v4207_v47, %v3919_v19  ;;  %4405 = vmatprep.mubr.bf16.mxu0 %v3447_v33  ;;  %v14746_v26 = vpop.f32.mrf.mxu1  ;;  %v2497_v19 = vld [vmem:[#allocation2 + $0x212] sm:$0xff]  ;;  %v2844_v47 = vpop.permute.xlu1 %2843 }
 0x410   :  { %v4209_v7 = vpop.f32.mrf.mxu0  ;;  %v3323_v61 = vsel %vm18886_vm2, %v14413_v6, %v2844_v47 }
 0x411   :  { %v3995_v41 = vpop.f32.mrf.mxu1 }
 0x412   :  { %v4210_v21 = vpop.f32.mrf.mxu0 }
 0x413   :  { %v14750_v59 = vadd.f32 %v4210_v21, %v3922_v48  ;;  %v14752_v38 = vpop.f32.mrf.mxu1  ;;  %11038 = vmatmul.mubr.msk.bf16.gmra.mxu1 %vm18886_vm2, %v2540_v46  ;;  %v2543_v46 = vpack.c.bf16 %v2498_v22, %v2497_v19  ;;  %v2499_v48 = vld [vmem:[#allocation2 + $0x22a] sm:$0xff]  ;;  %v2501_v21 = vld [vmem:[#allocation2 + $0x242] sm:$0xff]  ;;  %v2503_v22 = vld [vmem:[#allocation2 + $0x25a] sm:$0xff] }
 0x414   :  { %v4212_v57 = vpop.f32.mrf.mxu0  ;;  %11041 = vmatprep.mubr.msk.bf16.mxu1 %vm18886_vm2, %v2541_v56  ;;  %v2502_v56 = vld [vmem:[#allocation2 + $0x24a] sm:$0xff]  ;;  %v2544_v6 = vpack.c.bf16 %v2500_v13, %v2499_v48  ;;  %v3951_v48 = vadd.f32 %v14649_v62, %v14651_v54 }
 0x415   :  { %v4000_v27 = vpop.f32.mrf.mxu1  ;;  %v3938_v57 = vadd.f32 %v14649_v62, %v14635_v39  ;;  %v2504_v39 = vld [vmem:[#allocation2 + $0x262] sm:$0xff] }
 0x416   :  { %v4215_v49 = vpop.f32.mrf.mxu0  ;;  %4406 = vmatmul.mubr.bf16.gmra.mxu0 %v3319_v35  ;;  %v2545_v35 = vpack.c.bf16 %v2502_v56, %v2501_v21  ;;  %v2507_v56 = vld [vmem:[#allocation2 + $0x28a] sm:$0xff] }
 0x417   :  { %v14760_v42 = vadd.f32 %v4215_v49, %v3927_v36  ;;  %4413 = vmatprep.mubr.bf16.mxu0 %v3451_v18  ;;  %v14762_v52 = vpop.f32.mrf.mxu1 }
 0x418   :  { %v4217_v53 = vpop.f32.mrf.mxu0 }
 0x419   :  { %v4003_v12 = vpop.f32.mrf.mxu1 }
 0x41a   :  { %v4218_v33 = vpop.f32.mrf.mxu0  ;;  %v2505_v12 = vld [vmem:[#allocation2 + $0x272] sm:$0xff] }
 0x41b   :  { %v14766_v37 = vadd.f32 %v4218_v33, %v3930_v25  ;;  %v14768_v45 = vpop.f32.mrf.mxu1  ;;  %11042 = vmatmul.mubr.msk.bf16.gmra.mxu1 %vm18886_vm2, %v2542_v2  ;;  %v2506_v2 = vld [vmem:[#allocation2 + $0x27a] sm:$0xff]  ;;  %v3946_v33 = vadd.f32 %v14649_v62, %v14644_v43  ;;  %v2508_v43 = vld [vmem:[#allocation2 + $0x292] sm:$0xff] }
 0x41c   :  { %v4220_v17 = vpop.f32.mrf.mxu0  ;;  %11045 = vmatprep.mubr.msk.bf16.mxu1 %vm18886_vm2, %v2543_v46 }
 0x41d   :  { %v4008_v7 = vpop.f32.mrf.mxu1  ;;  %v2546_v17 = vpack.c.bf16 %v2504_v39, %v2503_v22 }
 0x41e   :  { %v4223_v28 = vpop.f32.mrf.mxu0  ;;  %4414 = vmatmul.mubr.bf16.gmra.mxu0 %v3323_v61 }
 0x41f   :  { %v14776_v41 = vadd.f32 %v4223_v28, %v3935_v29  ;;  %v14778_v30 = vpop.f32.mrf.mxu1  ;;  %v2547_v29 = vpack.c.bf16 %v2506_v2, %v2505_v12  ;;  %v3959_v12 = vadd.f32 %v14649_v62, %v14668_v40 }
 0x420   :  { %v4225_v20 = vpop.f32.mrf.mxu0 }
 0x421   :  { %v4011_v18 = vpop.f32.mrf.mxu1 }
 0x422   :  { %v4226_v36 = vpop.f32.mrf.mxu0  ;;  %v2509_v18 = vld [vmem:[#allocation2 + $0x2a2] sm:$0xff] }
 0x423   :  { %v14782_v15 = vadd.f32 %v4226_v36, %v3938_v57  ;;  %v14784_v27 = vpop.f32.mrf.mxu1  ;;  %11046 = vmatmul.mubr.msk.bf16.gmra.mxu1 %vm18886_vm2, %v2544_v6  ;;  %v2510_v6 = vld [vmem:[#allocation2 + $0x2aa] sm:$0xff] }
 0x424   :  { %v4228_v49 = vpop.f32.mrf.mxu0  ;;  %11049 = vmatprep.mubr.msk.bf16.mxu1 %vm18886_vm2, %v2545_v35  ;;  %v3954_v35 = vadd.f32 %v14649_v62, %v14662_v55  ;;  %v2512_v55 = vld [vmem:[#allocation2 + $0x2c2] sm:$0xff] }
 0x425   :  { %v4016_v10 = vpop.f32.mrf.mxu1 }
 0x426   :  { %v4231_v19 = vpop.f32.mrf.mxu0 }
 0x427   :  { %v14790_v53 = vadd.f32 %v4231_v19, %v3943_v14  ;;  %v14792_v25 = vpop.f32.mrf.mxu1  ;;  %v2548_v14 = vpack.c.bf16 %v2508_v43, %v2507_v56  ;;  %v2549_v19 = vpack.c.bf16 %v2510_v6, %v2509_v18 }
 0x428   :  { %v4233_v47 = vpop.f32.mrf.mxu0 }
 0x429   :  { %v4019_v46 = vpop.f32.mrf.mxu1 }
 0x42a   :  { %v4234_v61 = vpop.f32.mrf.mxu0 }
 0x42b   :  { %v14796_v7 = vadd.f32 %v4234_v61, %v3946_v33  ;;  %v14798_v31 = vpop.f32.mrf.mxu1  ;;  %11050 = vmatmul.mubr.msk.bf16.gmra.mxu1 %vm18886_vm2, %v2546_v17  ;;  %v2511_v33 = vld [vmem:[#allocation2 + $0x2ba] sm:$0xff]  ;;  %v2513_v61 = vld [vmem:[#allocation2 + $0x2d2] sm:$0xff] }
 0x42c   :  { %v4236_v28 = vpop.f32.mrf.mxu0  ;;  %11053 = vmatprep.mubr.msk.bf16.mxu1 %vm18886_vm2, %v2547_v29  ;;  %v2514_v29 = vld [vmem:[#allocation2 + $0x2da] sm:$0xff] }
 0x42d   :  { %v4024_v13 = vpop.f32.mrf.mxu1  ;;  %v2551_v43 = vpack.c.bf16 %v2514_v29, %v2513_v61 }
 0x42e   :  { %v4239_v21 = vpop.f32.mrf.mxu0 }
 0x42f   :  { %v14804_v20 = vadd.f32 %v4239_v21, %v3951_v48  ;;  %v14806_v57 = vpop.f32.mrf.mxu1  ;;  %v3962_v48 = vadd.f32 %v14649_v62, %v14679_v5  ;;  %v2550_v21 = vpack.c.bf16 %v2512_v55, %v2511_v33  ;;  %v2516_v5 = vld [vmem:[#allocation2 + $0x2f2] sm:$0xff] }
 0x430   :  { %v4241_v36 = vpop.f32.mrf.mxu0 }
 0x431   :  { %v4027_v49 = vpop.f32.mrf.mxu1  ;;  %v3967_v36 = vadd.f32 %v14649_v62, %v14685_v50 }
 0x432   :  { %v4242_v10 = vpop.f32.mrf.mxu0 }
 0x433   :  { %v14810_v22 = vadd.f32 %v4242_v10, %v3954_v35  ;;  %v14812_v54 = vpop.f32.mrf.mxu1  ;;  %11054 = vmatmul.mubr.msk.bf16.gmra.mxu1 %vm18886_vm2, %v2548_v14  ;;  %v2515_v14 = vld [vmem:[#allocation2 + $0x2ea] sm:$0xff] }
 0x434   :  { %v4244_v39 = vpop.f32.mrf.mxu0  ;;  %11057 = vmatprep.mubr.msk.bf16.mxu1 %vm18886_vm2, %v2549_v19  ;;  %v2552_v55 = vpack.c.bf16 %v2516_v5, %v2515_v14  ;;  %v3978_v5 = vadd.f32 %v14649_v62, %v14713_v32 }
 0x435   :  { %v4032_v2 = vpop.f32.mrf.mxu1  ;;  %v2517_v39 = vld [vmem:[#allocation2 + $0x302] sm:$0xff] }
 0x436   :  { %v4247_v47 = vpop.f32.mrf.mxu0 }
 0x437   :  { %v14818_v46 = vadd.f32 %v4247_v47, %v3959_v12  ;;  %v14820_v17 = vpop.f32.mrf.mxu1  ;;  %v2518_v12 = vld [vmem:[#allocation2 + $0x30a] sm:$0xff]  ;;  %v3970_v47 = vadd.f32 %v14649_v62, %v14696_v4  ;;  %v2520_v4 = vld [vmem:[#allocation2 + $0x322] sm:$0xff] }
 0x438   :  { %v4249_v28 = vpop.f32.mrf.mxu0  ;;  %v2553_v29 = vpack.c.bf16 %v2518_v12, %v2517_v39 }
 0x439   :  { %v4035_v13 = vpop.f32.mrf.mxu1 }
 0x43a   :  { %v4250_v56 = vpop.f32.mrf.mxu0  ;;  %v3975_v13 = vadd.f32 %v14649_v62, %v14702_v1 }
 0x43b   :  { %v14824_v18 = vadd.f32 %v4250_v56, %v3962_v48  ;;  %v14826_v40 = vpop.f32.mrf.mxu1  ;;  %11058 = vmatmul.mubr.msk.bf16.gmra.mxu1 %vm18886_vm2, %v2550_v21 }
 0x43c   :  { %v4252_v6 = vpop.f32.mrf.mxu0  ;;  %11061 = vmatprep.mubr.msk.bf16.mxu1 %vm18886_vm2, %v2551_v43  ;;  %v2519_v43 = vld [vmem:[#allocation2 + $0x31a] sm:$0xff] }
 0x43d   :  { %v4040_v35 = vpop.f32.mrf.mxu1  ;;  %v2554_v12 = vpack.c.bf16 %v2520_v4, %v2519_v43 }
 0x43e   :  { %v4255_v49 = vpop.f32.mrf.mxu0  ;;  %v2521_v35 = vld [vmem:[#allocation2 + $0x332] sm:$0xff] }
 0x43f   :  { %v14832_v10 = vadd.f32 %v4255_v49, %v3967_v36  ;;  %v14834_v19 = vpop.f32.mrf.mxu1  ;;  %v2522_v49 = vld [vmem:[#allocation2 + $0x33a] sm:$0xff] }
 0x440   :  { %v4257_v2 = vpop.f32.mrf.mxu0 }
 0x441   :  { %v4043_v33 = vpop.f32.mrf.mxu1 }
 0x442   :  { %v4258_v61 = vpop.f32.mrf.mxu0 }
 0x443   :  { %v14838_v28 = vadd.f32 %v4258_v61, %v3970_v47  ;;  %v14840_v50 = vpop.f32.mrf.mxu1  ;;  %11062 = vmatmul.mubr.msk.bf16.gmra.mxu1 %vm18886_vm2, %v2552_v55  ;;  %v2555_v47 = vpack.c.bf16 %v2522_v49, %v2521_v35  ;;  %v2523_v61 = vld [vmem:[#allocation2 + $0x34a] sm:$0xff]  ;;  %v3986_v35 = vadd.f32 %v14649_v62, %v14730_v9  ;;  %v3994_v9 = vadd.f32 %v14649_v62, %v14746_v26 }
 0x444   :  { %v4260_v48 = vpop.f32.mrf.mxu0  ;;  %11065 = vmatprep.mubr.msk.bf16.mxu1 %vm18886_vm2, %v2553_v29  ;;  %v2524_v29 = vld [vmem:[#allocation2 + $0x352] sm:$0xff]  ;;  %v4002_v26 = vadd.f32 %v14649_v62, %v14762_v52  ;;  %v4010_v52 = vadd.f32 %v14649_v62, %v14778_v30  ;;  %v4018_v30 = vadd.f32 %v14649_v62, %v14792_v25  ;;  %v4026_v25 = vadd.f32 %v14649_v62, %v14806_v57 }
 0x445   :  { %v4048_v21 = vpop.f32.mrf.mxu1  ;;  %v3983_v48 = vadd.f32 %v14649_v62, %v14719_v63  ;;  %v2556_v43 = vpack.c.bf16 %v2524_v29, %v2523_v61  ;;  %v4034_v57 = vadd.f32 %v14649_v62, %v14820_v17  ;;  %v4042_v17 = vadd.f32 %v14649_v62, %v14834_v19 }
 0x446   :  { %v4263_v56 = vpop.f32.mrf.mxu0 }
 0x447   :  { %v14846_v6 = vadd.f32 %v4263_v56, %v3975_v13  ;;  %v14848_v36 = vpop.f32.mrf.mxu1 }
 0x448   :  { %v4265_v14 = vpop.f32.mrf.mxu0  ;;  %v4050_v19 = vadd.f32 %v14649_v62, %v14848_v36 }
 0x449   :  { %v4051_v39 = vpop.f32.mrf.mxu1 }
 0x44a   :  { %v4266_v2 = vpop.f32.mrf.mxu0 }
 0x44b   :  { %v14852_v33 = vadd.f32 %v4266_v2, %v3978_v5  ;;  %v14854_v1 = vpop.f32.mrf.mxu1  ;;  %11066 = vmatmul.mubr.msk.bf16.gmra.mxu1 %vm18886_vm2, %v2554_v12  ;;  %v3991_v12 = vadd.f32 %v14649_v62, %v14736_v44  ;;  %v3999_v44 = vadd.f32 %v14649_v62, %v14752_v38  ;;  %v4007_v38 = vadd.f32 %v14649_v62, %v14768_v45 }
 0x44c   :  { %v4268_v55 = vpop.f32.mrf.mxu0  ;;  %11069 = vmatprep.mubr.msk.bf16.mxu1 %vm18886_vm2, %v2555_v47  ;;  %v4015_v45 = vadd.f32 %v14649_v62, %v14784_v27  ;;  %v4023_v27 = vadd.f32 %v14649_v62, %v14798_v31  ;;  %v4031_v31 = vadd.f32 %v14649_v62, %v14812_v54  ;;  %v4039_v54 = vadd.f32 %v14649_v62, %v14826_v40 }
 0x44d   :  { %v4056_v13 = vpop.f32.mrf.mxu1  ;;  %v4047_v40 = vadd.f32 %v14649_v62, %v14840_v50  ;;  %v4055_v50 = vadd.f32 %v14649_v62, %v14854_v1 }
 0x44e   :  { %v4271_v32 = vpop.f32.mrf.mxu0 }
 0x44f   :  { %v14860_v21 = vadd.f32 %v4271_v32, %v3983_v48  ;;  %v14862_v56 = vpop.f32.mrf.mxu1 }
 0x450   :  { %v4273_v4 = vpop.f32.mrf.mxu0  ;;  %v4058_v36 = vadd.f32 %v14649_v62, %v14862_v56 }
 0x451   :  { %v4059_v49 = vpop.f32.mrf.mxu1 }
 0x452   :  { %v4274_v14 = vpop.f32.mrf.mxu0 }
 0x453   :  { %v14866_v5 = vadd.f32 %v4274_v14, %v3986_v35  ;;  %v14868_v39 = vpop.f32.mrf.mxu1  ;;  %11070 = vmatmul.mubr.msk.bf16.gmra.mxu1 %vm18886_vm2, %v2556_v43 }
 0x454   :  { %v4276_v63 = vpop.f32.mrf.mxu0 }
 0x455   :  { %v4064_v2 = vpop.f32.mrf.mxu1 }
 0x456   :  { %v4279_v47 = vpop.f32.mrf.mxu0 }
 0x457   :  { %v14873_v55 = vadd.f32 %v4279_v47, %v3991_v12  ;;  %v14875_v61 = vpop.f32.mrf.mxu1 }
 0x458   :  { %v4281_v29 = vpop.f32.mrf.mxu0  ;;  %v4066_v56 = vadd.f32 %v14649_v62, %v14875_v61 }
 0x459   :  { %v4067_v48 = vpop.f32.mrf.mxu1 }
 0x45a   :  { %v4282_v13 = vpop.f32.mrf.mxu0 }
 0x45b   :  { %v14879_v32 = vadd.f32 %v4282_v13, %v3994_v9  ;;  %v14881_v4 = vpop.f32.mrf.mxu1 }
 0x45c   :  { %v4284_v43 = vpop.f32.mrf.mxu0 }
 0x45d   :  { %v4072_v35 = vpop.f32.mrf.mxu1 }
 0x45e   :  { %v4287_v49 = vpop.f32.mrf.mxu0 }
 0x45f   :  { %v14885_v14 = vadd.f32 %v4287_v49, %v3999_v44  ;;  %v14887_v63 = vpop.f32.mrf.mxu1 }
 0x460   :  { %v4289_v12 = vpop.f32.mrf.mxu0 }
 0x461   :  { %v4075_v2 = vpop.f32.mrf.mxu1 }
 0x462   :  { %v4290_v47 = vpop.f32.mrf.mxu0 }
 0x463   :  { %v14891_v29 = vadd.f32 %v4290_v47, %v4002_v26  ;;  %v14893_v9 = vpop.f32.mrf.mxu1 }
 0x464   :  { %v4292_v48 = vpop.f32.mrf.mxu0 }
 0x465   :  { %19097 = vst [vmem:[#allocation41_spill] sm:$0xff] %v14891_v29  ;;  %v4080_v13 = vpop.f32.mrf.mxu1 }
 0x466   :  { %v4295_v43 = vpop.f32.mrf.mxu0 }
 0x467   :  { %v14897_v44 = vadd.f32 %v4295_v43, %v4007_v38  ;;  %v14899_v35 = vpop.f32.mrf.mxu1 }
 0x468   :  { %v4297_v49 = vpop.f32.mrf.mxu0 }
 0x469   :  { %19098 = vst [vmem:[#allocation42_spill] sm:$0xff] %v14897_v44  ;;  %v4083_v12 = vpop.f32.mrf.mxu1 }
 0x46a   :  { %v4298_v2 = vpop.f32.mrf.mxu0 }
 0x46b   :  { %v14903_v26 = vadd.f32 %v4298_v2, %v4010_v52  ;;  %v14905_v47 = vpop.f32.mrf.mxu1 }
 0x46c   :  { %v4300_v48 = vpop.f32.mrf.mxu0 }
 0x46d   :  { %19099 = vst [vmem:[#allocation43_spill] sm:$0xff] %v14903_v26  ;;  %v4088_v13 = vpop.f32.mrf.mxu1 }
 0x46e   :  { %v4303_v29 = vpop.f32.mrf.mxu0 }
 0x46f   :  { %v14909_v38 = vadd.f32 %v4303_v29, %v4015_v45  ;;  %v14911_v43 = vpop.f32.mrf.mxu1 }
 0x470   :  { %v4305_v49 = vpop.f32.mrf.mxu0 }
 0x471   :  { %19100 = vst [vmem:[#allocation44_spill] sm:$0xff] %v14909_v38  ;;  %v4091_v12 = vpop.f32.mrf.mxu1 }
 0x472   :  { %v4306_v44 = vpop.f32.mrf.mxu0 }
 0x473   :  { %v14915_v52 = vadd.f32 %v4306_v44, %v4018_v30  ;;  %v14917_v2 = vpop.f32.mrf.mxu1 }
 0x474   :  { %v4308_v48 = vpop.f32.mrf.mxu0 }
 0x475   :  { %19101 = vst [vmem:[#allocation45_spill] sm:$0xff] %v14915_v52  ;;  %v4096_v13 = vpop.f32.mrf.mxu1 }
 0x476   :  { %v4311_v26 = vpop.f32.mrf.mxu0 }
 0x477   :  { %v14921_v29 = vadd.f32 %v4311_v26, %v4023_v27  ;;  %v14923_v45 = vpop.f32.mrf.mxu1 }
 0x478   :  { %v4313_v49 = vpop.f32.mrf.mxu0 }
 0x479   :  { %19102 = vst [vmem:[#allocation46_spill] sm:$0xff] %v14921_v29  ;;  %v4099_v12 = vpop.f32.mrf.mxu1 }
 0x47a   :  { %v4314_v38 = vpop.f32.mrf.mxu0 }
 0x47b   :  { %v14927_v44 = vadd.f32 %v4314_v38, %v4026_v25  ;;  %v14929_v30 = vpop.f32.mrf.mxu1 }
 0x47c   :  { %v4316_v48 = vpop.f32.mrf.mxu0 }
 0x47d   :  { %19103 = vst [vmem:[#allocation47_spill] sm:$0xff] %v14927_v44  ;;  %v4104_v13 = vpop.f32.mrf.mxu1 }
 0x47e   :  { %v4319_v52 = vpop.f32.mrf.mxu0 }
 0x47f   :  { %v14933_v26 = vadd.f32 %v4319_v52, %v4031_v31  ;;  %v14935_v27 = vpop.f32.mrf.mxu1 }
 0x480   :  { %v4321_v49 = vpop.f32.mrf.mxu0 }
 0x481   :  { %19104 = vst [vmem:[#allocation48_spill] sm:$0xff] %v14933_v26  ;;  %v4107_v12 = vpop.f32.mrf.mxu1 }
 0x482   :  { %v4322_v29 = vpop.f32.mrf.mxu0 }
 0x483   :  { %v14939_v38 = vadd.f32 %v4322_v29, %v4034_v57  ;;  %v14941_v25 = vpop.f32.mrf.mxu1 }
 0x484   :  { %v4324_v48 = vpop.f32.mrf.mxu0 }
 0x485   :  { %19105 = vst [vmem:[#allocation49_spill] sm:$0xff] %v14939_v38  ;;  %v4112_v13 = vpop.f32.mrf.mxu1 }
 0x486   :  { %v4327_v44 = vpop.f32.mrf.mxu0 }
 0x487   :  { %v14945_v52 = vadd.f32 %v4327_v44, %v4039_v54  ;;  %v14947_v31 = vpop.f32.mrf.mxu1 }
 0x488   :  { %v4329_v49 = vpop.f32.mrf.mxu0 }
 0x489   :  { %19106 = vst [vmem:[#allocation23_spill] sm:$0xff] %v14945_v52  ;;  %v4115_v12 = vpop.f32.mrf.mxu1 }
 0x48a   :  { %v4330_v26 = vpop.f32.mrf.mxu0 }
 0x48b   :  { %v14951_v29 = vadd.f32 %v4330_v26, %v4042_v17  ;;  %v14953_v57 = vpop.f32.mrf.mxu1 }
 0x48c   :  { %v4332_v48 = vpop.f32.mrf.mxu0 }
 0x48d   :  { %19107 = vst [vmem:[#allocation25_spill] sm:$0xff] %v14951_v29  ;;  %v4120_v13 = vpop.f32.mrf.mxu1 }
 0x48e   :  { %v4335_v38 = vpop.f32.mrf.mxu0 }
 0x48f   :  { %v14957_v44 = vadd.f32 %v4335_v38, %v4047_v40  ;;  %v14959_v54 = vpop.f32.mrf.mxu1 }
 0x490   :  { %v4337_v49 = vpop.f32.mrf.mxu0 }
 0x491   :  { %19108 = vst [vmem:[#allocation27_spill] sm:$0xff] %v14957_v44  ;;  %v4123_v12 = vpop.f32.mrf.mxu1 }
 0x492   :  { %v4338_v52 = vpop.f32.mrf.mxu0 }
 0x493   :  { %v14963_v26 = vadd.f32 %v4338_v52, %v4050_v19  ;;  %v14965_v17 = vpop.f32.mrf.mxu1 }
 0x494   :  { %19110 = vst [vmem:[#allocation29_spill] sm:$0xff] %v14965_v17  ;;  %v4340_v48 = vpop.f32.mrf.mxu0 }
 0x495   :  { %19109 = vst [vmem:[#allocation28_spill] sm:$0xff] %v14963_v26  ;;  %v4128_v13 = vpop.f32.mrf.mxu1  ;;  %v4063_v48 = vadd.f32 %v14649_v62, %v14868_v39 }
 0x496   :  { %v4343_v29 = vpop.f32.mrf.mxu0 }
 0x497   :  { %v14969_v38 = vadd.f32 %v4343_v29, %v4055_v50  ;;  %v14971_v40 = vpop.f32.mrf.mxu1 }
 0x498   :  { %v4345_v49 = vpop.f32.mrf.mxu0 }
 0x499   :  { %v4131_v12 = vpop.f32.mrf.mxu1 }
 0x49a   :  { %v4346_v44 = vpop.f32.mrf.mxu0 }
 0x49b   :  { %v14975_v52 = vadd.f32 %v4346_v44, %v4058_v36  ;;  %v11011_v19 = vpop.f32.mrf.mxu1 }
 0x49c   :  { %v4348_v26 = vpop.f32.mrf.mxu0  ;;  %v14987_v36 = vadd.f32 %v11011_v19, %v14677_v51  ;;  %v4071_v51 = vadd.f32 %v14649_v62, %v14881_v4  ;;  %v4074_v4 = vadd.f32 %v14649_v62, %v14887_v63 }
 0x49d   :  { %v4456_v1 = vpop.f32.mrf.mxu1 }
 0x49e   :  { %v4351_v13 = vpop.f32.mrf.mxu0  ;;  %v14982_v49 = vadd.f32 %v4456_v1, %v14660_v3  ;;  %19112 = vst [vmem:[#allocation31_spill] sm:$0xff] %v14987_v36 }
 0x49f   :  { %v14979_v17 = vadd.f32 %v4351_v13, %v4063_v48  ;;  %v11012_v29 = vpop.f32.mrf.mxu1 }
 0x4a0   :  { %v4353_v50 = vpop.f32.mrf.mxu0  ;;  %19111 = vst [vmem:[#allocation30_spill] sm:$0xff] %v14982_v49  ;;  %v14997_v3 = vadd.f32 %v11012_v29, %v14683_v8 }
 0x4a1   :  { %v4459_v12 = vpop.f32.mrf.mxu1  ;;  %v4713_v50 = vsel %vm18886_vm2, %v14982_v49, 0.0 }
 0x4a2   :  { %v4354_v44 = vpop.f32.mrf.mxu0  ;;  %v14990_v26 = vadd.f32 %v4459_v12, %v14666_v60  ;;  %v4716_v60 = vsel %vm18886_vm2, %v14987_v36, 0.0 }
 0x4a3   :  { %v14992_v39 = vadd.f32 %v4354_v44, %v4066_v56  ;;  %v11015_v48 = vpop.f32.mrf.mxu1 }
 0x4a4   :  { %19113 = vst [vmem:[#allocation32_spill] sm:$0xff] %v14990_v26  ;;  %v4356_v13 = vpop.f32.mrf.mxu0  ;;  %v4714_v61 = vsel %vm18886_vm2, %v14990_v26, 0.0  ;;  %v4718_v26 = vsel %vm18886_vm2, %v14997_v3, 0.0  ;;  %v15015_v36 = vadd.f32 %v11015_v48, %v14711_v0  ;;  %v4079_v0 = vadd.f32 %v14649_v62, %v14893_v9  ;;  %v15043_v62 = vld [vmem:[%s18746_s6] ss:$0 sm:$0xff] }
 0x4a5   :  { %v4715_v19 = vadd.f32 %v4714_v61, %v4713_v50  ;;  %v4472_v1 = vpop.f32.mrf.mxu1  ;;  %v4082_v9 = vadd.f32 %v15043_v62, %v14899_v35 }
 0x4a6   :  { %v4359_v56 = vpop.f32.mrf.mxu0  ;;  %v15006_v12 = vadd.f32 %v4472_v1, %v14694_v58 }
 0x4a7   :  { %v15008_v44 = vadd.f32 %v4359_v56, %v4071_v51  ;;  %v4717_v13 = vadd.f32 %v4716_v60, %v4715_v19  ;;  %v11016_v8 = vpop.f32.mrf.mxu1 }
 0x4a8   :  { %v4361_v29 = vpop.f32.mrf.mxu0  ;;  %v4720_v58 = vsel %vm18886_vm2, %v15006_v12, 0.0 }
 0x4a9   :  { %v4719_v50 = vadd.f32 %v4718_v26, %v4717_v13  ;;  %v4475_v61 = vpop.f32.mrf.mxu1  ;;  %v15025_v29 = vadd.f32 %v11016_v8, %v14717_v16 }
 0x4aa   :  { %v4362_v49 = vpop.f32.mrf.mxu0  ;;  %v15020_v51 = vadd.f32 %v4475_v61, %v14700_v24  ;;  %v4724_v24 = vsel %vm18886_vm2, %v15015_v36, 0.0 }
 0x4ab   :  { %v15022_v19 = vadd.f32 %v4362_v49, %v4074_v4  ;;  %v4721_v1 = vadd.f32 %v4720_v58, %v4719_v50  ;;  %v11019_v60 = vpop.f32.mrf.mxu1  ;;  %v4726_v61 = vsel %vm18886_vm2, %v15025_v29, 0.0 }
 0x4ac   :  { %v4364_v56 = vpop.f32.mrf.mxu0  ;;  %v4722_v63 = vsel %vm18886_vm2, %v15020_v51, 0.0 }
 0x4ad   :  { %v4723_v26 = vadd.f32 %v4722_v63, %v4721_v1  ;;  %v4488_v48 = vpop.f32.mrf.mxu1  ;;  %v15048_v56 = vadd.f32 %v11019_v60, %v14744_v11  ;;  %v4087_v11 = vadd.f32 %v15043_v62, %v14905_v47  ;;  %v4090_v47 = vadd.f32 %v15043_v62, %v14911_v43 }
 0x4ae   :  { %v4367_v13 = vpop.f32.mrf.mxu0  ;;  %v15034_v49 = vadd.f32 %v4488_v48, %v14728_v34 }
 0x4af   :  { %v15036_v4 = vadd.f32 %v4367_v13, %v4079_v0  ;;  %v4725_v50 = vadd.f32 %v4724_v24, %v4723_v26  ;;  %v11020_v16 = vpop.f32.mrf.mxu1 }
 0x4b0   :  { %v4369_v8 = vpop.f32.mrf.mxu0  ;;  %v4728_v63 = vsel %vm18886_vm2, %v15034_v49, 0.0 }
 0x4b1   :  { %v4727_v58 = vadd.f32 %v4726_v61, %v4725_v50  ;;  %v4491_v1 = vpop.f32.mrf.mxu1  ;;  %v15058_v8 = vadd.f32 %v11020_v16, %v14750_v59 }
 0x4b2   :  { %v4370_v34 = vpop.f32.mrf.mxu0  ;;  %v15053_v0 = vadd.f32 %v4491_v1, %v14734_v23  ;;  %v4732_v23 = vsel %vm18886_vm2, %v15048_v56, 0.0 }
 0x4b3   :  { %v15055_v26 = vadd.f32 %v4370_v34, %v4082_v9  ;;  %v4729_v48 = vadd.f32 %v4728_v63, %v4727_v58  ;;  %v11023_v24 = vpop.f32.mrf.mxu1  ;;  %v4734_v34 = vsel %vm18886_vm2, %v15058_v8, 0.0 }
 0x4b4   :  { %v4372_v13 = vpop.f32.mrf.mxu0  ;;  %v4730_v35 = vsel %vm18886_vm2, %v15053_v0, 0.0 }
 0x4b5   :  { %v4731_v60 = vadd.f32 %v4730_v35, %v4729_v48  ;;  %v4504_v50 = vpop.f32.mrf.mxu1  ;;  %v15076_v35 = vadd.f32 %v11023_v24, %v14776_v41  ;;  %v4095_v41 = vadd.f32 %v15043_v62, %v14917_v2  ;;  %v4098_v2 = vadd.f32 %v15043_v62, %v14923_v45 }
 0x4b6   :  { %v4375_v61 = vpop.f32.mrf.mxu0  ;;  %v15067_v9 = vadd.f32 %v4504_v50, %v14760_v42 }
 0x4b7   :  { %v15069_v58 = vadd.f32 %v4375_v61, %v4087_v11  ;;  %v4733_v1 = vadd.f32 %v4732_v23, %v4731_v60  ;;  %v11024_v59 = vpop.f32.mrf.mxu1 }
 0x4b8   :  { %v4377_v16 = vpop.f32.mrf.mxu0  ;;  %v4736_v42 = vsel %vm18886_vm2, %v15067_v9, 0.0 }
 0x4b9   :  { %v4735_v63 = vadd.f32 %v4734_v34, %v4733_v1  ;;  %v4507_v48 = vpop.f32.mrf.mxu1  ;;  %v15086_v16 = vadd.f32 %v11024_v59, %v14782_v15 }
 0x4ba   :  { %v4378_v13 = vpop.f32.mrf.mxu0  ;;  %v15081_v11 = vadd.f32 %v4507_v48, %v14766_v37  ;;  %v4740_v37 = vsel %vm18886_vm2, %v15076_v35, 0.0 }
 0x4bb   :  { %v15083_v60 = vadd.f32 %v4378_v13, %v4090_v47  ;;  %v4737_v50 = vadd.f32 %v4736_v42, %v4735_v63  ;;  %v11027_v23 = vpop.f32.mrf.mxu1  ;;  %v4742_v13 = vsel %vm18886_vm2, %v15086_v16, 0.0 }
 0x4bc   :  { %v4380_v61 = vpop.f32.mrf.mxu0  ;;  %v4738_v43 = vsel %vm18886_vm2, %v15081_v11, 0.0 }
 0x4bd   :  { %v4739_v24 = vadd.f32 %v4738_v43, %v4737_v50  ;;  %v4520_v1 = vpop.f32.mrf.mxu1  ;;  %v15104_v43 = vadd.f32 %v11027_v23, %v14804_v20  ;;  %v4103_v20 = vadd.f32 %v15043_v62, %v14929_v30  ;;  %v4106_v30 = vadd.f32 %v15043_v62, %v14935_v27 }
 0x4be   :  { %v4383_v34 = vpop.f32.mrf.mxu0  ;;  %v15095_v47 = vadd.f32 %v4520_v1, %v14790_v53 }
 0x4bf   :  { %v15097_v63 = vadd.f32 %v4383_v34, %v4095_v41  ;;  %v4741_v48 = vadd.f32 %v4740_v37, %v4739_v24  ;;  %v11028_v15 = vpop.f32.mrf.mxu1 }
 0x4c0   :  { %v4385_v59 = vpop.f32.mrf.mxu0  ;;  %v4744_v53 = vsel %vm18886_vm2, %v15095_v47, 0.0 }
 0x4c1   :  { %v4743_v42 = vadd.f32 %v4742_v13, %v4741_v48  ;;  %v4523_v50 = vpop.f32.mrf.mxu1  ;;  %v15114_v59 = vadd.f32 %v11028_v15, %v14810_v22 }
 0x4c2   :  { %v4386_v61 = vpop.f32.mrf.mxu0  ;;  %v15109_v41 = vadd.f32 %v4523_v50, %v14796_v7  ;;  %v4748_v7 = vsel %vm18886_vm2, %v15104_v43, 0.0 }
 0x4c3   :  { %v15111_v24 = vadd.f32 %v4386_v61, %v4098_v2  ;;  %v4745_v1 = vadd.f32 %v4744_v53, %v4743_v42  ;;  %v11031_v37 = vpop.f32.mrf.mxu1  ;;  %v4750_v61 = vsel %vm18886_vm2, %v15114_v59, 0.0 }
 0x4c4   :  { %v4388_v34 = vpop.f32.mrf.mxu0  ;;  %v4746_v45 = vsel %vm18886_vm2, %v15109_v41, 0.0 }
 0x4c5   :  { %v4747_v23 = vadd.f32 %v4746_v45, %v4745_v1  ;;  %v4536_v48 = vpop.f32.mrf.mxu1  ;;  %v15132_v45 = vadd.f32 %v11031_v37, %v14832_v10  ;;  %v4111_v10 = vadd.f32 %v15043_v62, %v14941_v25  ;;  %v4114_v25 = vadd.f32 %v15043_v62, %v14947_v31 }
 0x4c6   :  { %v4391_v13 = vpop.f32.mrf.mxu0  ;;  %v15123_v2 = vadd.f32 %v4536_v48, %v14818_v46 }
 0x4c7   :  { %v15125_v42 = vadd.f32 %v4391_v13, %v4103_v20  ;;  %v4749_v50 = vadd.f32 %v4748_v7, %v4747_v23  ;;  %v11032_v22 = vpop.f32.mrf.mxu1 }
 0x4c8   :  { %v4393_v15 = vpop.f32.mrf.mxu0  ;;  %v4752_v46 = vsel %vm18886_vm2, %v15123_v2, 0.0 }
 0x4c9   :  { %v4751_v53 = vadd.f32 %v4750_v61, %v4749_v50  ;;  %v4539_v1 = vpop.f32.mrf.mxu1  ;;  %v15142_v15 = vadd.f32 %v11032_v22, %v14838_v28 }
 0x4ca   :  { %v4394_v34 = vpop.f32.mrf.mxu0  ;;  %v15137_v20 = vadd.f32 %v4539_v1, %v14824_v18  ;;  %v4756_v18 = vsel %vm18886_vm2, %v15132_v45, 0.0 }
 0x4cb   :  { %v15139_v23 = vadd.f32 %v4394_v34, %v4106_v30  ;;  %v4753_v48 = vadd.f32 %v4752_v46, %v4751_v53  ;;  %v11035_v7 = vpop.f32.mrf.mxu1  ;;  %v4758_v34 = vsel %vm18886_vm2, %v15142_v15, 0.0 }
 0x4cc   :  { %v4396_v13 = vpop.f32.mrf.mxu0  ;;  %v4754_v27 = vsel %vm18886_vm2, %v15137_v20, 0.0 }
 0x4cd   :  { %v4755_v37 = vadd.f32 %v4754_v27, %v4753_v48  ;;  %v4552_v50 = vpop.f32.mrf.mxu1  ;;  %v15160_v27 = vadd.f32 %v11035_v7, %v14860_v21  ;;  %v4119_v21 = vadd.f32 %v15043_v62, %v14953_v57  ;;  %v4122_v57 = vadd.f32 %v15043_v62, %v14959_v54 }
 0x4ce   :  { %v4399_v61 = vpop.f32.mrf.mxu0  ;;  %v15151_v30 = vadd.f32 %v4552_v50, %v14846_v6 }
 0x4cf   :  { %v15153_v53 = vadd.f32 %v4399_v61, %v4111_v10  ;;  %v4757_v1 = vadd.f32 %v4756_v18, %v4755_v37  ;;  %v11036_v28 = vpop.f32.mrf.mxu1  ;;  %19114 = vst [vmem:[#allocation33_spill] sm:$0xff] %v15160_v27 }
 0x4d0   :  { %v4401_v22 = vpop.f32.mrf.mxu0  ;;  %v4760_v6 = vsel %vm18886_vm2, %v15151_v30, 0.0 }
 0x4d1   :  { %v4759_v46 = vadd.f32 %v4758_v34, %v4757_v1  ;;  %v4555_v48 = vpop.f32.mrf.mxu1  ;;  %v15170_v22 = vadd.f32 %v11036_v28, %v14866_v5 }
 0x4d2   :  { %v4402_v13 = vpop.f32.mrf.mxu0  ;;  %v15165_v10 = vadd.f32 %v4555_v48, %v14852_v33  ;;  %v4764_v33 = vsel %vm18886_vm2, %v15160_v27, 0.0 }
 0x4d3   :  { %v15167_v37 = vadd.f32 %v4402_v13, %v4114_v25  ;;  %v4761_v50 = vadd.f32 %v4760_v6, %v4759_v46  ;;  %v11039_v18 = vpop.f32.mrf.mxu1  ;;  %19115 = vst [vmem:[#allocation12_spill] sm:$0xff] %v15170_v22  ;;  %v4766_v13 = vsel %vm18886_vm2, %v15170_v22, 0.0 }
 0x4d4   :  { %v4404_v61 = vpop.f32.mrf.mxu0  ;;  %v4762_v31 = vsel %vm18886_vm2, %v15165_v10, 0.0 }
 0x4d5   :  { %v4763_v7 = vadd.f32 %v4762_v31, %v4761_v50  ;;  %v4568_v1 = vpop.f32.mrf.mxu1  ;;  %v15188_v31 = vadd.f32 %v11039_v18, %v14885_v14 }
 0x4d6   :  { %v4407_v34 = vpop.f32.mrf.mxu0  ;;  %v15179_v25 = vadd.f32 %v4568_v1, %v14873_v55 }
 0x4d7   :  { %v15181_v46 = vadd.f32 %v4407_v34, %v4119_v21  ;;  %v4765_v48 = vadd.f32 %v4764_v33, %v4763_v7  ;;  %v11040_v5 = vpop.f32.mrf.mxu1  ;;  %19117 = vst [vmem:[#allocation35_spill] sm:$0xff] %v15188_v31 }
 0x4d8   :  { %19116 = vst [vmem:[#allocation34_spill] sm:$0xff] %v15179_v25  ;;  %v4409_v28 = vpop.f32.mrf.mxu0  ;;  %v4768_v55 = vsel %vm18886_vm2, %v15179_v25, 0.0  ;;  %v19123_v25 = vld [vmem:[#allocation44_spill] sm:$0xff] }
 0x4d9   :  { %v4767_v6 = vadd.f32 %v4766_v13, %v4765_v48  ;;  %v4571_v50 = vpop.f32.mrf.mxu1  ;;  %v19119_v28 = vld [vmem:[#allocation41_spill] sm:$0xff] }
 0x4da   :  { %v4410_v61 = vpop.f32.mrf.mxu0  ;;  %v15193_v21 = vadd.f32 %v4571_v50, %v14879_v32  ;;  %v15198_v22 = vadd.f32 %v11040_v5, %v19119_v28  ;;  %v19121_v48 = vld [vmem:[#allocation29_spill] sm:$0xff]  ;;  %v4772_v32 = vsel %vm18886_vm2, %v15188_v31, 0.0 }
 0x4db   :  { %v15195_v7 = vadd.f32 %v4410_v61, %v4122_v57  ;;  %v4769_v1 = vadd.f32 %v4768_v55, %v4767_v6  ;;  %v11043_v33 = vpop.f32.mrf.mxu1  ;;  %v4127_v14 = vadd.f32 %v15043_v62, %v19121_v48  ;;  %v19122_v57 = vld [vmem:[#allocation42_spill] sm:$0xff]  ;;  %v4130_v48 = vadd.f32 %v15043_v62, %v14971_v40 }
 0x4dc   :  { %19118 = vst [vmem:[#allocation11_spill] sm:$0xff] %v15193_v21  ;;  %v4412_v34 = vpop.f32.mrf.mxu0  ;;  %19120 = vst [vmem:[#allocation36_spill] sm:$0xff] %v15198_v22  ;;  %v4770_v54 = vsel %vm18886_vm2, %v15193_v21, 0.0  ;;  %v4774_v28 = vsel %vm18886_vm2, %v15198_v22, 0.0  ;;  %v15216_v31 = vadd.f32 %v11043_v33, %v19123_v25  ;;  %v19126_v22 = vld [vmem:[#allocation45_spill] sm:$0xff] }
 0x4dd   :  { %v4771_v18 = vadd.f32 %v4770_v54, %v4769_v1  ;;  %v4584_v13 = vpop.f32.mrf.mxu1 }
 0x4de   :  { %v4415_v50 = vpop.f32.mrf.mxu0  ;;  %v15207_v61 = vadd.f32 %v4584_v13, %v19122_v57  ;;  %19124 = vst [vmem:[#allocation13_spill] sm:$0xff] %v15216_v31  ;;  %v4780_v33 = vsel %vm18886_vm2, %v15216_v31, 0.0 }
 0x4df   :  { %v15209_v6 = vadd.f32 %v4415_v50, %v4127_v14  ;;  %v4773_v55 = vadd.f32 %v4772_v32, %v4771_v18  ;;  %v11044_v5 = vpop.f32.mrf.mxu1  ;;  %v19125_v14 = vld [vmem:[#allocation43_spill] sm:$0xff] }
 0x4e0   :  { %v4417_v34 = vpop.f32.mrf.mxu0  ;;  %v4776_v13 = vsel %vm18886_vm2, %v15207_v61, 0.0  ;;  %v15226_v27 = vadd.f32 %v11044_v5, %v19126_v22  ;;  %v19130_v22 = vld [vmem:[#allocation48_spill] sm:$0xff] }
 0x4e1   :  { %v4775_v1 = vadd.f32 %v4774_v28, %v4773_v55  ;;  %v4587_v54 = vpop.f32.mrf.mxu1  ;;  %v19128_v55 = vld [vmem:[#allocation46_spill] sm:$0xff] }
 0x4e2   :  { %v4418_v21 = vpop.f32.mrf.mxu0  ;;  %v15221_v50 = vadd.f32 %v4587_v54, %v19125_v14  ;;  %19127 = vst [vmem:[#allocation37_spill] sm:$0xff] %v15226_v27 }
 0x4e3   :  { %v15223_v18 = vadd.f32 %v4418_v21, %v4130_v48  ;;  %v4777_v32 = vadd.f32 %v4776_v13, %v4775_v1  ;;  %v11047_v57 = vpop.f32.mrf.mxu1  ;;  %v4782_v48 = vsel %vm18886_vm2, %v15226_v27, 0.0 }
 0x4e4   :  { %v4420_v34 = vpop.f32.mrf.mxu0  ;;  %v4778_v40 = vsel %vm18886_vm2, %v15221_v50, 0.0  ;;  %v15238_v5 = vadd.f32 %v11047_v57, %v19130_v22 }
 0x4e5   :  { %v4779_v62 = vadd.f32 %v4778_v40, %v4777_v32  ;;  %v4600_v25 = vpop.f32.mrf.mxu1  ;;  %v19132_v32 = vld [vmem:[#allocation47_spill] sm:$0xff] }
 0x4e6   :  { %v15233_v28 = vadd.f32 %v4600_v25, %v19128_v55  ;;  %19131 = vst [vmem:[#allocation16_spill] sm:$0xff] %v15238_v5  ;;  %v19134_v25 = vld [vmem:[#allocation49_spill] sm:$0xff]  ;;  %v4788_v57 = vsel %vm18886_vm2, %v15238_v5, 0.0 }
 0x4e7   :  { %v4781_v54 = vadd.f32 %v4780_v33, %v4779_v62  ;;  %v11048_v21 = vpop.f32.mrf.mxu1 }
 0x4e8   :  { %19129 = vst [vmem:[#allocation14_spill] sm:$0xff] %v15233_v28  ;;  %v4784_v14 = vsel %vm18886_vm2, %v15233_v28, 0.0  ;;  %v15246_v55 = vadd.f32 %v11048_v21, %v19134_v25  ;;  %v19137_v21 = vld [vmem:[#allocation27_spill] sm:$0xff]  ;;  %v19139_v25 = vld [vmem:[#allocation25_spill] sm:$0xff] }
 0x4e9   :  { %v4783_v1 = vadd.f32 %v4782_v48, %v4781_v54  ;;  %v4603_v13 = vpop.f32.mrf.mxu1  ;;  %v19135_v48 = vld [vmem:[#allocation23_spill] sm:$0xff] }
 0x4ea   :  { %v15243_v34 = vadd.f32 %v4603_v13, %v19132_v32 }
 0x4eb   :  { %v4785_v40 = vadd.f32 %v4784_v14, %v4783_v1  ;;  %v11051_v31 = vpop.f32.mrf.mxu1  ;;  %v4790_v1 = vsel %vm18886_vm2, %v15246_v55, 0.0 }
 0x4ec   :  { %19133 = vst [vmem:[#allocation38_spill] sm:$0xff] %v15243_v34  ;;  %v4786_v62 = vsel %vm18886_vm2, %v15243_v34, 0.0  ;;  %v15258_v32 = vadd.f32 %v11051_v31, %v19137_v21 }
 0x4ed   :  { %v4787_v33 = vadd.f32 %v4786_v62, %v4785_v40  ;;  %v4616_v54 = vpop.f32.mrf.mxu1 }
 0x4ee   :  { %v15253_v22 = vadd.f32 %v4616_v54, %v19135_v48  ;;  %19138 = vst [vmem:[#allocation39_spill] sm:$0xff] %v15258_v32  ;;  %v19140_v54 = vld [vmem:[#allocation28_spill] sm:$0xff]  ;;  %v4796_v31 = vsel %vm18886_vm2, %v15258_v32, 0.0 }
 0x4ef   :  { %v4789_v28 = vadd.f32 %v4788_v57, %v4787_v33  ;;  %v11052_v27 = vpop.f32.mrf.mxu1 }
 0x4f0   :  { %19136 = vst [vmem:[#allocation15_spill] sm:$0xff] %v15253_v22  ;;  %v4792_v40 = vsel %vm18886_vm2, %v15253_v22, 0.0  ;;  %v15266_v48 = vadd.f32 %v11052_v27, %v19140_v54 }
 0x4f1   :  { %v4791_v13 = vadd.f32 %v4790_v1, %v4789_v28  ;;  %v4619_v14 = vpop.f32.mrf.mxu1 }
 0x4f2   :  { %v15263_v62 = vadd.f32 %v4619_v14, %v19139_v25  ;;  %19141 = vst [vmem:[#allocation17_spill] sm:$0xff] %v15266_v48 }
 0x4f3   :  { %v4793_v5 = vadd.f32 %v4792_v40, %v4791_v13  ;;  %v11055_v34 = vpop.f32.mrf.mxu1  ;;  %v4798_v13 = vsel %vm18886_vm2, %v15266_v48, 0.0 }
 0x4f4   :  { %v4794_v33 = vsel %vm18886_vm2, %v15263_v62, 0.0  ;;  %v15278_v27 = vadd.f32 %v11055_v34, %v14979_v17 }
 0x4f5   :  { %v4795_v57 = vadd.f32 %v4794_v33, %v4793_v5  ;;  %v4632_v28 = vpop.f32.mrf.mxu1 }
 0x4f6   :  { %v15273_v1 = vadd.f32 %v4632_v28, %v14969_v38  ;;  %19143 = vst [vmem:[#allocation20_spill] sm:$0xff] %v15278_v27  ;;  %v4804_v17 = vsel %vm18886_vm2, %v15278_v27, 0.0 }
 0x4f7   :  { %v4797_v21 = vadd.f32 %v4796_v31, %v4795_v57  ;;  %v11056_v22 = vpop.f32.mrf.mxu1 }
 0x4f8   :  { %19142 = vst [vmem:[#allocation18_spill] sm:$0xff] %v15273_v1  ;;  %v4800_v5 = vsel %vm18886_vm2, %v15273_v1, 0.0  ;;  %v15286_v38 = vadd.f32 %v11056_v22, %v14992_v39 }
 0x4f9   :  { %v4799_v14 = vadd.f32 %v4798_v13, %v4797_v21  ;;  %v4635_v40 = vpop.f32.mrf.mxu1 }
 0x4fa   :  { %v15283_v25 = vadd.f32 %v4635_v40, %v14975_v52  ;;  %19144 = vst [vmem:[#allocation40_spill] sm:$0xff] %v15286_v38  ;;  %v4806_v52 = vsel %vm18886_vm2, %v15286_v38, 0.0 }
 0x4fb   :  { %v4801_v54 = vadd.f32 %v4800_v5, %v4799_v14  ;;  %v11059_v33 = vpop.f32.mrf.mxu1 }
 0x4fc   :  { %v4802_v57 = vsel %vm18886_vm2, %v15283_v25, 0.0  ;;  %v15298_v39 = vadd.f32 %v11059_v33, %v15036_v4 }
 0x4fd   :  { %v4803_v28 = vadd.f32 %v4802_v57, %v4801_v54  ;;  %v4648_v31 = vpop.f32.mrf.mxu1 }
 0x4fe   :  { %v15293_v34 = vadd.f32 %v4648_v31, %v15008_v44  ;;  %v4812_v4 = vsel %vm18886_vm2, %v15298_v39, 0.0 }
 0x4ff   :  { %v4805_v21 = vadd.f32 %v4804_v17, %v4803_v28  ;;  %v11060_v13 = vpop.f32.mrf.mxu1 }
 0x500   :  { %v4808_v22 = vsel %vm18886_vm2, %v15293_v34, 0.0  ;;  %v15306_v44 = vadd.f32 %v11060_v13, %v15055_v26 }
 0x501   :  { %v4807_v14 = vadd.f32 %v4806_v52, %v4805_v21  ;;  %v4651_v40 = vpop.f32.mrf.mxu1 }
 0x502   :  { %v15303_v5 = vadd.f32 %v4651_v40, %v15022_v19  ;;  %v4814_v19 = vsel %vm18886_vm2, %v15306_v44, 0.0 }
 0x503   :  { %v4809_v54 = vadd.f32 %v4808_v22, %v4807_v14  ;;  %v11063_v57 = vpop.f32.mrf.mxu1 }
 0x504   :  { %v4810_v28 = vsel %vm18886_vm2, %v15303_v5, 0.0  ;;  %v4673_v26 = vadd.f32 %v11063_v57, %v15097_v63 }
 0x505   :  { %v4811_v31 = vadd.f32 %v4810_v28, %v4809_v54  ;;  %v4664_v17 = vpop.f32.mrf.mxu1 }
 0x506   :  { %v4665_v33 = vadd.f32 %v4664_v17, %v15069_v58  ;;  %v4820_v17 = vsel %vm18886_vm2, %v4673_v26, 0.0 }
 0x507   :  { %v4813_v21 = vadd.f32 %v4812_v4, %v4811_v31  ;;  %v11064_v52 = vpop.f32.mrf.mxu1 }
 0x508   :  { %v4816_v13 = vsel %vm18886_vm2, %v4665_v33, 0.0  ;;  %v4676_v38 = vadd.f32 %v11064_v52, %v15111_v24 }
 0x509   :  { %v4815_v14 = vadd.f32 %v4814_v19, %v4813_v21  ;;  %v4667_v40 = vpop.f32.mrf.mxu1 }
 0x50a   :  { %v4668_v22 = vadd.f32 %v4667_v40, %v15083_v60  ;;  %v4822_v63 = vsel %vm18886_vm2, %v4676_v38, 0.0 }
 0x50b   :  { %v4817_v54 = vadd.f32 %v4816_v13, %v4815_v14  ;;  %v11067_v28 = vpop.f32.mrf.mxu1 }
 0x50c   :  { %v4818_v27 = vsel %vm18886_vm2, %v4668_v22, 0.0  ;;  %v4689_v60 = vadd.f32 %v11067_v28, %v15153_v53 }
 0x50d   :  { %v4819_v58 = vadd.f32 %v4818_v27, %v4817_v54  ;;  %v4680_v31 = vpop.f32.mrf.mxu1 }
 0x50e   :  { %v4681_v4 = vadd.f32 %v4680_v31, %v15125_v42 }
 0x50f   :  { %v4821_v21 = vadd.f32 %v4820_v17, %v4819_v58  ;;  %v11068_v19 = vpop.f32.mrf.mxu1  ;;  %v4828_v58 = vsel %vm18886_vm2, %v4689_v60, 0.0 }
 0x510   :  { %v4824_v14 = vsel %vm18886_vm2, %v4681_v4, 0.0  ;;  %v4692_v27 = vadd.f32 %v11068_v19, %v15167_v37 }
 0x511   :  { %v4823_v57 = vadd.f32 %v4822_v63, %v4821_v21  ;;  %v4683_v1 = vpop.f32.mrf.mxu1 }
 0x512   :  { %v4684_v24 = vadd.f32 %v4683_v1, %v15139_v23  ;;  %v4830_v53 = vsel %vm18886_vm2, %v4692_v27, 0.0 }
 0x513   :  { %v4825_v52 = vadd.f32 %v4824_v14, %v4823_v57  ;;  %v11071_v40 = vpop.f32.mrf.mxu1 }
 0x514   :  { %v4826_v13 = vsel %vm18886_vm2, %v4684_v24, 0.0  ;;  %v4705_v23 = vadd.f32 %v11071_v40, %v15209_v6 }
 0x515   :  { %v4827_v54 = vadd.f32 %v4826_v13, %v4825_v52  ;;  %v4696_v42 = vpop.f32.mrf.mxu1 }
 0x516   :  { %v4697_v31 = vadd.f32 %v4696_v42, %v15181_v46  ;;  %v4836_v46 = vsel %vm18886_vm2, %v4705_v23, 0.0 }
 0x517   :  { %v4829_v17 = vadd.f32 %v4828_v58, %v4827_v54  ;;  %v11072_v21 = vpop.f32.mrf.mxu1 }
 0x518   :  { %v4832_v1 = vsel %vm18886_vm2, %v4697_v31, 0.0  ;;  %v4708_v57 = vadd.f32 %v11072_v21, %v15223_v18 }
 0x519   :  { %v4831_v28 = vadd.f32 %v4830_v53, %v4829_v17  ;;  %v4699_v63 = vpop.f32.mrf.mxu1 }
 0x51a   :  { %v4700_v37 = vadd.f32 %v4699_v63, %v15195_v7  ;;  %v4838_v54 = vsel %vm18886_vm2, %v4708_v57, 0.0 }
 0x51b   :  { %v4833_v19 = vadd.f32 %v4832_v1, %v4831_v28 }
 0x51c   :  { %v4834_v14 = vsel %vm18886_vm2, %v4700_v37, 0.0 }
 0x51d   :  { %v4835_v52 = vadd.f32 %v4834_v14, %v4833_v19 }
 0x51f   :  { %v4837_v13 = vadd.f32 %v4836_v46, %v4835_v52 }
 0x521   :  { %v4839_v42 = vadd.f32 %v4838_v54, %v4837_v13 }
 0x523   :  { %v4840_v58 = vrot.slane %v4839_v42, 4 }
 0x525   :  { %v4841_v17 = vadd.f32 %v4840_v58, %v4839_v42 }
 0x527   :  { %v4842_v53 = vrot.slane %v4841_v17, 2 }
 0x529   :  { %v4843_v6 = vadd.f32 %v4842_v53, %v4841_v17 }
 0x52b   :  { %v4844_v40 = vrot.slane %v4843_v6, 1 }
 0x52d   :  { %v4845_v48 = vadd.f32 %v4844_v40, %v4843_v6 }
 0x52f   :  { %v15338_v32 = vmul.f32 0.001953125, %v4845_v48 }
 0x531   :  { %v15342_v7 = vsub.f32 %v15283_v25, %v15338_v32  ;;  %v15346_v18 = vsub.f32 %v15293_v34, %v15338_v32  ;;  %v15350_v21 = vsub.f32 %v15303_v5, %v15338_v32  ;;  %v15354_v28 = vsub.f32 %v15298_v39, %v15338_v32 }
 0x532   :  { %v15358_v48 = vsub.f32 %v15306_v44, %v15338_v32  ;;  %v15361_v63 = vsub.f32 %v4665_v33, %v15338_v32  ;;  %v15364_v25 = vsub.f32 %v4668_v22, %v15338_v32  ;;  %v15367_v34 = vsub.f32 %v4673_v26, %v15338_v32 }
 0x533   :  { %19145 = vst [vmem:[#allocation19_spill] sm:$0xff] %v15342_v7  ;;  %v15370_v5 = vsub.f32 %v4676_v38, %v15338_v32  ;;  %v15373_v1 = vsub.f32 %v4681_v4, %v15338_v32  ;;  %v15376_v39 = vsub.f32 %v4684_v24, %v15338_v32  ;;  %v15379_v44 = vsub.f32 %v4689_v60, %v15338_v32  ;;  %v19150_v24 = vld [vmem:[#allocation30_spill] sm:$0xff]  ;;  %v19151_v60 = vld [vmem:[#allocation32_spill] sm:$0xff] }
 0x534   :  { %v15382_v33 = vsub.f32 %v4692_v27, %v15338_v32  ;;  %v15385_v22 = vsub.f32 %v4697_v31, %v15338_v32  ;;  %v15388_v26 = vsub.f32 %v4700_v37, %v15338_v32  ;;  %v15391_v38 = vsub.f32 %v4705_v23, %v15338_v32  ;;  %v19152_v31 = vld [vmem:[#allocation31_spill] sm:$0xff] }
 0x535   :  { %19146 = vst [vmem:[#allocation21_spill] sm:$0xff] %v15373_v1  ;;  %19147 = vst [vmem:[#allocation22_spill] sm:$0xff] %v15376_v39  ;;  %v15394_v4 = vsub.f32 %v4708_v57, %v15338_v32  ;;  %v15398_v19 = vsub.f32 %v19150_v24, %v15338_v32  ;;  %v15402_v27 = vsub.f32 %v19151_v60, %v15338_v32 }
 0x536   :  { %19148 = vst [vmem:[#allocation24_spill] sm:$0xff] %v15379_v44  ;;  %19149 = vst [vmem:[#allocation26_spill] sm:$0xff] %v15382_v33  ;;  %v15406_v14 = vsub.f32 %v19152_v31, %v15338_v32  ;;  %v15410_v37 = vsub.f32 %v14997_v3, %v15338_v32  ;;  %v15418_v52 = vsub.f32 %v15006_v12, %v15338_v32 }
 0x537   :  { %v4911_v23 = vmul.f32 %v15398_v19, %v15398_v19  ;;  %v4912_v57 = vmul.f32 %v15402_v27, %v15402_v27  ;;  %v15424_v13 = vsub.f32 %v15020_v51, %v15338_v32  ;;  %v15432_v17 = vsub.f32 %v15015_v36, %v15338_v32 }
 0x538   :  { %v4913_v46 = vmul.f32 %v15406_v14, %v15406_v14  ;;  %v4914_v3 = vmul.f32 %v15410_v37, %v15410_v37  ;;  %v4915_v12 = vmul.f32 %v15418_v52, %v15418_v52  ;;  %v15439_v51 = vsub.f32 %v15025_v29, %v15338_v32 }
 0x539   :  { %v4975_v54 = vsel %vm18886_vm2, %v4911_v23, 0.0  ;;  %v4976_v42 = vsel %vm18886_vm2, %v4912_v57, 0.0  ;;  %v4916_v40 = vmul.f32 %v15424_v13, %v15424_v13  ;;  %v15446_v36 = vsub.f32 %v15034_v49, %v15338_v32 }
 0x53a   :  { %v4977_v58 = vadd.f32 %v4976_v42, %v4975_v54  ;;  %v4978_v53 = vsel %vm18886_vm2, %v4913_v46, 0.0  ;;  %v4980_v24 = vsel %vm18886_vm2, %v4914_v3, 0.0  ;;  %v4917_v31 = vmul.f32 %v15432_v17, %v15432_v17 }
 0x53b   :  { %v4982_v23 = vsel %vm18886_vm2, %v4915_v12, 0.0  ;;  %v15453_v29 = vsub.f32 %v15053_v0, %v15338_v32  ;;  %v4918_v46 = vmul.f32 %v15439_v51, %v15439_v51  ;;  %v4984_v3 = vsel %vm18886_vm2, %v4916_v40, 0.0 }
 0x53c   :  { %v4979_v6 = vadd.f32 %v4978_v53, %v4977_v58  ;;  %v15460_v49 = vsub.f32 %v15048_v56, %v15338_v32  ;;  %v4919_v42 = vmul.f32 %v15446_v36, %v15446_v36  ;;  %v4986_v58 = vsel %vm18886_vm2, %v4917_v31, 0.0 }
 0x53d   :  { %v15467_v0 = vsub.f32 %v15058_v8, %v15338_v32  ;;  %v4920_v53 = vmul.f32 %v15453_v29, %v15453_v29  ;;  %v15474_v56 = vsub.f32 %v15067_v9, %v15338_v32  ;;  %v15481_v8 = vsub.f32 %v15081_v11, %v15338_v32 }
 0x53e   :  { %v4981_v60 = vadd.f32 %v4980_v24, %v4979_v6  ;;  %v4988_v6 = vsel %vm18886_vm2, %v4918_v46, 0.0  ;;  %v4921_v24 = vmul.f32 %v15460_v49, %v15460_v49  ;;  %v15488_v9 = vsub.f32 %v15076_v35, %v15338_v32 }
 0x53f   :  { %v15495_v11 = vsub.f32 %v15086_v16, %v15338_v32  ;;  %v15502_v35 = vsub.f32 %v15095_v47, %v15338_v32  ;;  %v15509_v16 = vsub.f32 %v15109_v41, %v15338_v32  ;;  %v15516_v47 = vsub.f32 %v15104_v43, %v15338_v32 }
 0x540   :  { %v4983_v57 = vadd.f32 %v4982_v23, %v4981_v60  ;;  %v4990_v60 = vsel %vm18886_vm2, %v4919_v42, 0.0  ;;  %v4922_v23 = vmul.f32 %v15467_v0, %v15467_v0  ;;  %v15523_v41 = vsub.f32 %v15114_v59, %v15338_v32 }
 0x541   :  { %v15530_v43 = vsub.f32 %v15123_v2, %v15338_v32  ;;  %v15537_v59 = vsub.f32 %v15137_v20, %v15338_v32  ;;  %v15544_v2 = vsub.f32 %v15132_v45, %v15338_v32  ;;  %v15551_v20 = vsub.f32 %v15142_v15, %v15338_v32 }
 0x542   :  { %v4985_v54 = vadd.f32 %v4984_v3, %v4983_v57  ;;  %v4992_v57 = vsel %vm18886_vm2, %v4920_v53, 0.0  ;;  %v4923_v3 = vmul.f32 %v15474_v56, %v15474_v56  ;;  %v15558_v45 = vsub.f32 %v15151_v30, %v15338_v32 }
 0x543   :  { %v15565_v15 = vsub.f32 %v15165_v10, %v15338_v32 }
 0x544   :  { %v4987_v12 = vadd.f32 %v4986_v58, %v4985_v54  ;;  %v4994_v54 = vsel %vm18886_vm2, %v4921_v24, 0.0  ;;  %v4924_v58 = vmul.f32 %v15481_v8, %v15481_v8 }
 0x546   :  { %v4989_v40 = vadd.f32 %v4988_v6, %v4987_v12  ;;  %v4996_v12 = vsel %vm18886_vm2, %v4922_v23, 0.0  ;;  %v4925_v6 = vmul.f32 %v15488_v9, %v15488_v9 }
 0x548   :  { %v4991_v31 = vadd.f32 %v4990_v60, %v4989_v40  ;;  %v4998_v40 = vsel %vm18886_vm2, %v4923_v3, 0.0  ;;  %v4926_v60 = vmul.f32 %v15495_v11, %v15495_v11 }
 0x54a   :  { %v4993_v46 = vadd.f32 %v4992_v57, %v4991_v31  ;;  %v5000_v31 = vsel %vm18886_vm2, %v4924_v58, 0.0  ;;  %v4927_v57 = vmul.f32 %v15502_v35, %v15502_v35 }
 0x54c   :  { %v4995_v42 = vadd.f32 %v4994_v54, %v4993_v46  ;;  %v5002_v46 = vsel %vm18886_vm2, %v4925_v6, 0.0  ;;  %v4928_v54 = vmul.f32 %v15509_v16, %v15509_v16 }
 0x54e   :  { %v4997_v53 = vadd.f32 %v4996_v12, %v4995_v42  ;;  %v5004_v42 = vsel %vm18886_vm2, %v4926_v60, 0.0  ;;  %v4929_v12 = vmul.f32 %v15516_v47, %v15516_v47 }
 0x550   :  { %v4999_v24 = vadd.f32 %v4998_v40, %v4997_v53  ;;  %v5006_v53 = vsel %vm18886_vm2, %v4927_v57, 0.0  ;;  %v4930_v40 = vmul.f32 %v15523_v41, %v15523_v41 }
 0x552   :  { %v5001_v23 = vadd.f32 %v5000_v31, %v4999_v24  ;;  %v5008_v24 = vsel %vm18886_vm2, %v4928_v54, 0.0  ;;  %v4931_v31 = vmul.f32 %v15530_v43, %v15530_v43 }
 0x554   :  { %v5003_v3 = vadd.f32 %v5002_v46, %v5001_v23  ;;  %v5010_v23 = vsel %vm18886_vm2, %v4929_v12, 0.0  ;;  %v4932_v46 = vmul.f32 %v15537_v59, %v15537_v59 }
 0x556   :  { %v5005_v58 = vadd.f32 %v5004_v42, %v5003_v3  ;;  %v5012_v3 = vsel %vm18886_vm2, %v4930_v40, 0.0  ;;  %v4933_v42 = vmul.f32 %v15544_v2, %v15544_v2 }
 0x558   :  { %v5007_v6 = vadd.f32 %v5006_v53, %v5005_v58  ;;  %v5014_v58 = vsel %vm18886_vm2, %v4931_v31, 0.0  ;;  %v4934_v53 = vmul.f32 %v15551_v20, %v15551_v20  ;;  %v5018_v31 = vsel %vm18886_vm2, %v4933_v42, 0.0 }
 0x55a   :  { %v5009_v60 = vadd.f32 %v5008_v24, %v5007_v6  ;;  %v5016_v6 = vsel %vm18886_vm2, %v4932_v46, 0.0  ;;  %v19153_v24 = vld [vmem:[#allocation33_spill] sm:$0xff]  ;;  %v5020_v46 = vsel %vm18886_vm2, %v4934_v53, 0.0 }
 0x55b   :  { %v15572_v30 = vsub.f32 %v19153_v24, %v15338_v32  ;;  %v19158_v24 = vld [vmem:[#allocation11_spill] sm:$0xff] }
 0x55c   :  { %v5011_v57 = vadd.f32 %v5010_v23, %v5009_v60  ;;  %v4935_v60 = vmul.f32 %v15558_v45, %v15558_v45 }
 0x55d   :  { %19154 = vst [vmem:[#allocation41_spill] sm:$0xff] %v15572_v30 }
 0x55e   :  { %v5013_v54 = vadd.f32 %v5012_v3, %v5011_v57  ;;  %v19155_v57 = vld [vmem:[#allocation12_spill] sm:$0xff]  ;;  %v4936_v3 = vmul.f32 %v15565_v15, %v15565_v15  ;;  %v5022_v42 = vsel %vm18886_vm2, %v4935_v60, 0.0 }
 0x55f   :  { %v15579_v10 = vsub.f32 %v19155_v57, %v15338_v32 }
 0x560   :  { %v5015_v12 = vadd.f32 %v5014_v58, %v5013_v54  ;;  %v19157_v58 = vld [vmem:[#allocation34_spill] sm:$0xff]  ;;  %v5024_v53 = vsel %vm18886_vm2, %v4936_v3, 0.0 }
 0x561   :  { %19156 = vst [vmem:[#allocation29_spill] sm:$0xff] %v15579_v10  ;;  %v4938_v57 = vmul.f32 %v15579_v10, %v15579_v10 }
 0x562   :  { %v5017_v40 = vadd.f32 %v5016_v6, %v5015_v12  ;;  %v15586_v12 = vsub.f32 %v19157_v58, %v15338_v32  ;;  %v4937_v6 = vmul.f32 %v15572_v30, %v15572_v30 }
 0x563   :  { %v5028_v3 = vsel %vm18886_vm2, %v4938_v57, 0.0 }
 0x564   :  { %v5019_v23 = vadd.f32 %v5018_v31, %v5017_v40  ;;  %v15593_v31 = vsub.f32 %v19158_v24, %v15338_v32  ;;  %v4939_v30 = vmul.f32 %v15586_v12, %v15586_v12  ;;  %v5026_v60 = vsel %vm18886_vm2, %v4937_v6, 0.0 }
 0x566   :  { %v5021_v54 = vadd.f32 %v5020_v46, %v5019_v23  ;;  %v19159_v46 = vld [vmem:[#allocation35_spill] sm:$0xff]  ;;  %v4940_v10 = vmul.f32 %v15593_v31, %v15593_v31  ;;  %v5030_v6 = vsel %vm18886_vm2, %v4939_v30, 0.0 }
 0x567   :  { %v15600_v58 = vsub.f32 %v19159_v46, %v15338_v32 }
 0x568   :  { %v5023_v40 = vadd.f32 %v5022_v42, %v5021_v54  ;;  %v19161_v42 = vld [vmem:[#allocation36_spill] sm:$0xff]  ;;  %v5032_v57 = vsel %vm18886_vm2, %v4940_v10, 0.0 }
 0x569   :  { %19160 = vst [vmem:[#allocation42_spill] sm:$0xff] %v15600_v58  ;;  %v15607_v24 = vsub.f32 %v19161_v42, %v15338_v32  ;;  %v4941_v46 = vmul.f32 %v15600_v58, %v15600_v58 }
 0x56a   :  { %v5025_v23 = vadd.f32 %v5024_v53, %v5023_v40  ;;  %v15614_v53 = vsub.f32 %v15207_v61, %v15338_v32 }
 0x56b   :  { %19162 = vst [vmem:[#allocation44_spill] sm:$0xff] %v15607_v24  ;;  %v4942_v42 = vmul.f32 %v15607_v24, %v15607_v24  ;;  %v5034_v30 = vsel %vm18886_vm2, %v4941_v46, 0.0 }
 0x56c   :  { %v5027_v54 = vadd.f32 %v5026_v60, %v5025_v23  ;;  %19163 = vst [vmem:[#allocation43_spill] sm:$0xff] %v15614_v53  ;;  %v15621_v60 = vsub.f32 %v15221_v50, %v15338_v32  ;;  %v4943_v58 = vmul.f32 %v15614_v53, %v15614_v53 }
 0x56d   :  { %v5036_v10 = vsel %vm18886_vm2, %v4942_v42, 0.0 }
 0x56e   :  { %v5029_v40 = vadd.f32 %v5028_v3, %v5027_v54  ;;  %19164 = vst [vmem:[#allocation45_spill] sm:$0xff] %v15621_v60  ;;  %v19165_v3 = vld [vmem:[#allocation13_spill] sm:$0xff]  ;;  %v4944_v24 = vmul.f32 %v15621_v60, %v15621_v60  ;;  %v5038_v46 = vsel %vm18886_vm2, %v4943_v58, 0.0 }
 0x56f   :  { %v15628_v61 = vsub.f32 %v19165_v3, %v15338_v32 }
 0x570   :  { %v5031_v23 = vadd.f32 %v5030_v6, %v5029_v40  ;;  %v19167_v6 = vld [vmem:[#allocation37_spill] sm:$0xff]  ;;  %v5040_v42 = vsel %vm18886_vm2, %v4944_v24, 0.0 }
 0x571   :  { %19166 = vst [vmem:[#allocation46_spill] sm:$0xff] %v15628_v61  ;;  %v15635_v50 = vsub.f32 %v19167_v6, %v15338_v32  ;;  %v4945_v53 = vmul.f32 %v15628_v61, %v15628_v61 }
 0x572   :  { %v5033_v54 = vadd.f32 %v5032_v57, %v5031_v23  ;;  %v19168_v57 = vld [vmem:[#allocation14_spill] sm:$0xff] }
 0x573   :  { %v15642_v3 = vsub.f32 %v19168_v57, %v15338_v32  ;;  %v4946_v60 = vmul.f32 %v15635_v50, %v15635_v50  ;;  %v5042_v58 = vsel %vm18886_vm2, %v4945_v53, 0.0 }
 0x574   :  { %v5035_v40 = vadd.f32 %v5034_v30, %v5033_v54  ;;  %v19170_v30 = vld [vmem:[#allocation38_spill] sm:$0xff] }
 0x575   :  { %19169 = vst [vmem:[#allocation48_spill] sm:$0xff] %v15642_v3  ;;  %v15649_v6 = vsub.f32 %v19170_v30, %v15338_v32  ;;  %v4947_v61 = vmul.f32 %v15642_v3, %v15642_v3  ;;  %v5044_v24 = vsel %vm18886_vm2, %v4946_v60, 0.0 }
 0x576   :  { %v5037_v23 = vadd.f32 %v5036_v10, %v5035_v40  ;;  %v19172_v10 = vld [vmem:[#allocation16_spill] sm:$0xff] }
 0x577   :  { %19171 = vst [vmem:[#allocation47_spill] sm:$0xff] %v15649_v6  ;;  %v15656_v57 = vsub.f32 %v19172_v10, %v15338_v32  ;;  %v4948_v30 = vmul.f32 %v15649_v6, %v15649_v6  ;;  %v5046_v53 = vsel %vm18886_vm2, %v4947_v61, 0.0 }
 0x578   :  { %v5039_v54 = vadd.f32 %v5038_v46, %v5037_v23  ;;  %v15663_v46 = vsub.f32 %v15246_v55, %v15338_v32  ;;  %v15677_v55 = vsub.f32 %v15263_v62, %v15338_v32 }
 0x579   :  { %19173 = vst [vmem:[#allocation49_spill] sm:$0xff] %v15656_v57  ;;  %v4949_v3 = vmul.f32 %v15656_v57, %v15656_v57  ;;  %v5048_v60 = vsel %vm18886_vm2, %v4948_v30, 0.0 }
 0x57a   :  { %v5041_v40 = vadd.f32 %v5040_v42, %v5039_v54  ;;  %19174 = vst [vmem:[#allocation23_spill] sm:$0xff] %v15663_v46  ;;  %v19175_v42 = vld [vmem:[#allocation15_spill] sm:$0xff]  ;;  %19177 = vst [vmem:[#allocation25_spill] sm:$0xff] %v15677_v55 }
 0x57b   :  { %v15670_v10 = vsub.f32 %v19175_v42, %v15338_v32  ;;  %v5050_v61 = vsel %vm18886_vm2, %v4949_v3, 0.0 }
 0x57c   :  { %v5043_v23 = vadd.f32 %v5042_v58, %v5041_v40  ;;  %v4950_v58 = vmul.f32 %v15663_v46, %v15663_v46  ;;  %v4952_v46 = vmul.f32 %v15677_v55, %v15677_v55  ;;  %v19182_v55 = vld [vmem:[#allocation20_spill] sm:$0xff] }
 0x57d   :  { %19176 = vst [vmem:[#allocation27_spill] sm:$0xff] %v15670_v10  ;;  %v4951_v57 = vmul.f32 %v15670_v10, %v15670_v10 }
 0x57e   :  { %v5045_v54 = vadd.f32 %v5044_v24, %v5043_v23  ;;  %v19178_v24 = vld [vmem:[#allocation39_spill] sm:$0xff]  ;;  %v5052_v30 = vsel %vm18886_vm2, %v4950_v58, 0.0  ;;  %v15708_v58 = vsub.f32 %v19182_v55, %v15338_v32 }
 0x57f   :  { %v15684_v42 = vsub.f32 %v19178_v24, %v15338_v32  ;;  %v5054_v3 = vsel %vm18886_vm2, %v4951_v57, 0.0 }
 0x580   :  { %v5047_v40 = vadd.f32 %v5046_v53, %v5045_v54  ;;  %v19180_v53 = vld [vmem:[#allocation17_spill] sm:$0xff]  ;;  %v4957_v55 = vmul.f32 %v15708_v58, %v15708_v58 }
 0x581   :  { %19179 = vst [vmem:[#allocation28_spill] sm:$0xff] %v15684_v42  ;;  %v15691_v62 = vsub.f32 %v19180_v53, %v15338_v32  ;;  %v4953_v10 = vmul.f32 %v15684_v42, %v15684_v42  ;;  %v5056_v53 = vsel %vm18886_vm2, %v4952_v46, 0.0  ;;  %v19183_v42 = vld [vmem:[#allocation40_spill] sm:$0xff] }
 0x582   :  { %v5049_v23 = vadd.f32 %v5048_v60, %v5047_v40  ;;  %v19181_v60 = vld [vmem:[#allocation18_spill] sm:$0xff]  ;;  %v15715_v57 = vsub.f32 %v19183_v42, %v15338_v32  ;;  %v5066_v42 = vsel %vm18886_vm2, %v4957_v55, 0.0  ;;  %v4963_v55 = vmul.f32 %v15361_v63, %v15361_v63 }
 0x583   :  { %v15698_v24 = vsub.f32 %v19181_v60, %v15338_v32  ;;  %v4959_v32 = vmul.f32 %v15346_v18, %v15346_v18 }
 0x584   :  { %v5051_v54 = vadd.f32 %v5050_v61, %v5049_v23  ;;  %v4954_v61 = vmul.f32 %v15691_v62, %v15691_v62 }
 0x586   :  { %v5053_v40 = vadd.f32 %v5052_v30, %v5051_v54  ;;  %v4955_v54 = vmul.f32 %v15698_v24, %v15698_v24  ;;  %v5058_v30 = vsel %vm18886_vm2, %v4953_v10, 0.0  ;;  %v5060_v46 = vsel %vm18886_vm2, %v4954_v61, 0.0 }
 0x587   :  { %v4958_v10 = vmul.f32 %v15715_v57, %v15715_v57  ;;  %v4960_v61 = vmul.f32 %v15350_v21, %v15350_v21 }
 0x588   :  { %v5055_v23 = vadd.f32 %v5054_v3, %v5053_v40  ;;  %v4956_v40 = vmul.f32 %v15342_v7, %v15342_v7 }
 0x58a   :  { %v5057_v6 = vadd.f32 %v5056_v53, %v5055_v23  ;;  %v5062_v23 = vsel %vm18886_vm2, %v4955_v54, 0.0  ;;  %v4961_v54 = vmul.f32 %v15354_v28, %v15354_v28 }
 0x58c   :  { %v5059_v60 = vadd.f32 %v5058_v30, %v5057_v6  ;;  %v5064_v6 = vsel %vm18886_vm2, %v4956_v40, 0.0  ;;  %v4962_v40 = vmul.f32 %v15358_v48, %v15358_v48 }
 0x58e   :  { %v5061_v3 = vadd.f32 %v5060_v46, %v5059_v60  ;;  %v5068_v60 = vsel %vm18886_vm2, %v4958_v10, 0.0  ;;  %v5076_v10 = vsel %vm18886_vm2, %v4962_v40, 0.0  ;;  %v4968_v40 = vmul.f32 %v15376_v39, %v15376_v39 }
 0x590   :  { %v5063_v53 = vadd.f32 %v5062_v23, %v5061_v3  ;;  %v5070_v3 = vsel %vm18886_vm2, %v4959_v32, 0.0  ;;  %v4965_v32 = vmul.f32 %v15367_v34, %v15367_v34 }
 0x592   :  { %v5065_v30 = vadd.f32 %v5064_v6, %v5063_v53  ;;  %v5072_v53 = vsel %vm18886_vm2, %v4960_v61, 0.0  ;;  %v4966_v61 = vmul.f32 %v15370_v5, %v15370_v5 }
 0x594   :  { %v5067_v7 = vadd.f32 %v5066_v42, %v5065_v30  ;;  %v5074_v30 = vsel %vm18886_vm2, %v4961_v54, 0.0  ;;  %v4967_v54 = vmul.f32 %v15373_v1, %v15373_v1 }
 0x596   :  { %v5069_v46 = vadd.f32 %v5068_v60, %v5067_v7  ;;  %v4964_v7 = vmul.f32 %v15364_v25, %v15364_v25 }
 0x598   :  { %v5071_v23 = vadd.f32 %v5070_v3, %v5069_v46  ;;  %v5078_v46 = vsel %vm18886_vm2, %v4963_v55, 0.0  ;;  %v4969_v55 = vmul.f32 %v15379_v44, %v15379_v44 }
 0x59a   :  { %v5073_v6 = vadd.f32 %v5072_v53, %v5071_v23  ;;  %v5080_v23 = vsel %vm18886_vm2, %v4964_v7, 0.0  ;;  %v4970_v7 = vmul.f32 %v15382_v33, %v15382_v33 }
 0x59c   :  { %v5075_v42 = vadd.f32 %v5074_v30, %v5073_v6  ;;  %v5082_v6 = vsel %vm18886_vm2, %v4965_v32, 0.0  ;;  %v4971_v32 = vmul.f32 %v15385_v22, %v15385_v22 }
 0x59e   :  { %v5077_v60 = vadd.f32 %v5076_v10, %v5075_v42  ;;  %v5084_v42 = vsel %vm18886_vm2, %v4966_v61, 0.0  ;;  %v4972_v61 = vmul.f32 %v15388_v26, %v15388_v26 }
 0x5a0   :  { %v5079_v3 = vadd.f32 %v5078_v46, %v5077_v60  ;;  %v5086_v60 = vsel %vm18886_vm2, %v4967_v54, 0.0  ;;  %v4973_v54 = vmul.f32 %v15391_v38, %v15391_v38 }
 0x5a2   :  { %v5081_v53 = vadd.f32 %v5080_v23, %v5079_v3  ;;  %v5088_v3 = vsel %vm18886_vm2, %v4968_v40, 0.0  ;;  %v4974_v40 = vmul.f32 %v15394_v4, %v15394_v4 }
 0x5a4   :  { %v5083_v30 = vadd.f32 %v5082_v6, %v5081_v53  ;;  %v5090_v53 = vsel %vm18886_vm2, %v4969_v55, 0.0  ;;  %v5098_v55 = vsel %vm18886_vm2, %v4973_v54, 0.0  ;;  %v11206_v54 = vld [vmem:[%s18749_s9 + $0x38] sm:$0xff]  }
 0x5a6   :  { %v5085_v10 = vadd.f32 %v5084_v42, %v5083_v30  ;;  %v5092_v30 = vsel %vm18886_vm2, %v4970_v7, 0.0 }
 0x5a8   :  { %v5087_v46 = vadd.f32 %v5086_v60, %v5085_v10  ;;  %v5094_v10 = vsel %vm18886_vm2, %v4971_v32, 0.0 }
 0x5aa   :  { %v5089_v23 = vadd.f32 %v5088_v3, %v5087_v46  ;;  %v5096_v46 = vsel %vm18886_vm2, %v4972_v61, 0.0  ;;  %v11205_v61 = vld [vmem:[%s18749_s9 + $0x78] sm:$0xff]  }
 0x5ab   :  { %10343 = vmatprep.subr.bf16.mxu0 %v11205_v61  ;;  %v11214_v61 = vld [vmem:[%s18749_s9 + $0x18] sm:$0xff]  }
 0x5ac   :  { %v5091_v6 = vadd.f32 %v5090_v53, %v5089_v23  ;;  %v5100_v53 = vsel %vm18886_vm2, %v4974_v40, 0.0  ;;  %10344 = vmatpush3.bf16.msra.mxu0 %v11206_v54  ;;  %v11211_v40 = vld [vmem:[%s18749_s9 + $0x60] sm:$0xff]  }
 0x5ae   :  { %v5093_v42 = vadd.f32 %v5092_v30, %v5091_v6 }
 0x5b0   :  { %v5095_v60 = vadd.f32 %v5094_v10, %v5093_v42 }
 0x5b2   :  { %v5097_v3 = vadd.f32 %v5096_v46, %v5095_v60  ;;  %v4711_v60 = vld [vmem:[%s18747_s7] sm:$0x1] }
 0x5b4   :  { %v5099_v23 = vadd.f32 %v5098_v55, %v5097_v3  ;;  %v11212_v55 = vld [vmem:[%s18749_s9 + $0x20] sm:$0xff]  }
 0x5b6   :  { %v5101_v33 = vadd.f32 %v5100_v53, %v5099_v23  ;;  %v11213_v23 = vld [vmem:[%s18749_s9 + $0x58] sm:$0xff]   ;;  %v19184_v53 = vld [vmem:[#allocation10_spill] sm:$0xff] }
 0x5b8   :  { %v5102_v7 = vrot.slane %v5101_v33, 4 }
 0x5ba   :  { %v5103_v6 = vadd.f32 %v5102_v7, %v5101_v33  ;;  %v11207_v33 = vld [vmem:[%s18749_s9 + $0x70] sm:$0xff]  }
 0x5bb   :  { %10345 = vmatprep.subr.bf16.mxu0 %v11207_v33 }
 0x5bc   :  { %v5104_v30 = vrot.slane %v5103_v6, 2 }
 0x5be   :  { %v5105_v44 = vadd.f32 %v5104_v30, %v5103_v6  ;;  %v15812_v6 = vld [vmem:[%s18748_s8] ss:$0 sm:$0xff] }
 0x5c0   :  { %v5106_v39 = vrot.slane %v5105_v44, 1 }
 0x5c2   :  { %v5107_v1 = vadd.f32 %v5106_v39, %v5105_v44  ;;  %v11209_v39 = vld [vmem:[%s18749_s9 + $0x68] sm:$0xff]  }
 0x5c3   :  { %v11210_v44 = vld [vmem:[%s18749_s9 + $0x28] sm:$0xff]  }
 0x5c4   :  { %v5108_v32 = vmul.f32 0.001953125, %v5107_v1  ;;  %v11208_v1 = vld [vmem:[%s18749_s9 + $0x30] sm:$0xff]  }
 0x5c5   :  { %10346 = vmatpush3.bf16.msra.mxu0 %v11208_v1 }
 0x5c6   :  { %v5109_v42 = vmax.f32 %v5108_v32, 0.0  ;;  %10347 = vmatprep.subr.bf16.mxu0 %v11209_v39 }
 0x5c8   :  { %v5110_v10 = vadd.f32 1e-05, %v5109_v42 }
 0x5c9   :  { %10348 = vmatpush3.bf16.msra.mxu0 %v11210_v44 }
 0x5ca   :  { %11443 = vrsqrt.f32 %v5110_v10  ;;  %10349 = vmatprep.subr.bf16.mxu0 %v11211_v40 }
 0x5cd   :  { %10350 = vmatpush3.bf16.msra.mxu0 %v11212_v55 }
 0x5ce   :  { %10351 = vmatprep.subr.bf16.mxu0 %v11213_v23 }
 0x5d1   :  { %10352 = vmatpush3.bf16.msra.mxu0 %v11214_v61 }
 0x5d7   :  { %v11444_v46 = vpop.eup %11443 }
 0x5d8   :  { %v5112_v3 = vmul.f32 %v11444_v46, %v4711_v60 }
 0x5da   :  { %v15807_v7 = vrot.slane %v5112_v3, %v19184_v53  ;;  %v11215_v3 = vld [vmem:[%s18749_s9 + $0x50] sm:$0xff]   ;;  %v19203_v53 = vld [vmem:[#allocation21_spill] sm:$0xff] }
 0x5db   :  { %10353 = vmatprep.subr.bf16.mxu0 %v11215_v3  ;;  %v19186_v3 = vld [vmem:[#allocation29_spill] sm:$0xff] }
 0x5dc   :  { %v5177_v30 = vmul.f32 %v15807_v7, %v15385_v22  ;;  %v5178_v32 = vmul.f32 %v15807_v7, %v15388_v26  ;;  %v5179_v42 = vmul.f32 %v15807_v7, %v15391_v38  ;;  %v5180_v10 = vmul.f32 %v15807_v7, %v15394_v4 }
 0x5dd   :  { %v15827_v54 = vmul.f32 %v15807_v7, %v15398_v19  ;;  %v15831_v22 = vmul.f32 %v15807_v7, %v15402_v27  ;;  %v15835_v26 = vmul.f32 %v15807_v7, %v15406_v14  ;;  %v15839_v38 = vmul.f32 %v15807_v7, %v15410_v37 }
 0x5de   :  { %v5247_v4 = vadd.f32 %v15812_v6, %v5177_v30  ;;  %v5248_v33 = vadd.f32 %v15812_v6, %v5178_v32  ;;  %v5249_v19 = vadd.f32 %v15812_v6, %v5179_v42  ;;  %v5250_v1 = vadd.f32 %v15812_v6, %v5180_v10 }
 0x5df   :  { %v15847_v27 = vmul.f32 %v15807_v7, %v15418_v52  ;;  %v15851_v14 = vmul.f32 %v15807_v7, %v15424_v13  ;;  %v15855_v37 = vmul.f32 %v15807_v7, %v15432_v17  ;;  %v15859_v39 = vmul.f32 %v15807_v7, %v15439_v51 }
 0x5e0   :  { %vm5311_vm12 = vcmp.ge.f32.partialorder %v5247_v4, 0.0  ;;  %vm5312_vm14 = vcmp.ge.f32.partialorder %v5248_v33, 0.0  ;;  %vm5313_vm8 = vcmp.ge.f32.partialorder %v5249_v19, 0.0  ;;  %vm5314_vm13 = vcmp.ge.f32.partialorder %v5250_v1, 0.0 }
 0x5e1   :  { %v5375_v44 = vmul.f32 0.2, %v5247_v4  ;;  %v5376_v52 = vmul.f32 0.2, %v5248_v33  ;;  %v5377_v60 = vmul.f32 0.2, %v5249_v19  ;;  %v15863_v13 = vmul.f32 %v15807_v7, %v15446_v36 }
 0x5e2   :  { %v5378_v40 = vmul.f32 0.2, %v5250_v1  ;;  %v15867_v17 = vmul.f32 %v15807_v7, %v15453_v29  ;;  %v15871_v51 = vmul.f32 %v15807_v7, %v15460_v49  ;;  %v15875_v46 = vmul.f32 %v15807_v7, %v15467_v0  ;;  %v11216_v36 = vld [vmem:[%s18749_s9 + $0xf8] sm:$0xff]  }
 0x5e3   :  { %v5439_v55 = vsel %vm5311_vm12, %v5247_v4, %v5375_v44  ;;  %v5440_v23 = vsel %vm5312_vm14, %v5248_v33, %v5376_v52  ;;  %v5441_v29 = vsel %vm5313_vm8, %v5249_v19, %v5377_v60  ;;  %v15885_v30 = vmul.f32 %v15807_v7, %v15474_v56  ;;  %10407 = vmatprep.subr.bf16.mxu1 %v11216_v36  ;;  %v11217_v33 = vld [vmem:[%s18749_s9 + $0x10] sm:$0xff]   ;;  %v11218_v19 = vld [vmem:[%s18749_s9 + $0xb8] sm:$0xff]   ;;  %v19187_v36 = vld [vmem:[#allocation42_spill] sm:$0xff] }
 0x5e4   :  { %v5442_v49 = vsel %vm5314_vm13, %v5250_v1, %v5378_v40  ;;  %v5533_v0 = vsel %vm18886_vm2, %v5439_v55, -inf  ;;  %v5534_v32 = vsel %vm18886_vm2, %v5441_v29, -inf  ;;  %v5536_v42 = vsel %vm18886_vm2, %v5440_v23, -inf  ;;  %10354 = vmatpush3.bf16.msra.mxu0 %v11217_v33  ;;  %10408 = vmatpush3.bf16.msra.mxu1 %v11218_v19  ;;  %v19188_v55 = vld [vmem:[#allocation44_spill] sm:$0xff]  ;;  %v19189_v29 = vld [vmem:[#allocation43_spill] sm:$0xff] }
 0x5e5   :  { %v5535_v10 = vmax.f32 %v5533_v0, %v5534_v32  ;;  %v5537_v61 = vsel %vm18886_vm2, %v5442_v49, -inf  ;;  %v15894_v4 = vmul.f32 %v15807_v7, %v15481_v8  ;;  %v15898_v56 = vmul.f32 %v15807_v7, %v15488_v9  ;;  %v19190_v0 = vld [vmem:[#allocation45_spill] sm:$0xff]  ;;  %v19191_v32 = vld [vmem:[#allocation46_spill] sm:$0xff]  ;;  %v19193_v33 = vld [vmem:[#allocation47_spill] sm:$0xff] }
 0x5e6   :  { %v5538_v1 = vmax.f32 %v5536_v42, %v5537_v61  ;;  %v15908_v44 = vmul.f32 %v15807_v7, %v15495_v11  ;;  %v15912_v8 = vmul.f32 %v15807_v7, %v15502_v35  ;;  %v15916_v9 = vmul.f32 %v15807_v7, %v15509_v16 }
 0x5e7   :  { %5569 = vst.msk [vmem:[#allocation5 + $0xf0] sm:$0xff] %vm18886_vm2, %v5535_v10  ;;  %v15921_v52 = vmul.f32 %v15807_v7, %v15516_v47  ;;  %v15925_v60 = vmul.f32 %v15807_v7, %v15523_v41  ;;  %v15929_v11 = vmul.f32 %v15807_v7, %v15530_v43  ;;  %v15933_v35 = vmul.f32 %v15807_v7, %v15537_v59  ;;  %v19185_v59 = vld [vmem:[#allocation41_spill] sm:$0xff]  ;;  %v19192_v10 = vld [vmem:[#allocation48_spill] sm:$0xff] }
 0x5e8   :  { %5570 = vst.msk [vmem:[#allocation5 + $0xf8] sm:$0xff] %vm18886_vm2, %v5538_v1  ;;  %v15938_v16 = vmul.f32 %v15807_v7, %v15544_v2  ;;  %v15942_v47 = vmul.f32 %v15807_v7, %v15551_v20  ;;  %v15946_v41 = vmul.f32 %v15807_v7, %v15558_v45  ;;  %v15950_v43 = vmul.f32 %v15807_v7, %v15565_v15  ;;  %v19194_v1 = vld [vmem:[#allocation49_spill] sm:$0xff] }
 0x5e9   :  { %v15954_v40 = vmul.f32 %v15807_v7, %v19185_v59  ;;  %v15958_v2 = vmul.f32 %v15807_v7, %v19186_v3  ;;  %v15962_v20 = vmul.f32 %v15807_v7, %v15586_v12  ;;  %v15966_v45 = vmul.f32 %v15807_v7, %v15593_v31  ;;  %v19195_v3 = vld [vmem:[#allocation23_spill] sm:$0xff] }
 0x5ea   :  { %v15970_v15 = vmul.f32 %v15807_v7, %v19187_v36  ;;  %v15974_v23 = vmul.f32 %v15807_v7, %v19188_v55  ;;  %v15978_v49 = vmul.f32 %v15807_v7, %v19189_v29  ;;  %v15982_v12 = vmul.f32 %v15807_v7, %v19190_v0  ;;  %v19196_v55 = vld [vmem:[#allocation27_spill] sm:$0xff]  ;;  %v19197_v29 = vld [vmem:[#allocation25_spill] sm:$0xff] }
 0x5eb   :  { %v15986_v31 = vmul.f32 %v15807_v7, %v19191_v32  ;;  %v15990_v42 = vmul.f32 %v15807_v7, %v15635_v50  ;;  %v15994_v61 = vmul.f32 %v15807_v7, %v19192_v10  ;;  %v15998_v19 = vmul.f32 %v15807_v7, %v19193_v33  ;;  %v19198_v32 = vld [vmem:[#allocation28_spill] sm:$0xff] }
 0x5ec   :  { %v16002_v59 = vmul.f32 %v15807_v7, %v19194_v1  ;;  %v16006_v36 = vmul.f32 %v15807_v7, %v19195_v3  ;;  %v16010_v50 = vmul.f32 %v15807_v7, %v19196_v55  ;;  %v16014_v0 = vmul.f32 %v15807_v7, %v19197_v29  ;;  %v19199_v3 = vld [vmem:[#allocation19_spill] sm:$0xff] }
 0x5ed   :  { %v16018_v10 = vmul.f32 %v15807_v7, %v19198_v32  ;;  %v16022_v33 = vmul.f32 %v15807_v7, %v15691_v62  ;;  %v16026_v1 = vmul.f32 %v15807_v7, %v15698_v24  ;;  %v16030_v55 = vmul.f32 %v15807_v7, %v19199_v3 }
 0x5ee   :  { %v16034_v29 = vmul.f32 %v15807_v7, %v15708_v58  ;;  %v16038_v32 = vmul.f32 %v15807_v7, %v15715_v57  ;;  %v16042_v62 = vmul.f32 %v15807_v7, %v15346_v18  ;;  %v16046_v24 = vmul.f32 %v15807_v7, %v15350_v21 }
 0x5ef   :  { %v16050_v3 = vmul.f32 %v15807_v7, %v15354_v28  ;;  %v16054_v58 = vmul.f32 %v15807_v7, %v15358_v48  ;;  %v16058_v57 = vmul.f32 %v15807_v7, %v15361_v63  ;;  %v16062_v18 = vmul.f32 %v15807_v7, %v15364_v25 }
 0x5f0   :  { %v16066_v21 = vmul.f32 %v15807_v7, %v15367_v34  ;;  %v16070_v28 = vmul.f32 %v15807_v7, %v15370_v5  ;;  %v16074_v48 = vmul.f32 %v15807_v7, %v19203_v53  ;;  %v16090_v5 = vadd.f32 %v15812_v6, %v15827_v54 }
 0x5f1   :  { %19200 = vst [vmem:[#allocation30_spill] sm:$0xff] %v16054_v58  ;;  %19201 = vst [vmem:[#allocation32_spill] sm:$0xff] %v16058_v57  ;;  %v19204_v58 = vld [vmem:[#allocation22_spill] sm:$0xff]  ;;  %v19205_v57 = vld [vmem:[#allocation24_spill] sm:$0xff]  ;;  %v16094_v53 = vadd.f32 %v15812_v6, %v15831_v22  ;;  %v16109_v54 = vadd.f32 %v15812_v6, %v15847_v27  ;;  %v16113_v22 = vadd.f32 %v15812_v6, %v15851_v14 }
 0x5f2   :  { %19202 = vst [vmem:[#allocation31_spill] sm:$0xff] %v16062_v18  ;;  %v16078_v63 = vmul.f32 %v15807_v7, %v19204_v58  ;;  %v16082_v25 = vmul.f32 %v15807_v7, %v19205_v57  ;;  %v19206_v18 = vld [vmem:[#allocation26_spill] sm:$0xff]  ;;  %v11219_v58 = vld [vmem:[%s18749_s9 + $0xf0] sm:$0xff]   ;;  %v16101_v57 = vadd.f32 %v15812_v6, %v15835_v26  ;;  %v16121_v26 = vadd.f32 %v15812_v6, %v15859_v39 }
 0x5f3   :  { %v16086_v34 = vmul.f32 %v15807_v7, %v19206_v18  ;;  %v16105_v7 = vadd.f32 %v15812_v6, %v15839_v38  ;;  %v16117_v18 = vadd.f32 %v15812_v6, %v15855_v37  ;;  %v16125_v38 = vadd.f32 %v15812_v6, %v15863_v13  ;;  %10409 = vmatprep.subr.bf16.mxu1 %v11219_v58 }
 0x5f4   :  { %v16129_v27 = vadd.f32 %v15812_v6, %v15867_v17  ;;  %v16133_v14 = vadd.f32 %v15812_v6, %v15871_v51  ;;  %v16137_v37 = vadd.f32 %v15812_v6, %v15875_v46  ;;  %v16141_v39 = vadd.f32 %v15812_v6, %v15885_v30 }
 0x5f5   :  { %v16145_v13 = vadd.f32 %v15812_v6, %v15894_v4  ;;  %v16149_v17 = vadd.f32 %v15812_v6, %v15898_v56  ;;  %v16153_v51 = vadd.f32 %v15812_v6, %v15908_v44  ;;  %v16157_v46 = vadd.f32 %v15812_v6, %v15912_v8  ;;  %v11220_v4 = vld [vmem:[%s18749_s9 + $0xb0] sm:$0xff]  }
 0x5f6   :  { %v16161_v30 = vadd.f32 %v15812_v6, %v15916_v9  ;;  %v16168_v56 = vadd.f32 %v15812_v6, %v15921_v52  ;;  %v16172_v44 = vadd.f32 %v15812_v6, %v15925_v60  ;;  %v16176_v8 = vadd.f32 %v15812_v6, %v15929_v11  ;;  %10410 = vmatpush3.bf16.msra.mxu1 %v11220_v4 }
 0x5f7   :  { %v16180_v9 = vadd.f32 %v15812_v6, %v15933_v35  ;;  %v16184_v58 = vadd.f32 %v15812_v6, %v15938_v16  ;;  %v16188_v52 = vadd.f32 %v15812_v6, %v15942_v47  ;;  %v16192_v60 = vadd.f32 %v15812_v6, %v15946_v41 }
 0x5f8   :  { %v16196_v11 = vadd.f32 %v15812_v6, %v15950_v43  ;;  %v16200_v35 = vadd.f32 %v15812_v6, %v15954_v40  ;;  %v16204_v16 = vadd.f32 %v15812_v6, %v15958_v2  ;;  %v16208_v47 = vadd.f32 %v15812_v6, %v15962_v20  ;;  %v19213_v4 = vld [vmem:[#allocation30_spill] sm:$0xff] }
 0x5f9   :  { %v16212_v41 = vadd.f32 %v15812_v6, %v15966_v45  ;;  %v16216_v43 = vadd.f32 %v15812_v6, %v15970_v15  ;;  %v16220_v40 = vadd.f32 %v15812_v6, %v15974_v23  ;;  %v16224_v2 = vadd.f32 %v15812_v6, %v15978_v49 }
 0x5fa   :  { %v16228_v20 = vadd.f32 %v15812_v6, %v15982_v12  ;;  %v16232_v45 = vadd.f32 %v15812_v6, %v15986_v31  ;;  %v16236_v15 = vadd.f32 %v15812_v6, %v15990_v42  ;;  %v16240_v23 = vadd.f32 %v15812_v6, %v15994_v61 }
 0x5fb   :  { %v16244_v49 = vadd.f32 %v15812_v6, %v15998_v19  ;;  %v16248_v12 = vadd.f32 %v15812_v6, %v16002_v59  ;;  %v16252_v31 = vadd.f32 %v15812_v6, %v16006_v36  ;;  %v16256_v42 = vadd.f32 %v15812_v6, %v16010_v50 }
 0x5fc   :  { %v16260_v61 = vadd.f32 %v15812_v6, %v16014_v0  ;;  %v16264_v19 = vadd.f32 %v15812_v6, %v16018_v10  ;;  %v16268_v59 = vadd.f32 %v15812_v6, %v16022_v33  ;;  %v16272_v36 = vadd.f32 %v15812_v6, %v16026_v1 }
 0x5fd   :  { %v16276_v50 = vadd.f32 %v15812_v6, %v16030_v55  ;;  %v16280_v0 = vadd.f32 %v15812_v6, %v16034_v29  ;;  %v16284_v10 = vadd.f32 %v15812_v6, %v16038_v32  ;;  %v16288_v33 = vadd.f32 %v15812_v6, %v16042_v62 }
 0x5fe   :  { %v16292_v1 = vadd.f32 %v15812_v6, %v16046_v24  ;;  %v16296_v55 = vadd.f32 %v15812_v6, %v16050_v3  ;;  %v16300_v29 = vadd.f32 %v15812_v6, %v19213_v4  ;;  %v16312_v24 = vadd.f32 %v15812_v6, %v16066_v21 }
 0x5ff   :  { %19207 = vst [vmem:[#allocation33_spill] sm:$0xff] %v16276_v50  ;;  %19208 = vst [vmem:[#allocation12_spill] sm:$0xff] %v16280_v0  ;;  %v19215_v0 = vld [vmem:[#allocation32_spill] sm:$0xff]  ;;  %v16316_v3 = vadd.f32 %v15812_v6, %v16070_v28  ;;  %v16320_v4 = vadd.f32 %v15812_v6, %v16074_v48  ;;  %v16332_v21 = vadd.f32 %v15812_v6, %v16086_v34  ;;  %v11221_v28 = vld [vmem:[%s18749_s9 + $0x48] sm:$0xff]   ;;  %vm5251_vm0 = vcmp.ge.f32.partialorder %v16090_v5, 0.0 }
 0x600   :  { %19209 = vst [vmem:[#allocation34_spill] sm:$0xff] %v16284_v10  ;;  %19210 = vst [vmem:[#allocation11_spill] sm:$0xff] %v16288_v33  ;;  %v16304_v32 = vadd.f32 %v15812_v6, %v19215_v0  ;;  %v19217_v10 = vld [vmem:[#allocation31_spill] sm:$0xff]  ;;  %v16324_v0 = vadd.f32 %v15812_v6, %v16078_v63  ;;  %10355 = vmatprep.subr.bf16.mxu0 %v11221_v28  ;;  %vm5252_vm4 = vcmp.ge.f32.partialorder %v16094_v53, 0.0  ;;  %vm5253_vm10 = vcmp.ge.f32.partialorder %v16101_v57, 0.0  ;;  %v11225_v28 = vld [vmem:[%s18749_s9 + $0xe0] sm:$0xff]  }
 0x601   :  { %19211 = vst [vmem:[#allocation35_spill] sm:$0xff] %v16292_v1  ;;  %19212 = vst [vmem:[#allocation36_spill] sm:$0xff] %v16296_v55  ;;  %v16308_v62 = vadd.f32 %v15812_v6, %v19217_v10  ;;  %v16328_v10 = vadd.f32 %v15812_v6, %v16082_v25  ;;  %v11222_v48 = vld [vmem:[%s18749_s9 + $0xe8] sm:$0xff]   ;;  %v5601_v6 = vld [vmem:[#allocation5 + $0xf0] ss:$2 sm:$0xff]  ;;  %vm5254_vm9 = vcmp.ge.f32.partialorder %v16105_v7, 0.0 }
 0x602   :  { %19214 = vst [vmem:[#allocation13_spill] sm:$0xff] %v16300_v29  ;;  %19216 = vst [vmem:[#allocation37_spill] sm:$0xff] %v16304_v32  ;;  %10411 = vmatprep.subr.bf16.mxu1 %v11222_v48  ;;  %v11223_v63 = vld [vmem:[%s18749_s9 + $0x8] sm:$0xff]   ;;  %v5633_v34 = vld [vmem:[#allocation5 + $0xf1] ss:$2 sm:$0xff]  ;;  %vm5255_vm5 = vcmp.ge.f32.partialorder %v16109_v54, 0.0 }
 0x603   :  { %19218 = vst [vmem:[#allocation14_spill] sm:$0xff] %v16308_v62  ;;  %19219 = vst [vmem:[#allocation38_spill] sm:$0xff] %v16312_v24  ;;  %v11224_v25 = vld [vmem:[%s18749_s9 + $0xa8] sm:$0xff]   ;;  %10356 = vmatpush3.bf16.msra.mxu0 %v11223_v63  ;;  %v11226_v48 = vld [vmem:[%s18749_s9 + $0xa0] sm:$0xff]   ;;  %vm5256_vm1 = vcmp.ge.f32.partialorder %v16113_v22, 0.0  ;;  %vm5257_vm15 = vcmp.ge.f32.partialorder %v16117_v18, 0.0  ;;  %v5649_v24 = vmax.f32 %v5601_v6, %v5633_v34 }
 0x604   :  { %19220 = vst [vmem:[#allocation16_spill] sm:$0xff] %v16316_v3  ;;  %19221 = vst [vmem:[#allocation15_spill] sm:$0xff] %v16320_v4  ;;  %10412 = vmatpush3.bf16.msra.mxu1 %v11224_v25  ;;  %vm5258_vm6 = vcmp.ge.f32.partialorder %v16121_v26, 0.0  ;;  %v11227_v63 = vld [vmem:[%s18749_s9 + $0x40] sm:$0xff]   ;;  %v11228_v25 = vld [vmem:[%s18749_s9 + $0xd8] sm:$0xff]   ;;  %vm5259_vm11 = vcmp.ge.f32.partialorder %v16125_v38, 0.0 }
 0x605   :  { %19222 = vst [vmem:[#allocation39_spill] sm:$0xff] %v16324_v0  ;;  %19223 = vst [vmem:[#allocation17_spill] sm:$0xff] %v16328_v10  ;;  %vm5260_vm3 = vcmp.ge.f32.partialorder %v16129_v27, 0.0  ;;  %v5316_v10 = vmul.f32 0.2, %v16094_v53  ;;  %10413 = vmatprep.subr.bf16.mxu1 %v11225_v28  ;;  %vm5261_vm7 = vcmp.ge.f32.partialorder %v16133_v14, 0.0  ;;  %10357 = vmatprep.subr.bf16.mxu0 %v11227_v63 }
 0x606   :  { %19224 = vst [vmem:[#allocation18_spill] sm:$0xff] %v16332_v21  ;;  %v5315_v21 = vmul.f32 0.2, %v16090_v5  ;;  %v5317_v0 = vmul.f32 0.2, %v16101_v57  ;;  %vm5262_vm12 = vcmp.ge.f32.partialorder %v16137_v37, 0.0 }
 0x607   :  { %v5318_v4 = vmul.f32 0.2, %v16105_v7  ;;  %v5319_v3 = vmul.f32 0.2, %v16109_v54  ;;  %v5320_v62 = vmul.f32 0.2, %v16113_v22  ;;  %v16390_v63 = vsel %vm5252_vm4, %v16094_v53, %v5316_v10 }
 0x608   :  { %10414 = vmatpush3.bf16.msra.mxu1 %v11226_v48  ;;  %v5321_v32 = vmul.f32 0.2, %v16117_v18  ;;  %v5322_v29 = vmul.f32 0.2, %v16121_v26  ;;  %v16381_v28 = vsel %vm5251_vm0, %v16090_v5, %v5315_v21  ;;  %vm5263_vm14 = vcmp.ge.f32.partialorder %v16141_v39, 0.0  ;;  %19226 = vst [vmem:[#allocation40_spill] sm:$0xff] %v16390_v63 }
 0x609   :  { %19225 = vst [vmem:[#allocation20_spill] sm:$0xff] %v16381_v28  ;;  %10415 = vmatprep.subr.bf16.mxu1 %v11228_v25  ;;  %v5323_v6 = vmul.f32 0.2, %v16125_v38  ;;  %v5324_v34 = vmul.f32 0.2, %v16129_v27  ;;  %5666 = vst.msk [vmem:[#allocation3 + $0x121] sm:$0xff] %vm18886_vm2, %v5649_v24  ;;  %v16406_v28 = vsel %vm5253_vm10, %v16101_v57, %v5317_v0  ;;  %v16421_v63 = vsel %vm5254_vm9, %v16105_v7, %v5318_v4 }
 0x60a   :  { %v5325_v48 = vmul.f32 0.2, %v16133_v14  ;;  %vm5264_vm8 = vcmp.ge.f32.partialorder %v16145_v13, 0.0  ;;  %v16395_v5 = vmul.f32 0.2, %v16137_v37  ;;  %19227 = vst [vmem:[#allocation41_spill] sm:$0xff] %v16406_v28 }
 0x60b   :  { %v16398_v21 = vmul.f32 0.2, %v16141_v39  ;;  %v16401_v25 = vmul.f32 0.2, %v16145_v13  ;;  %vm5265_vm13 = vcmp.ge.f32.partialorder %v16149_v17, 0.0  ;;  %19229 = vst [vmem:[#allocation42_spill] sm:$0xff] %v16421_v63 }
 0x60c   :  { %v16410_v53 = vmul.f32 0.2, %v16149_v17  ;;  %v16413_v24 = vmul.f32 0.2, %v16153_v51  ;;  %v16416_v10 = vmul.f32 0.2, %v16157_v46 }
 0x60d   :  { %vm5266_vm0 = vcmp.ge.f32.partialorder %v16153_v51, 0.0  ;;  %v16425_v57 = vmul.f32 0.2, %v16161_v30  ;;  %v16428_v0 = vmul.f32 0.2, %v16168_v56  ;;  %vm5267_vm4 = vcmp.ge.f32.partialorder %v16157_v46, 0.0 }
 0x60e   :  { %19228 = vst [vmem:[#allocation29_spill] sm:$0xff] %v16416_v10  ;;  %v16431_v28 = vmul.f32 0.2, %v16172_v44  ;;  %v16436_v10 = vsel %vm5255_vm5, %v16109_v54, %v5319_v3  ;;  %v16440_v7 = vmul.f32 0.2, %v16176_v8  ;;  %vm5268_vm10 = vcmp.ge.f32.partialorder %v16161_v30, 0.0 }
 0x60f   :  { %19231 = vst [vmem:[#allocation43_spill] sm:$0xff] %v16436_v10  ;;  %v16443_v4 = vmul.f32 0.2, %v16180_v9  ;;  %v16446_v63 = vmul.f32 0.2, %v16184_v58  ;;  %vm5269_vm9 = vcmp.ge.f32.partialorder %v16168_v56, 0.0 }
 0x610   :  { %19230 = vst [vmem:[#allocation44_spill] sm:$0xff] %v16431_v28  ;;  %v16451_v28 = vsel %vm5256_vm1, %v16113_v22, %v5320_v62  ;;  %v16455_v54 = vmul.f32 0.2, %v16188_v52  ;;  %v16458_v3 = vmul.f32 0.2, %v16192_v60  ;;  %vm19271_vm5 = vcmp.ge.f32.partialorder %v16176_v8, 0.0 }
 0x611   :  { %19232 = vst [vmem:[#allocation45_spill] sm:$0xff] %v16446_v63  ;;  %19233 = vst [vmem:[#allocation46_spill] sm:$0xff] %v16451_v28  ;;  %v16461_v10 = vmul.f32 0.2, %v16196_v11  ;;  %v16466_v63 = vsel %vm5257_vm15, %v16117_v18, %v5321_v32  ;;  %v16472_v22 = vmul.f32 0.2, %v16200_v35  ;;  %v16483_v18 = vsel %vm5258_vm6, %v16121_v26, %v5322_v29 }
 0x612   :  { %19234 = vst [vmem:[#allocation48_spill] sm:$0xff] %v16466_v63  ;;  %v16475_v62 = vmul.f32 0.2, %v16204_v16  ;;  %v16478_v28 = vmul.f32 0.2, %v16208_v47  ;;  %19236 = vst [vmem:[#allocation49_spill] sm:$0xff] %v16483_v18  ;;  %v16501_v26 = vsel %vm5259_vm11, %v16125_v38, %v5323_v6  ;;  %v16519_v38 = vsel %vm5260_vm3, %v16129_v27, %v5324_v34 }
 0x613   :  { %vm5272_vm15 = vcmp.ge.f32.partialorder %v16180_v9, 0.0  ;;  %v16490_v32 = vmul.f32 0.2, %v16212_v41  ;;  %v16493_v63 = vmul.f32 0.2, %v16216_v43  ;;  %19238 = vst [vmem:[#allocation27_spill] sm:$0xff] %v16501_v26  ;;  %v16537_v27 = vsel %vm5261_vm7, %v16133_v14, %v5325_v48 }
 0x614   :  { %19235 = vst [vmem:[#allocation47_spill] sm:$0xff] %v16478_v28  ;;  %v16496_v28 = vmul.f32 0.2, %v16220_v40  ;;  %vm5276_vm6 = vcmp.ge.f32.partialorder %v16196_v11, 0.0  ;;  %v16508_v29 = vmul.f32 0.2, %v16224_v2  ;;  %v16556_v14 = vsel %vm5262_vm12, %v16137_v37, %v16395_v5 }
 0x615   :  { %v16511_v18 = vmul.f32 0.2, %v16228_v20  ;;  %19240 = vst [vmem:[#allocation28_spill] sm:$0xff] %v16519_v38  ;;  %vm5280_vm11 = vcmp.ge.f32.partialorder %v16212_v41, 0.0  ;;  %v16526_v6 = vmul.f32 0.2, %v16236_v15  ;;  %v16575_v37 = vsel %vm5263_vm14, %v16141_v39, %v16398_v21 }
 0x616   :  { %19237 = vst [vmem:[#allocation23_spill] sm:$0xff] %v16496_v28  ;;  %v16514_v28 = vmul.f32 0.2, %v16232_v45  ;;  %v16529_v26 = vmul.f32 0.2, %v16240_v23  ;;  %19242 = vst [vmem:[#allocation21_spill] sm:$0xff] %v16537_v27  ;;  %v16594_v39 = vsel %vm5264_vm8, %v16145_v13, %v16401_v25  ;;  %v16613_v13 = vsel %vm5265_vm13, %v16149_v17, %v16410_v53 }
 0x617   :  { %vm5284_vm3 = vcmp.ge.f32.partialorder %v16228_v20, 0.0  ;;  %v16544_v34 = vmul.f32 0.2, %v16248_v12  ;;  %v16547_v38 = vmul.f32 0.2, %v16252_v31  ;;  %19244 = vst [vmem:[#allocation24_spill] sm:$0xff] %v16556_v14  ;;  %v16626_v17 = vsel %vm5266_vm0, %v16153_v51, %v16413_v24 }
 0x618   :  { %19239 = vst [vmem:[#allocation25_spill] sm:$0xff] %v16514_v28  ;;  %v16532_v28 = vmul.f32 0.2, %v16244_v49  ;;  %vm5288_vm7 = vcmp.ge.f32.partialorder %v16244_v49, 0.0  ;;  %v16563_v48 = vmul.f32 0.2, %v16260_v61 }
 0x619   :  { %v16566_v27 = vmul.f32 0.2, %v16264_v19  ;;  %19247 = vst [vmem:[#allocation32_spill] sm:$0xff] %v16575_v37  ;;  %vm5292_vm12 = vcmp.ge.f32.partialorder %v16260_v61, 0.0  ;;  %v16582_v5 = vmul.f32 0.2, %v16272_v36 }
 0x61a   :  { %19241 = vst [vmem:[#allocation19_spill] sm:$0xff] %v16532_v28  ;;  %v16550_v28 = vmul.f32 0.2, %v16256_v42  ;;  %v16585_v14 = vmul.f32 0.2, %v16276_v50  ;;  %19251 = vst [vmem:[#allocation51_spill] sm:$0xff] %v16594_v39 }
 0x61b   :  { %19245 = vst [vmem:[#allocation26_spill] sm:$0xff] %v16566_v27  ;;  %vm5296_vm14 = vcmp.ge.f32.partialorder %v16276_v50, 0.0  ;;  %v19252_v21 = vld [vmem:[#allocation34_spill] sm:$0xff]  ;;  %19256 = vst [vmem:[#allocation55_spill] sm:$0xff] %v16613_v13  ;;  %vm5300_vm8 = vcmp.ge.f32.partialorder %v16292_v1, 0.0  ;;  %v19257_v25 = vld [vmem:[#allocation13_spill] sm:$0xff] }
 0x61c   :  { %19243 = vst [vmem:[#allocation22_spill] sm:$0xff] %v16550_v28  ;;  %v16569_v28 = vmul.f32 0.2, %v16268_v59  ;;  %19248 = vst [vmem:[#allocation31_spill] sm:$0xff] %v16585_v14  ;;  %v16601_v37 = vmul.f32 0.2, %v19252_v21 }
 0x61d   :  { %v16604_v14 = vmul.f32 0.2, %v16288_v33  ;;  %v19258_v39 = vld [vmem:[#allocation37_spill] sm:$0xff]  ;;  %v5365_v33 = vmul.f32 0.2, %v16296_v55  ;;  %19259 = vst [vmem:[#allocation56_spill] sm:$0xff] %v16626_v17 }
 0x61e   :  { %19246 = vst [vmem:[#allocation30_spill] sm:$0xff] %v16569_v28  ;;  %v19249_v28 = vld [vmem:[#allocation12_spill] sm:$0xff]  ;;  %19253 = vst [vmem:[#allocation52_spill] sm:$0xff] %v16601_v37  ;;  %v19260_v53 = vld [vmem:[#allocation14_spill] sm:$0xff] }
 0x61f   :  { %v16588_v27 = vmul.f32 0.2, %v19249_v28  ;;  %19254 = vst [vmem:[#allocation53_spill] sm:$0xff] %v16604_v14  ;;  %v5366_v14 = vmul.f32 0.2, %v19257_v25  ;;  %vm5304_vm13 = vcmp.ge.f32.partialorder %v19260_v53, 0.0 }
 0x620   :  { %v19261_v13 = vld [vmem:[#allocation38_spill] sm:$0xff]  ;;  %v19263_v21 = vld [vmem:[#allocation15_spill] sm:$0xff]  ;;  %v5368_v55 = vmul.f32 0.2, %v19260_v53  ;;  %v19264_v37 = vld [vmem:[#allocation29_spill] sm:$0xff] }
 0x621   :  { %19250 = vst [vmem:[#allocation50_spill] sm:$0xff] %v16588_v27  ;;  %v16607_v27 = vmul.f32 0.2, %v16292_v1  ;;  %v19262_v1 = vld [vmem:[#allocation16_spill] sm:$0xff]  ;;  %vm5307_vm2 = vcmp.ge.f32.partialorder %v19263_v21, 0.0  ;;  %v16639_v51 = vsel %vm5267_vm4, %v16157_v46, %v19264_v37  ;;  %v19266_v24 = vld [vmem:[#allocation39_spill] sm:$0xff]  ;;  %v16658_v37 = vsel %vm5269_vm9, %v16168_v56, %v16428_v0 }
 0x622   :  { %v5369_v25 = vmul.f32 0.2, %v19261_v13  ;;  %19265 = vst [vmem:[#allocation15_spill] sm:$0xff] %v16639_v51  ;;  %vm5308_vm0 = vcmp.ge.f32.partialorder %v19266_v24, 0.0  ;;  %v19267_v17 = vld [vmem:[#allocation17_spill] sm:$0xff]  ;;  %v19268_v28 = vld [vmem:[#allocation18_spill] sm:$0xff] }
 0x623   :  { %19255 = vst [vmem:[#allocation54_spill] sm:$0xff] %v16607_v27  ;;  %v5367_v27 = vmul.f32 0.2, %v19258_v39  ;;  %v5370_v39 = vmul.f32 0.2, %v19262_v1  ;;  %vm5309_vm1 = vcmp.ge.f32.partialorder %v19267_v17, 0.0  ;;  %v16651_v1 = vsel %vm5268_vm10, %v16161_v30, %v16425_v57 }
 0x624   :  { %v5371_v50 = vmul.f32 0.2, %v19263_v21  ;;  %v5372_v53 = vmul.f32 0.2, %v19266_v24  ;;  %v5373_v13 = vmul.f32 0.2, %v19267_v17  ;;  %v16670_v30 = vsel %vm19271_vm5, %v16176_v8, %v16440_v7 }
 0x625   :  { %v5374_v46 = vmul.f32 0.2, %v19268_v28  ;;  %v19269_v51 = vld [vmem:[#allocation44_spill] sm:$0xff]  ;;  %vm19270_vm4 = vcmp.ge.f32.partialorder %v16172_v44, 0.0  ;;  %v16676_v57 = vsel %vm5272_vm15, %v16180_v9, %v16443_v4  ;;  %v19272_v56 = vld [vmem:[#allocation45_spill] sm:$0xff]  ;;  %vm19273_vm10 = vcmp.ge.f32.partialorder %v16184_v58, 0.0 }
 0x626   :  { %v16664_v24 = vsel %vm19270_vm4, %v16172_v44, %v19269_v51  ;;  %v16682_v0 = vsel %vm19273_vm10, %v16184_v58, %v19272_v56  ;;  %vm19274_vm9 = vcmp.ge.f32.partialorder %v16188_v52, 0.0  ;;  %vm19275_vm5 = vcmp.ge.f32.partialorder %v16192_v60, 0.0  ;;  %v11229_v9 = vld [vmem:[%s18749_s9] sm:$0xff]   ;;  %v11230_v58 = vld [vmem:[%s18749_s9 + $0x98] sm:$0xff]   ;;  %v11231_v7 = vld [vmem:[%s18749_s9 + $0xd0] sm:$0xff]  }
 0x627   :  { %v16688_v44 = vsel %vm19274_vm9, %v16188_v52, %v16455_v54  ;;  %v16694_v8 = vsel %vm19275_vm5, %v16192_v60, %v16458_v3  ;;  %v16709_v52 = vsel %vm5276_vm6, %v16196_v11, %v16461_v10  ;;  %vm19276_vm15 = vcmp.ge.f32.partialorder %v16200_v35, 0.0  ;;  %v19278_v54 = vld [vmem:[#allocation47_spill] sm:$0xff]  ;;  %10358 = vmatpush3.bf16.msra.mxu0 %v11229_v9  ;;  %10416 = vmatpush3.bf16.msra.mxu1 %v11230_v58 }
 0x628   :  { %v16715_v60 = vsel %vm19276_vm15, %v16200_v35, %v16472_v22  ;;  %vm19277_vm4 = vcmp.ge.f32.partialorder %v16204_v16, 0.0  ;;  %vm19279_vm10 = vcmp.ge.f32.partialorder %v16208_v47, 0.0  ;;  %v16733_v11 = vsel %vm5280_vm11, %v16212_v41, %v16490_v32  ;;  %v19288_v22 = vld [vmem:[#allocation19_spill] sm:$0xff]  ;;  %10417 = vmatprep.subr.bf16.mxu1 %v11231_v7 }
 0x629   :  { %v16721_v4 = vsel %vm19277_vm4, %v16204_v16, %v16475_v62  ;;  %v16727_v3 = vsel %vm19279_vm10, %v16208_v47, %v19278_v54  ;;  %vm19280_vm6 = vcmp.ge.f32.partialorder %v16216_v43, 0.0  ;;  %v19281_v16 = vld [vmem:[#allocation23_spill] sm:$0xff]  ;;  %vm19282_vm9 = vcmp.ge.f32.partialorder %v16220_v40, 0.0  ;;  %v19291_v62 = vld [vmem:[#allocation22_spill] sm:$0xff]  ;;  %v19311_v54 = vld [vmem:[#allocation36_spill] sm:$0xff] }
 0x62a   :  { %v16739_v35 = vsel %vm19280_vm6, %v16216_v43, %v16493_v63  ;;  %v16745_v10 = vsel %vm19282_vm9, %v16220_v40, %v19281_v16  ;;  %vm19283_vm5 = vcmp.ge.f32.partialorder %v16224_v2, 0.0  ;;  %v16757_v41 = vsel %vm5284_vm3, %v16228_v20, %v16511_v18  ;;  %v19284_v43 = vld [vmem:[#allocation25_spill] sm:$0xff]  ;;  %v11232_v20 = vld [vmem:[%s18749_s9 + $0x90] sm:$0xff]   ;;  %v19309_v9 = vld [vmem:[#allocation54_spill] sm:$0xff] }
 0x62b   :  { %v16751_v47 = vsel %vm19283_vm5, %v16224_v2, %v16508_v29  ;;  %vm19285_vm11 = vcmp.ge.f32.partialorder %v16232_v45, 0.0  ;;  %vm19286_vm15 = vcmp.ge.f32.partialorder %v16236_v15, 0.0  ;;  %vm19287_vm4 = vcmp.ge.f32.partialorder %v16240_v23, 0.0  ;;  %v19299_v29 = vld [vmem:[#allocation33_spill] sm:$0xff]  ;;  %v19310_v58 = vld [vmem:[#allocation35_spill] sm:$0xff]  ;;  %10418 = vmatpush3.bf16.msra.mxu1 %v11232_v20 }
 0x62c   :  { %v16763_v63 = vsel %vm19285_vm11, %v16232_v45, %v19284_v43  ;;  %v16769_v40 = vsel %vm19286_vm15, %v16236_v15, %v16526_v6  ;;  %v16775_v2 = vsel %vm19287_vm4, %v16240_v23, %v16529_v26  ;;  %v16784_v45 = vsel %vm5288_vm7, %v16244_v49, %v19288_v22  ;;  %v19301_v6 = vld [vmem:[#allocation12_spill] sm:$0xff]  ;;  %v19313_v43 = vld [vmem:[#allocation13_spill] sm:$0xff]  ;;  %v19322_v20 = vld [vmem:[#allocation39_spill] sm:$0xff] }
 0x62d   :  { %vm19289_vm3 = vcmp.ge.f32.partialorder %v16248_v12, 0.0  ;;  %vm19290_vm10 = vcmp.ge.f32.partialorder %v16252_v31, 0.0  ;;  %vm19292_vm6 = vcmp.ge.f32.partialorder %v16256_v42, 0.0  ;;  %v16808_v49 = vsel %vm5292_vm12, %v16260_v61, %v16563_v48  ;;  %v19298_v61 = vld [vmem:[#allocation31_spill] sm:$0xff]  ;;  %v19304_v48 = vld [vmem:[#allocation34_spill] sm:$0xff] }
 0x62e   :  { %v16790_v15 = vsel %vm19289_vm3, %v16248_v12, %v16544_v34  ;;  %v16796_v23 = vsel %vm19290_vm10, %v16252_v31, %v16547_v38  ;;  %v16802_v18 = vsel %vm19292_vm6, %v16256_v42, %v19291_v62  ;;  %v19293_v12 = vld [vmem:[#allocation26_spill] sm:$0xff]  ;;  %vm19294_vm7 = vcmp.ge.f32.partialorder %v16264_v19, 0.0  ;;  %v19315_v62 = vld [vmem:[#allocation37_spill] sm:$0xff] }
 0x62f   :  { %v16814_v32 = vsel %vm19294_vm7, %v16264_v19, %v19293_v12  ;;  %v19295_v31 = vld [vmem:[#allocation30_spill] sm:$0xff]  ;;  %vm19296_vm9 = vcmp.ge.f32.partialorder %v16268_v59, 0.0  ;;  %vm19297_vm5 = vcmp.ge.f32.partialorder %v16272_v36, 0.0  ;;  %v16832_v38 = vsel %vm5296_vm14, %v19299_v29, %v19298_v61 }
 0x630   :  { %v16820_v26 = vsel %vm19296_vm9, %v16268_v59, %v19295_v31  ;;  %v16826_v42 = vsel %vm19297_vm5, %v16272_v36, %v16582_v5  ;;  %v19300_v19 = vld [vmem:[#allocation50_spill] sm:$0xff]  ;;  %vm19302_vm12 = vcmp.ge.f32.partialorder %v19301_v6, 0.0  ;;  %v19303_v59 = vld [vmem:[#allocation52_spill] sm:$0xff]  ;;  %vm19305_vm11 = vcmp.ge.f32.partialorder %v19304_v48, 0.0  ;;  %v19306_v36 = vld [vmem:[#allocation53_spill] sm:$0xff] }
 0x631   :  { %v16838_v34 = vsel %vm19302_vm12, %v19301_v6, %v19300_v19  ;;  %v16844_v51 = vsel %vm19305_vm11, %v19304_v48, %v19303_v59  ;;  %v19307_v5 = vld [vmem:[#allocation11_spill] sm:$0xff]  ;;  %v16856_v7 = vsel %vm5300_vm8, %v19310_v58, %v19309_v9  ;;  %vm19312_vm14 = vcmp.ge.f32.partialorder %v19311_v54, 0.0  ;;  %v19317_v31 = vld [vmem:[#allocation14_spill] sm:$0xff]  ;;  %v19320_v19 = vld [vmem:[#allocation16_spill] sm:$0xff] }
 0x632   :  { %vm19308_vm15 = vcmp.ge.f32.partialorder %v19307_v5, 0.0  ;;  %v16861_v16 = vsel %vm19312_vm14, %v19311_v54, %v5365_v33  ;;  %vm19314_vm4 = vcmp.ge.f32.partialorder %v19313_v43, 0.0  ;;  %vm19316_vm3 = vcmp.ge.f32.partialorder %v19315_v62, 0.0  ;;  %v19318_v29 = vld [vmem:[#allocation38_spill] sm:$0xff]  ;;  %v19324_v6 = vld [vmem:[#allocation20_spill] sm:$0xff]  ;;  %v19332_v9 = vld [vmem:[#allocation43_spill] sm:$0xff] }
 0x633   :  { %v16850_v56 = vsel %vm19308_vm15, %v19307_v5, %v19306_v36  ;;  %v16866_v22 = vsel %vm19314_vm4, %v19313_v43, %v5366_v14  ;;  %v16871_v12 = vsel %vm19316_vm3, %v19315_v62, %v5367_v27  ;;  %v16876_v61 = vsel %vm5304_vm13, %v19317_v31, %v5368_v55  ;;  %v19328_v48 = vld [vmem:[#allocation40_spill] sm:$0xff]  ;;  %v19330_v36 = vld [vmem:[#allocation42_spill] sm:$0xff]  ;;  %v19338_v31 = vld [vmem:[#allocation49_spill] sm:$0xff] }
 0x634   :  { %vm19319_vm8 = vcmp.ge.f32.partialorder %v19318_v29, 0.0  ;;  %vm19321_vm10 = vcmp.ge.f32.partialorder %v19320_v19, 0.0  ;;  %v16891_v27 = vsel %vm5307_vm2, %v19263_v21, %v5371_v50  ;;  %v16896_v55 = vsel %vm5308_vm0, %v19322_v20, %v5372_v53  ;;  %v19326_v50 = vld [vmem:[#allocation41_spill] sm:$0xff]  ;;  %v19334_v54 = vld [vmem:[#allocation48_spill] sm:$0xff] }
 0x635   :  { %v16881_v33 = vsel %vm19319_vm8, %v19318_v29, %v5369_v25  ;;  %v16886_v14 = vsel %vm19321_vm10, %v19320_v19, %v5370_v39  ;;  %v16901_v25 = vsel %vm5309_vm1, %v19267_v17, %v5373_v13  ;;  %vm19323_vm13 = vcmp.ge.f32.partialorder %v19268_v28, 0.0  ;;  %v19340_v19 = vld [vmem:[#allocation27_spill] sm:$0xff] }
 0x636   :  { %v16906_v39 = vsel %vm19323_vm13, %v19268_v28, %v5374_v46  ;;  %vm19325_vm6 = vcmask 523264   ;;  %v19336_v46 = vld [vmem:[#allocation46_spill] sm:$0xff] }
 0x637   :  { %v5443_v59 = vsel %vm19325_vm6, %v19324_v6, -inf  ;;  %vm19327_vm2 = vmmov %vm19325_vm6  ;;  %v19342_v6 = vld [vmem:[#allocation21_spill] sm:$0xff] }
 0x638   :  { %v5444_v21 = vsel %vm19327_vm2, %v19326_v50, -inf  ;;  %vm19329_vm7 = vmmov %vm19327_vm2 }
 0x639   :  { %v5446_v53 = vsel %vm19329_vm7, %v19328_v48, -inf  ;;  %vm19331_vm0 = vmmov %vm19327_vm2  ;;  %v5445_v17 = vmax.f32 %v5443_v59, %v5444_v21  ;;  %v19344_v59 = vld [vmem:[#allocation28_spill] sm:$0xff] }
 0x63a   :  { %v5447_v5 = vsel %vm19331_vm0, %v19330_v36, -inf  ;;  %vm19333_vm1 = vmmov %vm19331_vm0 }
 0x63b   :  { %v5449_v13 = vsel %vm19333_vm1, %v19332_v9, -inf  ;;  %v5448_v58 = vmax.f32 %v5446_v53, %v5447_v5  ;;  %vm19335_vm9 = vmmov %vm19331_vm0  ;;  %v19346_v53 = vld [vmem:[#allocation24_spill] sm:$0xff] }
 0x63c   :  { %v5450_v28 = vsel %vm19335_vm9, %v19334_v54, -inf  ;;  %vm19337_vm5 = vmmov %vm19331_vm0 }
 0x63d   :  { %v5452_v43 = vsel %vm19337_vm5, %v19336_v46, -inf  ;;  %v5451_v62 = vmax.f32 %v5449_v13, %v5450_v28  ;;  %vm19339_vm12 = vmmov %vm19331_vm0  ;;  %v19350_v13 = vld [vmem:[#allocation32_spill] sm:$0xff]  ;;  %v19352_v28 = vld [vmem:[#allocation55_spill] sm:$0xff] }
 0x63e   :  { %v5453_v29 = vsel %vm19339_vm12, %v19338_v31, -inf  ;;  %vm19341_vm11 = vmmov %vm19331_vm0  ;;  %v19354_v31 = vld [vmem:[#allocation51_spill] sm:$0xff] }
 0x63f   :  { %v5455_v20 = vsel %vm19341_vm11, %v19340_v19, -inf  ;;  %vm19343_vm15 = vmmov %vm19331_vm0  ;;  %v5454_v48 = vmax.f32 %v5452_v43, %v5453_v29  ;;  %v19357_v19 = vld [vmem:[#allocation56_spill] sm:$0xff] }
 0x640   :  { %v5456_v50 = vsel %vm19343_vm15, %v19342_v6, -inf  ;;  %vm19345_vm14 = vmmov %vm19331_vm0  ;;  %v19359_v6 = vld [vmem:[#allocation15_spill] sm:$0xff] }
 0x641   :  { %v5457_v36 = vmax.f32 %v5455_v20, %v5456_v50  ;;  %v5458_v21 = vsel %vm19345_vm14, %v19344_v59, -inf  ;;  %vm19347_vm4 = vmmov %vm19331_vm0 }
 0x642   :  { %v5459_v5 = vsel %vm19347_vm4, %v19346_v53, -inf  ;;  %vm19348_vm3 = vmmov %vm19331_vm0 }
 0x643   :  { %5539 = vst.msk [vmem:[#allocation5] sm:$0xff] %vm19348_vm3, %v5445_v17  ;;  %vm19349_vm8 = vmmov %vm19331_vm0  ;;  %v5460_v9 = vmax.f32 %v5458_v21, %v5459_v5  ;;  %v5467_v17 = vsel %vm19331_vm0, %v19359_v6, -inf }
 0x644   :  { %5540 = vst.msk [vmem:[#allocation5 + $0x8] sm:$0xff] %vm19349_vm8, %v5448_v58  ;;  %vm19351_vm10 = vmmov %vm19331_vm0 }
 0x645   :  { %v5461_v54 = vsel %vm19351_vm10, %v19350_v13, -inf  ;;  %vm19353_vm13 = vmmov %vm19331_vm0 }
 0x646   :  { %v5462_v46 = vsel %vm19353_vm13, %v19352_v28, -inf  ;;  %vm19355_vm6 = vmmov %vm19331_vm0 }
 0x647   :  { %v5464_v43 = vsel %vm19355_vm6, %v19354_v31, -inf  ;;  %vm19356_vm2 = vmmov %vm19331_vm0  ;;  %v5463_v29 = vmax.f32 %v5461_v54, %v5462_v46 }
 0x648   :  { %5541 = vst.msk [vmem:[#allocation5 + $0x10] sm:$0xff] %vm19356_vm2, %v5451_v62  ;;  %vm19358_vm7 = vmmov %vm19331_vm0 }
 0x649   :  { %v5465_v20 = vsel %vm19358_vm7, %v19357_v19, -inf  ;;  %vm19360_vm1 = vmmov %vm19331_vm0 }
 0x64a   :  { %v5468_v58 = vsel %vm19360_vm1, %v16658_v37, -inf  ;;  %vm19361_vm9 = vmmov %vm19331_vm0  ;;  %v5466_v50 = vmax.f32 %v5464_v43, %v5465_v20 }
 0x64b   :  { %5542 = vst.msk [vmem:[#allocation5 + $0x18] sm:$0xff] %vm19361_vm9, %v5454_v48  ;;  %vm19362_vm5 = vmmov %vm19331_vm0  ;;  %v5469_v59 = vmax.f32 %v5467_v17, %v5468_v58 }
 0x64c   :  { %5543 = vst.msk [vmem:[#allocation5 + $0x20] sm:$0xff] %vm19362_vm5, %v5457_v36  ;;  %vm19363_vm12 = vmmov %vm19331_vm0 }
 0x64d   :  { %v5470_v21 = vsel %vm19363_vm12, %v16651_v1, -inf  ;;  %vm19364_vm11 = vmmov %vm19331_vm0 }
 0x64e   :  { %v5471_v62 = vsel %vm19364_vm11, %v16664_v24, -inf  ;;  %vm19365_vm15 = vmmov %vm19331_vm0 }
 0x64f   :  { %5544 = vst.msk [vmem:[#allocation5 + $0x28] sm:$0xff] %vm19365_vm15, %v5460_v9  ;;  %v5472_v53 = vmax.f32 %v5470_v21, %v5471_v62  ;;  %vm19366_vm14 = vmmov %vm19331_vm0 }
 0x650   :  { %v5473_v5 = vsel %vm19366_vm14, %v16670_v30, -inf  ;;  %vm19367_vm4 = vmmov %vm19331_vm0 }
 0x651   :  { %v5474_v37 = vsel %vm19367_vm4, %v16682_v0, -inf  ;;  %vm19368_vm3 = vmmov %vm19331_vm0 }
 0x652   :  { %v5476_v48 = vsel %vm19368_vm3, %v16676_v57, -inf  ;;  %vm19369_vm8 = vmmov %vm19331_vm0  ;;  %v5475_v36 = vmax.f32 %v5473_v5, %v5474_v37  ;;  %v5482_v57 = vsel %vm19331_vm0, %v16709_v52, -inf }
 0x653   :  { %5545 = vst.msk [vmem:[#allocation5 + $0x30] sm:$0xff] %vm19369_vm8, %v5463_v29  ;;  %vm19370_vm10 = vmmov %vm19331_vm0 }
 0x654   :  { %v5477_v1 = vsel %vm19370_vm10, %v16688_v44, -inf  ;;  %vm19371_vm13 = vmmov %vm19331_vm0 }
 0x655   :  { %v5479_v24 = vsel %vm19371_vm13, %v16694_v8, -inf  ;;  %vm19372_vm6 = vmmov %vm19331_vm0  ;;  %v5478_v30 = vmax.f32 %v5476_v48, %v5477_v1 }
 0x656   :  { %v5480_v9 = vsel %vm19372_vm6, %v16715_v60, -inf  ;;  %vm19373_vm2 = vmmov %vm19331_vm0  ;;  %v5607_v21 = vld [vmem:[#allocation5 + $0x21] ss:$2 sm:$0xff] }
 0x657   :  { %5546 = vst.msk [vmem:[#allocation5 + $0x38] sm:$0xff] %vm19373_vm2, %v5466_v50  ;;  %vm19374_vm7 = vmmov %vm19331_vm0  ;;  %v5481_v0 = vmax.f32 %v5479_v24, %v5480_v9  ;;  %v5575_v50 = vld [vmem:[#allocation5 + $0x20] ss:$2 sm:$0xff] }
 0x658   :  { %5547 = vst.msk [vmem:[#allocation5 + $0x40] sm:$0xff] %vm19374_vm7, %v5469_v59  ;;  %vm19375_vm1 = vmmov %vm19331_vm0  ;;  %v5605_v59 = vld [vmem:[#allocation5 + $0x11] ss:$2 sm:$0xff] }
 0x659   :  { %v5483_v13 = vsel %vm19375_vm1, %v16721_v4, -inf  ;;  %vm19376_vm9 = vmmov %vm19331_vm0 }
 0x65a   :  { %5548 = vst.msk [vmem:[#allocation5 + $0x48] sm:$0xff] %vm19376_vm9, %v5472_v53  ;;  %v5484_v44 = vmax.f32 %v5482_v57, %v5483_v13  ;;  %vm19377_vm5 = vmmov %vm19331_vm0 }
 0x65b   :  { %v5485_v8 = vsel %vm19377_vm5, %v16727_v3, -inf  ;;  %vm19378_vm12 = vmmov %vm19331_vm0 }
 0x65c   :  { %v5486_v60 = vsel %vm19378_vm12, %v16739_v35, -inf  ;;  %vm19379_vm11 = vmmov %vm19331_vm0 }
 0x65d   :  { %v5488_v54 = vsel %vm19379_vm11, %v16733_v11, -inf  ;;  %vm19380_vm15 = vmmov %vm19331_vm0  ;;  %v5487_v28 = vmax.f32 %v5485_v8, %v5486_v60  ;;  %v5530_v8 = vsel %vm19331_vm0, %v16896_v55, -inf }
 0x65e   :  { %5549 = vst.msk [vmem:[#allocation5 + $0x50] sm:$0xff] %vm19380_vm15, %v5475_v36  ;;  %vm19381_vm14 = vmmov %vm19331_vm0  ;;  %v5609_v48 = vld [vmem:[#allocation5 + $0x31] ss:$2 sm:$0xff] }
 0x65f   :  { %v5489_v52 = vsel %vm19381_vm14, %v16745_v10, -inf  ;;  %vm19382_vm4 = vmmov %vm19331_vm0 }
 0x660   :  { %v5491_v4 = vsel %vm19382_vm4, %v16751_v47, -inf  ;;  %vm19383_vm3 = vmmov %vm19331_vm0  ;;  %v5490_v3 = vmax.f32 %v5488_v54, %v5489_v52 }
 0x661   :  { %v5492_v46 = vsel %vm19383_vm3, %v16763_v63, -inf  ;;  %vm19384_vm8 = vmmov %vm19331_vm0  ;;  %v5498_v63 = vsel %vm19331_vm0, %v16790_v15, -inf  ;;  %v5579_v5 = vld [vmem:[#allocation5 + $0x40] ss:$2 sm:$0xff]  ;;  %v5611_v36 = vld [vmem:[#allocation5 + $0x41] ss:$2 sm:$0xff] }
 0x662   :  { %5550 = vst.msk [vmem:[#allocation5 + $0x58] sm:$0xff] %vm19384_vm8, %v5478_v30  ;;  %vm19385_vm10 = vmmov %vm19331_vm0  ;;  %v5493_v35 = vmax.f32 %v5491_v4, %v5492_v46  ;;  %v5636_v46 = vmax.f32 %v5575_v50, %v5607_v21 }
 0x663   :  { %5551 = vst.msk [vmem:[#allocation5 + $0x60] sm:$0xff] %vm19385_vm10, %v5481_v0  ;;  %vm19386_vm13 = vmmov %vm19331_vm0 }
 0x664   :  { %v5494_v11 = vsel %vm19386_vm13, %v16757_v41, -inf  ;;  %vm19387_vm6 = vmmov %vm19331_vm0 }
 0x665   :  { %v5495_v31 = vsel %vm19387_vm6, %v16769_v40, -inf  ;;  %vm19388_vm2 = vmmov %vm19331_vm0 }
 0x666   :  { %5552 = vst.msk [vmem:[#allocation5 + $0x68] sm:$0xff] %vm19388_vm2, %v5484_v44  ;;  %v5496_v10 = vmax.f32 %v5494_v11, %v5495_v31  ;;  %vm19389_vm7 = vmmov %vm19331_vm0  ;;  %v11233_v11 = vld [vmem:[%s18749_s9 + $0xc8] sm:$0xff]   ;;  %v17063_v31 = vld [vmem:[%s18749_s9 + $0x118] sm:$0xff]  }
 0x667   :  { %v5497_v47 = vsel %vm19389_vm7, %v16775_v2, -inf  ;;  %vm19390_vm1 = vmmov %vm19331_vm0  ;;  %10419 = vmatprep.subr.bf16.mxu1 %v11233_v11  ;;  %11073 = vmatprep.subr.bf16.mxu0 %v17063_v31 }
 0x668   :  { %v5500_v43 = vsel %vm19390_vm1, %v16784_v45, -inf  ;;  %vm19391_vm9 = vmmov %vm19331_vm0  ;;  %v5499_v29 = vmax.f32 %v5497_v47, %v5498_v63 }
 0x669   :  { %5553 = vst.msk [vmem:[#allocation5 + $0x70] sm:$0xff] %vm19391_vm9, %v5487_v28  ;;  %vm19392_vm5 = vmmov %vm19331_vm0  ;;  %v5581_v37 = vld [vmem:[#allocation5 + $0x50] ss:$2 sm:$0xff]  ;;  %v5613_v1 = vld [vmem:[#allocation5 + $0x51] ss:$2 sm:$0xff] }
 0x66a   :  { %v5501_v41 = vsel %vm19392_vm5, %v16796_v23, -inf  ;;  %vm19393_vm12 = vmmov %vm19331_vm0 }
 0x66b   :  { %v5503_v40 = vsel %vm19393_vm12, %v16802_v18, -inf  ;;  %vm19394_vm11 = vmmov %vm19331_vm0  ;;  %v5502_v2 = vmax.f32 %v5500_v43, %v5501_v41 }
 0x66c   :  { %v5504_v19 = vsel %vm19394_vm11, %v16814_v32, -inf  ;;  %vm19395_vm15 = vmmov %vm19331_vm0 }
 0x66d   :  { %5554 = vst.msk [vmem:[#allocation5 + $0x78] sm:$0xff] %vm19395_vm15, %v5490_v3  ;;  %vm19396_vm14 = vmmov %vm19331_vm0  ;;  %v5505_v15 = vmax.f32 %v5503_v40, %v5504_v19  ;;  %v5638_v3 = vmax.f32 %v5579_v5, %v5611_v36 }
 0x66e   :  { %5555 = vst.msk [vmem:[#allocation5 + $0x80] sm:$0xff] %vm19396_vm14, %v5493_v35  ;;  %vm19397_vm4 = vmmov %vm19331_vm0  ;;  %v5639_v35 = vmax.f32 %v5581_v37, %v5613_v1 }
 0x66f   :  { %v5506_v45 = vsel %vm19397_vm4, %v16808_v49, -inf  ;;  %vm19398_vm3 = vmmov %vm19331_vm0 }
 0x670   :  { %v5507_v20 = vsel %vm19398_vm3, %v16820_v26, -inf  ;;  %vm19399_vm8 = vmmov %vm19331_vm0  ;;  %v5515_v26 = vsel %vm19331_vm0, %v16850_v56, -inf }
 0x671   :  { %5556 = vst.msk [vmem:[#allocation5 + $0x88] sm:$0xff] %vm19399_vm8, %v5496_v10  ;;  %v5508_v23 = vmax.f32 %v5506_v45, %v5507_v20  ;;  %vm19400_vm10 = vmmov %vm19331_vm0 }
 0x672   :  { %v5509_v18 = vsel %vm19400_vm10, %v16826_v42, -inf  ;;  %vm19401_vm13 = vmmov %vm19331_vm0  ;;  %v5571_v42 = vld [vmem:[#allocation5] ss:$2 sm:$0xff] }
 0x673   :  { %v5510_v32 = vsel %vm19401_vm13, %v16838_v34, -inf  ;;  %vm19402_vm6 = vmmov %vm19331_vm0  ;;  %v5573_v34 = vld [vmem:[#allocation5 + $0x10] ss:$2 sm:$0xff] }
 0x674   :  { %v5512_v6 = vsel %vm19402_vm6, %v16832_v38, -inf  ;;  %vm19403_vm2 = vmmov %vm19331_vm0  ;;  %v5511_v17 = vmax.f32 %v5509_v18, %v5510_v32  ;;  %v5603_v38 = vld [vmem:[#allocation5 + $0x1] ss:$2 sm:$0xff]  ;;  %v5635_v4 = vmax.f32 %v5573_v34, %v5605_v59 }
 0x675   :  { %5557 = vst.msk [vmem:[#allocation5 + $0x90] sm:$0xff] %vm19403_vm2, %v5499_v29  ;;  %vm19404_vm7 = vmmov %vm19331_vm0  ;;  %v5634_v52 = vmax.f32 %v5571_v42, %v5603_v38  ;;  %v11235_v29 = vld [vmem:[%s18749_s9 + $0x88] sm:$0xff]  }
 0x676   :  { %v5513_v49 = vsel %vm19404_vm7, %v16844_v51, -inf  ;;  %vm19405_vm1 = vmmov %vm19331_vm0  ;;  %10420 = vmatpush3.bf16.msra.mxu1 %v11235_v29 }
 0x677   :  { %v5516_v58 = vsel %vm19405_vm1, %v16861_v16, -inf  ;;  %vm19406_vm9 = vmmov %vm19331_vm0  ;;  %v5514_v62 = vmax.f32 %v5512_v6, %v5513_v49  ;;  %v5577_v16 = vld [vmem:[#allocation5 + $0x30] ss:$2 sm:$0xff]  ;;  %v5691_v49 = vld [vmem:[#allocation3 + $0x1] sm:$0xff] }
 0x678   :  { %5558 = vst.msk [vmem:[#allocation5 + $0x98] sm:$0xff] %vm19406_vm9, %v5502_v2  ;;  %vm19407_vm5 = vmmov %vm19331_vm0  ;;  %v5517_v53 = vmax.f32 %v5515_v26, %v5516_v58  ;;  %v5619_v28 = vld [vmem:[#allocation5 + $0x81] ss:$2 sm:$0xff]  ;;  %v5637_v55 = vmax.f32 %v5577_v16, %v5609_v48 }
 0x679   :  { %5559 = vst.msk [vmem:[#allocation5 + $0xa0] sm:$0xff] %vm19407_vm5, %v5505_v15  ;;  %vm19408_vm12 = vmmov %vm19331_vm0 }
 0x67a   :  { %v5518_v51 = vsel %vm19408_vm12, %v16856_v7, -inf  ;;  %vm19409_vm11 = vmmov %vm19331_vm0 }
 0x67b   :  { %v5519_v56 = vsel %vm19409_vm11, %v16866_v22, -inf  ;;  %vm19410_vm15 = vmmov %vm19331_vm0  ;;  %v5583_v22 = vld [vmem:[#allocation5 + $0x60] ss:$2 sm:$0xff] }
 0x67c   :  { %5560 = vst.msk [vmem:[#allocation5 + $0xa8] sm:$0xff] %vm19410_vm15, %v5508_v23  ;;  %v5520_v24 = vmax.f32 %v5518_v51, %v5519_v56  ;;  %vm19411_vm14 = vmmov %vm19331_vm0 }
 0x67d   :  { %v5521_v9 = vsel %vm19411_vm14, %v16871_v12, -inf  ;;  %vm19412_vm4 = vmmov %vm19331_vm0  ;;  %v5615_v12 = vld [vmem:[#allocation5 + $0x61] ss:$2 sm:$0xff] }
 0x67e   :  { %v5522_v30 = vsel %vm19412_vm4, %v16881_v33, -inf  ;;  %vm19413_vm3 = vmmov %vm19331_vm0 }
 0x67f   :  { %v5524_v7 = vsel %vm19413_vm3, %v16876_v61, -inf  ;;  %vm19414_vm8 = vmmov %vm19331_vm0  ;;  %v5523_v0 = vmax.f32 %v5521_v9, %v5522_v30  ;;  %v5589_v10 = vld [vmem:[#allocation5 + $0x90] ss:$2 sm:$0xff]  ;;  %v5621_v47 = vld [vmem:[#allocation5 + $0x91] ss:$2 sm:$0xff] }
 0x680   :  { %5561 = vst.msk [vmem:[#allocation5 + $0xb0] sm:$0xff] %vm19414_vm8, %v5511_v17  ;;  %vm19415_vm10 = vmmov %vm19331_vm0  ;;  %v5643_v19 = vmax.f32 %v5589_v10, %v5621_v47 }
 0x681   :  { %v5525_v57 = vsel %vm19415_vm10, %v16886_v14, -inf  ;;  %vm19416_vm13 = vmmov %vm19331_vm0  ;;  %v5585_v14 = vld [vmem:[#allocation5 + $0x70] ss:$2 sm:$0xff] }
 0x682   :  { %v5527_v13 = vsel %vm19416_vm13, %v16891_v27, -inf  ;;  %vm19417_vm6 = vmmov %vm19331_vm0  ;;  %v5526_v33 = vmax.f32 %v5524_v7, %v5525_v57  ;;  %v5617_v27 = vld [vmem:[#allocation5 + $0x71] ss:$2 sm:$0xff]  ;;  %5660 = vst.msk [vmem:[#allocation3 + $0xc1] sm:$0xff] %vm19331_vm0, %v5643_v19 }
 0x683   :  { %v5528_v44 = vsel %vm19417_vm6, %v16901_v25, -inf  ;;  %vm19418_vm2 = vmmov %vm19331_vm0  ;;  %v5587_v25 = vld [vmem:[#allocation5 + $0x80] ss:$2 sm:$0xff]  ;;  %v5641_v63 = vmax.f32 %v5585_v14, %v5617_v27  ;;  %v5623_v40 = vld [vmem:[#allocation5 + $0xa1] ss:$2 sm:$0xff] }
 0x684   :  { %5562 = vst.msk [vmem:[#allocation5 + $0xb8] sm:$0xff] %vm19418_vm2, %v5514_v62  ;;  %vm19419_vm7 = vmmov %vm19331_vm0  ;;  %v5529_v61 = vmax.f32 %v5527_v13, %v5528_v44  ;;  %v5642_v43 = vmax.f32 %v5587_v25, %v5619_v28  ;;  %v5591_v41 = vld [vmem:[#allocation5 + $0xa0] ss:$2 sm:$0xff] }
 0x685   :  { %5563 = vst.msk [vmem:[#allocation5 + $0xc0] sm:$0xff] %vm19419_vm7, %v5517_v53  ;;  %vm19420_vm1 = vmmov %vm19331_vm0  ;;  %v5644_v2 = vmax.f32 %v5591_v41, %v5623_v40 }
 0x686   :  { %v5531_v60 = vsel %vm19420_vm1, %v16906_v39, -inf  ;;  %vm19421_vm9 = vmmov %vm19331_vm0  ;;  %v5640_v39 = vmax.f32 %v5583_v22, %v5615_v12 }
 0x687   :  { %5564 = vst.msk [vmem:[#allocation5 + $0xc8] sm:$0xff] %vm19421_vm9, %v5520_v24  ;;  %v5532_v54 = vmax.f32 %v5530_v8, %v5531_v60  ;;  %vm19422_vm5 = vmmov %vm19331_vm0 }
 0x688   :  { %5565 = vst.msk [vmem:[#allocation5 + $0xd0] sm:$0xff] %vm19422_vm5, %v5523_v0  ;;  %vm19423_vm12 = vmmov %vm19331_vm0 }
 0x689   :  { %5566 = vst.msk [vmem:[#allocation5 + $0xd8] sm:$0xff] %vm19423_vm12, %v5526_v33  ;;  %vm19424_vm11 = vmmov %vm19331_vm0  ;;  %v5748_v44 = vld [vmem:[#allocation3 + $0xc0] sm:$0xff] }
 0x68a   :  { %5567 = vst.msk [vmem:[#allocation5 + $0xe0] sm:$0xff] %vm19424_vm11, %v5529_v61  ;;  %vm19425_vm15 = vmmov %vm19331_vm0  ;;  %v17132_v27 = vld [vmem:[#allocation3 + $0xc1] sm:$0xff] }
 0x68b   :  { %5568 = vst.msk [vmem:[#allocation5 + $0xe8] sm:$0xff] %vm19425_vm15, %v5532_v54  ;;  %vm19426_vm14 = vmmov %vm19331_vm0  ;;  %v5593_v15 = vld [vmem:[#allocation5 + $0xb0] ss:$2 sm:$0xff]  ;;  %v5625_v45 = vld [vmem:[#allocation5 + $0xb1] ss:$2 sm:$0xff] }
 0x68c   :  { %5651 = vst.msk [vmem:[#allocation3 + $0x11] sm:$0xff] %vm19426_vm14, %v5634_v52  ;;  %vm19427_vm4 = vmmov %vm19331_vm0  ;;  %v5645_v18 = vmax.f32 %v5593_v15, %v5625_v45  ;;  %v5699_v15 = vld [vmem:[#allocation3 + $0xa1] sm:$0xff] }
 0x68d   :  { %5652 = vst.msk [vmem:[#allocation3 + $0x21] sm:$0xff] %vm19427_vm4, %v5635_v4  ;;  %vm19428_vm3 = vmmov %vm19331_vm0 }
 0x68e   :  { %5653 = vst.msk [vmem:[#allocation3 + $0x31] sm:$0xff] %vm19428_vm3, %v5636_v46  ;;  %vm19429_vm8 = vmmov %vm19331_vm0  ;;  %v5595_v20 = vld [vmem:[#allocation5 + $0xc0] ss:$2 sm:$0xff]  ;;  %v5627_v23 = vld [vmem:[#allocation5 + $0xc1] ss:$2 sm:$0xff] }
 0x68f   :  { %5654 = vst.msk [vmem:[#allocation3 + $0x41] sm:$0xff] %vm19429_vm8, %v5637_v55  ;;  %vm19430_vm10 = vmmov %vm19331_vm0  ;;  %v5646_v32 = vmax.f32 %v5595_v20, %v5627_v23 }
 0x690   :  { %5655 = vst.msk [vmem:[#allocation3 + $0x51] sm:$0xff] %vm19430_vm10, %v5638_v3  ;;  %vm19431_vm13 = vmmov %vm19331_vm0  ;;  %v5597_v6 = vld [vmem:[#allocation5 + $0xd0] ss:$2 sm:$0xff]  ;;  %v5629_v17 = vld [vmem:[#allocation5 + $0xd1] ss:$2 sm:$0xff] }
 0x691   :  { %5656 = vst.msk [vmem:[#allocation3 + $0x61] sm:$0xff] %vm19431_vm13, %v5639_v35  ;;  %vm19432_vm6 = vmmov %vm19331_vm0  ;;  %v5647_v34 = vmax.f32 %v5597_v6, %v5629_v17 }
 0x692   :  { %5657 = vst.msk [vmem:[#allocation3 + $0x71] sm:$0xff] %vm19432_vm6, %v5640_v39  ;;  %vm19433_vm2 = vmmov %vm19331_vm0  ;;  %v5599_v26 = vld [vmem:[#allocation5 + $0xe0] ss:$2 sm:$0xff]  ;;  %v5631_v58 = vld [vmem:[#allocation5 + $0xe1] ss:$2 sm:$0xff] }
 0x693   :  { %5658 = vst.msk [vmem:[#allocation3 + $0x81] sm:$0xff] %vm19433_vm2, %v5641_v63  ;;  %vm19434_vm7 = vmmov %vm19331_vm0  ;;  %v17082_v42 = vld [vmem:[#allocation3 + $0x10] sm:$0xff]  ;;  %v5648_v21 = vmax.f32 %v5599_v26, %v5631_v58 }
 0x694   :  { %5659 = vst.msk [vmem:[#allocation3 + $0xb1] sm:$0xff] %vm19434_vm7, %v5642_v43  ;;  %vm19435_vm1 = vmmov %vm19331_vm0  ;;  %v5740_v50 = vld [vmem:[#allocation3 + $0x20] sm:$0xff]  ;;  %v17085_v38 = vld [vmem:[#allocation3 + $0x11] sm:$0xff] }
 0x695   :  { %5661 = vst.msk [vmem:[#allocation3 + $0xd1] sm:$0xff] %vm19435_vm1, %v5644_v2  ;;  %vm19436_vm9 = vmmov %vm19331_vm0  ;;  %v5741_v59 = vld [vmem:[#allocation3 + $0x30] sm:$0xff]  ;;  %v5755_v62 = vpack.c.bf16 %v5740_v50, %v17082_v42  ;;  %v5707_v53 = vpack.c.bf16 %v17085_v38, %v5691_v49  ;;  %v17089_v56 = vld [vmem:[#allocation3 + $0x21] sm:$0xff] }
 0x696   :  { %5662 = vst.msk [vmem:[#allocation3 + $0xe1] sm:$0xff] %vm19436_vm9, %v5645_v18  ;;  %vm19437_vm5 = vmmov %vm19331_vm0  ;;  %v5742_v51 = vld [vmem:[#allocation3 + $0x40] sm:$0xff]  ;;  %v17091_v16 = vld [vmem:[#allocation3 + $0x31] sm:$0xff]  ;;  %v17094_v5 = vpack.c.bf16 %v5741_v59, %v5740_v50  ;;  %v5779_v1 = vpack.c.bf16 %v17089_v56, %v17085_v38 }
 0x697   :  { %5663 = vst.msk [vmem:[#allocation3 + $0xf1] sm:$0xff] %vm19437_vm5, %v5646_v32  ;;  %vm19438_vm12 = vmmov %vm19331_vm0  ;;  %v5743_v37 = vld [vmem:[#allocation3 + $0x50] sm:$0xff]  ;;  %v17096_v36 = vld [vmem:[#allocation3 + $0x41] sm:$0xff]  ;;  %5916 = vrot.lane.b32.xlu0 %v5755_v62, %s11477_s26  ;;  %5892 = vrot.lane.b32.xlu1 %v5707_v53, %s11477_s26  ;;  %v5756_v57 = vpack.c.bf16 %v5742_v51, %v5741_v59  ;;  %v17115_v13 = vpack.c.bf16 %v17091_v16, %v17089_v56 }
 0x698   :  { %5664 = vst.msk [vmem:[#allocation3 + $0x101] sm:$0xff] %vm19438_vm12, %v5647_v34  ;;  %v5744_v48 = vld [vmem:[#allocation3 + $0x60] sm:$0xff]  ;;  %vm19439_vm11 = vmmov %vm19331_vm0  ;;  %v17103_v24 = vld [vmem:[#allocation3 + $0x51] sm:$0xff]  ;;  %v17105_v30 = vpack.c.bf16 %v5743_v37, %v5742_v51  ;;  %v5780_v7 = vpack.c.bf16 %v17096_v36, %v17091_v16 }
 0x699   :  { %5665 = vst.msk [vmem:[#allocation3 + $0x111] sm:$0xff] %vm19439_vm11, %v5648_v21  ;;  %v5745_v9 = vld [vmem:[#allocation3 + $0x70] sm:$0xff]  ;;  %v17109_v22 = vld [vmem:[#allocation3 + $0x61] sm:$0xff]  ;;  %v5757_v39 = vpack.c.bf16 %v5744_v48, %v5743_v37  ;;  %v5709_v11 = vpack.c.bf16 %v17103_v24, %v17096_v36  ;;  %vm19440_vm15 = vmmov %vm19331_vm0 }
 0x69a   :  { %v17111_v0 = vpack.c.bf16 %v5745_v9, %v5744_v48  ;;  %v5781_v33 = vpack.c.bf16 %v17109_v22, %v17103_v24  ;;  %v17121_v61 = vld [vmem:[#allocation3 + $0x22] sm:$0xff]  ;;  %v17130_v14 = vld [vmem:[#allocation3 + $0x71] sm:$0xff]  ;;  %vm19441_vm14 = vmmov %vm19331_vm0 }
 0x69b   :  { %v17117_v12 = vld [vmem:[#allocation3 + $0xb1] sm:$0xff]  ;;  %5918 = vrot.lane.b32.xlu0 %v5756_v57, %s11477_s26  ;;  %5894 = vrot.lane.b32.xlu1 %v17115_v13, %s11477_s26  ;;  %v17141_v52 = vld [vmem:[#allocation3 + $0x80] sm:$0xff]  ;;  %v5710_v58 = vpack.c.bf16 %v17130_v14, %v17109_v22  ;;  %vm19442_vm4 = vmmov %vm19331_vm0 }
 0x69c   :  { %v17123_v8 = vld [vmem:[#allocation3 + $0xd0] sm:$0xff]  ;;  %v5790_v4 = vld [vmem:[#allocation3 + $0x42] sm:$0xff]  ;;  %v5758_v26 = vpack.c.bf16 %v17141_v52, %v5745_v9  ;;  %vm19443_vm3 = vmmov %vm19331_vm0 }
 0x69d   :  { %v17125_v60 = vld [vmem:[#allocation3 + $0xe0] sm:$0xff]  ;;  %v17134_v54 = vld [vmem:[#allocation3 + $0xd1] sm:$0xff]  ;;  %v17139_v28 = vpack.c.bf16 %v17123_v8, %v5748_v44  ;;  %vm19444_vm8 = vmmov %vm19331_vm0 }
 0x69e   :  { %v17136_v25 = vld [vmem:[#allocation3 + $0x32] sm:$0xff]  ;;  %v17151_v10 = vld [vmem:[#allocation3 + $0xe1] sm:$0xff]  ;;  %vm19445_vm10 = vmmov %vm19331_vm0 }
 0x69f   :  { %v5751_v46 = vld [vmem:[#allocation3 + $0xf0] sm:$0xff]  ;;  %v5752_v55 = vld [vmem:[#allocation3 + $0x100] sm:$0xff]  ;;  %v17145_v3 = vpack.c.bf16 %v17136_v25, %v17121_v61  ;;  %5920 = vrot.lane.b32.xlu0 %v5757_v39, %s11477_s26  ;;  %5896 = vrot.lane.b32.xlu1 %v5709_v11, %s11477_s26  ;;  %vm19446_vm13 = vmmov %vm19331_vm0 }
 0x6a0   :  { %v17153_v47 = vld [vmem:[#allocation3 + $0xf1] sm:$0xff]  ;;  %v17155_v43 = vld [vmem:[#allocation3 + $0x121] sm:$0xff]  ;;  %v17158_v29 = vpack.c.bf16 %v5751_v46, %v17125_v60  ;;  %vm19447_vm6 = vmmov %vm19331_vm0 }
 0x6a1   :  { %v5791_v63 = vld [vmem:[#allocation3 + $0x52] sm:$0xff]  ;;  %v5792_v41 = vld [vmem:[#allocation3 + $0x62] sm:$0xff]  ;;  %vm19448_vm2 = vmmov %vm19331_vm0 }
 0x6a2   :  { %v5753_v40 = vld [vmem:[#allocation3 + $0x110] sm:$0xff]  ;;  %v17160_v19 = vld [vmem:[#allocation3 + $0x81] sm:$0xff]  ;;  %v17162_v2 = vpack.c.bf16 %v5791_v63, %v5790_v4  ;;  %vm19449_vm7 = vmmov %vm19331_vm0 }
 0x6a3   :  { %v17168_v45 = vld [vmem:[#allocation3 + $0x101] sm:$0xff]  ;;  %v17170_v20 = vld [vmem:[#allocation3 + $0x111] sm:$0xff]  ;;  %v17176_v17 = vpack.c.bf16 %v5753_v40, %v5752_v55  ;;  %v5782_v49 = vpack.c.bf16 %v17160_v19, %v17130_v14  ;;  %5922 = vrot.lane.b32.xlu0 %v5758_v26, %s11477_s26  ;;  %5898 = vrot.lane.b32.xlu1 %v5710_v58, %s11477_s26  ;;  %v5711_v26 = vpack.c.bf16 %v17117_v12, %v5699_v15  ;;  %vm19450_vm1 = vmmov %vm19331_vm0 }
 0x6a4   :  { %v5793_v23 = vld [vmem:[#allocation3 + $0x72] sm:$0xff]  ;;  %v5796_v32 = vld [vmem:[#allocation3 + $0xc2] sm:$0xff]  ;;  %vm19451_vm9 = vmmov %vm19331_vm0  ;;  %v19463_v14 = vpack.c.bf16 %v17132_v27, %v17117_v12 }
 0x6a5   :  { %v17172_v18 = vld [vmem:[#allocation3 + $0xb0] sm:$0xff]  ;;  %v17174_v6 = vpack.c.bf16 %v5793_v23, %v5792_v41  ;;  %v5798_v50 = vld [vmem:[#allocation3 + $0xe2] sm:$0xff]  ;;  %vm19452_vm5 = vmmov %vm19331_vm0 }
 0x6a6   :  { %v5797_v34 = vld [vmem:[#allocation3 + $0xd2] sm:$0xff]  ;;  %v5800_v62 = vld [vmem:[#allocation3 + $0x102] sm:$0xff]  ;;  %v5759_v21 = vpack.c.bf16 %v5748_v44, %v17172_v18  ;;  %v5712_v44 = vpack.c.bf16 %v17134_v54, %v17132_v27  ;;  %vm19453_vm12 = vmmov %vm19331_vm0 }
 0x6a7   :  { %v5799_v59 = vld [vmem:[#allocation3 + $0xf2] sm:$0xff]  ;;  %v11236_v51 = vld [vmem:[%s18749_s9 + $0xc0] sm:$0xff]   ;;  %v17188_v37 = vpack.c.bf16 %v5797_v34, %v5796_v32  ;;  %5964 = vrot.lane.b32.xlu1 %v17115_v13, %s11477_s26  ;;  %v5804_v13 = vpack.c.bf16 %v5790_v4, %v17136_v25  ;;  %vm19454_vm11 = vmmov %vm19331_vm0 }
 0x6a8   :  { %v5801_v53 = vld [vmem:[#allocation3 + $0x112] sm:$0xff]  ;;  %v17190_v48 = vpack.c.bf16 %v5799_v59, %v5798_v50  ;;  %v11238_v57 = vld [vmem:[%s18749_s9 + $0x80] sm:$0xff]   ;;  %10421 = vmatprep.subr.bf16.mxu1 %v11236_v51  ;;  %5924 = vrot.lane.b32.xlu0 %v5759_v21, %s11477_s26  ;;  %v5760_v51 = vpack.c.bf16 %v17125_v60, %v17123_v8  ;;  %v5713_v8 = vpack.c.bf16 %v17153_v47, %v17151_v10 }
 0x6a9   :  { %v17199_v39 = vpack.c.bf16 %v5801_v53, %v5800_v62  ;;  %10422 = vmatpush3.bf16.msra.mxu1 %v11238_v57  ;;  %v5787_v35 = vld [vmem:[#allocation3 + $0x12] sm:$0xff]  ;;  %v5805_v60 = vpack.c.bf16 %v5792_v41, %v5791_v63  ;;  %v17222_v15 = vld [vmem:[#allocation3 + $0x120] sm:$0xff]  ;;  %v5809_v21 = vpack.c.bf16 %v5800_v62, %v5799_v59 }
 0x6aa   :  { %v5803_v9 = vpack.c.bf16 %v17121_v61, %v5787_v35  ;;  %v5761_v61 = vpack.c.bf16 %v5752_v55, %v5751_v46  ;;  %v5762_v25 = vpack.c.bf16 %v17222_v15, %v5753_v40  ;;  %v17228_v46 = vld [vmem:[#allocation3 + $0x82] sm:$0xff]  ;;  %v5714_v55 = vpack.c.bf16 %v17170_v20, %v17168_v45  ;;  %v17235_v41 = vld [vmem:[#allocation3 + $0xb2] sm:$0xff] }
 0x6ab   :  { %v5806_v63 = vpack.c.bf16 %v17228_v46, %v5793_v23  ;;  %v5807_v40 = vpack.c.bf16 %v5796_v32, %v17235_v41  ;;  %v17244_v23 = vld [vmem:[#allocation3 + $0x122] sm:$0xff]  ;;  %v5819_v16 = vld [vmem:[#allocation3 + $0x90] sm:$0xff] }
 0x6ac   :  { %5900 = vrot.lane.b32.xlu0 %v5711_v26, %s11477_s26  ;;  %5940 = vrot.lane.b32.xlu1 %v5803_v9, %s11477_s26  ;;  %v5851_v9 = vld [vmem:[#allocation3 + $0x131] sm:$0xff]  ;;  %v5810_v32 = vpack.c.bf16 %v17244_v23, %v5801_v53  ;;  %v5675_v56 = vld [vmem:[#allocation3 + $0xa0] sm:$0xff] }
 0x6ad   :  { %v5859_v57 = vpack.c.bf16 %v5851_v9, %v17155_v43 }
 0x6b0   :  { %5926 = vrot.lane.b32.xlu0 %v5760_v51, %s11477_s26  ;;  %5966 = vrot.lane.b32.xlu1 %v5709_v11, %s11477_s26  ;;  %v5843_v11 = vld [vmem:[#allocation3 + $0x91] sm:$0xff] }
 0x6b1   :  { %v5855_v4 = vpack.c.bf16 %v5843_v11, %v17160_v19 }
 0x6b4   :  { %5902 = vrot.lane.b32.xlu0 %v5712_v44, %s11477_s26  ;;  %5942 = vrot.lane.b32.xlu1 %v5804_v13, %s11477_s26 }
 0x6b8   :  { %5928 = vrot.lane.b32.xlu0 %v5761_v61, %s11477_s26  ;;  %5968 = vrot.lane.b32.xlu1 %v5710_v58, %s11477_s26  ;;  %v5808_v58 = vpack.c.bf16 %v5798_v50, %v5797_v34  ;;  %v5667_v34 = vld [vmem:[#allocation3] sm:$0xff]  ;;  %v11237_v61 = vld [vmem:[%s18749_s9 + $0x110] sm:$0xff]  }
 0x6b9   :  { %v5715_v50 = vld [vmem:[#allocation3 + $0x2] sm:$0xff]  ;;  %v5683_v26 = vpack.c.bf16 %v17082_v42, %v5667_v34 }
 0x6ba   :  { %v5731_v59 = vpack.c.bf16 %v5787_v35, %v5715_v50  ;;  %v11239_v35 = vld [vmem:[%s18749_s9 + $0x108] sm:$0xff]  }
 0x6bc   :  { %5904 = vrot.lane.b32.xlu0 %v5713_v8, %s11477_s26  ;;  %5944 = vrot.lane.b32.xlu1 %v5805_v60, %s11477_s26 }
 0x6c0   :  { %5930 = vrot.lane.b32.xlu0 %v5762_v25, %s11477_s26  ;;  %5970 = vrot.lane.b32.xlu1 %v5855_v4, %s11477_s26  ;;  %v11240_v25 = vld [vmem:[%s18749_s9 + $0x100] sm:$0xff]  }
 0x6c4   :  { %5906 = vrot.lane.b32.xlu0 %v5714_v55, %s11477_s26  ;;  %5946 = vrot.lane.b32.xlu1 %v5806_v63, %s11477_s26 }
 0x6c8   :  { %5972 = vrot.lane.b32.xlu0 %v5712_v44, %s11477_s26  ;;  %5948 = vrot.lane.b32.xlu1 %v5807_v40, %s11477_s26 }
 0x6cc   :  { %5974 = vrot.lane.b32.xlu0 %v5713_v8, %s11477_s26  ;;  %5950 = vrot.lane.b32.xlu1 %v5808_v58, %s11477_s26 }
 0x6d0   :  { %5976 = vrot.lane.b32.xlu0 %v5714_v55, %s11477_s26  ;;  %5952 = vrot.lane.b32.xlu1 %v5809_v21, %s11477_s26 }
 0x6d4   :  { %5978 = vrot.lane.b32.xlu0 %v5859_v57, %s11477_s26  ;;  %5954 = vrot.lane.b32.xlu1 %v5810_v32, %s11477_s26 }
 0x709   :  { %v5917_v62 = vpop.permute.xlu0 %5916  ;;  %v5893_v51 = vpop.permute.xlu1 %5892 }
 0x70a   :  { %v5982_v44 = vsel %vm19440_vm15, %v5683_v26, %v5893_v51  ;;  %v6014_v13 = vsel %vm19441_vm14, %v5731_v59, %v5917_v62  ;;  %v5723_v26 = vld [vmem:[#allocation3 + $0xa2] sm:$0xff]  ;;  %vm19455_vm15 = vmmov %vm19331_vm0 }
 0x70b   :  { %6459 = vmatprep.mubr.bf16.mxu0 %v6014_v13  ;;  %v5735_v51 = vpack.c.bf16 %v17235_v41, %v5723_v26  ;;  %vm19456_vm14 = vmmov %vm19331_vm0  ;;  %v5867_v26 = vld [vmem:[#allocation3 + $0x92] sm:$0xff] }
 0x70c   :  { %6460 = vmatmul.mubr.bf16.vlgmr.msra.gmra.mxu0 %v5982_v44 }
 0x70d   :  { %11074 = vmatpush3.bf16.msra.mxu0 %v17063_v31  ;;  %v5919_v53 = vpop.permute.xlu0 %5918  ;;  %v5895_v8 = vpop.permute.xlu1 %5894 }
 0x70e   :  { %v6018_v42 = vsel %vm19442_vm4, %v17145_v3, %v5919_v53  ;;  %11075 = vmatprep.subr.bf16.mxu0 %v11237_v61  ;;  %v5986_v31 = vsel %vm19443_vm3, %v17094_v5, %v5895_v8  ;;  %vm19457_vm4 = vmmov %vm19331_vm0 }
 0x70f   :  { %6467 = vmatprep.mubr.bf16.mxu0 %v6018_v42  ;;  %vm19458_vm3 = vmmov %vm19331_vm0 }
 0x711   :  { %v5921_v60 = vpop.permute.xlu0 %5920  ;;  %v5897_v11 = vpop.permute.xlu1 %5896  ;;  %11076 = vmatpush3.bf16.msra.mxu0 %v11237_v61 }
 0x712   :  { %11077 = vmatprep.subr.bf16.mxu0 %v11239_v35  ;;  %v6022_v4 = vsel %vm19444_vm8, %v17162_v2, %v5921_v60  ;;  %v5990_v9 = vsel %vm19446_vm13, %v17105_v30, %v5897_v11  ;;  %vm19459_vm8 = vmmov %vm19331_vm0 }
 0x713   :  { %vm19461_vm13 = vmmov %vm19331_vm0 }
 0x714   :  { %6468 = vmatmul.mubr.bf16.gmra.mxu0 %v5986_v31 }
 0x715   :  { %v5923_v55 = vpop.permute.xlu0 %5922  ;;  %v5899_v63 = vpop.permute.xlu1 %5898  ;;  %6475 = vmatprep.mubr.bf16.mxu0 %v6022_v4  ;;  %11078 = vmatpush3.bf16.msra.mxu0 %v11239_v35 }
 0x716   :  { %11079 = vmatprep.subr.bf16.mxu0 %v11240_v25  ;;  %v6026_v57 = vsel %vm19447_vm6, %v17174_v6, %v5923_v55  ;;  %v5994_v44 = vsel %vm19331_vm0, %v17111_v0, %v5899_v63  ;;  %vm19462_vm6 = vmmov %vm19331_vm0 }
 0x719   :  { %v5965_v58 = vpop.permute.xlu1 %5964  ;;  %11080 = vmatpush3.bf16.msra.mxu0 %v11240_v25 }
 0x71a   :  { %v5925_v40 = vpop.permute.xlu0 %5924  ;;  %v6078_v21 = vsel %vm19445_vm10, %v17094_v5, %v5965_v58  ;;  %vm19460_vm10 = vmmov %vm19331_vm0 }
 0x71b   :  { %6556 = vmatprep.mubr.bf16.mxu1 %v6078_v21  ;;  %v6030_v13 = vsel %vm19450_vm1, %v5735_v51, %v5925_v40  ;;  %vm19466_vm1 = vmmov %vm19331_vm0 }
 0x71c   :  { %6476 = vmatmul.mubr.bf16.gmra.mxu0 %v5990_v9 }
 0x71d   :  { %6483 = vmatprep.mubr.bf16.mxu0 %v6026_v57 }
 0x71e   :  { %v5901_v32 = vpop.permute.xlu0 %5900  ;;  %v5941_v34 = vpop.permute.xlu1 %5940 }
 0x71f   :  { %v6046_v50 = vsel %vm19448_vm2, %v5779_v1, %v5941_v34  ;;  %vm19464_vm2 = vmmov %vm19331_vm0 }
 0x720   :  { %6557 = vmatmul.mubr.bf16.vlgmr.msra.gmra.mxu1 %v6046_v50 }
 0x722   :  { %v5927_v59 = vpop.permute.xlu0 %5926  ;;  %v5967_v5 = vpop.permute.xlu1 %5966 }
 0x723   :  { %v6082_v62 = vsel %vm19449_vm7, %v17105_v30, %v5967_v5  ;;  %v5687_v30 = vpack.c.bf16 %v17172_v18, %v5675_v56  ;;  %v6034_v35 = vsel %vm19454_vm11, %v17188_v37, %v5927_v59  ;;  %vm19465_vm7 = vmmov %vm19331_vm0  ;;  %v5879_v59 = vpack.c.bf16 %v5867_v26, %v17228_v46  ;;  %v11241_v26 = vld [vmem:[%s18753_s13 + $0x78] sm:$0xff]  }
 0x724   :  { %6564 = vmatprep.mubr.bf16.mxu1 %v6082_v62  ;;  %6484 = vmatmul.mubr.bf16.gmra.mxu0 %v5994_v44  ;;  %vm19471_vm11 = vmmov %vm19331_vm0 }
 0x725   :  { %6491 = vmatprep.mubr.bf16.mxu0 %v6030_v13  ;;  %v5998_v42 = vsel %vm19453_vm12, %v5687_v30, %v5901_v32  ;;  %v19467_v32 = vpack.c.bf16 %v17151_v10, %v17134_v54  ;;  %vm19470_vm12 = vmmov %vm19331_vm0  ;;  %v19472_v54 = vpack.c.bf16 %v17168_v45, %v17153_v47  ;;  %v5875_v45 = vld [vmem:[#allocation3 + $0x132] sm:$0xff]  ;;  %10483 = vmatprep.subr.bf16.mxu0 %v11241_v26 }
 0x726   :  { %v5903_v61 = vpop.permute.xlu0 %5902  ;;  %v5943_v38 = vpop.permute.xlu1 %5942 }
 0x727   :  { %v6050_v1 = vsel %vm19451_vm9, %v5780_v7, %v5943_v38  ;;  %v5831_v7 = vpack.c.bf16 %v5819_v16, %v17141_v52  ;;  %v6002_v31 = vsel %vm19457_vm4, %v17139_v28, %v5903_v61  ;;  %vm19468_vm9 = vmmov %vm19331_vm0 }
 0x728   :  { %6565 = vmatmul.mubr.bf16.gmra.mxu1 %v6050_v1  ;;  %vm19475_vm4 = vmmov %vm19331_vm0 }
 0x72a   :  { %v5929_v41 = vpop.permute.xlu0 %5928  ;;  %v5969_v53 = vpop.permute.xlu1 %5968 }
 0x72b   :  { %v6086_v8 = vsel %vm19452_vm5, %v17111_v0, %v5969_v53  ;;  %v6038_v4 = vsel %vm19458_vm3, %v17190_v48, %v5929_v41  ;;  %vm19469_vm5 = vmmov %vm19331_vm0 }
 0x72c   :  { %6572 = vmatprep.mubr.bf16.mxu1 %v6086_v8  ;;  %6492 = vmatmul.mubr.bf16.gmra.mxu0 %v5998_v42  ;;  %vm19476_vm3 = vmmov %vm19331_vm0 }
 0x72d   :  { %6499 = vmatprep.mubr.bf16.mxu0 %v6034_v35 }
 0x72e   :  { %v5905_v60 = vpop.permute.xlu0 %5904  ;;  %v5945_v11 = vpop.permute.xlu1 %5944 }
 0x72f   :  { %v6054_v36 = vsel %vm19455_vm15, %v5781_v33, %v5945_v11  ;;  %v6006_v52 = vsel %vm19461_vm13, %v17158_v29, %v5905_v60  ;;  %vm19473_vm15 = vmmov %vm19331_vm0 }
 0x730   :  { %6573 = vmatmul.mubr.bf16.gmra.mxu1 %v6054_v36  ;;  %vm19480_vm13 = vmmov %vm19331_vm0 }
 0x732   :  { %v5931_v0 = vpop.permute.xlu0 %5930  ;;  %v5971_v18 = vpop.permute.xlu1 %5970 }
 0x733   :  { %v6090_v25 = vsel %vm19456_vm14, %v5831_v7, %v5971_v18  ;;  %v6042_v58 = vsel %vm19462_vm6, %v17199_v39, %v5931_v0  ;;  %vm19474_vm14 = vmmov %vm19331_vm0 }
 0x734   :  { %6580 = vmatprep.mubr.bf16.mxu1 %v6090_v25  ;;  %6500 = vmatmul.mubr.bf16.gmra.mxu0 %v6002_v31  ;;  %vm19481_vm6 = vmmov %vm19331_vm0 }
 0x735   :  { %6507 = vmatprep.mubr.bf16.mxu0 %v6038_v4 }
 0x736   :  { %v5907_v55 = vpop.permute.xlu0 %5906  ;;  %v5947_v63 = vpop.permute.xlu1 %5946 }
 0x737   :  { %v6058_v24 = vsel %vm19459_vm8, %v5782_v49, %v5947_v63  ;;  %vm19478_vm8 = vmmov %vm19331_vm0 }
 0x738   :  { %6581 = vmatmul.mubr.bf16.gmra.mxu1 %v6058_v24 }
 0x73a   :  { %v5973_v22 = vpop.permute.xlu0 %5972  ;;  %v5949_v40 = vpop.permute.xlu1 %5948 }
 0x73b   :  { %v6094_v33 = vsel %vm19460_vm10, %v17139_v28, %v5973_v22  ;;  %v6062_v19 = vsel %vm19464_vm2, %v19463_v14, %v5949_v40  ;;  %v6010_v28 = vsel %vm19331_vm0, %v17176_v17, %v5907_v55  ;;  %vm19479_vm10 = vmmov %vm19331_vm0 }
 0x73c   :  { %6588 = vmatprep.mubr.bf16.mxu1 %v6094_v33  ;;  %6508 = vmatmul.mubr.bf16.gmra.mxu0 %v6006_v52 }
 0x73d   :  { %6515 = vmatprep.mubr.bf16.mxu0 %v6042_v58 }
 0x73e   :  { %v5975_v21 = vpop.permute.xlu0 %5974  ;;  %v5951_v9 = vpop.permute.xlu1 %5950 }
 0x73f   :  { %v6098_v49 = vsel %vm19465_vm7, %v17158_v29, %v5975_v21  ;;  %v6066_v12 = vsel %vm19468_vm9, %v19467_v32, %v5951_v9  ;;  %v5827_v29 = vld [vmem:[#allocation3 + $0x130] sm:$0xff] }
 0x740   :  { %6589 = vmatmul.mubr.bf16.gmra.mxu1 %v6062_v19 }
 0x741   :  { %6596 = vmatprep.mubr.bf16.mxu1 %v6098_v49 }
 0x742   :  { %v5977_v57 = vpop.permute.xlu0 %5976  ;;  %v5953_v34 = vpop.permute.xlu1 %5952 }
 0x743   :  { %v6102_v27 = vsel %vm19469_vm5, %v17176_v17, %v5977_v57  ;;  %v6070_v10 = vsel %vm19473_vm15, %v19472_v54, %v5953_v34 }
 0x744   :  { %6516 = vmatmul.mubr.bf16.gmra.mxu0 %v6010_v28 }
 0x745   :  { %11081 = vmatprep.mubr.msk.bf16.mxu0 %vm19466_vm1, %v17145_v3  ;;  %v5835_v3 = vpack.c.bf16 %v5827_v29, %v17222_v15 }
 0x746   :  { %v5979_v50 = vpop.permute.xlu0 %5978  ;;  %v5955_v5 = vpop.permute.xlu1 %5954 }
 0x747   :  { %v6106_v17 = vsel %vm19474_vm14, %v5835_v3, %v5979_v50 }
 0x748   :  { %6597 = vmatmul.mubr.bf16.gmra.mxu1 %v6066_v12 }
 0x749   :  { %6604 = vmatprep.mubr.bf16.mxu1 %v6102_v27 }
 0x74c   :  { %11082 = vmatmul.mubr.msk.bf16.vlgmr.msra.gmra.mxu0 %vm19470_vm12, %v17162_v2  ;;  %v19477_v2 = vpack.c.bf16 %v17155_v43, %v17170_v20 }
 0x74d   :  { %11085 = vmatprep.mubr.msk.bf16.mxu0 %vm19471_vm11, %v17174_v6  ;;  %v5883_v6 = vpack.c.bf16 %v5875_v45, %v17244_v23 }
 0x74e   :  { %v6074_v47 = vsel %vm19478_vm8, %v19477_v2, %v5955_v5  ;;  %v11242_v2 = vld [vmem:[%s18753_s13 + $0xf8] sm:$0xff]  }
 0x74f   :  { %10547 = vmatprep.subr.bf16.mxu1 %v11242_v2  ;;  %v11249_v2 = vld [vmem:[%s18753_s13 + $0x68] sm:$0xff]  }
 0x750   :  { %6605 = vmatmul.mubr.bf16.gmra.mxu1 %v6070_v10 }
 0x751   :  { %6612 = vmatprep.mubr.bf16.mxu1 %v6106_v17 }
 0x754   :  { %11086 = vmatmul.mubr.msk.bf16.gmra.mxu0 %vm19475_vm4, %v5879_v59  ;;  %v17441_v59 = vld [vmem:[%s18750_s10] ss:$0 sm:$0xff] }
 0x755   :  { %11089 = vmatprep.mubr.msk.bf16.mxu0 %vm19476_vm3, %v17188_v37 }
 0x758   :  { %6613 = vmatmul.mubr.bf16.gmra.mxu1 %v6074_v47  ;;  %v11243_v47 = vld [vmem:[%s18753_s13 + $0x38] sm:$0xff]  }
 0x759   :  { %10484 = vmatpush3.bf16.msra.mxu0 %v11243_v47 }
 0x75c   :  { %11090 = vmatmul.mubr.msk.bf16.gmra.mxu0 %vm19479_vm10, %v17190_v48 }
 0x75d   :  { %11093 = vmatprep.mubr.msk.bf16.mxu0 %vm19480_vm13, %v17199_v39 }
 0x764   :  { %11094 = vmatmul.mubr.msk.bf16.gmra.mxu0 %vm19481_vm6, %v5883_v6 }
 0x7cc   :  { %v10359_v15 = vpop.f32.mrf.mxu0 }
 0x7ce   :  { %v10360_v46 = vpop.f32.mrf.mxu0 }
 0x7cf   :  { %v10361_v54 = vadd.f32 %v10360_v46, %v10359_v15 }
 0x7d0   :  { %v10362_v37 = vpop.f32.mrf.mxu0 }
 0x7d2   :  { %v10363_v62 = vpop.f32.mrf.mxu0 }
 0x7d3   :  { %v10364_v10 = vadd.f32 %v10363_v62, %v10362_v37  ;;  %v11244_v37 = vld [vmem:[%s18753_s13 + $0xb8] sm:$0xff]  }
 0x7d4   :  { %v10365_v51 = vpop.f32.mrf.mxu0  ;;  %10548 = vmatpush3.bf16.msra.mxu1 %v11244_v37 }
 0x7d6   :  { %v10366_v43 = vpop.f32.mrf.mxu0 }
 0x7d7   :  { %v10367_v45 = vadd.f32 %v10366_v43, %v10365_v51  ;;  %v11245_v51 = vld [vmem:[%s18753_s13 + $0x70] sm:$0xff]  }
 0x7d8   :  { %v10368_v20 = vpop.f32.mrf.mxu0  ;;  %10485 = vmatprep.subr.bf16.mxu0 %v11245_v51 }
 0x7da   :  { %v10369_v44 = vpop.f32.mrf.mxu0 }
 0x7db   :  { %v10370_v62 = vadd.f32 %v10369_v44, %v10368_v20  ;;  %v11246_v20 = vld [vmem:[%s18753_s13 + $0x30] sm:$0xff]  }
 0x7dc   :  { %v17357_v13 = vpop.f32.mrf.mxu0  ;;  %v11247_v44 = vld [vmem:[%s18753_s13 + $0xf0] sm:$0xff]   ;;  %10486 = vmatpush3.bf16.msra.mxu0 %v11246_v20 }
 0x7dd   :  { %10549 = vmatprep.subr.bf16.mxu1 %v11247_v44  ;;  %10487 = vmatprep.subr.bf16.mxu0 %v11249_v2 }
 0x7de   :  { %v17359_v61 = vpop.f32.mrf.mxu0 }
 0x7df   :  { %v10373_v43 = vadd.f32 %v17359_v61, %v17357_v13  ;;  %v11248_v13 = vld [vmem:[%s18753_s13 + $0xb0] sm:$0xff]   ;;  %v6473_v61 = vadd.f32 %v10370_v62, %v17441_v59 }
 0x7e0   :  { %v10423_v48 = vpop.f32.mrf.mxu1  ;;  %v17361_v38 = vpop.f32.mrf.mxu0  ;;  %10550 = vmatpush3.bf16.msra.mxu1 %v11248_v13 }
 0x7e2   :  { %v10424_v39 = vpop.f32.mrf.mxu1  ;;  %v17363_v56 = vpop.f32.mrf.mxu0 }
 0x7e3   :  { %v10425_v6 = vadd.f32 %v10424_v39, %v10423_v48  ;;  %v6470_v39 = vadd.f32 %v10367_v45, %v17441_v59 }
 0x7e4   :  { %v10426_v23 = vpop.f32.mrf.mxu1  ;;  %v17365_v1 = vpop.f32.mrf.mxu0 }
 0x7e6   :  { %v10427_v30 = vpop.f32.mrf.mxu1  ;;  %v17367_v41 = vpop.f32.mrf.mxu0 }
 0x7e7   :  { %v10428_v15 = vadd.f32 %v10427_v30, %v10426_v23 }
 0x7e8   :  { %v10429_v53 = vpop.f32.mrf.mxu1  ;;  %v17369_v8 = vpop.f32.mrf.mxu0 }
 0x7ea   :  { %v10430_v42 = vpop.f32.mrf.mxu1  ;;  %v17371_v35 = vpop.f32.mrf.mxu0 }
 0x7ec   :  { %v10432_v60 = vpop.f32.mrf.mxu1  ;;  %v17373_v11 = vpop.f32.mrf.mxu0 }
 0x7ee   :  { %v10433_v16 = vpop.f32.mrf.mxu1  ;;  %v17375_v36 = vpop.f32.mrf.mxu0 }
 0x7ef   :  { %v10434_v23 = vadd.f32 %v10433_v16, %v10432_v60 }
 0x7f0   :  { %v17377_v7 = vpop.f32.mrf.mxu1  ;;  %v17379_v0 = vpop.f32.mrf.mxu0 }
 0x7f1   :  { %v6570_v45 = vadd.f32 %v10434_v23, %v6473_v61 }
 0x7f2   :  { %v17381_v18 = vpop.f32.mrf.mxu1  ;;  %v17383_v25 = vpop.f32.mrf.mxu0 }
 0x7f3   :  { %v10437_v60 = vadd.f32 %v17381_v18, %v17377_v7  ;;  %v11250_v7 = vld [vmem:[%s18753_s13 + $0x28] sm:$0xff]  }
 0x7f4   :  { %v17385_v31 = vpop.f32.mrf.mxu1  ;;  %v17387_v4 = vpop.f32.mrf.mxu0  ;;  %v11251_v18 = vld [vmem:[%s18753_s13 + $0xe8] sm:$0xff]   ;;  %10488 = vmatpush3.bf16.msra.mxu0 %v11250_v7 }
 0x7f5   :  { %10551 = vmatprep.subr.bf16.mxu1 %v11251_v18 }
 0x7f6   :  { %v17389_v55 = vpop.f32.mrf.mxu1  ;;  %v17391_v63 = vpop.f32.mrf.mxu0 }
 0x7f8   :  { %v17393_v24 = vpop.f32.mrf.mxu1  ;;  %v17395_v22 = vpop.f32.mrf.mxu0 }
 0x7fa   :  { %v17397_v33 = vpop.f32.mrf.mxu1  ;;  %v17399_v52 = vpop.f32.mrf.mxu0 }
 0x7fc   :  { %v17401_v40 = vpop.f32.mrf.mxu1  ;;  %v17403_v58 = vpop.f32.mrf.mxu0 }
 0x7fe   :  { %v17405_v21 = vpop.f32.mrf.mxu1  ;;  %v17407_v14 = vpop.f32.mrf.mxu0 }
 0x800   :  { %v17409_v19 = vpop.f32.mrf.mxu1  ;;  %v17411_v49 = vpop.f32.mrf.mxu0 }
 0x802   :  { %v17413_v28 = vpop.f32.mrf.mxu1  ;;  %v17415_v9 = vpop.f32.mrf.mxu0 }
 0x803   :  { %19482 = vst [vmem:[#allocation29_spill] sm:$0xff] %v17415_v9 }
 0x804   :  { %v17417_v57 = vpop.f32.mrf.mxu1  ;;  %v17419_v32 = vpop.f32.mrf.mxu0 }
 0x805   :  { %19483 = vst [vmem:[#allocation17_spill] sm:$0xff] %v17419_v32  ;;  %v10431_v32 = vadd.f32 %v10430_v42, %v10429_v53 }
 0x806   :  { %v17421_v12 = vpop.f32.mrf.mxu1  ;;  %v17423_v27 = vpop.f32.mrf.mxu0 }
 0x807   :  { %19484 = vst [vmem:[#allocation18_spill] sm:$0xff] %v17423_v27  ;;  %v6465_v27 = vadd.f32 %v10364_v10, %v17441_v59  ;;  %v6567_v16 = vadd.f32 %v10431_v32, %v6470_v39  ;;  %v10440_v32 = vadd.f32 %v17389_v55, %v17385_v31  ;;  %v10443_v31 = vadd.f32 %v17397_v33, %v17393_v24  ;;  %v11254_v24 = vld [vmem:[%s18753_s13 + $0x20] sm:$0xff]  }
 0x808   :  { %v17425_v29 = vpop.f32.mrf.mxu1  ;;  %v17427_v34 = vpop.f32.mrf.mxu0  ;;  %v11255_v33 = vld [vmem:[%s18753_s13 + $0xe0] sm:$0xff]  }
 0x809   :  { %19485 = vst [vmem:[#allocation44_spill] sm:$0xff] %v17427_v34  ;;  %v6462_v34 = vadd.f32 %v10361_v54, %v17441_v59  ;;  %v6562_v42 = vadd.f32 %v10428_v15, %v6465_v27  ;;  %v10376_v54 = vadd.f32 %v17363_v56, %v17361_v38  ;;  %v6478_v38 = vadd.f32 %v10373_v43, %v17441_v59  ;;  %v11253_v43 = vld [vmem:[%s18753_s13 + $0x60] sm:$0xff]  }
 0x80a   :  { %v17429_v50 = vpop.f32.mrf.mxu1  ;;  %v17431_v3 = vpop.f32.mrf.mxu0  ;;  %v10379_v56 = vadd.f32 %v17367_v41, %v17365_v1  ;;  %v11252_v1 = vld [vmem:[%s18753_s13 + $0xa8] sm:$0xff]   ;;  %v10382_v15 = vadd.f32 %v17371_v35, %v17369_v8  ;;  %v10385_v35 = vadd.f32 %v17375_v36, %v17373_v11  ;;  %10489 = vmatprep.subr.bf16.mxu0 %v11253_v43  ;;  %v11256_v11 = vld [vmem:[%s18753_s13 + $0xa0] sm:$0xff]  }
 0x80b   :  { %19486 = vst [vmem:[#allocation45_spill] sm:$0xff] %v17431_v3  ;;  %v6559_v30 = vadd.f32 %v10425_v6, %v6462_v34  ;;  %v6481_v41 = vadd.f32 %v10376_v54, %v17441_v59  ;;  %v6575_v51 = vadd.f32 %v10437_v60, %v6478_v38  ;;  %10552 = vmatpush3.bf16.msra.mxu1 %v11252_v1  ;;  %v19487_v43 = vld [vmem:[#allocation29_spill] sm:$0xff] }
 0x80c   :  { %v17433_v17 = vpop.f32.mrf.mxu1  ;;  %v11083_v5 = vpop.f32.mrf.mxu0  ;;  %v6486_v8 = vadd.f32 %v10379_v56, %v17441_v59  ;;  %v6489_v36 = vadd.f32 %v10382_v15, %v17441_v59  ;;  %10490 = vmatpush3.bf16.msra.mxu0 %v11254_v24  ;;  %10553 = vmatprep.subr.bf16.mxu1 %v11255_v33  ;;  %v11264_v15 = vld [vmem:[%s18753_s13 + $0x90] sm:$0xff]  }
 0x80d   :  { %v6578_v23 = vadd.f32 %v10440_v32, %v6481_v41 }
 0x80e   :  { %v17449_v46 = vpop.f32.mrf.mxu1  ;;  %v6655_v3 = vpop.f32.mrf.mxu0 }
 0x80f   :  { %v17480_v34 = vadd.f32 %v6655_v3, %v6559_v30  ;;  %v17500_v3 = vadd.f32 %v11083_v5, %v6567_v16  ;;  %v10388_v30 = vadd.f32 %v17383_v25, %v17379_v0  ;;  %10554 = vmatpush3.bf16.msra.mxu1 %v11256_v11  ;;  %v10391_v0 = vadd.f32 %v17391_v63, %v17387_v4  ;;  %v11260_v4 = vld [vmem:[%s18753_s13 + $0x98] sm:$0xff]  }
 0x810   :  { %v17456_v9 = vpop.f32.mrf.mxu1  ;;  %v11084_v48 = vpop.f32.mrf.mxu0  ;;  %v10452_v25 = vadd.f32 %v17421_v12, %v17417_v57  ;;  %v6494_v16 = vadd.f32 %v10385_v35, %v17441_v59  ;;  %v10394_v57 = vadd.f32 %v17399_v52, %v17395_v22  ;;  %v11262_v22 = vld [vmem:[%s18753_s13 + $0x10] sm:$0xff]  }
 0x811   :  { %v17514_v55 = vadd.f32 %v11084_v48, %v6570_v45  ;;  %v10446_v48 = vadd.f32 %v17405_v21, %v17401_v40  ;;  %v10449_v40 = vadd.f32 %v17413_v28, %v17409_v19  ;;  %v6583_v21 = vadd.f32 %v10443_v31, %v6486_v8  ;;  %v11258_v19 = vld [vmem:[%s18753_s13 + $0x18] sm:$0xff]   ;;  %v11263_v52 = vld [vmem:[%s18753_s13 + $0xd0] sm:$0xff]  }
 0x812   :  { %v17470_v53 = vpop.f32.mrf.mxu1  ;;  %v6658_v10 = vpop.f32.mrf.mxu0  ;;  %v11259_v28 = vld [vmem:[%s18753_s13 + $0xd8] sm:$0xff]   ;;  %v6497_v63 = vadd.f32 %v10388_v30, %v17441_v59  ;;  %v10458_v31 = vadd.f32 %v17449_v46, %v17433_v17  ;;  %v10400_v8 = vadd.f32 %v19487_v43, %v17411_v49  ;;  %v11266_v46 = vld [vmem:[%s18753_s13 + $0x8] sm:$0xff]   ;;  %v11271_v30 = vld [vmem:[%s18753_s13 + $0xc0] sm:$0xff]  }
 0x813   :  { %v17482_v27 = vadd.f32 %v6658_v10, %v6562_v42  ;;  %v11257_v10 = vld [vmem:[%s18753_s13 + $0x58] sm:$0xff]   ;;  %v6586_v38 = vadd.f32 %v10446_v48, %v6489_v36  ;;  %10555 = vmatprep.subr.bf16.mxu1 %v11259_v28  ;;  %v6591_v45 = vadd.f32 %v10449_v40, %v6494_v16  ;;  %v10461_v35 = vadd.f32 %v17470_v53, %v17456_v9  ;;  %v11268_v49 = vld [vmem:[%s18753_s13 + $0x88] sm:$0xff]   ;;  %v11269_v9 = vld [vmem:[%s18753_s13 + $0x40] sm:$0xff]  }
 0x814   :  { %v17484_v26 = vpop.f32.mrf.mxu1  ;;  %v11087_v47 = vpop.f32.mrf.mxu0  ;;  %10491 = vmatprep.subr.bf16.mxu0 %v11257_v10  ;;  %10556 = vmatpush3.bf16.msra.mxu1 %v11260_v4  ;;  %v6594_v41 = vadd.f32 %v10452_v25, %v6497_v63  ;;  %v6513_v10 = vadd.f32 %v10400_v8, %v17441_v59  ;;  %v19491_v25 = vld [vmem:[#allocation45_spill] sm:$0xff] }
 0x815   :  { %v6720_v6 = vadd.f32 %v17482_v27, %v17480_v34  ;;  %v17561_v2 = vadd.f32 %v11087_v47, %v6583_v21  ;;  %10492 = vmatpush3.bf16.msra.mxu0 %v11258_v19  ;;  %v10455_v47 = vadd.f32 %v17429_v50, %v17425_v29  ;;  %v6502_v29 = vadd.f32 %v10391_v0, %v17441_v59  ;;  %v19490_v0 = vld [vmem:[#allocation44_spill] sm:$0xff]  ;;  %v11272_v4 = vld [vmem:[%s18753_s13 + $0x80] sm:$0xff]  }
 0x816   :  { %v17510_v37 = vpop.f32.mrf.mxu1  ;;  %v6671_v62 = vpop.f32.mrf.mxu0  ;;  %v10397_v50 = vadd.f32 %v17407_v14, %v17403_v58  ;;  %10557 = vmatprep.subr.bf16.mxu1 %v11263_v52  ;;  %v11267_v58 = vld [vmem:[%s18753_s13 + $0xc8] sm:$0xff]   ;;  %v6505_v14 = vadd.f32 %v10394_v57, %v17441_v59  ;;  %v10406_v19 = vadd.f32 %v19491_v25, %v19490_v0 }
 0x817   :  { %v6721_v5 = vadd.f32 %v6720_v6, %v17500_v3  ;;  %v17531_v44 = vadd.f32 %v6671_v62, %v6575_v51  ;;  %v11261_v6 = vld [vmem:[%s18753_s13 + $0x50] sm:$0xff]   ;;  %v11265_v62 = vld [vmem:[%s18753_s13 + $0x48] sm:$0xff]   ;;  %v6599_v24 = vadd.f32 %v10455_v47, %v6502_v29 }
 0x818   :  { %v11088_v20 = vpop.f32.mrf.mxu0  ;;  %v17540_v42 = vpop.f32.mrf.mxu1  ;;  %10493 = vmatprep.subr.bf16.mxu0 %v11261_v6  ;;  %10558 = vmatpush3.bf16.msra.mxu1 %v11264_v15  ;;  %v6510_v53 = vadd.f32 %v10397_v50, %v17441_v59  ;;  %v6602_v21 = vadd.f32 %v10458_v31, %v6505_v14  ;;  %v6521_v6 = vadd.f32 %v10406_v19, %v17441_v59 }
 0x819   :  { %v6722_v39 = vadd.f32 %v6721_v5, %v17514_v55  ;;  %v17572_v18 = vadd.f32 %v11088_v20, %v6586_v38  ;;  %10494 = vmatpush3.bf16.msra.mxu0 %v11262_v22  ;;  %10559 = vmatprep.subr.bf16.mxu1 %v11267_v58 }
 0x81a   :  { %v6674_v13 = vpop.f32.mrf.mxu0  ;;  %v10466_v12 = vpop.f32.mrf.mxu1  ;;  %10495 = vmatprep.subr.bf16.mxu0 %v11265_v62  ;;  %v6607_v16 = vadd.f32 %v10461_v35, %v6510_v53 }
 0x81b   :  { %v6723_v61 = vadd.f32 %v6722_v39, %v17531_v44  ;;  %v17545_v54 = vadd.f32 %v6674_v13, %v6578_v23  ;;  %v19488_v39 = vld [vmem:[#allocation17_spill] sm:$0xff]  ;;  %v19489_v23 = vld [vmem:[#allocation18_spill] sm:$0xff]  ;;  %v10464_v13 = vadd.f32 %v17510_v37, %v17484_v26  ;;  %v10467_v26 = vadd.f32 %v10466_v12, %v17540_v42 }
 0x81c   :  { %v11091_v60 = vpop.f32.mrf.mxu0  ;;  %v10468_v20 = vpop.f32.mrf.mxu1  ;;  %v10403_v11 = vadd.f32 %v19489_v23, %v19488_v39  ;;  %10560 = vmatpush3.bf16.msra.mxu1 %v11268_v49  ;;  %v11273_v12 = vld [vmem:[%s18753_s13 + $0x178] sm:$0xff]  }
 0x81d   :  { %v6724_v56 = vadd.f32 %v6723_v61, %v17545_v54  ;;  %v17626_v40 = vadd.f32 %v11091_v60, %v6599_v24  ;;  %10496 = vmatpush3.bf16.msra.mxu0 %v11266_v46  ;;  %10561 = vmatprep.subr.bf16.mxu1 %v11271_v30  ;;  %v11282_v46 = vld [vmem:[%s18753_s13 + $0x1f8] sm:$0xff]  }
 0x81e   :  { %v6687_v7 = vpop.f32.mrf.mxu0  ;;  %v10469_v28 = vpop.f32.mrf.mxu1  ;;  %10497 = vmatprep.subr.bf16.mxu0 %v11269_v9  ;;  %v6518_v63 = vadd.f32 %v10403_v11, %v17441_v59 }
 0x81f   :  { %v6725_v32 = vadd.f32 %v6724_v56, %v17561_v2  ;;  %v17595_v5 = vadd.f32 %v6687_v7, %v6591_v45  ;;  %v11270_v56 = vld [vmem:[%s18753_s13] sm:$0xff]   ;;  %v10470_v7 = vadd.f32 %v10469_v28, %v10468_v20  ;;  %v6610_v45 = vadd.f32 %v10464_v13, %v6513_v10 }
 0x820   :  { %v11092_v1 = vpop.f32.mrf.mxu0  ;;  %v6615_v22 = vadd.f32 %v10467_v26, %v6518_v63  ;;  %10562 = vmatpush3.bf16.msra.mxu1 %v11272_v4 }
 0x821   :  { %v6726_v51 = vadd.f32 %v6725_v32, %v17572_v18  ;;  %v17636_v37 = vadd.f32 %v11092_v1, %v6602_v21  ;;  %10498 = vmatpush3.bf16.msra.mxu0 %v11270_v56  ;;  %v6618_v1 = vadd.f32 %v10470_v7, %v6521_v6  ;;  %10675 = vmatprep.subr.bf16.mxu1 %v11282_v46 }
 0x822   :  { %v6690_v17 = vpop.f32.mrf.mxu0  ;;  %10611 = vmatprep.subr.bf16.mxu0 %v11273_v12 }
 0x823   :  { %v6727_v33 = vadd.f32 %v6726_v51, %v17595_v5  ;;  %v17610_v48 = vadd.f32 %v6690_v17, %v6594_v41 }
 0x824   :  { %v11095_v36 = vpop.f32.mrf.mxu0 }
 0x825   :  { %v6728_v61 = vadd.f32 %v6727_v33, %v17610_v48  ;;  %v6712_v50 = vadd.f32 %v11095_v36, %v6615_v22 }
 0x826   :  { %v6703_v38 = vpop.f32.mrf.mxu0 }
 0x827   :  { %v6729_v60 = vadd.f32 %v6728_v61, %v17626_v40  ;;  %v6704_v47 = vadd.f32 %v6703_v38, %v6607_v16 }
 0x828   :  { %v11096_v57 = vpop.f32.mrf.mxu0 }
 0x829   :  { %v6730_v32 = vadd.f32 %v6729_v60, %v17636_v37  ;;  %v6715_v15 = vadd.f32 %v11096_v57, %v6618_v1 }
 0x82a   :  { %v6706_v42 = vpop.f32.mrf.mxu0 }
 0x82b   :  { %v6731_v52 = vadd.f32 %v6730_v32, %v6704_v47  ;;  %v6707_v29 = vadd.f32 %v6706_v42, %v6610_v45 }
 0x82d   :  { %v6732_v41 = vadd.f32 %v6731_v52, %v6707_v29 }
 0x82f   :  { %v6733_v62 = vadd.f32 %v6732_v41, %v6712_v50 }
 0x831   :  { %v6734_v31 = vadd.f32 %v6733_v62, %v6715_v15 }
 0x833   :  { %v6735_v51 = vrot.slane %v6734_v31, 4 }
 0x835   :  { %v6736_v58 = vadd.f32 %v6735_v51, %v6734_v31 }
 0x837   :  { %v6737_v14 = vrot.slane %v6736_v58, 2 }
 0x839   :  { %v6738_v43 = vadd.f32 %v6737_v14, %v6736_v58 }
 0x83b   :  { %v6739_v8 = vrot.slane %v6738_v43, 1 }
 0x83d   :  { %v6740_v35 = vadd.f32 %v6739_v8, %v6738_v43  ;;  %v19492_v43 = vld [vmem:[#allocation10_spill] sm:$0xff] }
 0x83f   :  { %v6741_v20 = vmul.f32 0.0078125, %v6740_v35 }
 0x841   :  { %v17649_v59 = vsub.f32 %v17480_v34, %v6741_v20  ;;  %v17652_v17 = vsub.f32 %v17482_v27, %v6741_v20  ;;  %v6744_v24 = vsub.f32 %v17500_v3, %v6741_v20  ;;  %v6745_v9 = vsub.f32 %v17514_v55, %v6741_v20 }
 0x842   :  { %v6746_v34 = vsub.f32 %v17531_v44, %v6741_v20  ;;  %v6747_v39 = vsub.f32 %v17545_v54, %v6741_v20  ;;  %v6748_v36 = vsub.f32 %v17561_v2, %v6741_v20  ;;  %v6749_v13 = vsub.f32 %v17572_v18, %v6741_v20 }
 0x843   :  { %v6758_v33 = vmul.f32 %v17649_v59, %v17649_v59  ;;  %v6759_v49 = vmul.f32 %v17652_v17, %v17652_v17  ;;  %v6760_v53 = vmul.f32 %v6744_v24, %v6744_v24  ;;  %v6761_v23 = vmul.f32 %v6745_v9, %v6745_v9 }
 0x844   :  { %v6762_v3 = vmul.f32 %v6746_v34, %v6746_v34  ;;  %v6763_v21 = vmul.f32 %v6747_v39, %v6747_v39  ;;  %v6750_v10 = vsub.f32 %v17595_v5, %v6741_v20  ;;  %v6764_v0 = vmul.f32 %v6748_v36, %v6748_v36 }
 0x845   :  { %v6774_v27 = vadd.f32 %v6759_v49, %v6758_v33  ;;  %v6751_v44 = vsub.f32 %v17610_v48, %v6741_v20  ;;  %v6765_v25 = vmul.f32 %v6749_v13, %v6749_v13  ;;  %v6752_v54 = vsub.f32 %v17626_v40, %v6741_v20  ;;  %v10068_v49 = vld [vmem:[%s18752_s12] ss:$0 sm:$0xff] }
 0x846   :  { %v6766_v28 = vmul.f32 %v6750_v10, %v6750_v10  ;;  %v6753_v2 = vsub.f32 %v17636_v37, %v6741_v20  ;;  %v6754_v26 = vsub.f32 %v6704_v47, %v6741_v20  ;;  %v6755_v4 = vsub.f32 %v6707_v29, %v6741_v20 }
 0x847   :  { %v6775_v11 = vadd.f32 %v6774_v27, %v6760_v53  ;;  %v6767_v38 = vmul.f32 %v6751_v44, %v6751_v44  ;;  %v6768_v18 = vmul.f32 %v6752_v54, %v6752_v54  ;;  %v6756_v57 = vsub.f32 %v6712_v50, %v6741_v20  ;;  %v6718_v50 = vld [vmem:[%s18751_s11] sm:$0x1] }
 0x848   :  { %v6769_v63 = vmul.f32 %v6753_v2, %v6753_v2  ;;  %v6770_v7 = vmul.f32 %v6754_v26, %v6754_v26  ;;  %v6757_v48 = vsub.f32 %v6715_v15, %v6741_v20  ;;  %v6771_v45 = vmul.f32 %v6755_v4, %v6755_v4 }
 0x849   :  { %v6776_v30 = vadd.f32 %v6775_v11, %v6761_v23  ;;  %v6772_v12 = vmul.f32 %v6756_v57, %v6756_v57 }
 0x84a   :  { %v6773_v6 = vmul.f32 %v6757_v48, %v6757_v48 }
 0x84b   :  { %v6777_v61 = vadd.f32 %v6776_v30, %v6762_v3 }
 0x84d   :  { %v6778_v55 = vadd.f32 %v6777_v61, %v6763_v21 }
 0x84f   :  { %v6779_v19 = vadd.f32 %v6778_v55, %v6764_v0 }
 0x851   :  { %v6780_v16 = vadd.f32 %v6779_v19, %v6765_v25 }
 0x853   :  { %v6781_v56 = vadd.f32 %v6780_v16, %v6766_v28 }
 0x855   :  { %v6782_v60 = vadd.f32 %v6781_v56, %v6767_v38 }
 0x857   :  { %v6783_v5 = vadd.f32 %v6782_v60, %v6768_v18 }
 0x859   :  { %v6784_v32 = vadd.f32 %v6783_v5, %v6769_v63 }
 0x85b   :  { %v6785_v42 = vadd.f32 %v6784_v32, %v6770_v7 }
 0x85d   :  { %v6786_v40 = vadd.f32 %v6785_v42, %v6771_v45 }
 0x85f   :  { %v6787_v22 = vadd.f32 %v6786_v40, %v6772_v12 }
 0x861   :  { %v6788_v52 = vadd.f32 %v6787_v22, %v6773_v6 }
 0x863   :  { %v6789_v37 = vrot.slane %v6788_v52, 4 }
 0x865   :  { %v6790_v1 = vadd.f32 %v6789_v37, %v6788_v52 }
 0x867   :  { %v6791_v41 = vrot.slane %v6790_v1, 2 }
 0x869   :  { %v6792_v47 = vadd.f32 %v6791_v41, %v6790_v1 }
 0x86b   :  { %v6793_v62 = vrot.slane %v6792_v47, 1 }
 0x86d   :  { %v6794_v31 = vadd.f32 %v6793_v62, %v6792_v47 }
 0x86f   :  { %v6795_v29 = vmul.f32 0.0078125, %v6794_v31 }
 0x871   :  { %v6796_v51 = vmax.f32 %v6795_v29, 0.0 }
 0x873   :  { %v6797_v58 = vadd.f32 1e-05, %v6796_v51 }
 0x875   :  { %11445 = vrsqrt.f32 %v6797_v58 }
 0x882   :  { %v11446_v15 = vpop.eup %11445 }
 0x883   :  { %v6799_v14 = vmul.f32 %v11446_v15, %v6718_v50 }
 0x885   :  { %v6803_v8 = vrot.slane %v6799_v14, %v19492_v43  ;;  %v6931_v14 = vld [vmem:[#allocation4 + $0x1] sm:$0xff] }
 0x887   :  { %v6804_v35 = vmul.f32 %v6803_v8, %v17649_v59  ;;  %v6805_v20 = vmul.f32 %v6803_v8, %v17652_v17  ;;  %v6806_v46 = vmul.f32 %v6803_v8, %v6744_v24  ;;  %v6807_v33 = vmul.f32 %v6803_v8, %v6745_v9 }
 0x888   :  { %v6808_v53 = vmul.f32 %v6803_v8, %v6746_v34  ;;  %v6809_v27 = vmul.f32 %v6803_v8, %v6747_v39  ;;  %v6810_v23 = vmul.f32 %v6803_v8, %v6748_v36  ;;  %v6811_v11 = vmul.f32 %v6803_v8, %v6749_v13 }
 0x889   :  { %v6812_v3 = vmul.f32 %v6803_v8, %v6750_v10  ;;  %v6813_v30 = vmul.f32 %v6803_v8, %v6751_v44  ;;  %v6814_v21 = vmul.f32 %v6803_v8, %v6752_v54  ;;  %v6815_v61 = vmul.f32 %v6803_v8, %v6753_v2 }
 0x88a   :  { %v6816_v0 = vmul.f32 %v6803_v8, %v6754_v26  ;;  %v6817_v55 = vmul.f32 %v6803_v8, %v6755_v4  ;;  %v6818_v25 = vmul.f32 %v6803_v8, %v6756_v57  ;;  %v6819_v59 = vmul.f32 %v6803_v8, %v6757_v48 }
 0x88b   :  { %v17680_v19 = vadd.f32 %v10068_v49, %v6804_v35  ;;  %v17682_v17 = vadd.f32 %v10068_v49, %v6805_v20  ;;  %v17684_v24 = vadd.f32 %v10068_v49, %v6806_v46  ;;  %v6829_v9 = vadd.f32 %v10068_v49, %v6807_v33 }
 0x88c   :  { %v6830_v28 = vadd.f32 %v10068_v49, %v6808_v53  ;;  %v6831_v34 = vadd.f32 %v10068_v49, %v6809_v27  ;;  %v6832_v39 = vadd.f32 %v10068_v49, %v6810_v23  ;;  %v6833_v36 = vadd.f32 %v10068_v49, %v6811_v11 }
 0x88d   :  { %v6834_v13 = vadd.f32 %v10068_v49, %v6812_v3  ;;  %v6835_v10 = vadd.f32 %v10068_v49, %v6813_v30  ;;  %v6836_v44 = vadd.f32 %v10068_v49, %v6814_v21  ;;  %v6837_v54 = vadd.f32 %v10068_v49, %v6815_v61  ;;  %v6955_v30 = vld [vmem:[#allocation4 + $0x2] sm:$0xff]  ;;  %v11274_v21 = vld [vmem:[%s18753_s13 + $0x138] sm:$0xff]  }
 0x88e   :  { %v6838_v16 = vadd.f32 %v10068_v49, %v6816_v0  ;;  %v6839_v2 = vadd.f32 %v10068_v49, %v6817_v55  ;;  %v6840_v38 = vadd.f32 %v10068_v49, %v6818_v25  ;;  %v6841_v56 = vadd.f32 %v10068_v49, %v6819_v59 }
 0x88f   :  { %vm6844_vm2 = vcmp.ge.f32.partialorder %v17684_v24, 0.0  ;;  %vm6845_vm7 = vcmp.ge.f32.partialorder %v6829_v9, 0.0  ;;  %vm6846_vm0 = vcmp.ge.f32.partialorder %v6830_v28, 0.0  ;;  %vm6847_vm1 = vcmp.ge.f32.partialorder %v6831_v34, 0.0 }
 0x890   :  { %vm6848_vm9 = vcmp.ge.f32.partialorder %v6832_v39, 0.0  ;;  %vm6849_vm5 = vcmp.ge.f32.partialorder %v6833_v36, 0.0  ;;  %vm6850_vm12 = vcmp.ge.f32.partialorder %v6834_v13, 0.0  ;;  %vm6851_vm11 = vcmp.ge.f32.partialorder %v6835_v10, 0.0 }
 0x891   :  { %vm6852_vm15 = vcmp.ge.f32.partialorder %v6836_v44, 0.0  ;;  %vm6853_vm14 = vcmp.ge.f32.partialorder %v6837_v54, 0.0  ;;  %vm6854_vm4 = vcmp.ge.f32.partialorder %v6838_v16, 0.0  ;;  %vm6855_vm3 = vcmp.ge.f32.partialorder %v6839_v2, 0.0 }
 0x892   :  { %vm6856_vm8 = vcmp.ge.f32.partialorder %v6840_v38, 0.0  ;;  %vm6857_vm10 = vcmp.ge.f32.partialorder %v6841_v56, 0.0  ;;  %v6858_v26 = vmul.f32 0.2, %v17680_v19  ;;  %v6859_v18 = vmul.f32 0.2, %v17682_v17 }
 0x893   :  { %v6860_v60 = vmul.f32 0.2, %v17684_v24  ;;  %v6861_v4 = vmul.f32 0.2, %v6829_v9  ;;  %v6862_v63 = vmul.f32 0.2, %v6830_v28 }
 0x894   :  { %v6863_v5 = vmul.f32 0.2, %v6831_v34  ;;  %v6864_v57 = vmul.f32 0.2, %v6832_v39  ;;  %v6865_v7 = vmul.f32 0.2, %v6833_v36 }
 0x895   :  { %v6866_v32 = vmul.f32 0.2, %v6834_v13  ;;  %v6867_v48 = vmul.f32 0.2, %v6835_v10  ;;  %v6868_v45 = vmul.f32 0.2, %v6836_v44  ;;  %v17691_v42 = vsel %vm6845_vm7, %v6829_v9, %v6861_v4 }
 0x896   :  { %v6869_v12 = vmul.f32 0.2, %v6837_v54  ;;  %v6870_v40 = vmul.f32 0.2, %v6838_v16  ;;  %v6871_v6 = vmul.f32 0.2, %v6839_v2  ;;  %v17694_v22 = vsel %vm6846_vm0, %v6830_v28, %v6862_v63 }
 0x897   :  { %6894 = vst [vmem:[#allocation4 + $0x41] sm:$0xff] %v17691_v42  ;;  %v6872_v52 = vmul.f32 0.2, %v6840_v38  ;;  %v6873_v37 = vmul.f32 0.2, %v6841_v56  ;;  %v17698_v1 = vsel %vm6847_vm1, %v6831_v34, %v6863_v5  ;;  %v17701_v41 = vsel %vm6848_vm9, %v6832_v39, %v6864_v57  ;;  %6895 = vst [vmem:[#allocation4 + $0x51] sm:$0xff] %v17694_v22 }
 0x898   :  { %v17705_v47 = vsel %vm6849_vm5, %v6833_v36, %v6865_v7  ;;  %v17708_v62 = vsel %vm6850_vm12, %v6834_v13, %v6866_v32  ;;  %v17711_v31 = vsel %vm6851_vm11, %v6835_v10, %v6867_v48  ;;  %v17714_v29 = vsel %vm6852_vm15, %v6836_v44, %v6868_v45  ;;  %6897 = vst [vmem:[#allocation4 + $0x71] sm:$0xff] %v17701_v41  ;;  %v11275_v28 = vld [vmem:[%s18753_s13 + $0x170] sm:$0xff]   ;;  %v11284_v34 = vld [vmem:[%s18753_s13 + $0x1b8] sm:$0xff]   ;;  %v11277_v44 = vld [vmem:[%s18753_s13 + $0x168] sm:$0xff]  }
 0x899   :  { %6896 = vst [vmem:[#allocation4 + $0x61] sm:$0xff] %v17698_v1  ;;  %v17719_v51 = vsel %vm6853_vm14, %v6837_v54, %v6869_v12  ;;  %v17722_v58 = vsel %vm6854_vm4, %v6838_v16, %v6870_v40  ;;  %v17725_v50 = vsel %vm6855_vm3, %v6839_v2, %v6871_v6  ;;  %v17728_v15 = vsel %vm6856_vm8, %v6840_v38, %v6872_v52  ;;  %v11285_v13 = vld [vmem:[%s18753_s13 + $0x1f0] sm:$0xff]   ;;  %v11289_v38 = vld [vmem:[%s18753_s13 + $0x1e8] sm:$0xff]   ;;  %v11279_v63 = vld [vmem:[%s18753_s13 + $0x160] sm:$0xff]  }
 0x89a   :  { %6898 = vst [vmem:[#allocation4 + $0x81] sm:$0xff] %v17705_v47  ;;  %6899 = vst [vmem:[#allocation4 + $0xb1] sm:$0xff] %v17708_v62  ;;  %v6889_v8 = vsel %vm6857_vm10, %v6841_v56, %v6873_v37  ;;  %vm6842_vm13 = vcmp.ge.f32.partialorder %v17680_v19, 0.0  ;;  %vm6843_vm6 = vcmp.ge.f32.partialorder %v17682_v17, 0.0  ;;  %v17744_v35 = vsel %vm6844_vm2, %v17684_v24, %v6860_v60  ;;  %v11276_v10 = vld [vmem:[%s18753_s13 + $0x130] sm:$0xff]   ;;  %v11278_v60 = vld [vmem:[%s18753_s13 + $0x128] sm:$0xff]  }
 0x89b   :  { %6900 = vst [vmem:[#allocation4 + $0xc1] sm:$0xff] %v17711_v31  ;;  %6901 = vst [vmem:[#allocation4 + $0xd1] sm:$0xff] %v17714_v29  ;;  %v17747_v20 = vsel %vm6842_vm13, %v17680_v19, %v6858_v26  ;;  %v17750_v46 = vsel %vm6843_vm6, %v17682_v17, %v6859_v18  ;;  %v17755_v33 = vpack.c.bf16 %v17694_v22, %v17691_v42  ;;  %v17775_v17 = vld [vmem:[#allocation4] sm:$0xff]  ;;  %v11286_v54 = vld [vmem:[%s18753_s13 + $0x1b0] sm:$0xff]  }
 0x89c   :  { %6902 = vst [vmem:[#allocation4 + $0xe1] sm:$0xff] %v17719_v51  ;;  %6903 = vst [vmem:[#allocation4 + $0xf1] sm:$0xff] %v17722_v58  ;;  %v6947_v49 = vpack.c.bf16 %v17747_v20, %v6931_v14  ;;  %v7019_v53 = vpack.c.bf16 %v17750_v46, %v17747_v20  ;;  %v7020_v27 = vpack.c.bf16 %v17691_v42, %v17744_v35  ;;  %v11290_v5 = vld [vmem:[%s18753_s13 + $0x1a8] sm:$0xff]   ;;  %v11291_v7 = vld [vmem:[%s18753_s13 + $0x1e0] sm:$0xff]  }
 0x89d   :  { %6904 = vst [vmem:[#allocation4 + $0x101] sm:$0xff] %v17725_v50  ;;  %6905 = vst [vmem:[#allocation4 + $0x111] sm:$0xff] %v17728_v15  ;;  %v7021_v23 = vpack.c.bf16 %v17698_v1, %v17694_v22  ;;  %v7022_v11 = vpack.c.bf16 %v17705_v47, %v17701_v41  ;;  %v7023_v3 = vpack.c.bf16 %v17711_v31, %v17708_v62  ;;  %v11280_v32 = vld [vmem:[%s18753_s13 + $0x120] sm:$0xff]   ;;  %v11281_v48 = vld [vmem:[%s18753_s13 + $0x158] sm:$0xff]  }
 0x89e   :  { %6906 = vst [vmem:[#allocation4 + $0x121] sm:$0xff] %v6889_v8  ;;  %6893 = vst [vmem:[#allocation4 + $0x31] sm:$0xff] %v17744_v35  ;;  %7739 = vmatprep.mubr.bf16.mxu0 %v6947_v49  ;;  %v6982_v0 = vld [vmem:[#allocation4 + $0x40] sm:$0xff]  ;;  %v17787_v39 = vpack.c.bf16 %v17744_v35, %v17750_v46  ;;  %v6983_v56 = vld [vmem:[#allocation4 + $0x50] sm:$0xff] }
 0x89f   :  { %6891 = vst [vmem:[#allocation4 + $0x11] sm:$0xff] %v17747_v20  ;;  %6892 = vst [vmem:[#allocation4 + $0x21] sm:$0xff] %v17750_v46  ;;  %v11292_v45 = vld [vmem:[%s18753_s13 + $0x1a0] sm:$0xff]   ;;  %v17841_v40 = vld [vmem:[#allocation4 + $0x52] sm:$0xff]  ;;  %v17848_v14 = vpack.c.bf16 %v6983_v56, %v6982_v0 }
 0x8a0   :  { %v6984_v26 = vld [vmem:[#allocation4 + $0x60] sm:$0xff]  ;;  %v11295_v6 = vld [vmem:[%s18753_s13 + $0x1d8] sm:$0xff]   ;;  %v6985_v52 = vld [vmem:[#allocation4 + $0x70] sm:$0xff] }
 0x8a1   :  { %v6997_v57 = vpack.c.bf16 %v6984_v26, %v6983_v56  ;;  %v17839_v12 = vld [vmem:[#allocation4 + $0x42] sm:$0xff]  ;;  %v11283_v8 = vld [vmem:[%s18753_s13 + $0x118] sm:$0xff]   ;;  %v11310_v42 = vld [vmem:[%s18753_s13 + $0x210] sm:$0xff]  }
 0x8a2   :  { %v17846_v37 = vld [vmem:[#allocation4 + $0x80] sm:$0xff]  ;;  %v17855_v49 = vpack.c.bf16 %v17841_v40, %v17839_v12 }
 0x8a3   :  { %v11308_v46 = vld [vmem:[%s18753_s13 + $0x220] sm:$0xff]  }
 0x8a5   :  { %v6981_v61 = vld [vmem:[#allocation4 + $0x30] sm:$0xff] }
 0x8a6   :  { %v6979_v55 = vld [vmem:[#allocation4 + $0x10] sm:$0xff]  ;;  %v6980_v25 = vld [vmem:[#allocation4 + $0x20] sm:$0xff]  ;;  %v6996_v36 = vpack.c.bf16 %v6982_v0, %v6981_v61  ;;  %v6998_v0 = vpack.c.bf16 %v17846_v37, %v6985_v52 }
 0x8a7   :  { %v17773_v59 = vld [vmem:[#allocation4 + $0x12] sm:$0xff]  ;;  %v6995_v19 = vpack.c.bf16 %v6980_v25, %v6979_v55  ;;  %v6923_v24 = vpack.c.bf16 %v6979_v55, %v17775_v17  ;;  %v17802_v16 = vld [vmem:[#allocation4 + $0x22] sm:$0xff]  ;;  %v17809_v18 = vpack.c.bf16 %v6981_v61, %v6980_v25 }
 0x8a8   :  { %v6971_v9 = vpack.c.bf16 %v17773_v59, %v6955_v30  ;;  %v17804_v2 = vld [vmem:[#allocation4 + $0x32] sm:$0xff]  ;;  %v17859_v30 = vpack.c.bf16 %v17701_v41, %v17698_v1  ;;  %v11312_v1 = vld [vmem:[%s18753_s13 + $0x200] sm:$0xff]  }
 0x8a9   :  { %7836 = vmatprep.mubr.bf16.mxu1 %v6995_v19  ;;  %7740 = vmatmul.mubr.bf16.vlgmr.msra.gmra.mxu0 %v6923_v24  ;;  %v17816_v4 = vpack.c.bf16 %v17804_v2, %v17802_v16  ;;  %v11296_v61 = vld [vmem:[%s18753_s13 + $0x198] sm:$0xff]   ;;  %v11297_v55 = vld [vmem:[%s18753_s13 + $0x1d0] sm:$0xff]   ;;  %v6939_v19 = vld [vmem:[#allocation4 + $0xa1] sm:$0xff] }
 0x8aa   :  { %7837 = vmatmul.mubr.bf16.vlgmr.msra.gmra.mxu1 %v6971_v9  ;;  %10612 = vmatpush3.bf16.msra.mxu0 %v11274_v21  ;;  %v11287_v21 = vld [vmem:[%s18753_s13 + $0x150] sm:$0xff]   ;;  %v11293_v24 = vld [vmem:[%s18753_s13 + $0x148] sm:$0xff]   ;;  %v6951_v56 = vpack.c.bf16 %v17708_v62, %v6939_v19 }
 0x8ab   :  { %7747 = vmatprep.mubr.bf16.mxu0 %v17787_v39  ;;  %7844 = vmatprep.mubr.bf16.mxu1 %v6996_v36  ;;  %v11288_v25 = vld [vmem:[%s18753_s13 + $0x110] sm:$0xff]   ;;  %v11301_v36 = vld [vmem:[%s18753_s13 + $0x1c8] sm:$0xff]  }
 0x8ac   :  { %10613 = vmatprep.subr.bf16.mxu0 %v11275_v28  ;;  %10676 = vmatpush3.bf16.msra.mxu1 %v11284_v34  ;;  %v11298_v9 = vld [vmem:[%s18753_s13 + $0x190] sm:$0xff]   ;;  %v17883_v28 = vld [vmem:[#allocation4 + $0x62] sm:$0xff] }
 0x8ad   :  { %10677 = vmatprep.subr.bf16.mxu1 %v11285_v13  ;;  %v17885_v34 = vld [vmem:[#allocation4 + $0x72] sm:$0xff]  ;;  %v7045_v20 = vpack.c.bf16 %v17883_v28, %v17841_v40 }
 0x8ae   :  { %10614 = vmatpush3.bf16.msra.mxu0 %v11276_v10  ;;  %v6987_v13 = vld [vmem:[#allocation4 + $0xb0] sm:$0xff]  ;;  %v6988_v10 = vld [vmem:[#allocation4 + $0xc0] sm:$0xff] }
 0x8af   :  { %10615 = vmatprep.subr.bf16.mxu0 %v11277_v44  ;;  %v17890_v44 = vpack.c.bf16 %v6985_v52, %v6984_v26  ;;  %v11302_v26 = vld [vmem:[%s18753_s13 + $0x188] sm:$0xff]   ;;  %v6990_v52 = vld [vmem:[#allocation4 + $0xe0] sm:$0xff]  ;;  %v6991_v19 = vld [vmem:[#allocation4 + $0xf0] sm:$0xff] }
 0x8b0   :  { %10678 = vmatpush3.bf16.msra.mxu1 %v11286_v54  ;;  %v11294_v54 = vld [vmem:[%s18753_s13 + $0x108] sm:$0xff]   ;;  %v7013_v41 = vld [vmem:[#allocation4 + $0xd1] sm:$0xff] }
 0x8b1   :  { %7748 = vmatmul.mubr.bf16.gmra.mxu0 %v17809_v18  ;;  %10679 = vmatprep.subr.bf16.mxu1 %v11289_v38  ;;  %v17897_v38 = vpack.c.bf16 %v17885_v34, %v17883_v28  ;;  %v7015_v62 = vld [vmem:[#allocation4 + $0xf1] sm:$0xff] }
 0x8b2   :  { %7845 = vmatmul.mubr.bf16.gmra.mxu1 %v17816_v4  ;;  %7755 = vmatprep.mubr.bf16.mxu0 %v17755_v33 }
 0x8b3   :  { %7852 = vmatprep.mubr.bf16.mxu1 %v6997_v57  ;;  %10616 = vmatpush3.bf16.msra.mxu0 %v11278_v60  ;;  %v11299_v60 = vld [vmem:[%s18753_s13 + $0x140] sm:$0xff]  }
 0x8b4   :  { %10617 = vmatprep.subr.bf16.mxu0 %v11279_v63  ;;  %10680 = vmatpush3.bf16.msra.mxu1 %v11290_v5  ;;  %v6999_v63 = vpack.c.bf16 %v6988_v10, %v6987_v13  ;;  %v11303_v5 = vld [vmem:[%s18753_s13 + $0x1c0] sm:$0xff]  }
 0x8b5   :  { %10681 = vmatprep.subr.bf16.mxu1 %v11291_v7  ;;  %v11300_v57 = vld [vmem:[%s18753_s13 + $0x100] sm:$0xff]  }
 0x8b6   :  { %v11304_v7 = vld [vmem:[%s18753_s13 + $0x180] sm:$0xff]  }
 0x8b7   :  { %10618 = vmatpush3.bf16.msra.mxu0 %v11280_v32  ;;  %v11305_v32 = vld [vmem:[%s18753_s13 + $0x238] sm:$0xff]  }
 0x8b8   :  { %10619 = vmatprep.subr.bf16.mxu0 %v11281_v48  ;;  %10682 = vmatpush3.bf16.msra.mxu1 %v11292_v45  ;;  %v6963_v48 = vld [vmem:[#allocation4 + $0xa2] sm:$0xff]  ;;  %v17920_v45 = vld [vmem:[#allocation4 + $0xb2] sm:$0xff] }
 0x8b9   :  { %7756 = vmatmul.mubr.bf16.gmra.mxu0 %v17848_v14  ;;  %10683 = vmatprep.subr.bf16.mxu1 %v11295_v6  ;;  %v6989_v6 = vld [vmem:[#allocation4 + $0xd0] sm:$0xff] }
 0x8ba   :  { %7853 = vmatmul.mubr.bf16.gmra.mxu1 %v17855_v49  ;;  %7763 = vmatprep.mubr.bf16.mxu0 %v17859_v30 }
 0x8bb   :  { %7860 = vmatprep.mubr.bf16.mxu1 %v6998_v0  ;;  %10620 = vmatpush3.bf16.msra.mxu0 %v11283_v8  ;;  %v6927_v8 = vpack.c.bf16 %v6987_v13, %v17775_v17  ;;  %v7000_v0 = vpack.c.bf16 %v6990_v52, %v6989_v6 }
 0x8bc   :  { %10621 = vmatprep.subr.bf16.mxu0 %v11287_v21  ;;  %10684 = vmatpush3.bf16.msra.mxu1 %v11296_v61  ;;  %v6975_v21 = vpack.c.bf16 %v17920_v45, %v6963_v48  ;;  %v17926_v61 = vpack.c.bf16 %v17714_v29, %v17711_v31  ;;  %v7042_v31 = vld [vmem:[#allocation4 + $0x122] sm:$0xff] }
 0x8bd   :  { %10685 = vmatprep.subr.bf16.mxu1 %v11297_v55  ;;  %v17929_v55 = vld [vmem:[#allocation4 + $0xc2] sm:$0xff] }
 0x8be   :  { %v7047_v22 = vpack.c.bf16 %v17929_v55, %v17920_v45  ;;  %v7107_v45 = vld [vmem:[#allocation4 + $0x92] sm:$0xff] }
 0x8bf   :  { %10622 = vmatpush3.bf16.msra.mxu0 %v11288_v25  ;;  %v17931_v25 = vld [vmem:[#allocation4 + $0xd2] sm:$0xff] }
 0x8c0   :  { %10623 = vmatprep.subr.bf16.mxu0 %v11293_v24  ;;  %10686 = vmatpush3.bf16.msra.mxu1 %v11298_v9  ;;  %v6992_v24 = vld [vmem:[#allocation4 + $0x100] sm:$0xff]  ;;  %v17933_v9 = vpack.c.bf16 %v6989_v6, %v6988_v10  ;;  %v17937_v29 = vpack.c.bf16 %v17931_v25, %v17929_v55  ;;  %v17948_v10 = vld [vmem:[#allocation4 + $0xf2] sm:$0xff]  ;;  %v7044_v6 = vpack.c.bf16 %v17839_v12, %v17804_v2 }
 0x8c1   :  { %7764 = vmatmul.mubr.bf16.gmra.mxu0 %v17890_v44  ;;  %10687 = vmatprep.subr.bf16.mxu1 %v11301_v36  ;;  %v17941_v36 = vpack.c.bf16 %v17722_v58, %v17719_v51  ;;  %v7001_v13 = vpack.c.bf16 %v6992_v24, %v6991_v19  ;;  %v6954_v58 = vpack.c.bf16 %v17728_v15, %v17725_v50  ;;  %v11306_v15 = vld [vmem:[%s18753_s13 + $0x230] sm:$0xff]  }
 0x8c2   :  { %7861 = vmatmul.mubr.bf16.gmra.mxu1 %v17897_v38  ;;  %7771 = vmatprep.mubr.bf16.mxu0 %v6951_v56  ;;  %v6993_v56 = vld [vmem:[#allocation4 + $0x110] sm:$0xff]  ;;  %v7043_v50 = vpack.c.bf16 %v17802_v16, %v17773_v59  ;;  %v11307_v59 = vld [vmem:[%s18753_s13 + $0x228] sm:$0xff]   ;;  %v7071_v2 = vpack.c.bf16 %v17775_v17, %v17846_v37 }
 0x8c3   :  { %7868 = vmatprep.mubr.bf16.mxu1 %v6999_v63  ;;  %10624 = vmatpush3.bf16.msra.mxu0 %v11294_v54  ;;  %v17946_v54 = vld [vmem:[#allocation4 + $0xe2] sm:$0xff] }
 0x8c4   :  { %10625 = vmatprep.subr.bf16.mxu0 %v11299_v60  ;;  %10688 = vmatpush3.bf16.msra.mxu1 %v11302_v26  ;;  %v17950_v60 = vld [vmem:[#allocation4 + $0x120] sm:$0xff]  ;;  %v17952_v26 = vpack.c.bf16 %v6991_v19, %v6990_v52  ;;  %v17956_v51 = vpack.c.bf16 %v17948_v10, %v17946_v54 }
 0x8c5   :  { %10689 = vmatprep.subr.bf16.mxu1 %v11303_v5  ;;  %v7002_v63 = vpack.c.bf16 %v17950_v60, %v6993_v56  ;;  %v17963_v5 = vld [vmem:[#allocation4 + $0x102] sm:$0xff] }
 0x8c6   :  { %v7049_v40 = vpack.c.bf16 %v17963_v5, %v17948_v10 }
 0x8c7   :  { %10626 = vmatpush3.bf16.msra.mxu0 %v11300_v57  ;;  %v17965_v57 = vld [vmem:[#allocation4 + $0x112] sm:$0xff] }
 0x8c8   :  { %10690 = vmatpush3.bf16.msra.mxu1 %v11304_v7  ;;  %11097 = vmatprep.subr.bf16.mxu0 %v11305_v32  ;;  %v17967_v7 = vpack.c.bf16 %v6993_v56, %v6992_v24  ;;  %v17971_v48 = vpack.c.bf16 %v17965_v57, %v17963_v5  ;;  %v7050_v28 = vpack.c.bf16 %v7042_v31, %v17965_v57 }
 0x8c9   :  { %7772 = vmatmul.mubr.bf16.gmra.mxu0 %v6927_v8  ;;  %v7115_v8 = vld [vmem:[#allocation4 + $0x132] sm:$0xff] }
 0x8ca   :  { %7869 = vmatmul.mubr.bf16.gmra.mxu1 %v6975_v21  ;;  %7779 = vmatprep.mubr.bf16.mxu0 %v17926_v61  ;;  %v7123_v21 = vpack.c.bf16 %v7115_v8, %v7042_v31 }
 0x8cb   :  { %7876 = vmatprep.mubr.bf16.mxu1 %v7000_v0 }
 0x8d1   :  { %7780 = vmatmul.mubr.bf16.gmra.mxu0 %v17933_v9 }
 0x8d2   :  { %7877 = vmatmul.mubr.bf16.gmra.mxu1 %v17937_v29  ;;  %7787 = vmatprep.mubr.bf16.mxu0 %v17941_v36 }
 0x8d3   :  { %7884 = vmatprep.mubr.bf16.mxu1 %v7001_v13 }
 0x8d9   :  { %7788 = vmatmul.mubr.bf16.gmra.mxu0 %v17952_v26 }
 0x8da   :  { %7885 = vmatmul.mubr.bf16.gmra.mxu1 %v17956_v51  ;;  %7795 = vmatprep.mubr.bf16.mxu0 %v6954_v58 }
 0x8db   :  { %7892 = vmatprep.mubr.bf16.mxu1 %v7002_v63 }
 0x8e1   :  { %7796 = vmatmul.mubr.bf16.gmra.mxu0 %v17967_v7 }
 0x8e2   :  { %7893 = vmatmul.mubr.bf16.gmra.mxu1 %v17971_v48  ;;  %7933 = vmatprep.mubr.bf16.mxu0 %v7043_v50 }
 0x8e3   :  { %8030 = vmatprep.mubr.bf16.mxu1 %v17787_v39  ;;  %v7083_v39 = vld [vmem:[#allocation4 + $0x91] sm:$0xff] }
 0x8e4   :  { %v7095_v35 = vpack.c.bf16 %v7083_v39, %v17705_v47  ;;  %v7014_v47 = vld [vmem:[#allocation4 + $0xe1] sm:$0xff] }
 0x8e5   :  { %v7024_v12 = vpack.c.bf16 %v7014_v47, %v7013_v41 }
 0x8e9   :  { %7934 = vmatmul.mubr.bf16.vlgmr.msra.gmra.mxu0 %v7019_v53  ;;  %v7034_v53 = vld [vmem:[#allocation4 + $0x82] sm:$0xff] }
 0x8ea   :  { %8031 = vmatmul.mubr.bf16.vlgmr.msra.gmra.mxu1 %v17809_v18  ;;  %11098 = vmatpush3.bf16.msra.mxu0 %v11305_v32  ;;  %v7046_v16 = vpack.c.bf16 %v7034_v53, %v17885_v34  ;;  %v7089_v18 = vld [vmem:[#allocation4 + $0x111] sm:$0xff]  ;;  %v7075_v32 = vpack.c.bf16 %v17775_v17, %v17950_v60  ;;  %v7119_v52 = vpack.c.bf16 %v7107_v45, %v7034_v53 }
 0x8eb   :  { %7941 = vmatprep.mubr.bf16.mxu0 %v7044_v6  ;;  %8038 = vmatprep.mubr.bf16.mxu1 %v17755_v33  ;;  %v11309_v33 = vld [vmem:[%s18753_s13 + $0x218] sm:$0xff]  }
 0x8ec   :  { %11099 = vmatprep.subr.bf16.mxu0 %v11306_v15 }
 0x8ee   :  { %11100 = vmatpush3.bf16.msra.mxu0 %v11306_v15 }
 0x8ef   :  { %11101 = vmatprep.subr.bf16.mxu0 %v11307_v59 }
 0x8f1   :  { %7942 = vmatmul.mubr.bf16.gmra.mxu0 %v7020_v27  ;;  %v11311_v27 = vld [vmem:[%s18753_s13 + $0x208] sm:$0xff]  }
 0x8f2   :  { %8039 = vmatmul.mubr.bf16.gmra.mxu1 %v17848_v14  ;;  %7949 = vmatprep.mubr.bf16.mxu0 %v7045_v20  ;;  %v7091_v14 = vld [vmem:[#allocation4 + $0x131] sm:$0xff] }
 0x8f3   :  { %8046 = vmatprep.mubr.bf16.mxu1 %v17859_v30  ;;  %11102 = vmatpush3.bf16.msra.mxu0 %v11307_v59 }
 0x8f4   :  { %11103 = vmatprep.subr.bf16.mxu0 %v11308_v46 }
 0x8f7   :  { %11104 = vmatpush3.bf16.msra.mxu0 %v11308_v46 }
 0x8f8   :  { %11105 = vmatprep.subr.bf16.mxu0 %v11309_v33 }
 0x8f9   :  { %7950 = vmatmul.mubr.bf16.gmra.mxu0 %v7021_v23  ;;  %v7048_v23 = vpack.c.bf16 %v17946_v54, %v17931_v25 }
 0x8fa   :  { %8047 = vmatmul.mubr.bf16.gmra.mxu1 %v17890_v44  ;;  %7957 = vmatprep.mubr.bf16.mxu0 %v7046_v16 }
 0x8fb   :  { %8054 = vmatprep.mubr.bf16.mxu1 %v7095_v35  ;;  %11106 = vmatpush3.bf16.msra.mxu0 %v11309_v33 }
 0x8fc   :  { %11107 = vmatprep.subr.bf16.mxu0 %v11310_v42 }
 0x8ff   :  { %11108 = vmatpush3.bf16.msra.mxu0 %v11310_v42 }
 0x900   :  { %11109 = vmatprep.subr.bf16.mxu0 %v11311_v27 }
 0x901   :  { %7958 = vmatmul.mubr.bf16.gmra.mxu0 %v7022_v11  ;;  %v7088_v11 = vld [vmem:[#allocation4 + $0x101] sm:$0xff] }
 0x902   :  { %8055 = vmatmul.mubr.bf16.gmra.mxu1 %v7071_v2  ;;  %7965 = vmatprep.mubr.bf16.mxu0 %v7047_v22  ;;  %v7098_v37 = vpack.c.bf16 %v7089_v18, %v7088_v11  ;;  %v7025_v30 = vpack.c.bf16 %v7088_v11, %v7015_v62 }
 0x903   :  { %8062 = vmatprep.mubr.bf16.mxu1 %v17926_v61  ;;  %11110 = vmatpush3.bf16.msra.mxu0 %v11311_v27 }
 0x904   :  { %11111 = vmatprep.subr.bf16.mxu0 %v11312_v1 }
 0x907   :  { %11112 = vmatpush3.bf16.msra.mxu0 %v11312_v1 }
 0x909   :  { %7966 = vmatmul.mubr.bf16.gmra.mxu0 %v7023_v3  ;;  %v7090_v3 = vld [vmem:[#allocation4 + $0x121] sm:$0xff] }
 0x90a   :  { %8063 = vmatmul.mubr.bf16.gmra.mxu1 %v17933_v9  ;;  %7973 = vmatprep.mubr.bf16.mxu0 %v7048_v23  ;;  %v7099_v34 = vpack.c.bf16 %v7091_v14, %v7090_v3  ;;  %v7026_v44 = vpack.c.bf16 %v7090_v3, %v7089_v18 }
 0x90b   :  { %8070 = vmatprep.mubr.bf16.mxu1 %v17941_v36 }
 0x911   :  { %7974 = vmatmul.mubr.bf16.gmra.mxu0 %v7024_v12 }
 0x912   :  { %8071 = vmatmul.mubr.bf16.gmra.mxu1 %v17952_v26  ;;  %7981 = vmatprep.mubr.bf16.mxu0 %v7049_v40 }
 0x913   :  { %8078 = vmatprep.mubr.bf16.mxu1 %v7098_v37 }
 0x919   :  { %7982 = vmatmul.mubr.bf16.gmra.mxu0 %v7025_v30 }
 0x91a   :  { %8079 = vmatmul.mubr.bf16.gmra.mxu1 %v17967_v7  ;;  %7989 = vmatprep.mubr.bf16.mxu0 %v7050_v28 }
 0x91b   :  { %8086 = vmatprep.mubr.bf16.mxu1 %v7099_v34 }
 0x921   :  { %7990 = vmatmul.mubr.bf16.gmra.mxu0 %v7026_v44 }
 0x922   :  { %8087 = vmatmul.mubr.bf16.gmra.mxu1 %v7075_v32  ;;  %11113 = vmatprep.mubr.bf16.mxu0 %v17816_v4  ;;  %v18050_v4 = vld [vmem:[%s18754_s14] ss:$0 sm:$0xff] }
 0x923   :  { %19493 = vst [vmem:[#allocation47_spill] sm:$0xff] %v18050_v4 }
 0x929   :  { %11114 = vmatmul.mubr.bf16.vlgmr.msra.gmra.mxu0 %v17855_v49 }
 0x92a   :  { %11117 = vmatprep.mubr.bf16.mxu0 %v17897_v38 }
 0x931   :  { %11118 = vmatmul.mubr.bf16.gmra.mxu0 %v7119_v52 }
 0x932   :  { %11121 = vmatprep.mubr.bf16.mxu0 %v17937_v29 }
 0x939   :  { %11122 = vmatmul.mubr.bf16.gmra.mxu0 %v17956_v51 }
 0x93a   :  { %11125 = vmatprep.mubr.bf16.mxu0 %v17971_v48 }
 0x941   :  { %11126 = vmatmul.mubr.bf16.gmra.mxu0 %v7123_v21 }
 0x969   :  { %v10499_v17 = vpop.f32.mrf.mxu0 }
 0x96a   :  { %v10563_v61 = vpop.f32.mrf.mxu1 }
 0x96b   :  { %v10500_v49 = vpop.f32.mrf.mxu0 }
 0x96c   :  { %v10501_v38 = vadd.f32 %v10500_v49, %v10499_v17  ;;  %v10564_v0 = vpop.f32.mrf.mxu1 }
 0x96d   :  { %v10565_v55 = vadd.f32 %v10564_v0, %v10563_v61  ;;  %v10502_v25 = vpop.f32.mrf.mxu0 }
 0x96e   :  { %v7742_v19 = vadd.f32 %v10501_v38, %v18050_v4  ;;  %v10566_v24 = vpop.f32.mrf.mxu1 }
 0x96f   :  { %v10503_v9 = vpop.f32.mrf.mxu0 }
 0x970   :  { %v18053_v29 = vadd.f32 %v10565_v55, %v7742_v19  ;;  %v10504_v36 = vadd.f32 %v10503_v9, %v10502_v25  ;;  %v10567_v13 = vpop.f32.mrf.mxu1 }
 0x971   :  { %v10568_v54 = vadd.f32 %v10567_v13, %v10566_v24  ;;  %v10505_v10 = vpop.f32.mrf.mxu0 }
 0x972   :  { %v7745_v56 = vadd.f32 %v10504_v36, %v18050_v4  ;;  %v10569_v60 = vpop.f32.mrf.mxu1 }
 0x973   :  { %v10506_v26 = vpop.f32.mrf.mxu0 }
 0x974   :  { %v18056_v51 = vadd.f32 %v10568_v54, %v7745_v56  ;;  %v10507_v58 = vadd.f32 %v10506_v26, %v10505_v10  ;;  %v10570_v63 = vpop.f32.mrf.mxu1 }
 0x975   :  { %v10571_v5 = vadd.f32 %v10570_v63, %v10569_v60  ;;  %v10508_v57 = vpop.f32.mrf.mxu0 }
 0x976   :  { %v7750_v7 = vadd.f32 %v10507_v58, %v18050_v4  ;;  %v10572_v48 = vpop.f32.mrf.mxu1 }
 0x977   :  { %v10509_v50 = vpop.f32.mrf.mxu0 }
 0x978   :  { %v18059_v15 = vadd.f32 %v10571_v5, %v7750_v7  ;;  %v10510_v6 = vadd.f32 %v10509_v50, %v10508_v57  ;;  %v10573_v59 = vpop.f32.mrf.mxu1 }
 0x979   :  { %v10574_v20 = vadd.f32 %v10573_v59, %v10572_v48  ;;  %v10511_v46 = vpop.f32.mrf.mxu0 }
 0x97a   :  { %v7753_v33 = vadd.f32 %v10510_v6, %v18050_v4  ;;  %v10575_v53 = vpop.f32.mrf.mxu1 }
 0x97b   :  { %v10512_v39 = vpop.f32.mrf.mxu0 }
 0x97c   :  { %v18062_v16 = vadd.f32 %v10574_v20, %v7753_v33  ;;  %v10513_v42 = vadd.f32 %v10512_v39, %v10511_v46  ;;  %v10576_v35 = vpop.f32.mrf.mxu1 }
 0x97d   :  { %v10577_v27 = vadd.f32 %v10576_v35, %v10575_v53  ;;  %v10514_v2 = vpop.f32.mrf.mxu0 }
 0x97e   :  { %v7758_v22 = vadd.f32 %v10513_v42, %v18050_v4  ;;  %v10578_v1 = vpop.f32.mrf.mxu1 }
 0x97f   :  { %v10515_v23 = vpop.f32.mrf.mxu0 }
 0x980   :  { %v18065_v41 = vadd.f32 %v10577_v27, %v7758_v22  ;;  %v10516_v47 = vadd.f32 %v10515_v23, %v10514_v2  ;;  %v10579_v11 = vpop.f32.mrf.mxu1 }
 0x981   :  { %v10580_v18 = vadd.f32 %v10579_v11, %v10578_v1  ;;  %v10517_v12 = vpop.f32.mrf.mxu0 }
 0x982   :  { %v7761_v40 = vadd.f32 %v10516_v47, %v18050_v4  ;;  %v10581_v37 = vpop.f32.mrf.mxu1 }
 0x983   :  { %v10518_v62 = vpop.f32.mrf.mxu0 }
 0x984   :  { %v18068_v31 = vadd.f32 %v10580_v18, %v7761_v40  ;;  %v10519_v3 = vadd.f32 %v10518_v62, %v10517_v12  ;;  %v10582_v14 = vpop.f32.mrf.mxu1 }
 0x985   :  { %v10583_v30 = vadd.f32 %v10582_v14, %v10581_v37  ;;  %v10520_v28 = vpop.f32.mrf.mxu0 }
 0x986   :  { %v7766_v34 = vadd.f32 %v10519_v3, %v18050_v4  ;;  %v10584_v44 = vpop.f32.mrf.mxu1 }
 0x987   :  { %v10521_v32 = vpop.f32.mrf.mxu0 }
 0x988   :  { %v18071_v45 = vadd.f32 %v10583_v30, %v7766_v34  ;;  %v10522_v52 = vadd.f32 %v10521_v32, %v10520_v28  ;;  %v10585_v8 = vpop.f32.mrf.mxu1 }
 0x989   :  { %v10586_v21 = vadd.f32 %v10585_v8, %v10584_v44  ;;  %v10523_v17 = vpop.f32.mrf.mxu0 }
 0x98a   :  { %v7769_v61 = vadd.f32 %v10522_v52, %v18050_v4  ;;  %v10587_v49 = vpop.f32.mrf.mxu1 }
 0x98b   :  { %v10524_v38 = vpop.f32.mrf.mxu0 }
 0x98c   :  { %v18074_v0 = vadd.f32 %v10586_v21, %v7769_v61  ;;  %v10525_v55 = vadd.f32 %v10524_v38, %v10523_v17  ;;  %v10588_v25 = vpop.f32.mrf.mxu1 }
 0x98d   :  { %v10589_v19 = vadd.f32 %v10588_v25, %v10587_v49  ;;  %v10526_v24 = vpop.f32.mrf.mxu0 }
 0x98e   :  { %v7774_v9 = vadd.f32 %v10525_v55, %v18050_v4  ;;  %v10590_v36 = vpop.f32.mrf.mxu1 }
 0x98f   :  { %v10527_v13 = vpop.f32.mrf.mxu0 }
 0x990   :  { %v18077_v54 = vadd.f32 %v10589_v19, %v7774_v9  ;;  %v10528_v10 = vadd.f32 %v10527_v13, %v10526_v24  ;;  %v10591_v56 = vpop.f32.mrf.mxu1 }
 0x991   :  { %v10592_v60 = vadd.f32 %v10591_v56, %v10590_v36  ;;  %v10529_v26 = vpop.f32.mrf.mxu0 }
 0x992   :  { %v7777_v58 = vadd.f32 %v10528_v10, %v18050_v4  ;;  %v10593_v63 = vpop.f32.mrf.mxu1 }
 0x993   :  { %v10530_v5 = vpop.f32.mrf.mxu0 }
 0x994   :  { %v18080_v57 = vadd.f32 %v10592_v60, %v7777_v58  ;;  %v10531_v7 = vadd.f32 %v10530_v5, %v10529_v26  ;;  %v10594_v48 = vpop.f32.mrf.mxu1 }
 0x995   :  { %v10595_v50 = vadd.f32 %v10594_v48, %v10593_v63  ;;  %v10532_v6 = vpop.f32.mrf.mxu0 }
 0x996   :  { %v7782_v59 = vadd.f32 %v10531_v7, %v18050_v4  ;;  %v10596_v20 = vpop.f32.mrf.mxu1 }
 0x997   :  { %v10533_v46 = vpop.f32.mrf.mxu0 }
 0x998   :  { %v18083_v33 = vadd.f32 %v10595_v50, %v7782_v59  ;;  %v10534_v53 = vadd.f32 %v10533_v46, %v10532_v6  ;;  %v10597_v39 = vpop.f32.mrf.mxu1 }
 0x999   :  { %v10598_v42 = vadd.f32 %v10597_v39, %v10596_v20  ;;  %v10535_v35 = vpop.f32.mrf.mxu0 }
 0x99a   :  { %19494 = vst [vmem:[#allocation23_spill] sm:$0xff] %v18083_v33  ;;  %v7785_v27 = vadd.f32 %v10534_v53, %v18050_v4  ;;  %v10599_v2 = vpop.f32.mrf.mxu1 }
 0x99b   :  { %v10536_v22 = vpop.f32.mrf.mxu0 }
 0x99c   :  { %v18086_v1 = vadd.f32 %v10598_v42, %v7785_v27  ;;  %v10537_v23 = vadd.f32 %v10536_v22, %v10535_v35  ;;  %v10600_v47 = vpop.f32.mrf.mxu1 }
 0x99d   :  { %v10601_v11 = vadd.f32 %v10600_v47, %v10599_v2  ;;  %v10538_v18 = vpop.f32.mrf.mxu0 }
 0x99e   :  { %19495 = vst [vmem:[#allocation25_spill] sm:$0xff] %v18086_v1  ;;  %v7790_v12 = vadd.f32 %v10537_v23, %v18050_v4  ;;  %v10602_v40 = vpop.f32.mrf.mxu1 }
 0x99f   :  { %v10539_v37 = vpop.f32.mrf.mxu0 }
 0x9a0   :  { %v18089_v62 = vadd.f32 %v10601_v11, %v7790_v12  ;;  %v10540_v3 = vadd.f32 %v10539_v37, %v10538_v18  ;;  %v10603_v14 = vpop.f32.mrf.mxu1 }
 0x9a1   :  { %v10604_v30 = vadd.f32 %v10603_v14, %v10602_v40  ;;  %v10541_v28 = vpop.f32.mrf.mxu0 }
 0x9a2   :  { %19496 = vst [vmem:[#allocation19_spill] sm:$0xff] %v18089_v62  ;;  %v7793_v34 = vadd.f32 %v10540_v3, %v18050_v4  ;;  %v10605_v44 = vpop.f32.mrf.mxu1 }
 0x9a3   :  { %v10542_v32 = vpop.f32.mrf.mxu0 }
 0x9a4   :  { %v18092_v52 = vadd.f32 %v10604_v30, %v7793_v34  ;;  %v10543_v8 = vadd.f32 %v10542_v32, %v10541_v28  ;;  %v10606_v21 = vpop.f32.mrf.mxu1 }
 0x9a5   :  { %v10607_v17 = vadd.f32 %v10606_v21, %v10605_v44  ;;  %v10544_v61 = vpop.f32.mrf.mxu0 }
 0x9a6   :  { %19497 = vst [vmem:[#allocation22_spill] sm:$0xff] %v18092_v52  ;;  %v7798_v49 = vadd.f32 %v10543_v8, %v18050_v4  ;;  %v18095_v38 = vpop.f32.mrf.mxu1 }
 0x9a7   :  { %19498 = vst [vmem:[#allocation26_spill] sm:$0xff] %v18095_v38  ;;  %v10545_v55 = vpop.f32.mrf.mxu0 }
 0x9a8   :  { %v18097_v25 = vadd.f32 %v10607_v17, %v7798_v49  ;;  %v18099_v19 = vadd.f32 %v10545_v55, %v10544_v61  ;;  %v18101_v24 = vpop.f32.mrf.mxu1 }
 0x9a9   :  { %19501 = vst [vmem:[#allocation33_spill] sm:$0xff] %v18101_v24  ;;  %v10627_v9 = vpop.f32.mrf.mxu0 }
 0x9aa   :  { %19499 = vst [vmem:[#allocation30_spill] sm:$0xff] %v18097_v25  ;;  %19500 = vst [vmem:[#allocation31_spill] sm:$0xff] %v18099_v19  ;;  %v10691_v36 = vpop.f32.mrf.mxu1 }
 0x9ab   :  { %v10628_v13 = vpop.f32.mrf.mxu0 }
 0x9ac   :  { %v10629_v10 = vadd.f32 %v10628_v13, %v10627_v9  ;;  %v10692_v56 = vpop.f32.mrf.mxu1 }
 0x9ad   :  { %v10630_v60 = vpop.f32.mrf.mxu0 }
 0x9ae   :  { %v18104_v26 = vadd.f32 %v10629_v10, %v18053_v29  ;;  %v10694_v58 = vpop.f32.mrf.mxu1 }
 0x9af   :  { %v10631_v63 = vpop.f32.mrf.mxu0 }
 0x9b0   :  { %v10695_v5 = vpop.f32.mrf.mxu1 }
 0x9b1   :  { %v10633_v7 = vpop.f32.mrf.mxu0 }
 0x9b2   :  { %v10697_v48 = vpop.f32.mrf.mxu1 }
 0x9b3   :  { %v10634_v50 = vpop.f32.mrf.mxu0 }
 0x9b4   :  { %v10698_v6 = vpop.f32.mrf.mxu1 }
 0x9b5   :  { %v10636_v59 = vpop.f32.mrf.mxu0 }
 0x9b6   :  { %v10700_v20 = vpop.f32.mrf.mxu1 }
 0x9b7   :  { %v10637_v46 = vpop.f32.mrf.mxu0 }
 0x9b8   :  { %v10701_v53 = vpop.f32.mrf.mxu1 }
 0x9b9   :  { %v10639_v39 = vpop.f32.mrf.mxu0 }
 0x9ba   :  { %v10703_v42 = vpop.f32.mrf.mxu1 }
 0x9bb   :  { %v10640_v35 = vpop.f32.mrf.mxu0 }
 0x9bc   :  { %v10704_v27 = vpop.f32.mrf.mxu1 }
 0x9bd   :  { %v10642_v2 = vpop.f32.mrf.mxu0 }
 0x9be   :  { %v18106_v22 = vpop.f32.mrf.mxu1 }
 0x9bf   :  { %v10643_v29 = vpop.f32.mrf.mxu0 }
 0x9c0   :  { %v10707_v23 = vpop.f32.mrf.mxu1 }
 0x9c1   :  { %v10645_v47 = vpop.f32.mrf.mxu0 }
 0x9c2   :  { %v18108_v11 = vpop.f32.mrf.mxu1 }
 0x9c3   :  { %v10646_v18 = vpop.f32.mrf.mxu0 }
 0x9c4   :  { %v18110_v12 = vpop.f32.mrf.mxu1 }
 0x9c5   :  { %v10648_v40 = vpop.f32.mrf.mxu0 }
 0x9c6   :  { %v18112_v37 = vpop.f32.mrf.mxu1 }
 0x9c7   :  { %v10649_v3 = vpop.f32.mrf.mxu0 }
 0x9c8   :  { %v18114_v14 = vpop.f32.mrf.mxu1 }
 0x9c9   :  { %v18116_v30 = vpop.f32.mrf.mxu0 }
 0x9ca   :  { %v18118_v28 = vpop.f32.mrf.mxu1 }
 0x9cb   :  { %v18120_v34 = vpop.f32.mrf.mxu0 }
 0x9cc   :  { %v18122_v44 = vpop.f32.mrf.mxu1 }
 0x9cd   :  { %v18124_v32 = vpop.f32.mrf.mxu0 }
 0x9ce   :  { %v18126_v8 = vpop.f32.mrf.mxu1 }
 0x9cf   :  { %v18128_v21 = vpop.f32.mrf.mxu0 }
 0x9d0   :  { %v18132_v61 = vpop.f32.mrf.mxu1 }
 0x9d1   :  { %v18130_v17 = vpop.f32.mrf.mxu0  ;;  %19502 = vst [vmem:[#allocation50_spill] sm:$0xff] %v18132_v61  ;;  %v10699_v61 = vadd.f32 %v10698_v6, %v10697_v48  ;;  %v10711_v6 = vadd.f32 %v18110_v12, %v18108_v11  ;;  %v11316_v12 = vld [vmem:[%s18757_s17 + $0x30] sm:$0xff]  }
 0x9d2   :  { %v18138_v9 = vpop.f32.mrf.mxu1 }
 0x9d3   :  { %v18134_v49 = vpop.f32.mrf.mxu0  ;;  %19504 = vst [vmem:[#allocation52_spill] sm:$0xff] %v18138_v9  ;;  %v10632_v9 = vadd.f32 %v10631_v63, %v10630_v60 }
 0x9d4   :  { %v18144_v43 = vpop.f32.mrf.mxu1 }
 0x9d5   :  { %v18136_v55 = vpop.f32.mrf.mxu0  ;;  %19507 = vst [vmem:[#allocation11_spill] sm:$0xff] %v18144_v43 }
 0x9d6   :  { %19503 = vst [vmem:[#allocation12_spill] sm:$0xff] %v18136_v55  ;;  %v18150_v62 = vpop.f32.mrf.mxu1  ;;  %v10641_v55 = vadd.f32 %v10640_v35, %v10639_v39  ;;  %v10653_v39 = vadd.f32 %v18120_v34, %v18116_v30 }
 0x9d7   :  { %v18140_v13 = vpop.f32.mrf.mxu0  ;;  %19510 = vst [vmem:[#allocation36_spill] sm:$0xff] %v18150_v62  ;;  %v7939_v62 = vadd.f32 %v10632_v9, %v18056_v51  ;;  %v10705_v51 = vadd.f32 %v10704_v27, %v10703_v42 }
 0x9d8   :  { %19505 = vst [vmem:[#allocation34_spill] sm:$0xff] %v18140_v13  ;;  %v18156_v38 = vpop.f32.mrf.mxu1  ;;  %v10696_v13 = vadd.f32 %v10695_v5, %v10694_v58  ;;  %v7968_v34 = vadd.f32 %v10653_v39, %v18077_v54  ;;  %v11328_v54 = vld [vmem:[%s18757_s17 + $0xe8] sm:$0xff]  }
 0x9d9   :  { %v18142_v10 = vpop.f32.mrf.mxu0  ;;  %19513 = vst [vmem:[#allocation14_spill] sm:$0xff] %v18156_v38 }
 0x9da   :  { %19506 = vst [vmem:[#allocation53_spill] sm:$0xff] %v18142_v10  ;;  %v18162_v10 = vpop.f32.mrf.mxu1 }
 0x9db   :  { %v18146_v25 = vpop.f32.mrf.mxu0  ;;  %19516 = vst [vmem:[#allocation39_spill] sm:$0xff] %v18162_v10  ;;  %v10702_v10 = vadd.f32 %v10701_v53, %v10700_v20 }
 0x9dc   :  { %19508 = vst [vmem:[#allocation54_spill] sm:$0xff] %v18146_v25  ;;  %v10635_v25 = vadd.f32 %v10634_v50, %v10633_v7  ;;  %v8036_v50 = vadd.f32 %v10696_v13, %v7939_v62  ;;  %v11313_v62 = vld [vmem:[%s18757_s17 + $0x78] sm:$0xff]  }
 0x9dd   :  { %v18148_v52 = vpop.f32.mrf.mxu0  ;;  %10755 = vmatprep.subr.bf16.mxu1 %v11313_v62 }
 0x9de   :  { %19509 = vst [vmem:[#allocation35_spill] sm:$0xff] %v18148_v52  ;;  %v10693_v52 = vadd.f32 %v10692_v56, %v10691_v36  ;;  %v7952_v36 = vadd.f32 %v10641_v55, %v18065_v41  ;;  %v10647_v56 = vadd.f32 %v10646_v18, %v10645_v47  ;;  %v11322_v41 = vld [vmem:[%s18757_s17 + $0xf8] sm:$0xff]   ;;  %v10714_v47 = vadd.f32 %v18114_v14, %v18112_v37 }
 0x9df   :  { %v18152_v1 = vpop.f32.mrf.mxu0  ;;  %10777 = vmatprep.subr.bf16.mxu0 %v11322_v41  ;;  %v19518_v55 = vld [vmem:[#allocation12_spill] sm:$0xff]  ;;  %v19519_v9 = vld [vmem:[#allocation34_spill] sm:$0xff] }
 0x9e0   :  { %19511 = vst [vmem:[#allocation13_spill] sm:$0xff] %v18152_v1  ;;  %v10638_v1 = vadd.f32 %v10637_v46, %v10636_v59  ;;  %v8033_v7 = vadd.f32 %v10693_v52, %v18104_v26  ;;  %v10650_v52 = vadd.f32 %v10649_v3, %v10648_v40  ;;  %v7960_v48 = vadd.f32 %v10647_v56, %v18071_v45  ;;  %v11326_v40 = vld [vmem:[%s18757_s17 + $0xb0] sm:$0xff]  }
 0x9e1   :  { %v18154_v24 = vpop.f32.mrf.mxu0  ;;  %v10656_v45 = vadd.f32 %v18128_v21, %v18124_v32  ;;  %v10717_v3 = vadd.f32 %v18122_v44, %v18118_v28  ;;  %v19517_v28 = vld [vmem:[#allocation50_spill] sm:$0xff]  ;;  %v10662_v13 = vadd.f32 %v19519_v9, %v19518_v55 }
 0x9e2   :  { %19512 = vst [vmem:[#allocation37_spill] sm:$0xff] %v18154_v24  ;;  %v18167_v24 = vpop.f32.mrf.mxu1  ;;  %v7947_v63 = vadd.f32 %v10638_v1, %v18062_v16  ;;  %v10708_v16 = vadd.f32 %v10707_v23, %v18106_v22  ;;  %v11315_v22 = vld [vmem:[%s18757_s17 + $0x70] sm:$0xff]   ;;  %v7963_v23 = vadd.f32 %v10650_v52, %v18074_v0  ;;  %v10659_v0 = vadd.f32 %v18134_v49, %v18130_v17  ;;  %v11317_v49 = vld [vmem:[%s18757_s17 + $0x68] sm:$0xff]  }
 0x9e3   :  { %v18158_v19 = vpop.f32.mrf.mxu0  ;;  %v8057_v37 = vadd.f32 %v10711_v6, %v7960_v48  ;;  %v10720_v44 = vadd.f32 %v19517_v28, %v18126_v8  ;;  %v11318_v8 = vld [vmem:[%s18757_s17 + $0x28] sm:$0xff]   ;;  %v8065_v52 = vadd.f32 %v10717_v3, %v7968_v34  ;;  %v19528_v48 = vld [vmem:[#allocation33_spill] sm:$0xff] }
 0x9e4   :  { %19514 = vst [vmem:[#allocation38_spill] sm:$0xff] %v18158_v19  ;;  %v7944_v19 = vadd.f32 %v10635_v25, %v18059_v15  ;;  %v18173_v58 = vpop.f32.mrf.mxu1  ;;  %v11320_v3 = vld [vmem:[%s18757_s17 + $0x20] sm:$0xff]   ;;  %v19535_v34 = vld [vmem:[#allocation39_spill] sm:$0xff] }
 0x9e5   :  { %v18160_v4 = vpop.f32.mrf.mxu0 }
 0x9e6   :  { %19515 = vst [vmem:[#allocation16_spill] sm:$0xff] %v18160_v4  ;;  %v10644_v4 = vadd.f32 %v10643_v29, %v10642_v2  ;;  %v8041_v59 = vadd.f32 %v10699_v61, %v7944_v19  ;;  %v18200_v20 = vpop.f32.mrf.mxu1  ;;  %v11325_v29 = vld [vmem:[%s18757_s17 + $0xf0] sm:$0xff]   ;;  %v7971_v61 = vadd.f32 %v10656_v45, %v18080_v57 }
 0x9e7   :  { %v18164_v43 = vpop.f32.mrf.mxu0 }
 0x9e8   :  { %v7955_v25 = vadd.f32 %v10644_v4, %v18068_v31  ;;  %v11314_v4 = vld [vmem:[%s18757_s17 + $0x38] sm:$0xff]   ;;  %v18231_v30 = vpop.f32.mrf.mxu1  ;;  %v8068_v45 = vadd.f32 %v10720_v44, %v7971_v61 }
 0x9e9   :  { %v11115_v33 = vpop.f32.mrf.mxu0  ;;  %v11324_v31 = vld [vmem:[%s18757_s17 + $0xb8] sm:$0xff]   ;;  %10756 = vmatpush3.bf16.msra.mxu1 %v11314_v4 }
 0x9ea   :  { %v18187_v26 = vadd.f32 %v11115_v33, %v8041_v59  ;;  %v8049_v33 = vadd.f32 %v10705_v51, %v7952_v36  ;;  %10778 = vmatpush3.bf16.msra.mxu0 %v11324_v31  ;;  %v8052_v2 = vadd.f32 %v10708_v16, %v7955_v25  ;;  %10757 = vmatprep.subr.bf16.mxu1 %v11315_v22  ;;  %v19521_v36 = vld [vmem:[#allocation52_spill] sm:$0xff]  ;;  %v19522_v51 = vld [vmem:[#allocation11_spill] sm:$0xff]  ;;  %v19524_v59 = vld [vmem:[#allocation54_spill] sm:$0xff]  ;;  %v10734_v16 = vpop.f32.mrf.mxu1 }
 0x9eb   :  { %v8129_v38 = vpop.f32.mrf.mxu0  ;;  %10779 = vmatprep.subr.bf16.mxu0 %v11325_v29  ;;  %v10723_v56 = vadd.f32 %v19522_v51, %v19521_v36  ;;  %v19527_v31 = vld [vmem:[#allocation26_spill] sm:$0xff]  ;;  %v19531_v22 = vld [vmem:[#allocation25_spill] sm:$0xff] }
 0x9ec   :  { %v18175_v46 = vadd.f32 %v8129_v38, %v8033_v7  ;;  %v8044_v38 = vadd.f32 %v10702_v10, %v7947_v63  ;;  %v11330_v63 = vld [vmem:[%s18757_s17 + $0xa8] sm:$0xff]   ;;  %v10610_v6 = vadd.f32 %v19528_v48, %v19527_v31  ;;  %v7979_v29 = vadd.f32 %v10662_v13, %v19531_v22  ;;  %v10736_v61 = vpop.f32.mrf.mxu1  ;;  %v11334_v36 = vld [vmem:[%s18757_s17 + $0xd8] sm:$0xff]  }
 0x9ed   :  { %v11116_v60 = vpop.f32.mrf.mxu0  ;;  %10758 = vmatpush3.bf16.msra.mxu1 %v11316_v12  ;;  %v19520_v7 = vld [vmem:[#allocation23_spill] sm:$0xff]  ;;  %v19539_v51 = vld [vmem:[#allocation16_spill] sm:$0xff] }
 0x9ee   :  { %v18204_v42 = vadd.f32 %v11116_v60, %v8044_v38  ;;  %10780 = vmatpush3.bf16.msra.mxu0 %v11326_v40  ;;  %v8060_v60 = vadd.f32 %v10714_v47, %v7963_v23  ;;  %10759 = vmatprep.subr.bf16.mxu1 %v11317_v49  ;;  %v19525_v38 = vld [vmem:[#allocation47_spill] sm:$0xff]  ;;  %v19532_v23 = vld [vmem:[#allocation36_spill] sm:$0xff]  ;;  %v19533_v47 = vld [vmem:[#allocation14_spill] sm:$0xff] }
 0x9ef   :  { %v8132_v5 = vpop.f32.mrf.mxu0  ;;  %10781 = vmatprep.subr.bf16.mxu0 %v11328_v54  ;;  %v19536_v49 = vld [vmem:[#allocation37_spill] sm:$0xff]  ;;  %v19537_v54 = vld [vmem:[#allocation38_spill] sm:$0xff] }
 0x9f0   :  { %v18177_v15 = vadd.f32 %v8132_v5, %v8036_v50  ;;  %v7976_v50 = vadd.f32 %v10659_v0, %v19520_v7  ;;  %v19523_v5 = vld [vmem:[#allocation53_spill] sm:$0xff]  ;;  %v10671_v55 = vadd.f32 %v19537_v54, %v19536_v49 }
 0x9f1   :  { %v11119_v1 = vpop.f32.mrf.mxu0  ;;  %v10665_v25 = vadd.f32 %v19524_v59, %v19523_v5  ;;  %10760 = vmatpush3.bf16.msra.mxu1 %v11318_v8  ;;  %v11332_v0 = vld [vmem:[%s18757_s17 + $0xa0] sm:$0xff]   ;;  %v11345_v54 = vld [vmem:[%s18757_s17 + $0x178] sm:$0xff]  }
 0x9f2   :  { %v8194_v19 = vadd.f32 %v18177_v15, %v18175_v46  ;;  %v18248_v10 = vadd.f32 %v11119_v1, %v8057_v37  ;;  %10782 = vmatpush3.bf16.msra.mxu0 %v11330_v63  ;;  %v19534_v37 = vld [vmem:[#allocation19_spill] sm:$0xff]  ;;  %v8073_v28 = vadd.f32 %v10723_v56, %v7976_v50  ;;  %v10732_v63 = vadd.f32 %v18200_v20, %v18173_v58  ;;  %v11336_v58 = vld [vmem:[%s18757_s17 + $0x98] sm:$0xff]  }
 0x9f3   :  { %v8145_v53 = vpop.f32.mrf.mxu0  ;;  %v11327_v50 = vld [vmem:[%s18757_s17 + $0x50] sm:$0xff]   ;;  %v10674_v56 = vadd.f32 %v18164_v43, %v19539_v51 }
 0x9f4   :  { %v8195_v35 = vadd.f32 %v8194_v19, %v18187_v26  ;;  %v18218_v11 = vadd.f32 %v8145_v53, %v8049_v33  ;;  %v19526_v19 = vld [vmem:[#allocation31_spill] sm:$0xff]  ;;  %v19530_v53 = vld [vmem:[#allocation13_spill] sm:$0xff] }
 0x9f5   :  { %v11120_v27 = vpop.f32.mrf.mxu0  ;;  %v7801_v4 = vadd.f32 %v19526_v19, %v19525_v38  ;;  %v19529_v33 = vld [vmem:[#allocation35_spill] sm:$0xff] }
 0x9f6   :  { %v8196_v18 = vadd.f32 %v8195_v35, %v18204_v42  ;;  %v18262_v62 = vadd.f32 %v11120_v27, %v8060_v60  ;;  %v10668_v39 = vadd.f32 %v19530_v53, %v19529_v33  ;;  %v11319_v27 = vld [vmem:[%s18757_s17 + $0x60] sm:$0xff]   ;;  %v11321_v60 = vld [vmem:[%s18757_s17 + $0x58] sm:$0xff]   ;;  %v11337_v20 = vld [vmem:[%s18757_s17 + $0xd0] sm:$0xff]  }
 0x9f7   :  { %v8148_v14 = vpop.f32.mrf.mxu0  ;;  %10761 = vmatprep.subr.bf16.mxu1 %v11319_v27  ;;  %v11329_v33 = vld [vmem:[%s18757_s17 + $0x10] sm:$0xff]   ;;  %v11340_v53 = vld [vmem:[%s18757_s17 + $0xc8] sm:$0xff]  }
 0x9f8   :  { %v8197_v32 = vadd.f32 %v8196_v18, %v18218_v11  ;;  %v18235_v21 = vadd.f32 %v8148_v14, %v8052_v2  ;;  %v11331_v2 = vld [vmem:[%s18757_s17 + $0xe0] sm:$0xff]   ;;  %v10726_v18 = vadd.f32 %v19533_v47, %v19532_v23  ;;  %v7984_v14 = vadd.f32 %v10665_v25, %v19534_v37  ;;  %10762 = vmatpush3.bf16.msra.mxu1 %v11320_v3  ;;  %v11335_v47 = vld [vmem:[%s18757_s17 + $0x8] sm:$0xff]  }
 0x9f9   :  { %v11123_v17 = vpop.f32.mrf.mxu0  ;;  %10783 = vmatprep.subr.bf16.mxu0 %v11331_v2  ;;  %10763 = vmatprep.subr.bf16.mxu1 %v11321_v60  ;;  %v11343_v3 = vld [vmem:[%s18757_s17 + $0xc0] sm:$0xff]  }
 0x9fa   :  { %v8198_v57 = vadd.f32 %v8197_v32, %v18235_v21  ;;  %v10729_v32 = vadd.f32 %v18167_v24, %v19535_v34  ;;  %v11323_v24 = vld [vmem:[%s18757_s17 + $0x18] sm:$0xff]   ;;  %10784 = vmatpush3.bf16.msra.mxu0 %v11332_v0  ;;  %v18314_v5 = vadd.f32 %v11123_v17, %v8073_v28  ;;  %v8076_v59 = vadd.f32 %v10726_v18, %v7979_v29  ;;  %v19540_v17 = vld [vmem:[#allocation30_spill] sm:$0xff] }
 0x9fb   :  { %v8161_v1 = vpop.f32.mrf.mxu0  ;;  %10785 = vmatprep.subr.bf16.mxu0 %v11334_v36  ;;  %v7992_v19 = vadd.f32 %v10671_v55, %v19540_v17  ;;  %v11342_v18 = vld [vmem:[%s18757_s17 + $0x88] sm:$0xff]   ;;  %v11344_v28 = vld [vmem:[%s18757_s17 + $0x80] sm:$0xff]   ;;  %v11346_v55 = vld [vmem:[%s18757_s17 + $0x1f8] sm:$0xff]  }
 0x9fc   :  { %v8199_v41 = vadd.f32 %v8198_v57, %v18248_v10  ;;  %v18280_v12 = vadd.f32 %v8161_v1, %v8065_v52  ;;  %v19538_v57 = vld [vmem:[#allocation22_spill] sm:$0xff]  ;;  %v7898_v1 = vadd.f32 %v10610_v6, %v7801_v4  ;;  %v10737_v52 = vpop.f32.mrf.mxu1  ;;  %v8081_v38 = vadd.f32 %v10729_v32, %v7984_v14  ;;  %10764 = vmatpush3.bf16.msra.mxu1 %v11323_v24 }
 0x9fd   :  { %v11124_v35 = vpop.f32.mrf.mxu0  ;;  %v7987_v8 = vadd.f32 %v10668_v39, %v19538_v57  ;;  %10765 = vmatprep.subr.bf16.mxu1 %v11327_v50  ;;  %v11333_v6 = vld [vmem:[%s18757_s17 + $0x48] sm:$0xff]  }
 0x9fe   :  { %v8200_v40 = vadd.f32 %v8199_v41, %v18262_v62  ;;  %v10735_v41 = vadd.f32 %v10734_v16, %v18231_v30  ;;  %v18325_v31 = vadd.f32 %v11124_v35, %v8076_v59  ;;  %10786 = vmatpush3.bf16.msra.mxu0 %v11336_v58  ;;  %v11338_v30 = vld [vmem:[%s18757_s17 + $0x90] sm:$0xff]   ;;  %v7995_v39 = vadd.f32 %v10674_v56, %v7898_v1 }
 0x9ff   :  { %v8164_v44 = vpop.f32.mrf.mxu0  ;;  %v8084_v4 = vadd.f32 %v10732_v63, %v7987_v8  ;;  %10787 = vmatprep.subr.bf16.mxu0 %v11337_v20  ;;  %v10738_v35 = vadd.f32 %v10737_v52, %v10736_v61  ;;  %v11341_v61 = vld [vmem:[%s18757_s17] sm:$0xff]  }
 0xa00   :  { %v8201_v9 = vadd.f32 %v8200_v40, %v18280_v12  ;;  %v18295_v13 = vadd.f32 %v8164_v44, %v8068_v45  ;;  %v8089_v22 = vadd.f32 %v10735_v41, %v7992_v19  ;;  %10766 = vmatpush3.bf16.msra.mxu1 %v11329_v33  ;;  %v11339_v40 = vld [vmem:[%s18757_s17 + $0x40] sm:$0xff]  }
 0xa01   :  { %v11127_v7 = vpop.f32.mrf.mxu0  ;;  %10767 = vmatprep.subr.bf16.mxu1 %v11333_v6  ;;  %v8092_v37 = vadd.f32 %v10738_v35, %v7995_v39 }
 0xa02   :  { %v8202_v25 = vadd.f32 %v8201_v9, %v18295_v13  ;;  %10788 = vmatpush3.bf16.msra.mxu0 %v11338_v30  ;;  %v8186_v0 = vadd.f32 %v11127_v7, %v8089_v22 }
 0xa03   :  { %v8177_v43 = vpop.f32.mrf.mxu0  ;;  %10789 = vmatprep.subr.bf16.mxu0 %v11340_v53 }
 0xa04   :  { %v8203_v48 = vadd.f32 %v8202_v25, %v18314_v5  ;;  %v8178_v45 = vadd.f32 %v8177_v43, %v8081_v38  ;;  %10768 = vmatpush3.bf16.msra.mxu1 %v11335_v47 }
 0xa05   :  { %v11128_v16 = vpop.f32.mrf.mxu0  ;;  %10769 = vmatprep.subr.bf16.mxu1 %v11339_v40 }
 0xa06   :  { %v8204_v27 = vadd.f32 %v8203_v48, %v18325_v31  ;;  %v8189_v34 = vadd.f32 %v11128_v16, %v8092_v37  ;;  %10790 = vmatpush3.bf16.msra.mxu0 %v11342_v18 }
 0xa07   :  { %v8180_v2 = vpop.f32.mrf.mxu0  ;;  %10791 = vmatprep.subr.bf16.mxu0 %v11343_v3 }
 0xa08   :  { %v8205_v29 = vadd.f32 %v8204_v27, %v8178_v45  ;;  %v8181_v23 = vadd.f32 %v8180_v2, %v8084_v4  ;;  %10770 = vmatpush3.bf16.msra.mxu1 %v11341_v61 }
 0xa09   :  { %10799 = vmatprep.subr.bf16.mxu1 %v11345_v54  ;;  %v8192_v54 = vld [vmem:[%s18755_s15] sm:$0x1] }
 0xa0a   :  { %v8206_v14 = vadd.f32 %v8205_v29, %v8181_v23  ;;  %10792 = vmatpush3.bf16.msra.mxu0 %v11344_v28 }
 0xa0b   :  { %10821 = vmatprep.subr.bf16.mxu0 %v11346_v55 }
 0xa0c   :  { %v8207_v32 = vadd.f32 %v8206_v14, %v8186_v0 }
 0xa0e   :  { %v8208_v44 = vadd.f32 %v8207_v32, %v8189_v34 }
 0xa10   :  { %v8209_v49 = vrot.slane %v8208_v44, 4 }
 0xa12   :  { %v8210_v9 = vadd.f32 %v8209_v49, %v8208_v44 }
 0xa14   :  { %v8211_v60 = vrot.slane %v8210_v9, 2 }
 0xa16   :  { %v8212_v24 = vadd.f32 %v8211_v60, %v8210_v9  ;;  %v19541_v60 = vld [vmem:[#allocation10_spill] sm:$0xff] }
 0xa18   :  { %v8213_v57 = vrot.slane %v8212_v24, 1 }
 0xa1a   :  { %v8214_v8 = vadd.f32 %v8213_v57, %v8212_v24 }
 0xa1c   :  { %v8215_v63 = vmul.f32 0.0078125, %v8214_v8 }
 0xa1e   :  { %v8216_v7 = vsub.f32 %v18175_v46, %v8215_v63  ;;  %v8217_v50 = vsub.f32 %v18177_v15, %v8215_v63  ;;  %v8218_v36 = vsub.f32 %v18187_v26, %v8215_v63  ;;  %v8219_v51 = vsub.f32 %v18204_v42, %v8215_v63 }
 0xa1f   :  { %v8220_v56 = vsub.f32 %v18218_v11, %v8215_v63  ;;  %v8221_v59 = vsub.f32 %v18235_v21, %v8215_v63  ;;  %v8222_v25 = vsub.f32 %v18248_v10, %v8215_v63  ;;  %v8223_v58 = vsub.f32 %v18262_v62, %v8215_v63 }
 0xa20   :  { %v8224_v20 = vsub.f32 %v18280_v12, %v8215_v63  ;;  %v8225_v1 = vsub.f32 %v18295_v13, %v8215_v63  ;;  %v8226_v46 = vsub.f32 %v18314_v5, %v8215_v63  ;;  %v8227_v15 = vsub.f32 %v18325_v31, %v8215_v63 }
 0xa21   :  { %v8228_v41 = vsub.f32 %v8178_v45, %v8215_v63  ;;  %v8229_v26 = vsub.f32 %v8181_v23, %v8215_v63  ;;  %v8230_v52 = vsub.f32 %v8186_v0, %v8215_v63  ;;  %v8231_v42 = vsub.f32 %v8189_v34, %v8215_v63 }
 0xa22   :  { %v8232_v38 = vmul.f32 %v8216_v7, %v8216_v7  ;;  %v8233_v11 = vmul.f32 %v8217_v50, %v8217_v50  ;;  %v8234_v43 = vmul.f32 %v8218_v36, %v8218_v36  ;;  %v8235_v17 = vmul.f32 %v8219_v51, %v8219_v51 }
 0xa23   :  { %v8236_v19 = vmul.f32 %v8220_v56, %v8220_v56  ;;  %v8237_v48 = vmul.f32 %v8221_v59, %v8221_v59  ;;  %v8238_v33 = vmul.f32 %v8222_v25, %v8222_v25  ;;  %v8239_v30 = vmul.f32 %v8223_v58, %v8223_v58 }
 0xa24   :  { %v8248_v21 = vadd.f32 %v8233_v11, %v8232_v38  ;;  %v8240_v16 = vmul.f32 %v8224_v20, %v8224_v20  ;;  %v8241_v4 = vmul.f32 %v8225_v1, %v8225_v1  ;;  %v8242_v53 = vmul.f32 %v8226_v46, %v8226_v46  ;;  %v10142_v11 = vld [vmem:[%s18756_s16] ss:$0 sm:$0xff] }
 0xa25   :  { %v8243_v35 = vmul.f32 %v8227_v15, %v8227_v15  ;;  %v8244_v27 = vmul.f32 %v8228_v41, %v8228_v41  ;;  %v8245_v22 = vmul.f32 %v8229_v26, %v8229_v26  ;;  %v8246_v23 = vmul.f32 %v8230_v52, %v8230_v52 }
 0xa26   :  { %v8249_v10 = vadd.f32 %v8248_v21, %v8234_v43  ;;  %v8247_v18 = vmul.f32 %v8231_v42, %v8231_v42 }
 0xa28   :  { %v8250_v62 = vadd.f32 %v8249_v10, %v8235_v17 }
 0xa2a   :  { %v8251_v12 = vadd.f32 %v8250_v62, %v8236_v19 }
 0xa2c   :  { %v8252_v13 = vadd.f32 %v8251_v12, %v8237_v48 }
 0xa2e   :  { %v8253_v5 = vadd.f32 %v8252_v13, %v8238_v33 }
 0xa30   :  { %v8254_v31 = vadd.f32 %v8253_v5, %v8239_v30 }
 0xa32   :  { %v8255_v6 = vadd.f32 %v8254_v31, %v8240_v16 }
 0xa34   :  { %v8256_v39 = vadd.f32 %v8255_v6, %v8241_v4 }
 0xa36   :  { %v8257_v45 = vadd.f32 %v8256_v39, %v8242_v53 }
 0xa38   :  { %v8258_v2 = vadd.f32 %v8257_v45, %v8243_v35 }
 0xa3a   :  { %v8259_v29 = vadd.f32 %v8258_v2, %v8244_v27 }
 0xa3c   :  { %v8260_v47 = vadd.f32 %v8259_v29, %v8245_v22 }
 0xa3e   :  { %v8261_v40 = vadd.f32 %v8260_v47, %v8246_v23 }
 0xa40   :  { %v8262_v3 = vadd.f32 %v8261_v40, %v8247_v18 }
 0xa42   :  { %v8263_v0 = vrot.slane %v8262_v3, 4 }
 0xa44   :  { %v8264_v37 = vadd.f32 %v8263_v0, %v8262_v3 }
 0xa46   :  { %v8265_v14 = vrot.slane %v8264_v37, 2 }
 0xa48   :  { %v8266_v34 = vadd.f32 %v8265_v14, %v8264_v37 }
 0xa4a   :  { %v8267_v32 = vrot.slane %v8266_v34, 1 }
 0xa4c   :  { %v8268_v61 = vadd.f32 %v8267_v32, %v8266_v34 }
 0xa4e   :  { %v8269_v28 = vmul.f32 0.0078125, %v8268_v61 }
 0xa50   :  { %v8270_v44 = vmax.f32 %v8269_v28, 0.0 }
 0xa52   :  { %v8271_v49 = vadd.f32 1e-05, %v8270_v44 }
 0xa54   :  { %11447 = vrsqrt.f32 %v8271_v49 }
 0xa61   :  { %v11448_v55 = vpop.eup %11447 }
 0xa62   :  { %v8273_v9 = vmul.f32 %v11448_v55, %v8192_v54 }
 0xa64   :  { %v8277_v24 = vrot.slane %v8273_v9, %v19541_v60 }
 0xa66   :  { %v8278_v57 = vmul.f32 %v8277_v24, %v8216_v7  ;;  %v8279_v8 = vmul.f32 %v8277_v24, %v8217_v50  ;;  %v8280_v63 = vmul.f32 %v8277_v24, %v8218_v36  ;;  %v8281_v38 = vmul.f32 %v8277_v24, %v8219_v51 }
 0xa67   :  { %v8282_v43 = vmul.f32 %v8277_v24, %v8220_v56  ;;  %v8283_v21 = vmul.f32 %v8277_v24, %v8221_v59  ;;  %v8284_v17 = vmul.f32 %v8277_v24, %v8222_v25  ;;  %v8285_v10 = vmul.f32 %v8277_v24, %v8223_v58 }
 0xa68   :  { %v8286_v19 = vmul.f32 %v8277_v24, %v8224_v20  ;;  %v8287_v62 = vmul.f32 %v8277_v24, %v8225_v1  ;;  %v8288_v48 = vmul.f32 %v8277_v24, %v8226_v46  ;;  %v8289_v12 = vmul.f32 %v8277_v24, %v8227_v15 }
 0xa69   :  { %v8290_v33 = vmul.f32 %v8277_v24, %v8228_v41  ;;  %v8291_v13 = vmul.f32 %v8277_v24, %v8229_v26  ;;  %v8292_v30 = vmul.f32 %v8277_v24, %v8230_v52  ;;  %v8293_v5 = vmul.f32 %v8277_v24, %v8231_v42 }
 0xa6a   :  { %v8300_v7 = vadd.f32 %v10142_v11, %v8278_v57  ;;  %v8301_v50 = vadd.f32 %v10142_v11, %v8279_v8  ;;  %v8302_v36 = vadd.f32 %v10142_v11, %v8280_v63  ;;  %v8303_v51 = vadd.f32 %v10142_v11, %v8281_v38 }
 0xa6b   :  { %v8304_v16 = vadd.f32 %v10142_v11, %v8282_v43  ;;  %v8305_v31 = vadd.f32 %v10142_v11, %v8283_v21  ;;  %v8306_v4 = vadd.f32 %v10142_v11, %v8284_v17  ;;  %v8307_v6 = vadd.f32 %v10142_v11, %v8285_v10 }
 0xa6c   :  { %v8308_v56 = vadd.f32 %v10142_v11, %v8286_v19  ;;  %v8309_v59 = vadd.f32 %v10142_v11, %v8287_v62  ;;  %v8310_v25 = vadd.f32 %v10142_v11, %v8288_v48  ;;  %v8311_v58 = vadd.f32 %v10142_v11, %v8289_v12 }
 0xa6d   :  { %v8312_v20 = vadd.f32 %v10142_v11, %v8290_v33  ;;  %v8313_v1 = vadd.f32 %v10142_v11, %v8291_v13  ;;  %v8314_v46 = vadd.f32 %v10142_v11, %v8292_v30  ;;  %v8315_v15 = vadd.f32 %v10142_v11, %v8293_v5 }
 0xa6e   :  { %vm8316_vm2 = vcmp.ge.f32.partialorder %v8300_v7, 0.0  ;;  %vm8317_vm7 = vcmp.ge.f32.partialorder %v8301_v50, 0.0  ;;  %vm8318_vm0 = vcmp.ge.f32.partialorder %v8302_v36, 0.0  ;;  %vm8319_vm1 = vcmp.ge.f32.partialorder %v8303_v51, 0.0 }
 0xa6f   :  { %vm8320_vm9 = vcmp.ge.f32.partialorder %v8304_v16, 0.0  ;;  %vm8321_vm5 = vcmp.ge.f32.partialorder %v8305_v31, 0.0  ;;  %vm8322_vm12 = vcmp.ge.f32.partialorder %v8306_v4, 0.0  ;;  %vm8323_vm11 = vcmp.ge.f32.partialorder %v8307_v6, 0.0 }
 0xa70   :  { %vm8324_vm15 = vcmp.ge.f32.partialorder %v8308_v56, 0.0  ;;  %vm8325_vm14 = vcmp.ge.f32.partialorder %v8309_v59, 0.0  ;;  %vm8326_vm4 = vcmp.ge.f32.partialorder %v8310_v25, 0.0  ;;  %vm8327_vm3 = vcmp.ge.f32.partialorder %v8311_v58, 0.0 }
 0xa71   :  { %vm8328_vm8 = vcmp.ge.f32.partialorder %v8312_v20, 0.0  ;;  %vm8329_vm10 = vcmp.ge.f32.partialorder %v8313_v1, 0.0  ;;  %vm8330_vm13 = vcmp.ge.f32.partialorder %v8314_v46, 0.0  ;;  %vm8331_vm6 = vcmp.ge.f32.partialorder %v8315_v15, 0.0 }
 0xa72   :  { %v8332_v41 = vmul.f32 0.2, %v8300_v7  ;;  %v8333_v26 = vmul.f32 0.2, %v8301_v50  ;;  %v8334_v52 = vmul.f32 0.2, %v8302_v36 }
 0xa73   :  { %v8335_v42 = vmul.f32 0.2, %v8303_v51  ;;  %v8336_v53 = vmul.f32 0.2, %v8304_v16  ;;  %v8337_v39 = vmul.f32 0.2, %v8305_v31 }
 0xa74   :  { %v8338_v35 = vmul.f32 0.2, %v8306_v4  ;;  %v8339_v45 = vmul.f32 0.2, %v8307_v6  ;;  %v8340_v27 = vmul.f32 0.2, %v8308_v56  ;;  %v8348_v2 = vsel %vm8316_vm2, %v8300_v7, %v8332_v41 }
 0xa75   :  { %v8341_v22 = vmul.f32 0.2, %v8309_v59  ;;  %v8342_v29 = vmul.f32 0.2, %v8310_v25  ;;  %v8343_v23 = vmul.f32 0.2, %v8311_v58  ;;  %v8349_v47 = vsel %vm8317_vm7, %v8301_v50, %v8333_v26 }
 0xa76   :  { %v8344_v18 = vmul.f32 0.2, %v8312_v20  ;;  %v8345_v40 = vmul.f32 0.2, %v8313_v1  ;;  %v8346_v3 = vmul.f32 0.2, %v8314_v46  ;;  %v8350_v0 = vsel %vm8318_vm0, %v8302_v36, %v8334_v52 }
 0xa77   :  { %v8347_v37 = vmul.f32 0.2, %v8315_v15  ;;  %v8351_v14 = vsel %vm8319_vm1, %v8303_v51, %v8335_v42  ;;  %v8352_v34 = vsel %vm8320_vm9, %v8304_v16, %v8336_v53  ;;  %v8353_v32 = vsel %vm8321_vm5, %v8305_v31, %v8337_v39 }
 0xa78   :  { %v8354_v61 = vsel %vm8322_vm12, %v8306_v4, %v8338_v35  ;;  %v8355_v28 = vsel %vm8323_vm11, %v8307_v6, %v8339_v45  ;;  %v8356_v44 = vsel %vm8324_vm15, %v8308_v56, %v8340_v27  ;;  %v8357_v49 = vsel %vm8325_vm14, %v8309_v59, %v8341_v22  ;;  %v11347_v45 = vld [vmem:[%s18757_s17 + $0x138] sm:$0xff]  }
 0xa79   :  { %v8358_v54 = vsel %vm8326_vm4, %v8310_v25, %v8342_v29  ;;  %v8359_v55 = vsel %vm8327_vm3, %v8311_v58, %v8343_v23  ;;  %v8360_v9 = vsel %vm8328_vm8, %v8312_v20, %v8344_v18  ;;  %v8361_v60 = vsel %vm8329_vm10, %v8313_v1, %v8345_v40  ;;  %v11348_v29 = vld [vmem:[%s18757_s17 + $0x1b8] sm:$0xff]  }
 0xa7a   :  { %v8362_v24 = vsel %vm8330_vm13, %v8314_v46, %v8346_v3  ;;  %v8363_v57 = vsel %vm8331_vm6, %v8315_v15, %v8347_v37  ;;  %v8364_v8 = vmax.f32 %v8348_v2, %v8349_v47  ;;  %v8365_v63 = vmax.f32 %v8350_v0, %v8351_v14  ;;  %v11349_v47 = vld [vmem:[%s18757_s17 + $0x170] sm:$0xff]  }
 0xa7b   :  { %v8366_v38 = vmax.f32 %v8352_v34, %v8353_v32  ;;  %v8367_v11 = vmax.f32 %v8354_v61, %v8355_v28  ;;  %v8368_v43 = vmax.f32 %v8356_v44, %v8357_v49  ;;  %v8369_v21 = vmax.f32 %v8358_v54, %v8359_v55  ;;  %v11350_v3 = vld [vmem:[%s18757_s17 + $0x1f0] sm:$0xff]   ;;  %v11353_v28 = vld [vmem:[%s18757_s17 + $0x168] sm:$0xff]   ;;  %v11357_v55 = vld [vmem:[%s18757_s17 + $0x160] sm:$0xff]  }
 0xa7c   :  { %v8370_v17 = vmax.f32 %v8360_v9, %v8361_v60  ;;  %v8371_v10 = vmax.f32 %v8362_v24, %v8363_v57  ;;  %8372 = vst [vmem:[#allocation6] sm:$0xff] %v8364_v8  ;;  %8373 = vst [vmem:[#allocation6 + $0x8] sm:$0xff] %v8365_v63  ;;  %vm8432_vm2 = vcmask 1041409   ;;  %v11351_v34 = vld [vmem:[%s18757_s17 + $0x130] sm:$0xff]   ;;  %v11354_v44 = vld [vmem:[%s18757_s17 + $0x1e8] sm:$0xff]   ;;  %vm9868_vm7 = vcmask 254976  }
 0xa7d   :  { %8374 = vst [vmem:[#allocation6 + $0x10] sm:$0xff] %v8366_v38  ;;  %8375 = vst [vmem:[#allocation6 + $0x18] sm:$0xff] %v8367_v11  ;;  %v11352_v61 = vld [vmem:[%s18757_s17 + $0x1b0] sm:$0xff]   ;;  %v11355_v49 = vld [vmem:[%s18757_s17 + $0x128] sm:$0xff]  }
 0xa7e   :  { %8376 = vst [vmem:[#allocation6 + $0x20] sm:$0xff] %v8368_v43  ;;  %8377 = vst [vmem:[#allocation6 + $0x28] sm:$0xff] %v8369_v21  ;;  %v11356_v54 = vld [vmem:[%s18757_s17 + $0x1a8] sm:$0xff]   ;;  %v11358_v9 = vld [vmem:[%s18757_s17 + $0x1e0] sm:$0xff]  }
 0xa7f   :  { %8378 = vst [vmem:[#allocation6 + $0x30] sm:$0xff] %v8370_v17  ;;  %8379 = vst [vmem:[#allocation6 + $0x38] sm:$0xff] %v8371_v10  ;;  %v11359_v60 = vld [vmem:[%s18757_s17 + $0x120] sm:$0xff]   ;;  %v11361_v57 = vld [vmem:[%s18757_s17 + $0x158] sm:$0xff]  }
 0xa80   :  { %v11360_v24 = vld [vmem:[%s18757_s17 + $0x1a0] sm:$0xff]   ;;  %v11362_v8 = vld [vmem:[%s18757_s17 + $0x1d8] sm:$0xff]  }
 0xa81   :  { %v11363_v21 = vld [vmem:[%s18757_s17 + $0x118] sm:$0xff]  }
 0xa82   :  { %v11364_v10 = vld [vmem:[%s18757_s17 + $0x198] sm:$0xff]  }
 0xa83   :  { %v8380_v19 = vld [vmem:[#allocation6] ss:$2 sm:$0xf]  ;;  %v8396_v62 = vld [vmem:[#allocation6 + $0x1] ss:$2 sm:$0xf] }
 0xa84   :  { %v8411_v33 = vmax.f32 %v8380_v19, %v8396_v62  ;;  %v8382_v30 = vld [vmem:[#allocation6 + $0x8] ss:$2 sm:$0xf]  ;;  %v8398_v50 = vld [vmem:[#allocation6 + $0x9] ss:$2 sm:$0xf] }
 0xa85   :  { %v8388_v48 = vld [vmem:[#allocation6 + $0x20] ss:$2 sm:$0xf]  ;;  %v8404_v12 = vld [vmem:[#allocation6 + $0x21] ss:$2 sm:$0xf]  ;;  %v8412_v16 = vmax.f32 %v8382_v30, %v8398_v50 }
 0xa86   :  { %v8415_v13 = vmax.f32 %v8388_v48, %v8404_v12  ;;  %v8390_v5 = vld [vmem:[#allocation6 + $0x28] ss:$2 sm:$0xf]  ;;  %v8419_v7 = vpack.c.bf16 %v8411_v33, %v8411_v33  ;;  %v8406_v36 = vld [vmem:[#allocation6 + $0x29] ss:$2 sm:$0xf] }
 0xa87   :  { %v8416_v31 = vmax.f32 %v8390_v5, %v8406_v36  ;;  %v8421_v56 = vpack.c.bf16 %v8412_v16, %v8412_v16  ;;  %v8384_v63 = vld [vmem:[#allocation6 + $0x10] ss:$2 sm:$0xf]  ;;  %v8400_v38 = vld [vmem:[#allocation6 + $0x11] ss:$2 sm:$0xf] }
 0xa88   :  { %v8420_v51 = vpack.c.bf16 %v8415_v13, %v8415_v13  ;;  %v8429_v4 = vunpack.c.l.b16 %v8419_v7  ;;  %v8392_v11 = vld [vmem:[#allocation6 + $0x30] ss:$2 sm:$0xf]  ;;  %v8408_v43 = vld [vmem:[#allocation6 + $0x31] ss:$2 sm:$0xf]  ;;  %v8413_v17 = vmax.f32 %v8384_v63, %v8400_v38 }
 0xa89   :  { %v8422_v59 = vpack.c.bf16 %v8416_v31, %v8416_v31  ;;  %v18400_v41 = vunpack.c.l.b16 %v8421_v56  ;;  %v11365_v19 = vld [vmem:[%s18757_s17 + $0x150] sm:$0xff]   ;;  %v8417_v62 = vmax.f32 %v8392_v11, %v8408_v43  ;;  %v11369_v30 = vld [vmem:[%s18757_s17 + $0x148] sm:$0xff]   ;;  %v11373_v16 = vld [vmem:[%s18757_s17 + $0x140] sm:$0xff]  }
 0xa8a   :  { %v8430_v6 = vunpack.c.l.b16 %v8420_v51  ;;  %v8436_v25 = vrot.slane %v8429_v4, 1  ;;  %v8445_v58 = vrot.slane %v8429_v4, 3  ;;  %v8440_v20 = vrot.slane %v8429_v4, 2  ;;  %v11366_v48 = vld [vmem:[%s18757_s17 + $0x1d0] sm:$0xff]   ;;  %v11370_v7 = vld [vmem:[%s18757_s17 + $0x1c8] sm:$0xff]  }
 0xa8b   :  { %v18403_v52 = vunpack.c.l.b16 %v8422_v59  ;;  %v8458_v23 = vrot.slane %v18400_v41, 1  ;;  %v8467_v18 = vrot.slane %v18400_v41, 3  ;;  %v11367_v12 = vld [vmem:[%s18757_s17 + $0x110] sm:$0xff]   ;;  %v8423_v33 = vpack.c.bf16 %v8413_v17, %v8413_v17  ;;  %v11371_v50 = vld [vmem:[%s18757_s17 + $0x108] sm:$0xff]  }
 0xa8c   :  { %v8431_v1 = vrot.slane %v8430_v6, 7  ;;  %v8441_v46 = vrot.slane %v8430_v6, 1  ;;  %v8446_v15 = vrot.slane %v8430_v6, 2  ;;  %v8437_v26 = vsel %vm8432_vm2, %v8430_v6, %v8436_v25  ;;  %v11368_v13 = vld [vmem:[%s18757_s17 + $0x190] sm:$0xff]   ;;  %v11372_v51 = vld [vmem:[%s18757_s17 + $0x188] sm:$0xff]   ;;  %v11375_v25 = vld [vmem:[%s18757_s17 + $0x100] sm:$0xff]  }
 0xa8d   :  { %v8438_v42 = vpack.c.b16 %v8437_v26, %v8437_v26  ;;  %v8468_v40 = vrot.slane %v18403_v52, 2  ;;  %v8459_v0 = vsel %vm8432_vm2, %v18403_v52, %v8458_v23  ;;  %v8424_v5 = vpack.c.bf16 %v8417_v62, %v8417_v62  ;;  %v11398_v38 = vld [vmem:[%s18757_s17 + $0x2d0] sm:$0xff]   ;;  %v11401_v17 = vld [vmem:[%s18757_s17 + $0x248] sm:$0xff]  }
 0xa8e   :  { %v8447_v53 = vsel %vm8432_vm2, %v8446_v15, %v8445_v58  ;;  %v8433_v39 = vsel %vm8432_vm2, %v8431_v1, %v8429_v4  ;;  %v8442_v35 = vsel %vm8432_vm2, %v8441_v46, %v8440_v20  ;;  %v8460_v37 = vpack.c.b16 %v8459_v0, %v8459_v0  ;;  %v11374_v4 = vld [vmem:[%s18757_s17 + $0x1c0] sm:$0xff]   ;;  %v11377_v1 = vld [vmem:[%s18757_s17 + $0x278] sm:$0xff]   ;;  %v11387_v0 = vld [vmem:[%s18757_s17 + $0x228] sm:$0xff]  }
 0xa8f   :  { %v8448_v27 = vpack.c.b16 %v8447_v53, %v8447_v53  ;;  %v8434_v2 = vpack.c.b16 %v8433_v39, %v8433_v39  ;;  %v8443_v22 = vpack.c.b16 %v8442_v35, %v8442_v35  ;;  %9579 = vmatprep.mubr.bf16.mxu1 %v8438_v42  ;;  %v8469_v14 = vsel %vm8432_vm2, %v8468_v40, %v8467_v18  ;;  %v11376_v20 = vld [vmem:[%s18757_s17 + $0x180] sm:$0xff]   ;;  %v11379_v53 = vld [vmem:[%s18757_s17 + $0x238] sm:$0xff]   ;;  %v11384_v18 = vld [vmem:[%s18757_s17 + $0x2b0] sm:$0xff]  }
 0xa90   :  { %v8470_v32 = vpack.c.b16 %v8469_v14, %v8469_v14  ;;  %v18489_v36 = vunpack.c.l.b16 %v8423_v33  ;;  %v18497_v31 = vunpack.c.l.b16 %v8424_v5  ;;  %v8454_v6 = vrot.slane %v18403_v52, 7  ;;  %v11385_v40 = vld [vmem:[%s18757_s17 + $0x268] sm:$0xff]   ;;  %v11389_v14 = vld [vmem:[%s18757_s17 + $0x260] sm:$0xff]   ;;  %v11399_v11 = vld [vmem:[%s18757_s17 + $0x210] sm:$0xff]  }
 0xa91   :  { %9619 = vmatprep.mubr.bf16.mxu0 %v8448_v27  ;;  %9580 = vmatmul.mubr.bf16.vlgmr.msra.gmra.mxu1 %v8434_v2  ;;  %v8462_v56 = vrot.slane %v18400_v41, 2  ;;  %v8463_v59 = vrot.slane %v18403_v52, 1  ;;  %v11378_v52 = vld [vmem:[%s18757_s17 + $0x2f8] sm:$0xff]   ;;  %v11381_v2 = vld [vmem:[%s18757_s17 + $0x270] sm:$0xff]   ;;  %v11403_v62 = vld [vmem:[%s18757_s17 + $0x208] sm:$0xff]  }
 0xa92   :  { %9620 = vmatmul.mubr.bf16.vlgmr.msra.gmra.mxu0 %v8443_v22  ;;  %10800 = vmatpush3.bf16.msra.mxu1 %v11347_v45  ;;  %v8480_v58 = vrot.slane %v18489_v36, 1  ;;  %v8489_v46 = vrot.slane %v18489_v36, 3  ;;  %v8490_v15 = vrot.slane %v18497_v31, 2  ;;  %v8455_v26 = vsel %vm8432_vm2, %v8454_v6, %v18400_v41  ;;  %v11380_v41 = vld [vmem:[%s18757_s17 + $0x2b8] sm:$0xff]   ;;  %v11405_v33 = vld [vmem:[%s18757_s17 + $0x240] sm:$0xff]  }
 0xa93   :  { %10822 = vmatpush3.bf16.msra.mxu0 %v11348_v29  ;;  %10801 = vmatprep.subr.bf16.mxu1 %v11349_v47  ;;  %v8464_v42 = vsel %vm8432_vm2, %v8463_v59, %v8462_v56  ;;  %v8456_v35 = vpack.c.b16 %v8455_v26, %v8455_v26  ;;  %v11382_v29 = vld [vmem:[%s18757_s17 + $0x2f0] sm:$0xff]   ;;  %v8476_v5 = vrot.slane %v18497_v31, 7  ;;  %v11409_v6 = vld [vmem:[%s18757_s17 + $0x378] sm:$0xff]  }
 0xa94   :  { %9659 = vmatprep.mubr.bf16.mxu1 %v8460_v37  ;;  %10823 = vmatprep.subr.bf16.mxu0 %v11350_v3  ;;  %v8481_v39 = vsel %vm8432_vm2, %v18497_v31, %v8480_v58  ;;  %v8491_v45 = vsel %vm8432_vm2, %v8490_v15, %v8489_v46  ;;  %v8465_v27 = vpack.c.b16 %v8464_v42, %v8464_v42  ;;  %v11383_v47 = vld [vmem:[%s18757_s17 + $0x230] sm:$0xff]   ;;  %v11386_v3 = vld [vmem:[%s18757_s17 + $0x2e8] sm:$0xff]  }
 0xa95   :  { %9699 = vmatprep.mubr.bf16.mxu0 %v8470_v32  ;;  %v8482_v22 = vpack.c.b16 %v8481_v39, %v8481_v39  ;;  %v8492_v23 = vpack.c.b16 %v8491_v45, %v8491_v45  ;;  %v11388_v37 = vld [vmem:[%s18757_s17 + $0x2a8] sm:$0xff]   ;;  %v11391_v32 = vld [vmem:[%s18757_s17 + $0x220] sm:$0xff]   ;;  %v8477_v59 = vsel %vm8432_vm2, %v8476_v5, %v18489_v36 }
 0xa96   :  { %10802 = vmatpush3.bf16.msra.mxu1 %v11351_v34  ;;  %v11390_v34 = vld [vmem:[%s18757_s17 + $0x2e0] sm:$0xff]   ;;  %v8478_v46 = vpack.c.b16 %v8477_v59, %v8477_v59  ;;  %v11417_v45 = vld [vmem:[%s18757_s17 + $0x368] sm:$0xff]  }
 0xa97   :  { %10824 = vmatpush3.bf16.msra.mxu0 %v11352_v61  ;;  %10803 = vmatprep.subr.bf16.mxu1 %v11353_v28  ;;  %v11392_v61 = vld [vmem:[%s18757_s17 + $0x2a0] sm:$0xff]   ;;  %v11393_v28 = vld [vmem:[%s18757_s17 + $0x258] sm:$0xff]  }
 0xa98   :  { %10825 = vmatprep.subr.bf16.mxu0 %v11354_v44  ;;  %v11394_v44 = vld [vmem:[%s18757_s17 + $0x2d8] sm:$0xff]  }
 0xa9a   :  { %10804 = vmatpush3.bf16.msra.mxu1 %v11355_v49  ;;  %v8386_v49 = vld [vmem:[#allocation6 + $0x18] ss:$2 sm:$0xf] }
 0xa9b   :  { %10826 = vmatpush3.bf16.msra.mxu0 %v11356_v54  ;;  %10805 = vmatprep.subr.bf16.mxu1 %v11357_v55  ;;  %v8402_v54 = vld [vmem:[#allocation6 + $0x19] ss:$2 sm:$0xf]  ;;  %v8394_v55 = vld [vmem:[#allocation6 + $0x38] ss:$2 sm:$0xf] }
 0xa9c   :  { %10827 = vmatprep.subr.bf16.mxu0 %v11358_v9  ;;  %v8410_v9 = vld [vmem:[#allocation6 + $0x39] ss:$2 sm:$0xf] }
 0xa9d   :  { %v8418_v63 = vmax.f32 %v8394_v55, %v8410_v9  ;;  %v11437_v55 = vld [vmem:[%s18757_s17 + $0x340] sm:$0xff]  }
 0xa9e   :  { %10806 = vmatpush3.bf16.msra.mxu1 %v11359_v60  ;;  %v11395_v60 = vld [vmem:[%s18757_s17 + $0x218] sm:$0xff]   ;;  %v11438_v9 = vld [vmem:[%s18757_s17 + $0x3c0] sm:$0xff]  }
 0xa9f   :  { %10828 = vmatpush3.bf16.msra.mxu0 %v11360_v24  ;;  %10807 = vmatprep.subr.bf16.mxu1 %v11361_v57  ;;  %v8414_v24 = vmax.f32 %v8386_v49, %v8402_v54  ;;  %v11396_v57 = vld [vmem:[%s18757_s17 + $0x298] sm:$0xff]   ;;  %v11435_v49 = vld [vmem:[%s18757_s17 + $0x308] sm:$0xff]  }
 0xaa0   :  { %10829 = vmatprep.subr.bf16.mxu0 %v11362_v8  ;;  %v11397_v8 = vld [vmem:[%s18757_s17 + $0x250] sm:$0xff]   ;;  %v11436_v54 = vld [vmem:[%s18757_s17 + $0x388] sm:$0xff]  }
 0xaa1   :  { %v8425_v43 = vpack.c.bf16 %v8414_v24, %v8414_v24 }
 0xaa2   :  { %10808 = vmatpush3.bf16.msra.mxu1 %v11363_v21  ;;  %v11400_v21 = vld [vmem:[%s18757_s17 + $0x290] sm:$0xff]  }
 0xaa3   :  { %10830 = vmatpush3.bf16.msra.mxu0 %v11364_v10  ;;  %10809 = vmatprep.subr.bf16.mxu1 %v11365_v19  ;;  %v8426_v10 = vpack.c.bf16 %v8418_v63, %v8418_v63  ;;  %v11402_v19 = vld [vmem:[%s18757_s17 + $0x2c8] sm:$0xff]   ;;  %v11440_v63 = vld [vmem:[%s18757_s17 + $0x380] sm:$0xff]  }
 0xaa4   :  { %10831 = vmatprep.subr.bf16.mxu0 %v11366_v48  ;;  %v18601_v48 = vunpack.c.l.b16 %v8425_v43 }
 0xaa6   :  { %10810 = vmatpush3.bf16.msra.mxu1 %v11367_v12  ;;  %v11404_v12 = vld [vmem:[%s18757_s17 + $0x288] sm:$0xff]   ;;  %v8511_v56 = vrot.slane %v18601_v48, 3  ;;  %v8506_v24 = vrot.slane %v18601_v48, 2 }
 0xaa7   :  { %10832 = vmatpush3.bf16.msra.mxu0 %v11368_v13  ;;  %10811 = vmatprep.subr.bf16.mxu1 %v11369_v30  ;;  %v18609_v13 = vunpack.c.l.b16 %v8426_v10  ;;  %v11406_v30 = vld [vmem:[%s18757_s17 + $0x2c0] sm:$0xff]  }
 0xaa8   :  { %10833 = vmatprep.subr.bf16.mxu0 %v11370_v7  ;;  %v8484_v7 = vrot.slane %v18489_v36, 2  ;;  %v11412_v36 = vld [vmem:[%s18757_s17 + $0x3b8] sm:$0xff]  }
 0xaaa   :  { %10812 = vmatpush3.bf16.msra.mxu1 %v11371_v50  ;;  %v8485_v50 = vrot.slane %v18497_v31, 1  ;;  %v8512_v31 = vrot.slane %v18609_v13, 2 }
 0xaab   :  { %10834 = vmatpush3.bf16.msra.mxu0 %v11372_v51  ;;  %10813 = vmatprep.subr.bf16.mxu1 %v11373_v16  ;;  %v11407_v51 = vld [vmem:[%s18757_s17 + $0x200] sm:$0xff]   ;;  %v8502_v16 = vrot.slane %v18601_v48, 1 }
 0xaac   :  { %10835 = vmatprep.subr.bf16.mxu0 %v11374_v4  ;;  %v11408_v4 = vld [vmem:[%s18757_s17 + $0x280] sm:$0xff]   ;;  %v8486_v58 = vsel %vm8432_vm2, %v8485_v50, %v8484_v7  ;;  %v8513_v15 = vsel %vm8432_vm2, %v8512_v31, %v8511_v56 }
 0xaad   :  { %v8487_v26 = vpack.c.b16 %v8486_v58, %v8486_v58  ;;  %v8514_v39 = vpack.c.b16 %v8513_v15, %v8513_v15 }
 0xaae   :  { %10814 = vmatpush3.bf16.msra.mxu1 %v11375_v25  ;;  %v11410_v25 = vld [vmem:[%s18757_s17 + $0x3f8] sm:$0xff]  }
 0xaaf   :  { %10836 = vmatpush3.bf16.msra.mxu0 %v11376_v20  ;;  %10843 = vmatprep.subr.bf16.mxu1 %v11377_v1  ;;  %v11411_v20 = vld [vmem:[%s18757_s17 + $0x338] sm:$0xff]   ;;  %v8503_v1 = vsel %vm8432_vm2, %v18609_v13, %v8502_v16 }
 0xab0   :  { %10865 = vmatprep.subr.bf16.mxu0 %v11378_v52  ;;  %v11413_v52 = vld [vmem:[%s18757_s17 + $0x370] sm:$0xff]   ;;  %v8504_v42 = vpack.c.b16 %v8503_v1, %v8503_v1 }
 0xab1   :  { %9660 = vmatmul.mubr.bf16.vlgmr.msra.gmra.mxu1 %v8456_v35  ;;  %v11415_v35 = vld [vmem:[%s18757_s17 + $0x330] sm:$0xff]  }
 0xab2   :  { %9700 = vmatmul.mubr.bf16.vlgmr.msra.gmra.mxu0 %v8465_v27  ;;  %10844 = vmatpush3.bf16.msra.mxu1 %v11379_v53  ;;  %v11414_v53 = vld [vmem:[%s18757_s17 + $0x3f0] sm:$0xff]   ;;  %v11418_v27 = vld [vmem:[%s18757_s17 + $0x3e8] sm:$0xff]  }
 0xab3   :  { %9739 = vmatprep.mubr.bf16.mxu1 %v8482_v22  ;;  %10866 = vmatpush3.bf16.msra.mxu0 %v11380_v41  ;;  %v11416_v41 = vld [vmem:[%s18757_s17 + $0x3b0] sm:$0xff]   ;;  %v11420_v22 = vld [vmem:[%s18757_s17 + $0x3a8] sm:$0xff]  }
 0xab4   :  { %9779 = vmatprep.mubr.bf16.mxu0 %v8492_v23  ;;  %10845 = vmatprep.subr.bf16.mxu1 %v11381_v2  ;;  %v11419_v2 = vld [vmem:[%s18757_s17 + $0x328] sm:$0xff]   ;;  %v11422_v23 = vld [vmem:[%s18757_s17 + $0x3e0] sm:$0xff]  }
 0xab5   :  { %10867 = vmatprep.subr.bf16.mxu0 %v11382_v29  ;;  %v11421_v29 = vld [vmem:[%s18757_s17 + $0x360] sm:$0xff]  }
 0xab6   :  { %10846 = vmatpush3.bf16.msra.mxu1 %v11383_v47  ;;  %v11423_v47 = vld [vmem:[%s18757_s17 + $0x320] sm:$0xff]  }
 0xab7   :  { %10868 = vmatpush3.bf16.msra.mxu0 %v11384_v18  ;;  %10847 = vmatprep.subr.bf16.mxu1 %v11385_v40  ;;  %v11424_v18 = vld [vmem:[%s18757_s17 + $0x3a0] sm:$0xff]   ;;  %v11425_v40 = vld [vmem:[%s18757_s17 + $0x358] sm:$0xff]  }
 0xab8   :  { %10869 = vmatprep.subr.bf16.mxu0 %v11386_v3  ;;  %v11426_v3 = vld [vmem:[%s18757_s17 + $0x3d8] sm:$0xff]  }
 0xaba   :  { %10848 = vmatpush3.bf16.msra.mxu1 %v11387_v0  ;;  %v11427_v0 = vld [vmem:[%s18757_s17 + $0x318] sm:$0xff]  }
 0xabb   :  { %10870 = vmatpush3.bf16.msra.mxu0 %v11388_v37  ;;  %10849 = vmatprep.subr.bf16.mxu1 %v11389_v14  ;;  %v11428_v37 = vld [vmem:[%s18757_s17 + $0x398] sm:$0xff]   ;;  %v11429_v14 = vld [vmem:[%s18757_s17 + $0x350] sm:$0xff]  }
 0xabc   :  { %10871 = vmatprep.subr.bf16.mxu0 %v11390_v34  ;;  %v11430_v34 = vld [vmem:[%s18757_s17 + $0x3d0] sm:$0xff]  }
 0xabe   :  { %10850 = vmatpush3.bf16.msra.mxu1 %v11391_v32  ;;  %v11431_v32 = vld [vmem:[%s18757_s17 + $0x310] sm:$0xff]  }
 0xabf   :  { %10872 = vmatpush3.bf16.msra.mxu0 %v11392_v61  ;;  %10851 = vmatprep.subr.bf16.mxu1 %v11393_v28  ;;  %v11432_v61 = vld [vmem:[%s18757_s17 + $0x390] sm:$0xff]   ;;  %v11433_v28 = vld [vmem:[%s18757_s17 + $0x348] sm:$0xff]  }
 0xac0   :  { %10873 = vmatprep.subr.bf16.mxu0 %v11394_v44  ;;  %v11434_v44 = vld [vmem:[%s18757_s17 + $0x3c8] sm:$0xff]  }
 0xac2   :  { %10852 = vmatpush3.bf16.msra.mxu1 %v11395_v60  ;;  %v8498_v60 = vrot.slane %v18609_v13, 7 }
 0xac3   :  { %10874 = vmatpush3.bf16.msra.mxu0 %v11396_v57  ;;  %10853 = vmatprep.subr.bf16.mxu1 %v11397_v8  ;;  %v8507_v57 = vrot.slane %v18609_v13, 1  ;;  %v11439_v8 = vld [vmem:[%s18757_s17 + $0x300] sm:$0xff]   ;;  %s11478_s17 = smov [#allocation7]  }
 0xac4   :  { %10875 = vmatprep.subr.bf16.mxu0 %v11398_v38  ;;  %v8499_v38 = vsel %vm8432_vm2, %v8498_v60, %v18601_v48 }
 0xac5   :  { %v8500_v43 = vpack.c.b16 %v8499_v38, %v8499_v38 }
 0xac6   :  { %10854 = vmatpush3.bf16.msra.mxu1 %v11399_v11  ;;  %v8508_v11 = vsel %vm8432_vm2, %v8507_v57, %v8506_v24 }
 0xac7   :  { %10876 = vmatpush3.bf16.msra.mxu0 %v11400_v21  ;;  %10855 = vmatprep.subr.bf16.mxu1 %v11401_v17  ;;  %v8509_v21 = vpack.c.b16 %v8508_v11, %v8508_v11 }
 0xac8   :  { %10877 = vmatprep.subr.bf16.mxu0 %v11402_v19  ;;  %v10143_v19 = vld [vmem:[%s18758_s18] ss:$0 sm:$0xff]  ;;  %s9876_s18 = sshll.u32 %s11478_s17, 4  ;;  %s9877_s18 = int_to_ptr.vmem [resolvable:$true] %s9876_s18 }
 0xac9   :  { %s11453_s25 = scalar_lea.vmem %s9877_s18, 32  ;;  %p11458_p1 = scmp.lt.s32.totalorder %s9877_s18, %s9877_s18 }
 0xaca   :  { %10856 = vmatpush3.bf16.msra.mxu1 %v11403_v62  ;;  %p11454_p0 = scmp.ne.s32.totalorder %s9877_s18, %s11453_s25  ;;  %p11459_p2 = scmp.lt.s32.totalorder %s11453_s25, %s11453_s25 }
 0xacb   :  { %10878 = vmatpush3.bf16.msra.mxu0 %v11404_v12  ;;  %10857 = vmatprep.subr.bf16.mxu1 %v11405_v33 }
 0xacc   :  { %10879 = vmatprep.subr.bf16.mxu0 %v11406_v30  ;;  %p11460_p3 = por %p11459_p2, %p11458_p1 }
 0xace   :  { %10858 = vmatpush3.bf16.msra.mxu1 %v11407_v51  ;;  %p11461_p4 = pnand %p11460_p3, %p11454_p0 }
 0xacf   :  { %10880 = vmatpush3.bf16.msra.mxu0 %v11408_v4  ;;  %10887 = vmatprep.subr.bf16.mxu1 %v11409_v6 }
 0xad0   :  { %10909 = vmatprep.subr.bf16.mxu0 %v11410_v25 }
 0xad1   :  { %9740 = vmatmul.mubr.bf16.vlgmr.msra.gmra.mxu1 %v8478_v46 }
 0xad2   :  { %9780 = vmatmul.mubr.bf16.vlgmr.msra.gmra.mxu0 %v8487_v26  ;;  %10888 = vmatpush3.bf16.msra.mxu1 %v11411_v20 }
 0xad3   :  { %9819 = vmatprep.mubr.bf16.mxu1 %v8504_v42  ;;  %10910 = vmatpush3.bf16.msra.mxu0 %v11412_v36 }
 0xad4   :  { %9859 = vmatprep.mubr.bf16.mxu0 %v8514_v39  ;;  %10889 = vmatprep.subr.bf16.mxu1 %v11413_v52 }
 0xad5   :  { %10911 = vmatprep.subr.bf16.mxu0 %v11414_v53 }
 0xad6   :  { %10890 = vmatpush3.bf16.msra.mxu1 %v11415_v35 }
 0xad7   :  { %10912 = vmatpush3.bf16.msra.mxu0 %v11416_v41  ;;  %10891 = vmatprep.subr.bf16.mxu1 %v11417_v45 }
 0xad8   :  { %10913 = vmatprep.subr.bf16.mxu0 %v11418_v27 }
 0xada   :  { %10892 = vmatpush3.bf16.msra.mxu1 %v11419_v2 }
 0xadb   :  { %10914 = vmatpush3.bf16.msra.mxu0 %v11420_v22  ;;  %10893 = vmatprep.subr.bf16.mxu1 %v11421_v29 }
 0xadc   :  { %10915 = vmatprep.subr.bf16.mxu0 %v11422_v23 }
 0xade   :  { %10894 = vmatpush3.bf16.msra.mxu1 %v11423_v47 }
 0xadf   :  { %10916 = vmatpush3.bf16.msra.mxu0 %v11424_v18  ;;  %10895 = vmatprep.subr.bf16.mxu1 %v11425_v40 }
 0xae0   :  { %10917 = vmatprep.subr.bf16.mxu0 %v11426_v3 }
 0xae2   :  { %10896 = vmatpush3.bf16.msra.mxu1 %v11427_v0 }
 0xae3   :  { %10918 = vmatpush3.bf16.msra.mxu0 %v11428_v37  ;;  %10897 = vmatprep.subr.bf16.mxu1 %v11429_v14 }
 0xae4   :  { %10919 = vmatprep.subr.bf16.mxu0 %v11430_v34 }
 0xae6   :  { %10898 = vmatpush3.bf16.msra.mxu1 %v11431_v32 }
 0xae7   :  { %10920 = vmatpush3.bf16.msra.mxu0 %v11432_v61  ;;  %10899 = vmatprep.subr.bf16.mxu1 %v11433_v28 }
 0xae8   :  { %10921 = vmatprep.subr.bf16.mxu0 %v11434_v44 }
 0xaea   :  { %10900 = vmatpush3.bf16.msra.mxu1 %v11435_v49 }
 0xaeb   :  { %10922 = vmatpush3.bf16.msra.mxu0 %v11436_v54  ;;  %10901 = vmatprep.subr.bf16.mxu1 %v11437_v55 }
 0xaec   :  { %10923 = vmatprep.subr.bf16.mxu0 %v11438_v9 }
 0xaee   :  { %10902 = vmatpush3.bf16.msra.mxu1 %v11439_v8 }
 0xaef   :  { %10924 = vmatpush3.bf16.msra.mxu0 %v11440_v63 }
 0xaf1   :  { %9820 = vmatmul.mubr.bf16.vlgmr.msra.gmra.mxu1 %v8500_v43 }
 0xaf2   :  { %9860 = vmatmul.mubr.bf16.vlgmr.msra.gmra.mxu0 %v8509_v21 }
 0xb51   :  { %v10771_v17 = vpop.f32.mrf.mxu1 }
 0xb52   :  { %v10793_v10 = vpop.f32.mrf.mxu0 }
 0xb53   :  { %v10772_v62 = vpop.f32.mrf.mxu1 }
 0xb54   :  { %v10773_v12 = vadd.f32 %v10772_v62, %v10771_v17  ;;  %v10794_v33 = vpop.f32.mrf.mxu0 }
 0xb55   :  { %v10795_v13 = vadd.f32 %v10794_v33, %v10793_v10  ;;  %v10774_v30 = vpop.f32.mrf.mxu1 }
 0xb56   :  { %v9582_v48 = vadd.f32 %v10773_v12, %v10143_v19  ;;  %v10796_v5 = vpop.f32.mrf.mxu0 }
 0xb57   :  { %v10775_v7 = vpop.f32.mrf.mxu1 }
 0xb58   :  { %v9622_v50 = vadd.f32 %v10795_v13, %v9582_v48  ;;  %v10797_v51 = vpop.f32.mrf.mxu0 }
 0xb71   :  { %v10815_v16 = vpop.f32.mrf.mxu1 }
 0xb72   :  { %v10837_v4 = vpop.f32.mrf.mxu0 }
 0xb73   :  { %v10816_v6 = vpop.f32.mrf.mxu1 }
 0xb74   :  { %v10838_v56 = vpop.f32.mrf.mxu0  ;;  %v10817_v53 = vadd.f32 %v10816_v6, %v10815_v16 }
 0xb75   :  { %v10818_v31 = vpop.f32.mrf.mxu1  ;;  %v10839_v35 = vadd.f32 %v10838_v56, %v10837_v4 }
 0xb76   :  { %v10840_v59 = vpop.f32.mrf.mxu0  ;;  %v9662_v39 = vadd.f32 %v10817_v53, %v9622_v50 }
 0xb77   :  { %v10819_v25 = vpop.f32.mrf.mxu1 }
 0xb78   :  { %v10841_v58 = vpop.f32.mrf.mxu0  ;;  %v9702_v45 = vadd.f32 %v10839_v35, %v9662_v39 }
 0xb91   :  { %v10859_v20 = vpop.f32.mrf.mxu1 }
 0xb92   :  { %v10881_v1 = vpop.f32.mrf.mxu0 }
 0xb93   :  { %v10860_v46 = vpop.f32.mrf.mxu1 }
 0xb94   :  { %v10882_v36 = vpop.f32.mrf.mxu0  ;;  %v10861_v41 = vadd.f32 %v10860_v46, %v10859_v20 }
 0xb95   :  { %v10862_v15 = vpop.f32.mrf.mxu1  ;;  %v10883_v22 = vadd.f32 %v10882_v36, %v10881_v1 }
 0xb96   :  { %v10884_v26 = vpop.f32.mrf.mxu0  ;;  %v9742_v27 = vadd.f32 %v10861_v41, %v9702_v45 }
 0xb97   :  { %v10863_v52 = vpop.f32.mrf.mxu1 }
 0xb98   :  { %v10885_v42 = vpop.f32.mrf.mxu0  ;;  %v9782_v47 = vadd.f32 %v10883_v22, %v9742_v27 }
 0xbb1   :  { %v10903_v2 = vpop.f32.mrf.mxu1 }
 0xbb2   :  { %v10925_v29 = vpop.f32.mrf.mxu0 }
 0xbb3   :  { %v10904_v23 = vpop.f32.mrf.mxu1 }
 0xbb4   :  { %v10905_v18 = vadd.f32 %v10904_v23, %v10903_v2  ;;  %v10926_v40 = vpop.f32.mrf.mxu0 }
 0xbb5   :  { %v10906_v3 = vpop.f32.mrf.mxu1  ;;  %v10927_v37 = vadd.f32 %v10926_v40, %v10925_v29 }
 0xbb6   :  { %v9822_v0 = vadd.f32 %v10905_v18, %v9782_v47  ;;  %v10928_v14 = vpop.f32.mrf.mxu0 }
 0xbb7   :  { %v10907_v34 = vpop.f32.mrf.mxu1 }
 0xbb8   :  { %v9862_v32 = vadd.f32 %v10927_v37, %v9822_v0  ;;  %v10929_v61 = vpop.f32.mrf.mxu0 }
 0xbba   :  { %11449 = vtanh.f32 %v9862_v32 }
 0xbc7   :  { %v11450_v28 = vpop.eup %11449 }
 0xbc8   :  { %9869 = vst.msk [vmem:[#allocation7] sm:$0x3] %vm9868_vm7, %v11450_v28 }
 0xbc9   :  { %11464 = shalt.err (!%p11461_p4)
}
 0xbca   :  { %9879 = dma.vmem_to_hbm [thread:$0]  %s9877_s18, 32, %s18759_s19, [#allocation8]  }
 0xbcb   :  { %11473 = dma.done.wait [#allocation8], 32  }
 0xbcc   :  { %11474 = vsyncadd [#allocation8], 4294967264 }
 0xbcd   :  { %9883 = vsyncpa [#allocation8], 1 }

</bundles_post_ra>
